<compile_context>
chip_gen: v5e
topology: v5e:2x2
jax: 0.10.0
libtpu: 0.0.40
codegen_flags: <defaults>
</compile_context>

<pallas_src>
import numpy as np

import jax
import jax.numpy as jnp
from jax import lax
from jax.experimental import pallas as pl
from jax.experimental.pallas import tpu as pltpu

# exact f32 matmuls on both the XLA reference path and inside the kernel
jax.config.update("jax_default_matmul_precision", "highest")

NUM_CLASSES = 4
NUM_ANCHORS = 2
BB1_CH = 16
FPN_CH = 32
ANCHOR_SCALES = ((0.1, 0.2), (0.3, 0.5))   # per FPN level


# ----------------------------------------------------------------------------
# The single fused kernel.
#   cols1  : (M1, 9*Cin)   stage-1 im2col patches (rows = (b, h1, w1))
#   w1_t   : (16, 9*Cin)   b1 (16,1)      conv1 weights (transposed)
#   wl3_t  : (32, 16)      bl3 (32,1)     FPN lateral3
#   gsel   : (9, M1, M2)   constant 0/1 tap-selection (in-kernel stage-2 im2col)
#   w2_t   : (9, 32, 16)   b2 (32,1)      conv2 weights per tap (transposed)
#   wl4_t  : (32, 32)      bl4 (32,1)     FPN lateral4
#   p3m    : (M1, M)       constant: level-3 column placement (batch-major M)
#   upm    : (M2, M)       constant: upsample-fold + level-4 column placement
#   wh_t   : (24, 32)      bh (24,1)      head: [cls(8) | dpos(8) | dsize(8)] rows
#   geo    : (24, M)       constant: [anchor size(8) | anchor ctr(8) | signed half(8)]
# outputs:
#   scores : (A*C, M)  sigmoid class scores, rows a*C+c, lane-dense
#   boxes  : (4*A, M)  decoded clamped boxes, rows a*4+k (k = x1,y1,x2,y2), lane-dense
# ----------------------------------------------------------------------------
def _detector_kernel(cols1_ref, w1_ref, b1_ref, wl3_ref, bl3_ref,
                     gsel_ref, w2_ref, b2_ref, wl4_ref, bl4_ref,
                     p3m_ref, upm_ref, wh_ref, bh_ref, geo_ref,
                     scores_ref, boxes_ref):
    nc = scores_ref.shape[0]            # A*C
    nb = boxes_ref.shape[0]             # 4*A
    n_taps = gsel_ref.shape[0]          # 9
    m2 = gsel_ref.shape[2]              # B*H2*W2

    # backbone conv1 (3x3 s2 as GEMM on pre-extracted patches) + bias + ReLU,
    # computed transposed so the prediction axis sits on lanes ("NT" dot: contract
    # the last dim of both operands, no transpose materialized).
    feat1 = lax.dot_general(w1_ref[...], cols1_ref[...],
                            (((1,), (1,)), ((), ())),
                            preferred_element_type=jnp.float32)      # (16, M1)
    feat1 = jnp.maximum(feat1 + b1_ref[...], 0.0)

    # FPN lateral 3 (1x1 conv)
    lat3 = jnp.dot(wl3_ref[...], feat1,
                   preferred_element_type=jnp.float32) + bl3_ref[...]  # (32, M1)

    # backbone conv2 (3x3 s2) entirely in VMEM: 9-tap accumulation where the spatial
    # gather is a constant lane-selection matmul per tap (no HBM round trip of c3).
    c4 = jnp.zeros((b2_ref.shape[0], m2), jnp.float32)                 # (32, M2)
    for t in range(n_taps):
        tap = jnp.dot(feat1, gsel_ref[t],
                      preferred_element_type=jnp.float32)              # (16, M2)
        c4 = c4 + jnp.dot(w2_ref[t], tap, preferred_element_type=jnp.float32)
    c4 = jnp.maximum(c4 + b2_ref[...], 0.0)

    # FPN lateral 4 + top-down add + batch-major column placement, folded into two
    # constant placement matmuls:  feat = lat3 @ P3 + p4 @ (U @ P3 + P4)
    p4 = jnp.dot(wl4_ref[...], c4,
                 preferred_element_type=jnp.float32) + bl4_ref[...]    # (32, M2)
    feat = (jnp.dot(lat3, p3m_ref[...], preferred_element_type=jnp.float32)
            + jnp.dot(p4, upm_ref[...], preferred_element_type=jnp.float32))  # (32, M)

    # detection head: cls + box for BOTH levels in one GEMM; the box rows are
    # pre-duplicated into the final (anchor, coord) interleaved order at pack time.
    head = jnp.dot(wh_ref[...], feat,
                   preferred_element_type=jnp.float32) + bh_ref[...]   # (24, M)

    # scores: sigmoid -> single lane-dense full-sublane store
    scores_ref[...] = 1.0 / (1.0 + jnp.exp(-head[0:nc, :]))

    # anchor-delta decode directly in the final interleaved row order -> one store
    d_pos = head[nc:nc + nb, :]                              # dx/dy per (a, coord)
    d_size = jnp.minimum(head[nc + nb:nc + 2 * nb, :], 4.0)  # clamp(dw/dh, max=4.0)
    geo = geo_ref[...]
    size_g = geo[0:nb, :]            # anchor w/h per row
    ctr_g = geo[nb:2 * nb, :]        # anchor cx/cy per row
    shalf = geo[2 * nb:3 * nb, :]    # -/+ 0.5 * anchor size per row
    boxes_ref[...] = jnp.clip(d_pos * size_g + ctr_g + shalf * jnp.exp(d_size),
                              0.0, 1.0)


def _full_spec(a):
    zeros = (0,) * a.ndim
    return pl.BlockSpec(a.shape, lambda i, _z=zeros: _z)


def fused_detector_forward(packed, cols1):
    """Runs the single fused Pallas kernel. Returns (scores_t (A*C,M), boxes_t (4A,M))."""
    nc = NUM_ANCHORS * NUM_CLASSES
    nb = 4 * NUM_ANCHORS
    M = packed["geo"].shape[1]
    M1, K1 = cols1.shape
    M2 = packed["gsel"].shape[2]
    n1 = packed["w1_t"].shape[0]
    nf = packed["wl3_t"].shape[0]
    R = packed["wh_t"].shape[0]

    operands = (cols1, packed["w1_t"], packed["b1"], packed["wl3_t"], packed["bl3"],
                packed["gsel"], packed["w2_t"], packed["b2"],
                packed["wl4_t"], packed["bl4"],
                packed["p3m"], packed["upm"], packed["wh_t"], packed["bh"],
                packed["geo"])

    flops = int(2 * (n1 * K1 * M1 + nf * n1 * M1
                     + 9 * (n1 * M1 * M2 + nf * n1 * M2) + nf * nf * M2
                     + nf * M1 * M + nf * M2 * M + R * nf * M))
    bytes_accessed = int(4 * (sum(int(np.prod(o.shape)) for o in operands)
                              + (nc + nb) * M))
    cost = pl.CostEstimate(flops=flops, transcendentals=int((nc + nb) * M),
                           bytes_accessed=bytes_accessed)

    # Single grid step: total work is <4 MFLOP and M=160, so splitting M across the two
    # v7x TensorCores would be pure per-step overhead here.  At realistic resolutions,
    # tile M in multiples of 128, mark the axis "parallel", and set vmem_limit_bytes.
    return pl.pallas_call(
        _detector_kernel,
        out_shape=(jax.ShapeDtypeStruct((nc, M), jnp.float32),
                   jax.ShapeDtypeStruct((nb, M), jnp.float32)),
        grid=(1,),
        in_specs=[_full_spec(o) for o in operands],
        out_specs=(pl.BlockSpec((nc, M), lambda i: (0, 0)),
                   pl.BlockSpec((nb, M), lambda i: (0, 0))),
        compiler_params=pltpu.CompilerParams(dimension_semantics=("arbitrary",)),
        cost_estimate=cost,
    )(*operands)


# ----------------------------------------------------------------------------
# Glue: stage-1 im2col (on the raw input only) and trace-time constants.
# ----------------------------------------------------------------------------
def im2col(x_nhwc, ksize=3, stride=2, pad=1):
    # TODO(synk): at realistic resolutions this should also move in-kernel (9 shifted
    # reads of the input tile) instead of a 9x patch expansion in XLA glue.
    B, H, W, C = x_nhwc.shape
    xp = jnp.pad(x_nhwc, ((0, 0), (pad, pad), (pad, pad), (0, 0)))
    Ho = (H + 2 * pad - ksize) // stride + 1
    Wo = (W + 2 * pad - ksize) // stride + 1
    patches = []
    for ki in range(ksize):
        for kj in range(ksize):
            patches.append(xp[:, ki:ki + stride * Ho:stride, kj:kj + stride * Wo:stride, :])
    cols = jnp.concatenate(patches, axis=-1)              # (B, Ho, Wo, k*k*C)
    return cols.reshape(B * Ho * Wo, ksize * ksize * C), (B, Ho, Wo)


def _build_constants(B, H1, W1, H2, W2, anchor_scales, num_anchors):
    """All numpy: tap-selection, placement, upsample and anchor-geometry constants."""
    A = num_anchors
    M1 = B * H1 * W1
    M2 = B * H2 * W2
    cells = H1 * W1 + H2 * W2
    M = B * cells

    # stage-2 3x3/s2/pad1 im2col as 9 lane-selection matrices (M1 -> M2)
    gsel = np.zeros((9, M1, M2), np.float32)
    for b in range(B):
        for ho in range(H2):
            for wo in range(W2):
                m2 = b * H2 * W2 + ho * W2 + wo
                for ki in range(3):
                    for kj in range(3):
                        h1 = 2 * ho + ki - 1
                        w1 = 2 * wo + kj - 1
                        if 0 <= h1 < H1 and 0 <= w1 < W1:
                            gsel[ki * 3 + kj, b * H1 * W1 + h1 * W1 + w1, m2] = 1.0

    # column placements (final M order = (batch, level, cell)) and 2x nearest upsample
    p3m = np.zeros((M1, M), np.float32)
    umat = np.zeros((M2, M1), np.float32)
    p4m = np.zeros((M2, M), np.float32)
    for b in range(B):
        for h1 in range(H1):
            for w1 in range(W1):
                i = b * H1 * W1 + h1 * W1 + w1
                p3m[i, b * cells + h1 * W1 + w1] = 1.0
                umat[b * H2 * W2 + (h1 // 2) * W2 + (w1 // 2), i] = 1.0
        for h2 in range(H2):
            for w2 in range(W2):
                j = b * H2 * W2 + h2 * W2 + w2
                p4m[j, b * cells + H1 * W1 + h2 * W2 + w2] = 1.0
    upm = umat @ p3m + p4m                                 # (M2, M)

    # anchor geometry in the interleaved (a, coord) row order, batch-major columns
    size_g = np.zeros((4 * A, M), np.float32)
    ctr_g = np.zeros((4 * A, M), np.float32)
    shalf = np.zeros((4 * A, M), np.float32)

    def fill(q, cx, cy, scales):
        for a, s in enumerate(scales):
            for k in range(4):
                r = a * 4 + k
                size_g[r, q] = s                                  # square anchors (aw=ah=s)
                ctr_g[r, q] = cx if k % 2 == 0 else cy
                shalf[r, q] = (-0.5 if k < 2 else 0.5) * s

    for b in range(B):
        for h1 in range(H1):
            for w1 in range(W1):
                fill(b * cells + h1 * W1 + w1,
                     (w1 + 0.5) / W1, (h1 + 0.5) / H1, anchor_scales[0])
        for h2 in range(H2):
            for w2 in range(W2):
                fill(b * cells + H1 * W1 + h2 * W2 + w2,
                     (w2 + 0.5) / W2, (h2 + 0.5) / H2, anchor_scales[1])
    geo = np.concatenate([size_g, ctr_g, shalf], axis=0)   # (3*4*A, M)

    return dict(gsel=gsel, p3m=p3m, upm=upm, geo=geo)


# ----------------------------------------------------------------------------
# Parameters (synthetic, deterministic) and one-time packing into kernel layout.
# ----------------------------------------------------------------------------
def init_params(key, in_ch=4):
    ks = jax.random.split(key, 6)

    def w(k, shape, fan_in):
        return (jax.random.normal(k, shape, jnp.float32) / jnp.sqrt(fan_in)).astype(jnp.float32)

    p = {}
    p["bb1_w"] = w(ks[0], (9 * in_ch, BB1_CH), 9 * in_ch)      # conv1 3x3 s2
    p["bb1_b"] = jnp.zeros((BB1_CH,), jnp.float32)
    p["bb2_w"] = w(ks[1], (9 * BB1_CH, FPN_CH), 9 * BB1_CH)    # conv2 3x3 s2
    p["bb2_b"] = jnp.zeros((FPN_CH,), jnp.float32)
    p["lat3_w"] = w(ks[2], (BB1_CH, FPN_CH), BB1_CH)           # FPN laterals (1x1)
    p["lat3_b"] = jnp.zeros((FPN_CH,), jnp.float32)
    p["lat4_w"] = w(ks[3], (FPN_CH, FPN_CH), FPN_CH)
    p["lat4_b"] = jnp.zeros((FPN_CH,), jnp.float32)
    p["cls_w"] = w(ks[4], (FPN_CH, NUM_ANCHORS * NUM_CLASSES), FPN_CH)   # head (1x1)
    p["cls_b"] = jnp.full((NUM_ANCHORS * NUM_CLASSES,), -2.0, jnp.float32)
    p["box_w"] = w(ks[5], (FPN_CH, NUM_ANCHORS * 4), FPN_CH)
    p["box_b"] = jnp.zeros((NUM_ANCHORS * 4,), jnp.float32)
    return p


def pack_params(params, batch, in_hw):
    """One-time rearrangement of parameters + constants into the kernel layout."""
    A = NUM_ANCHORS
    H, W = in_hw
    H1 = (H + 2 - 3) // 2 + 1
    W1 = (W + 2 - 3) // 2 + 1
    H2 = (H1 + 2 - 3) // 2 + 1
    W2 = (W1 + 2 - 3) // 2 + 1
    consts = _build_constants(batch, H1, W1, H2, W2, ANCHOR_SCALES, A)

    cls_wt = params["cls_w"].T                    # (A*C, 32), rows a*C + c
    box_wt = params["box_w"].T                    # (4*A, 32), rows a*4 + k (dx,dy,dw,dh)
    # duplicate/interleave box rows so the decode works directly on (a, coord) rows:
    #   coords 0/2 (x1,x2) use dx & dw, coords 1/3 (y1,y2) use dy & dh
    pos_idx = np.array([a * 4 + (0 if k % 2 == 0 else 1)
                        for a in range(A) for k in range(4)])
    size_idx = np.array([a * 4 + (2 if k % 2 == 0 else 3)
                         for a in range(A) for k in range(4)])
    wh_t = jnp.concatenate([cls_wt, box_wt[pos_idx], box_wt[size_idx]], axis=0)  # (24, 32)
    bh = jnp.concatenate([params["cls_b"], params["box_b"][pos_idx],
                          params["box_b"][size_idx]]).reshape(-1, 1)

    return dict(
        w1_t=params["bb1_w"].T,                              # (16, 9*Cin)
        b1=params["bb1_b"].reshape(-1, 1),
        wl3_t=params["lat3_w"].T,                            # (32, 16)
        bl3=params["lat3_b"].reshape(-1, 1),
        w2_t=params["bb2_w"].reshape(9, BB1_CH, FPN_CH).transpose(0, 2, 1),  # (9,32,16)
        b2=params["bb2_b"].reshape(-1, 1),
        wl4_t=params["lat4_w"].T,                            # (32, 32)
        bl4=params["lat4_b"].reshape(-1, 1),
        wh_t=wh_t, bh=bh,
        gsel=jnp.asarray(consts["gsel"]),
        p3m=jnp.asarray(consts["p3m"]),
        upm=jnp.asarray(consts["upm"]),
        geo=jnp.asarray(consts["geo"]),
    )


# ----------------------------------------------------------------------------
# Forward pass (training branch of DetectionModel.forward)
# ----------------------------------------------------------------------------
def detection_model_forward(packed, x_nchw, gt_boxes=None, gt_labels=None):
    A, C = NUM_ANCHORS, NUM_CLASSES
    B = x_nchw.shape[0]
    x = jnp.transpose(x_nchw, (0, 2, 3, 1)).astype(jnp.float32)   # NCHW -> NHWC
    cols1, _ = im2col(x, 3, 2, 1)

    scores_t, boxes_t = fused_detector_forward(packed, cols1)     # (A*C, M), (4A, M)

    # lane-dense kernel outputs are already in the final (batch, level, cell) column
    # order and (anchor, class)/(anchor, coord) row order -> one transpose+reshape each.
    cells = scores_t.shape[1] // B
    scores = scores_t.T.reshape(B, cells * A, C)
    boxes = boxes_t.T.reshape(B, cells * A, 4)

    if gt_boxes is not None and gt_labels is not None:
        # NOTE: faithfully replicates the reference torch code where the local `boxes`
        # was overwritten by predictions before being returned as 'gt_boxes'.
        return {"pred_boxes": boxes, "pred_scores": scores,
                "gt_boxes": boxes, "gt_labels": gt_labels}

    # TODO(synk): inference branch (confidence filter + size filter + NMS) produces
    # data-dependent ragged shapes and has no clean static-shape Pallas equivalent.
    return {"pred_boxes": boxes, "pred_scores": scores}


# ----------------------------------------------------------------------------
# Pure-JAX reference (for numerical validation of the fused kernel)
# ----------------------------------------------------------------------------
def reference_forward(params, x_nchw):
    A, C = NUM_ANCHORS, NUM_CLASSES
    x = jnp.transpose(x_nchw, (0, 2, 3, 1)).astype(jnp.float32)
    B = x.shape[0]

    def conv3x3s2_relu(inp, w, b):
        cols, (Bb, Ho, Wo) = im2col(inp, 3, 2, 1)
        return jnp.maximum(cols @ w + b, 0.0).reshape(Bb, Ho, Wo, -1)

    c3 = conv3x3s2_relu(x, params["bb1_w"], params["bb1_b"])
    c4 = conv3x3s2_relu(c3, params["bb2_w"], params["bb2_b"])
    p4 = c4 @ params["lat4_w"] + params["lat4_b"]
    p3 = (c3 @ params["lat3_w"] + params["lat3_b"]
          + jnp.repeat(jnp.repeat(p4, 2, axis=1), 2, axis=2))

    all_scores, all_boxes = [], []
    for feat, scales in zip([p3, p4], ANCHOR_SCALES):
        _, H, W, _ = feat.shape
        cls = (feat @ params["cls_w"] + params["cls_b"]).reshape(B, -1, C)
        box = (feat @ params["box_w"] + params["box_b"]).reshape(B, -1, 4)
        scores = 1.0 / (1.0 + jnp.exp(-cls))
        ys = (jnp.arange(H, dtype=jnp.float32) + 0.5) / H
        xs = (jnp.arange(W, dtype=jnp.float32) + 0.5) / W
        cy, cx = jnp.meshgrid(ys, xs, indexing="ij")
        acx = jnp.repeat(cx.reshape(-1), A)
        acy = jnp.repeat(cy.reshape(-1), A)
        s = jnp.tile(jnp.asarray(scales, jnp.float32), H * W)
        dx, dy = box[..., 0], box[..., 1]
        dw = jnp.minimum(box[..., 2], 4.0)
        dh = jnp.minimum(box[..., 3], 4.0)
        pcx, pcy = dx * s + acx, dy * s + acy
        pw, ph = jnp.exp(dw) * s, jnp.exp(dh) * s
        bx = jnp.stack([pcx - 0.5 * pw, pcy - 0.5 * ph,
                        pcx + 0.5 * pw, pcy + 0.5 * ph], axis=-1)
        all_scores.append(scores)
        all_boxes.append(jnp.clip(bx, 0.0, 1.0))
    return jnp.concatenate(all_scores, axis=1), jnp.concatenate(all_boxes, axis=1)


# ----------------------------------------------------------------------------
if __name__ == "__main__":
    key = jax.random.PRNGKey(0)
    kx, kb, kl, kp = jax.random.split(key, 4)

    B, Cin, H, W = 2, 4, 16, 16
    x = jax.random.normal(kx, (B, Cin, H, W), jnp.float32)        # NCHW like PyTorch
    gt_boxes = jax.random.uniform(kb, (B, 5, 4), jnp.float32)     # [B, N, 4]
    gt_labels = jax.random.randint(kl, (B, 5), 0, NUM_CLASSES)    # [B, N]

    params = init_params(kp, in_ch=Cin)
    packed = pack_params(params, batch=B, in_hw=(H, W))           # one-time packing

    fwd = jax.jit(detection_model_forward)
    out = fwd(packed, x, gt_boxes, gt_labels)
    jax.block_until_ready(out)

    # structural sanity checks
    total_preds = (8 * 8 + 4 * 4) * NUM_ANCHORS                   # two FPN levels
    assert out["pred_scores"].shape == (B, total_preds, NUM_CLASSES)
    assert out["pred_boxes"].shape == (B, total_preds, 4)
    assert out["gt_boxes"].shape == (B, total_preds, 4)
    assert bool(jnp.all(out["pred_scores"] >= 0) & jnp.all(out["pred_scores"] <= 1))
    assert bool(jnp.all(out["pred_boxes"] >= 0) & jnp.all(out["pred_boxes"] <= 1))
    assert bool(jnp.all(jnp.isfinite(out["pred_boxes"])))

    # numerical check against the pure-JAX reference
    ref_scores, ref_boxes = jax.jit(reference_forward)(params, x)
    np.testing.assert_allclose(np.asarray(out["pred_scores"]), np.asarray(ref_scores),
                               rtol=1e-3, atol=1e-3)
    np.testing.assert_allclose(np.asarray(out["pred_boxes"]), np.asarray(ref_boxes),
                               rtol=1e-3, atol=1e-3)

    print("KERNEL_OK")
</pallas_src>

<mosaic_0001>
module attributes {stable_mosaic.version = 11 : i64} {
  func.func @_detector_kernel(%arg0: i32, %arg1: memref<128x36xf32, #tpu.memory_space<vmem>>, %arg2: memref<16x36xf32, #tpu.memory_space<vmem>>, %arg3: memref<16x1xf32, #tpu.memory_space<vmem>>, %arg4: memref<32x16xf32, #tpu.memory_space<vmem>>, %arg5: memref<32x1xf32, #tpu.memory_space<vmem>>, %arg6: memref<9x128x32xf32, #tpu.memory_space<vmem>>, %arg7: memref<9x32x16xf32, #tpu.memory_space<vmem>>, %arg8: memref<32x1xf32, #tpu.memory_space<vmem>>, %arg9: memref<32x32xf32, #tpu.memory_space<vmem>>, %arg10: memref<32x1xf32, #tpu.memory_space<vmem>>, %arg11: memref<128x160xf32, #tpu.memory_space<vmem>>, %arg12: memref<32x160xf32, #tpu.memory_space<vmem>>, %arg13: memref<24x32xf32, #tpu.memory_space<vmem>>, %arg14: memref<24x1xf32, #tpu.memory_space<vmem>>, %arg15: memref<24x160xf32, #tpu.memory_space<vmem>>, %arg16: memref<8x160xf32, #tpu.memory_space<vmem>>, %arg17: memref<8x160xf32, #tpu.memory_space<vmem>>) attributes {dimension_semantics = [#tpu.dimension_semantics<arbitrary>], iteration_bounds = array<i64: 1>, scalar_prefetch = 0 : i64, scratch_operands = 0 : i64, tpu.core_type = #tpu.core_type<tc>, window_params = [{pipeline_mode = #tpu.pipeline_mode<synchronous>, transform_indices = @transform_0, window_bounds = array<i64: 128, 36>}, {pipeline_mode = #tpu.pipeline_mode<synchronous>, transform_indices = @transform_1, window_bounds = array<i64: 16, 36>}, {pipeline_mode = #tpu.pipeline_mode<synchronous>, transform_indices = @transform_2, window_bounds = array<i64: 16, 1>}, {pipeline_mode = #tpu.pipeline_mode<synchronous>, transform_indices = @transform_3, window_bounds = array<i64: 32, 16>}, {pipeline_mode = #tpu.pipeline_mode<synchronous>, transform_indices = @transform_4, window_bounds = array<i64: 32, 1>}, {pipeline_mode = #tpu.pipeline_mode<synchronous>, transform_indices = @transform_5, window_bounds = array<i64: 9, 128, 32>}, {pipeline_mode = #tpu.pipeline_mode<synchronous>, transform_indices = @transform_6, window_bounds = array<i64: 9, 32, 16>}, {pipeline_mode = #tpu.pipeline_mode<synchronous>, transform_indices = @transform_7, window_bounds = array<i64: 32, 1>}, {pipeline_mode = #tpu.pipeline_mode<synchronous>, transform_indices = @transform_8, window_bounds = array<i64: 32, 32>}, {pipeline_mode = #tpu.pipeline_mode<synchronous>, transform_indices = @transform_9, window_bounds = array<i64: 32, 1>}, {pipeline_mode = #tpu.pipeline_mode<synchronous>, transform_indices = @transform_10, window_bounds = array<i64: 128, 160>}, {pipeline_mode = #tpu.pipeline_mode<synchronous>, transform_indices = @transform_11, window_bounds = array<i64: 32, 160>}, {pipeline_mode = #tpu.pipeline_mode<synchronous>, transform_indices = @transform_12, window_bounds = array<i64: 24, 32>}, {pipeline_mode = #tpu.pipeline_mode<synchronous>, transform_indices = @transform_13, window_bounds = array<i64: 24, 1>}, {pipeline_mode = #tpu.pipeline_mode<synchronous>, transform_indices = @transform_14, window_bounds = array<i64: 24, 160>}, {pipeline_mode = #tpu.pipeline_mode<synchronous>, transform_indices = @transform_15, window_bounds = array<i64: 8, 160>}, {pipeline_mode = #tpu.pipeline_mode<synchronous>, transform_indices = @transform_16, window_bounds = array<i64: 8, 160>}]} {
    %c0 = arith.constant 0 : index
    %c0_0 = arith.constant 0 : index
    %0 = vector.load %arg2[%c0, %c0_0] : memref<16x36xf32, #tpu.memory_space<vmem>>, vector<16x36xf32>
    %c0_1 = arith.constant 0 : index
    %c0_2 = arith.constant 0 : index
    %1 = vector.load %arg1[%c0_1, %c0_2] : memref<128x36xf32, #tpu.memory_space<vmem>>, vector<128x36xf32>
    %cst = arith.constant dense<0.000000e+00> : vector<16x128xf32>
    %2 = tpu.matmul %0, %1, %cst {dimension_numbers = #tpu.dot_dimension_numbers<[1], [1], [0], [0], [0, 0, 1, 0], [], []>, precision = #tpu.contract_precision<fp32>} : vector<16x36xf32>, vector<128x36xf32>, vector<16x128xf32> -> vector<16x128xf32>
    %c0_3 = arith.constant 0 : index
    %c0_4 = arith.constant 0 : index
    %3 = vector.load %arg3[%c0_3, %c0_4] : memref<16x1xf32, #tpu.memory_space<vmem>>, vector<16x1xf32>
    %4 = vector.broadcast %3 : vector<16x1xf32> to vector<16x128xf32>
    %5 = arith.addf %2, %4 : vector<16x128xf32>
    %cst_5 = arith.constant 0.000000e+00 : f32
    %6 = vector.broadcast %cst_5 : f32 to vector<16x128xf32>
    %7 = arith.maximumf %5, %6 : vector<16x128xf32>
    %c0_6 = arith.constant 0 : index
    %c0_7 = arith.constant 0 : index
    %8 = vector.load %arg4[%c0_6, %c0_7] : memref<32x16xf32, #tpu.memory_space<vmem>>, vector<32x16xf32>
    %cst_8 = arith.constant dense<0.000000e+00> : vector<32x128xf32>
    %9 = tpu.matmul %8, %7, %cst_8 {dimension_numbers = #tpu.dot_dimension_numbers<[1], [0], [0], [1], [0, 0, 1, 1], [], []>, precision = #tpu.contract_precision<fp32>} : vector<32x16xf32>, vector<16x128xf32>, vector<32x128xf32> -> vector<32x128xf32>
    %c0_9 = arith.constant 0 : index
    %c0_10 = arith.constant 0 : index
    %10 = vector.load %arg5[%c0_9, %c0_10] : memref<32x1xf32, #tpu.memory_space<vmem>>, vector<32x1xf32>
    %11 = vector.broadcast %10 : vector<32x1xf32> to vector<32x128xf32>
    %12 = arith.addf %9, %11 : vector<32x128xf32>
    %cst_11 = arith.constant 0.000000e+00 : f32
    %13 = vector.broadcast %cst_11 : f32 to vector<32x32xf32>
    %c0_12 = arith.constant 0 : index
    %c0_13 = arith.constant 0 : index
    %c0_14 = arith.constant 0 : index
    %14 = vector.load %arg6[%c0_12, %c0_13, %c0_14] : memref<9x128x32xf32, #tpu.memory_space<vmem>>, vector<1x128x32xf32>
    %15 = vector.shape_cast %14 : vector<1x128x32xf32> to vector<128x32xf32>
    %cst_15 = arith.constant dense<0.000000e+00> : vector<16x32xf32>
    %16 = tpu.matmul %7, %15, %cst_15 {dimension_numbers = #tpu.dot_dimension_numbers<[1], [0], [0], [1], [0, 0, 1, 1], [], []>, precision = #tpu.contract_precision<fp32>} : vector<16x128xf32>, vector<128x32xf32>, vector<16x32xf32> -> vector<16x32xf32>
    %c0_16 = arith.constant 0 : index
    %c0_17 = arith.constant 0 : index
    %c0_18 = arith.constant 0 : index
    %17 = vector.load %arg7[%c0_16, %c0_17, %c0_18] : memref<9x32x16xf32, #tpu.memory_space<vmem>>, vector<1x32x16xf32>
    %18 = vector.shape_cast %17 : vector<1x32x16xf32> to vector<32x16xf32>
    %cst_19 = arith.constant dense<0.000000e+00> : vector<32x32xf32>
    %19 = tpu.matmul %18, %16, %cst_19 {dimension_numbers = #tpu.dot_dimension_numbers<[1], [0], [0], [1], [0, 0, 1, 1], [], []>, precision = #tpu.contract_precision<fp32>} : vector<32x16xf32>, vector<16x32xf32>, vector<32x32xf32> -> vector<32x32xf32>
    %20 = arith.addf %13, %19 : vector<32x32xf32>
    %c1 = arith.constant 1 : index
    %c0_20 = arith.constant 0 : index
    %c0_21 = arith.constant 0 : index
    %21 = vector.load %arg6[%c1, %c0_20, %c0_21] : memref<9x128x32xf32, #tpu.memory_space<vmem>>, vector<1x128x32xf32>
    %22 = vector.shape_cast %21 : vector<1x128x32xf32> to vector<128x32xf32>
    %cst_22 = arith.constant dense<0.000000e+00> : vector<16x32xf32>
    %23 = tpu.matmul %7, %22, %cst_22 {dimension_numbers = #tpu.dot_dimension_numbers<[1], [0], [0], [1], [0, 0, 1, 1], [], []>, precision = #tpu.contract_precision<fp32>} : vector<16x128xf32>, vector<128x32xf32>, vector<16x32xf32> -> vector<16x32xf32>
    %c1_23 = arith.constant 1 : index
    %c0_24 = arith.constant 0 : index
    %c0_25 = arith.constant 0 : index
    %24 = vector.load %arg7[%c1_23, %c0_24, %c0_25] : memref<9x32x16xf32, #tpu.memory_space<vmem>>, vector<1x32x16xf32>
    %25 = vector.shape_cast %24 : vector<1x32x16xf32> to vector<32x16xf32>
    %cst_26 = arith.constant dense<0.000000e+00> : vector<32x32xf32>
    %26 = tpu.matmul %25, %23, %cst_26 {dimension_numbers = #tpu.dot_dimension_numbers<[1], [0], [0], [1], [0, 0, 1, 1], [], []>, precision = #tpu.contract_precision<fp32>} : vector<32x16xf32>, vector<16x32xf32>, vector<32x32xf32> -> vector<32x32xf32>
    %27 = arith.addf %20, %26 : vector<32x32xf32>
    %c2 = arith.constant 2 : index
    %c0_27 = arith.constant 0 : index
    %c0_28 = arith.constant 0 : index
    %28 = vector.load %arg6[%c2, %c0_27, %c0_28] : memref<9x128x32xf32, #tpu.memory_space<vmem>>, vector<1x128x32xf32>
    %29 = vector.shape_cast %28 : vector<1x128x32xf32> to vector<128x32xf32>
    %cst_29 = arith.constant dense<0.000000e+00> : vector<16x32xf32>
    %30 = tpu.matmul %7, %29, %cst_29 {dimension_numbers = #tpu.dot_dimension_numbers<[1], [0], [0], [1], [0, 0, 1, 1], [], []>, precision = #tpu.contract_precision<fp32>} : vector<16x128xf32>, vector<128x32xf32>, vector<16x32xf32> -> vector<16x32xf32>
    %c2_30 = arith.constant 2 : index
    %c0_31 = arith.constant 0 : index
    %c0_32 = arith.constant 0 : index
    %31 = vector.load %arg7[%c2_30, %c0_31, %c0_32] : memref<9x32x16xf32, #tpu.memory_space<vmem>>, vector<1x32x16xf32>
    %32 = vector.shape_cast %31 : vector<1x32x16xf32> to vector<32x16xf32>
    %cst_33 = arith.constant dense<0.000000e+00> : vector<32x32xf32>
    %33 = tpu.matmul %32, %30, %cst_33 {dimension_numbers = #tpu.dot_dimension_numbers<[1], [0], [0], [1], [0, 0, 1, 1], [], []>, precision = #tpu.contract_precision<fp32>} : vector<32x16xf32>, vector<16x32xf32>, vector<32x32xf32> -> vector<32x32xf32>
    %34 = arith.addf %27, %33 : vector<32x32xf32>
    %c3 = arith.constant 3 : index
    %c0_34 = arith.constant 0 : index
    %c0_35 = arith.constant 0 : index
    %35 = vector.load %arg6[%c3, %c0_34, %c0_35] : memref<9x128x32xf32, #tpu.memory_space<vmem>>, vector<1x128x32xf32>
    %36 = vector.shape_cast %35 : vector<1x128x32xf32> to vector<128x32xf32>
    %cst_36 = arith.constant dense<0.000000e+00> : vector<16x32xf32>
    %37 = tpu.matmul %7, %36, %cst_36 {dimension_numbers = #tpu.dot_dimension_numbers<[1], [0], [0], [1], [0, 0, 1, 1], [], []>, precision = #tpu.contract_precision<fp32>} : vector<16x128xf32>, vector<128x32xf32>, vector<16x32xf32> -> vector<16x32xf32>
    %c3_37 = arith.constant 3 : index
    %c0_38 = arith.constant 0 : index
    %c0_39 = arith.constant 0 : index
    %38 = vector.load %arg7[%c3_37, %c0_38, %c0_39] : memref<9x32x16xf32, #tpu.memory_space<vmem>>, vector<1x32x16xf32>
    %39 = vector.shape_cast %38 : vector<1x32x16xf32> to vector<32x16xf32>
    %cst_40 = arith.constant dense<0.000000e+00> : vector<32x32xf32>
    %40 = tpu.matmul %39, %37, %cst_40 {dimension_numbers = #tpu.dot_dimension_numbers<[1], [0], [0], [1], [0, 0, 1, 1], [], []>, precision = #tpu.contract_precision<fp32>} : vector<32x16xf32>, vector<16x32xf32>, vector<32x32xf32> -> vector<32x32xf32>
    %41 = arith.addf %34, %40 : vector<32x32xf32>
    %c4 = arith.constant 4 : index
    %c0_41 = arith.constant 0 : index
    %c0_42 = arith.constant 0 : index
    %42 = vector.load %arg6[%c4, %c0_41, %c0_42] : memref<9x128x32xf32, #tpu.memory_space<vmem>>, vector<1x128x32xf32>
    %43 = vector.shape_cast %42 : vector<1x128x32xf32> to vector<128x32xf32>
    %cst_43 = arith.constant dense<0.000000e+00> : vector<16x32xf32>
    %44 = tpu.matmul %7, %43, %cst_43 {dimension_numbers = #tpu.dot_dimension_numbers<[1], [0], [0], [1], [0, 0, 1, 1], [], []>, precision = #tpu.contract_precision<fp32>} : vector<16x128xf32>, vector<128x32xf32>, vector<16x32xf32> -> vector<16x32xf32>
    %c4_44 = arith.constant 4 : index
    %c0_45 = arith.constant 0 : index
    %c0_46 = arith.constant 0 : index
    %45 = vector.load %arg7[%c4_44, %c0_45, %c0_46] : memref<9x32x16xf32, #tpu.memory_space<vmem>>, vector<1x32x16xf32>
    %46 = vector.shape_cast %45 : vector<1x32x16xf32> to vector<32x16xf32>
    %cst_47 = arith.constant dense<0.000000e+00> : vector<32x32xf32>
    %47 = tpu.matmul %46, %44, %cst_47 {dimension_numbers = #tpu.dot_dimension_numbers<[1], [0], [0], [1], [0, 0, 1, 1], [], []>, precision = #tpu.contract_precision<fp32>} : vector<32x16xf32>, vector<16x32xf32>, vector<32x32xf32> -> vector<32x32xf32>
    %48 = arith.addf %41, %47 : vector<32x32xf32>
    %c5 = arith.constant 5 : index
    %c0_48 = arith.constant 0 : index
    %c0_49 = arith.constant 0 : index
    %49 = vector.load %arg6[%c5, %c0_48, %c0_49] : memref<9x128x32xf32, #tpu.memory_space<vmem>>, vector<1x128x32xf32>
    %50 = vector.shape_cast %49 : vector<1x128x32xf32> to vector<128x32xf32>
    %cst_50 = arith.constant dense<0.000000e+00> : vector<16x32xf32>
    %51 = tpu.matmul %7, %50, %cst_50 {dimension_numbers = #tpu.dot_dimension_numbers<[1], [0], [0], [1], [0, 0, 1, 1], [], []>, precision = #tpu.contract_precision<fp32>} : vector<16x128xf32>, vector<128x32xf32>, vector<16x32xf32> -> vector<16x32xf32>
    %c5_51 = arith.constant 5 : index
    %c0_52 = arith.constant 0 : index
    %c0_53 = arith.constant 0 : index
    %52 = vector.load %arg7[%c5_51, %c0_52, %c0_53] : memref<9x32x16xf32, #tpu.memory_space<vmem>>, vector<1x32x16xf32>
    %53 = vector.shape_cast %52 : vector<1x32x16xf32> to vector<32x16xf32>
    %cst_54 = arith.constant dense<0.000000e+00> : vector<32x32xf32>
    %54 = tpu.matmul %53, %51, %cst_54 {dimension_numbers = #tpu.dot_dimension_numbers<[1], [0], [0], [1], [0, 0, 1, 1], [], []>, precision = #tpu.contract_precision<fp32>} : vector<32x16xf32>, vector<16x32xf32>, vector<32x32xf32> -> vector<32x32xf32>
    %55 = arith.addf %48, %54 : vector<32x32xf32>
    %c6 = arith.constant 6 : index
    %c0_55 = arith.constant 0 : index
    %c0_56 = arith.constant 0 : index
    %56 = vector.load %arg6[%c6, %c0_55, %c0_56] : memref<9x128x32xf32, #tpu.memory_space<vmem>>, vector<1x128x32xf32>
    %57 = vector.shape_cast %56 : vector<1x128x32xf32> to vector<128x32xf32>
    %cst_57 = arith.constant dense<0.000000e+00> : vector<16x32xf32>
    %58 = tpu.matmul %7, %57, %cst_57 {dimension_numbers = #tpu.dot_dimension_numbers<[1], [0], [0], [1], [0, 0, 1, 1], [], []>, precision = #tpu.contract_precision<fp32>} : vector<16x128xf32>, vector<128x32xf32>, vector<16x32xf32> -> vector<16x32xf32>
    %c6_58 = arith.constant 6 : index
    %c0_59 = arith.constant 0 : index
    %c0_60 = arith.constant 0 : index
    %59 = vector.load %arg7[%c6_58, %c0_59, %c0_60] : memref<9x32x16xf32, #tpu.memory_space<vmem>>, vector<1x32x16xf32>
    %60 = vector.shape_cast %59 : vector<1x32x16xf32> to vector<32x16xf32>
    %cst_61 = arith.constant dense<0.000000e+00> : vector<32x32xf32>
    %61 = tpu.matmul %60, %58, %cst_61 {dimension_numbers = #tpu.dot_dimension_numbers<[1], [0], [0], [1], [0, 0, 1, 1], [], []>, precision = #tpu.contract_precision<fp32>} : vector<32x16xf32>, vector<16x32xf32>, vector<32x32xf32> -> vector<32x32xf32>
    %62 = arith.addf %55, %61 : vector<32x32xf32>
    %c7 = arith.constant 7 : index
    %c0_62 = arith.constant 0 : index
    %c0_63 = arith.constant 0 : index
    %63 = vector.load %arg6[%c7, %c0_62, %c0_63] : memref<9x128x32xf32, #tpu.memory_space<vmem>>, vector<1x128x32xf32>
    %64 = vector.shape_cast %63 : vector<1x128x32xf32> to vector<128x32xf32>
    %cst_64 = arith.constant dense<0.000000e+00> : vector<16x32xf32>
    %65 = tpu.matmul %7, %64, %cst_64 {dimension_numbers = #tpu.dot_dimension_numbers<[1], [0], [0], [1], [0, 0, 1, 1], [], []>, precision = #tpu.contract_precision<fp32>} : vector<16x128xf32>, vector<128x32xf32>, vector<16x32xf32> -> vector<16x32xf32>
    %c7_65 = arith.constant 7 : index
    %c0_66 = arith.constant 0 : index
    %c0_67 = arith.constant 0 : index
    %66 = vector.load %arg7[%c7_65, %c0_66, %c0_67] : memref<9x32x16xf32, #tpu.memory_space<vmem>>, vector<1x32x16xf32>
    %67 = vector.shape_cast %66 : vector<1x32x16xf32> to vector<32x16xf32>
    %cst_68 = arith.constant dense<0.000000e+00> : vector<32x32xf32>
    %68 = tpu.matmul %67, %65, %cst_68 {dimension_numbers = #tpu.dot_dimension_numbers<[1], [0], [0], [1], [0, 0, 1, 1], [], []>, precision = #tpu.contract_precision<fp32>} : vector<32x16xf32>, vector<16x32xf32>, vector<32x32xf32> -> vector<32x32xf32>
    %69 = arith.addf %62, %68 : vector<32x32xf32>
    %c8 = arith.constant 8 : index
    %c0_69 = arith.constant 0 : index
    %c0_70 = arith.constant 0 : index
    %70 = vector.load %arg6[%c8, %c0_69, %c0_70] : memref<9x128x32xf32, #tpu.memory_space<vmem>>, vector<1x128x32xf32>
    %71 = vector.shape_cast %70 : vector<1x128x32xf32> to vector<128x32xf32>
    %cst_71 = arith.constant dense<0.000000e+00> : vector<16x32xf32>
    %72 = tpu.matmul %7, %71, %cst_71 {dimension_numbers = #tpu.dot_dimension_numbers<[1], [0], [0], [1], [0, 0, 1, 1], [], []>, precision = #tpu.contract_precision<fp32>} : vector<16x128xf32>, vector<128x32xf32>, vector<16x32xf32> -> vector<16x32xf32>
    %c8_72 = arith.constant 8 : index
    %c0_73 = arith.constant 0 : index
    %c0_74 = arith.constant 0 : index
    %73 = vector.load %arg7[%c8_72, %c0_73, %c0_74] : memref<9x32x16xf32, #tpu.memory_space<vmem>>, vector<1x32x16xf32>
    %74 = vector.shape_cast %73 : vector<1x32x16xf32> to vector<32x16xf32>
    %cst_75 = arith.constant dense<0.000000e+00> : vector<32x32xf32>
    %75 = tpu.matmul %74, %72, %cst_75 {dimension_numbers = #tpu.dot_dimension_numbers<[1], [0], [0], [1], [0, 0, 1, 1], [], []>, precision = #tpu.contract_precision<fp32>} : vector<32x16xf32>, vector<16x32xf32>, vector<32x32xf32> -> vector<32x32xf32>
    %76 = arith.addf %69, %75 : vector<32x32xf32>
    %c0_76 = arith.constant 0 : index
    %c0_77 = arith.constant 0 : index
    %77 = vector.load %arg8[%c0_76, %c0_77] : memref<32x1xf32, #tpu.memory_space<vmem>>, vector<32x1xf32>
    %78 = vector.broadcast %77 : vector<32x1xf32> to vector<32x32xf32>
    %79 = arith.addf %76, %78 : vector<32x32xf32>
    %cst_78 = arith.constant 0.000000e+00 : f32
    %80 = vector.broadcast %cst_78 : f32 to vector<32x32xf32>
    %81 = arith.maximumf %79, %80 : vector<32x32xf32>
    %c0_79 = arith.constant 0 : index
    %c0_80 = arith.constant 0 : index
    %82 = vector.load %arg9[%c0_79, %c0_80] : memref<32x32xf32, #tpu.memory_space<vmem>>, vector<32x32xf32>
    %cst_81 = arith.constant dense<0.000000e+00> : vector<32x32xf32>
    %83 = tpu.matmul %82, %81, %cst_81 {dimension_numbers = #tpu.dot_dimension_numbers<[1], [0], [0], [1], [0, 0, 1, 1], [], []>, precision = #tpu.contract_precision<fp32>} : vector<32x32xf32>, vector<32x32xf32>, vector<32x32xf32> -> vector<32x32xf32>
    %c0_82 = arith.constant 0 : index
    %c0_83 = arith.constant 0 : index
    %84 = vector.load %arg10[%c0_82, %c0_83] : memref<32x1xf32, #tpu.memory_space<vmem>>, vector<32x1xf32>
    %85 = vector.broadcast %84 : vector<32x1xf32> to vector<32x32xf32>
    %86 = arith.addf %83, %85 : vector<32x32xf32>
    %c0_84 = arith.constant 0 : index
    %c0_85 = arith.constant 0 : index
    %87 = vector.load %arg11[%c0_84, %c0_85] : memref<128x160xf32, #tpu.memory_space<vmem>>, vector<128x160xf32>
    %cst_86 = arith.constant dense<0.000000e+00> : vector<32x160xf32>
    %88 = tpu.matmul %12, %87, %cst_86 {dimension_numbers = #tpu.dot_dimension_numbers<[1], [0], [0], [1], [0, 0, 1, 1], [], []>, precision = #tpu.contract_precision<fp32>} : vector<32x128xf32>, vector<128x160xf32>, vector<32x160xf32> -> vector<32x160xf32>
    %c0_87 = arith.constant 0 : index
    %c0_88 = arith.constant 0 : index
    %89 = vector.load %arg12[%c0_87, %c0_88] : memref<32x160xf32, #tpu.memory_space<vmem>>, vector<32x160xf32>
    %cst_89 = arith.constant dense<0.000000e+00> : vector<32x160xf32>
    %90 = tpu.matmul %86, %89, %cst_89 {dimension_numbers = #tpu.dot_dimension_numbers<[1], [0], [0], [1], [0, 0, 1, 1], [], []>, precision = #tpu.contract_precision<fp32>} : vector<32x32xf32>, vector<32x160xf32>, vector<32x160xf32> -> vector<32x160xf32>
    %91 = arith.addf %88, %90 : vector<32x160xf32>
    %c0_90 = arith.constant 0 : index
    %c0_91 = arith.constant 0 : index
    %92 = vector.load %arg13[%c0_90, %c0_91] : memref<24x32xf32, #tpu.memory_space<vmem>>, vector<24x32xf32>
    %cst_92 = arith.constant dense<0.000000e+00> : vector<24x160xf32>
    %93 = tpu.matmul %92, %91, %cst_92 {dimension_numbers = #tpu.dot_dimension_numbers<[1], [0], [0], [1], [0, 0, 1, 1], [], []>, precision = #tpu.contract_precision<fp32>} : vector<24x32xf32>, vector<32x160xf32>, vector<24x160xf32> -> vector<24x160xf32>
    %c0_93 = arith.constant 0 : index
    %c0_94 = arith.constant 0 : index
    %94 = vector.load %arg14[%c0_93, %c0_94] : memref<24x1xf32, #tpu.memory_space<vmem>>, vector<24x1xf32>
    %95 = vector.broadcast %94 : vector<24x1xf32> to vector<24x160xf32>
    %96 = arith.addf %93, %95 : vector<24x160xf32>
    %97 = vector.extract_strided_slice %96 {offsets = [0, 0], sizes = [8, 160], strides = [1, 1]} : vector<24x160xf32> to vector<8x160xf32>
    %cst_95 = arith.constant 0.000000e+00 : f32
    %98 = vector.broadcast %cst_95 : f32 to vector<8x160xf32>
    %99 = arith.subf %98, %97 : vector<8x160xf32>
    %100 = math.exp %99 : vector<8x160xf32>
    %cst_96 = arith.constant 1.000000e+00 : f32
    %101 = vector.broadcast %cst_96 : f32 to vector<8x160xf32>
    %102 = arith.addf %101, %100 : vector<8x160xf32>
    %cst_97 = arith.constant 1.000000e+00 : f32
    %103 = vector.broadcast %cst_97 : f32 to vector<8x160xf32>
    %104 = arith.divf %103, %102 : vector<8x160xf32>
    %c0_98 = arith.constant 0 : index
    %c0_99 = arith.constant 0 : index
    %105 = vector.load %arg16[%c0_98, %c0_99] : memref<8x160xf32, #tpu.memory_space<vmem>>, vector<8x160xf32>
    tpu.vector_store %arg16[%c0_98, %c0_99], %104 {strides = array<i32>} : memref<8x160xf32, #tpu.memory_space<vmem>>, vector<8x160xf32>,
    %106 = vector.extract_strided_slice %96 {offsets = [8, 0], sizes = [8, 160], strides = [1, 1]} : vector<24x160xf32> to vector<8x160xf32>
    %107 = vector.extract_strided_slice %96 {offsets = [16, 0], sizes = [8, 160], strides = [1, 1]} : vector<24x160xf32> to vector<8x160xf32>
    %cst_100 = arith.constant 4.000000e+00 : f32
    %108 = vector.broadcast %cst_100 : f32 to vector<8x160xf32>
    %109 = arith.minimumf %107, %108 : vector<8x160xf32>
    %c0_101 = arith.constant 0 : index
    %c0_102 = arith.constant 0 : index
    %110 = vector.load %arg15[%c0_101, %c0_102] : memref<24x160xf32, #tpu.memory_space<vmem>>, vector<24x160xf32>
    %111 = vector.extract_strided_slice %110 {offsets = [0, 0], sizes = [8, 160], strides = [1, 1]} : vector<24x160xf32> to vector<8x160xf32>
    %112 = vector.extract_strided_slice %110 {offsets = [8, 0], sizes = [8, 160], strides = [1, 1]} : vector<24x160xf32> to vector<8x160xf32>
    %113 = vector.extract_strided_slice %110 {offsets = [16, 0], sizes = [8, 160], strides = [1, 1]} : vector<24x160xf32> to vector<8x160xf32>
    %114 = arith.mulf %106, %111 : vector<8x160xf32>
    %115 = arith.addf %114, %112 : vector<8x160xf32>
    %116 = math.exp %109 : vector<8x160xf32>
    %117 = arith.mulf %113, %116 : vector<8x160xf32>
    %118 = arith.addf %115, %117 : vector<8x160xf32>
    %cst_103 = arith.constant 0.000000e+00 : f32
    %cst_104 = arith.constant 1.000000e+00 : f32
    %119 = vector.broadcast %cst_103 : f32 to vector<8x160xf32>
    %120 = arith.maximumf %119, %118 : vector<8x160xf32>
    %121 = vector.broadcast %cst_104 : f32 to vector<8x160xf32>
    %122 = arith.minimumf %121, %120 : vector<8x160xf32>
    %c0_105 = arith.constant 0 : index
    %c0_106 = arith.constant 0 : index
    %123 = vector.load %arg17[%c0_105, %c0_106] : memref<8x160xf32, #tpu.memory_space<vmem>>, vector<8x160xf32>
    tpu.vector_store %arg17[%c0_105, %c0_106], %122 {strides = array<i32>} : memref<8x160xf32, #tpu.memory_space<vmem>>, vector<8x160xf32>,
    return
  }
  func.func @transform_0(%arg0: i32) -> (i32, i32) {
    %c0_i32 = arith.constant 0 : i32
    %c0_i32_0 = arith.constant 0 : i32
    %c0_i32_1 = arith.constant 0 : i32
    return %c0_i32, %c0_i32_0 : i32, i32
  }
  func.func @transform_1(%arg0: i32) -> (i32, i32) {
    %c0_i32 = arith.constant 0 : i32
    %c0_i32_0 = arith.constant 0 : i32
    %c0_i32_1 = arith.constant 0 : i32
    return %c0_i32, %c0_i32_0 : i32, i32
  }
  func.func @transform_2(%arg0: i32) -> (i32, i32) {
    %c0_i32 = arith.constant 0 : i32
    %c0_i32_0 = arith.constant 0 : i32
    %c0_i32_1 = arith.constant 0 : i32
    return %c0_i32, %c0_i32_0 : i32, i32
  }
  func.func @transform_3(%arg0: i32) -> (i32, i32) {
    %c0_i32 = arith.constant 0 : i32
    %c0_i32_0 = arith.constant 0 : i32
    %c0_i32_1 = arith.constant 0 : i32
    return %c0_i32, %c0_i32_0 : i32, i32
  }
  func.func @transform_4(%arg0: i32) -> (i32, i32) {
    %c0_i32 = arith.constant 0 : i32
    %c0_i32_0 = arith.constant 0 : i32
    %c0_i32_1 = arith.constant 0 : i32
    return %c0_i32, %c0_i32_0 : i32, i32
  }
  func.func @transform_5(%arg0: i32) -> (i32, i32, i32) {
    %c0_i32 = arith.constant 0 : i32
    %c0_i32_0 = arith.constant 0 : i32
    %c0_i32_1 = arith.constant 0 : i32
    %c0_i32_2 = arith.constant 0 : i32
    return %c0_i32, %c0_i32_0, %c0_i32_1 : i32, i32, i32
  }
  func.func @transform_6(%arg0: i32) -> (i32, i32, i32) {
    %c0_i32 = arith.constant 0 : i32
    %c0_i32_0 = arith.constant 0 : i32
    %c0_i32_1 = arith.constant 0 : i32
    %c0_i32_2 = arith.constant 0 : i32
    return %c0_i32, %c0_i32_0, %c0_i32_1 : i32, i32, i32
  }
  func.func @transform_7(%arg0: i32) -> (i32, i32) {
    %c0_i32 = arith.constant 0 : i32
    %c0_i32_0 = arith.constant 0 : i32
    %c0_i32_1 = arith.constant 0 : i32
    return %c0_i32, %c0_i32_0 : i32, i32
  }
  func.func @transform_8(%arg0: i32) -> (i32, i32) {
    %c0_i32 = arith.constant 0 : i32
    %c0_i32_0 = arith.constant 0 : i32
    %c0_i32_1 = arith.constant 0 : i32
    return %c0_i32, %c0_i32_0 : i32, i32
  }
  func.func @transform_9(%arg0: i32) -> (i32, i32) {
    %c0_i32 = arith.constant 0 : i32
    %c0_i32_0 = arith.constant 0 : i32
    %c0_i32_1 = arith.constant 0 : i32
    return %c0_i32, %c0_i32_0 : i32, i32
  }
  func.func @transform_10(%arg0: i32) -> (i32, i32) {
    %c0_i32 = arith.constant 0 : i32
    %c0_i32_0 = arith.constant 0 : i32
    %c0_i32_1 = arith.constant 0 : i32
    return %c0_i32, %c0_i32_0 : i32, i32
  }
  func.func @transform_11(%arg0: i32) -> (i32, i32) {
    %c0_i32 = arith.constant 0 : i32
    %c0_i32_0 = arith.constant 0 : i32
    %c0_i32_1 = arith.constant 0 : i32
    return %c0_i32, %c0_i32_0 : i32, i32
  }
  func.func @transform_12(%arg0: i32) -> (i32, i32) {
    %c0_i32 = arith.constant 0 : i32
    %c0_i32_0 = arith.constant 0 : i32
    %c0_i32_1 = arith.constant 0 : i32
    return %c0_i32, %c0_i32_0 : i32, i32
  }
  func.func @transform_13(%arg0: i32) -> (i32, i32) {
    %c0_i32 = arith.constant 0 : i32
    %c0_i32_0 = arith.constant 0 : i32
    %c0_i32_1 = arith.constant 0 : i32
    return %c0_i32, %c0_i32_0 : i32, i32
  }
  func.func @transform_14(%arg0: i32) -> (i32, i32) {
    %c0_i32 = arith.constant 0 : i32
    %c0_i32_0 = arith.constant 0 : i32
    %c0_i32_1 = arith.constant 0 : i32
    return %c0_i32, %c0_i32_0 : i32, i32
  }
  func.func @transform_15(%arg0: i32) -> (i32, i32) {
    %c0_i32 = arith.constant 0 : i32
    %c0_i32_0 = arith.constant 0 : i32
    %c0_i32_1 = arith.constant 0 : i32
    return %c0_i32, %c0_i32_0 : i32, i32
  }
  func.func @transform_16(%arg0: i32) -> (i32, i32) {
    %c0_i32 = arith.constant 0 : i32
    %c0_i32_0 = arith.constant 0 : i32
    %c0_i32_1 = arith.constant 0 : i32
    return %c0_i32, %c0_i32_0 : i32, i32
  }
}

</mosaic_0001>

<bundles_post_ra>
// kernel: detection_model_forward.1
= control target key start
LH: loop header
LB: loop body
LE: loop exit
PB: predicated region body
PF: predicated region fallthrough
CT: control target
= control target key end

     0   :  { %vm82_vm0 = vcmask 293888   ;;  %vm539_vm1 = vcmask 130048   ;;  %vm6812_vm2 = vcmask 261120   ;;  %s15128_s0 = inlined_call_operand.vmem [shape: f32[128,36], index: 0, kind: input, shape index: {}]   ;;  %s15129_s2 = inlined_call_operand.vmem [shape: f32[16,1], index: 2, kind: input, shape index: {}]   ;;  %s15130_s1 = inlined_call_operand.vmem [shape: f32[16,36], index: 1, kind: input, shape index: {}]   ;;  %s15131_s9 = inlined_call_operand.vmem [shape: f32[32,1], index: 9, kind: input, shape index: {}]   ;;  %s15132_s4 = inlined_call_operand.vmem [shape: f32[32,1], index: 4, kind: input, shape index: {}]   ;;  %s15133_s13 = inlined_call_operand.vmem [shape: f32[24,1], index: 13, kind: input, shape index: {}]   ;;  %s15134_s7 = inlined_call_operand.vmem [shape: f32[32,1], index: 7, kind: input, shape index: {}]   ;;  %s15135_s3 = inlined_call_operand.vmem [shape: f32[32,16], index: 3, kind: input, shape index: {}]   ;;  %s15136_s5 = inlined_call_operand.vmem [shape: f32[9,128,32], index: 5, kind: input, shape index: {}]   ;;  %s15137_s6 = inlined_call_operand.vmem [shape: f32[9,32,16], index: 6, kind: input, shape index: {}]   ;;  %s15138_s8 = inlined_call_operand.vmem [shape: f32[32,32], index: 8, kind: input, shape index: {}]   ;;  %s15139_s11 = inlined_call_operand.vmem [shape: f32[32,160], index: 11, kind: input, shape index: {}]   ;;  %s15140_s10 = inlined_call_operand.vmem [shape: f32[128,160], index: 10, kind: input, shape index: {}]   ;;  %s15141_s12 = inlined_call_operand.vmem [shape: f32[24,32], index: 12, kind: input, shape index: {}]   ;;  %s15142_s14 = inlined_call_operand.vmem [shape: f32[24,160], index: 14, kind: input, shape index: {}]   ;;  %s15143_s15 = inlined_call_operand.vmem [shape: f32[8,160], index: 15, kind: output, shape index: {0}]   ;;  %s15144_s16 = inlined_call_operand.vmem [shape: f32[8,160], index: 16, kind: output, shape index: {1}]  }
   0x1   :  { %15237 = sst [smem:[#allocation195_spill]] %s15128_s0 }
   0x2   :  { %s15238_s23 = sld [smem:[#allocation195_spill]] }
   0x8   :  { %v69_v0 = vld [vmem:[%s15238_s23 + $0x78] sm:$0xff]  ;;  %v68_v1 = vld [vmem:[%s15238_s23 + $0x70] sm:$0xff]  ;;  %v67_v2 = vld [vmem:[%s15238_s23 + $0x68] sm:$0xff] }
   0x9   :  { %v135_v3 = vsel %vm82_vm0, %v69_v0, 0  ;;  %v132_v4 = vsel %vm82_vm0, %v68_v1, 0  ;;  %v129_v5 = vsel %vm82_vm0, %v67_v2, 0  ;;  %v66_v6 = vld [vmem:[%s15238_s23 + $0x60] sm:$0xff]  ;;  %v65_v7 = vld [vmem:[%s15238_s23 + $0x58] sm:$0xff]  ;;  %v64_v17 = vld [vmem:[%s15238_s23 + $0x50] sm:$0xff] }
   0xa   :  { %v9457_v8 = vand.u32 4294901760, %v135_v3  ;;  %v9459_v9 = vand.u32 4294901760, %v132_v4  ;;  %v9461_v10 = vand.u32 4294901760, %v129_v5  ;;  %v126_v11 = vsel %vm82_vm0, %v66_v6, 0  ;;  %v63_v26 = vld [vmem:[%s15238_s23 + $0x48] sm:$0xff]  ;;  %v62_v34 = vld [vmem:[%s15238_s23 + $0x40] sm:$0xff] }
   0xb   :  { %v9464_v12 = vand.u32 4294901760, %v126_v11  ;;  %v123_v15 = vsel %vm82_vm0, %v65_v7, 0  ;;  %v120_v21 = vsel %vm82_vm0, %v64_v17, 0  ;;  %v117_v29 = vsel %vm82_vm0, %v63_v26, 0  ;;  %v61_v41 = vld [vmem:[%s15238_s23 + $0x38] sm:$0xff]  ;;  %v60_v48 = vld [vmem:[%s15238_s23 + $0x30] sm:$0xff] }
   0xc   :  { %138 = vmatpush.xpose.msra.mxu0 %v9457_v8  ;;  %v9468_v13 = vsub.f32 %v135_v3, %v9457_v8  ;;  %v9471_v14 = vsub.f32 %v132_v4, %v9459_v9  ;;  %v9475_v16 = vsub.f32 %v129_v5, %v9461_v10  ;;  %351 = vmatpush.xpose.msra.mxu3 %v9457_v8  ;;  %v9484_v20 = vand.u32 4294901760, %v123_v15  ;;  %v59_v55 = vld [vmem:[%s15238_s23 + $0x28] sm:$0xff]  ;;  %v58_v62 = vld [vmem:[%s15238_s23 + $0x20] sm:$0xff]  ;;  %v57_v5 = vld [vmem:[%s15238_s23 + $0x18] sm:$0xff] }
   0xd   :  { %v9496_v25 = vsub.f32 %v126_v11, %v9464_v12  ;;  %v9503_v28 = vand.u32 4294901760, %v120_v21  ;;  %v9519_v35 = vand.u32 4294901760, %v117_v29  ;;  %v114_v40 = vsel %vm82_vm0, %v62_v34, 0  ;;  %v55_v34 = vld [vmem:[%s15238_s23 + $0x8] sm:$0xff] }
   0xe   :  { %v188_v18 = vand.u32 4294901760, %v9468_v13  ;;  %v194_v19 = vand.u32 4294901760, %v9471_v14  ;;  %293 = vmatpush.xpose.msra.mxu2 %v9468_v13  ;;  %v200_v24 = vand.u32 4294901760, %v9475_v16  ;;  %v9512_v33 = vsub.f32 %v123_v15, %v9484_v20 }
   0xf   :  { %v206_v32 = vand.u32 4294901760, %v9496_v25  ;;  %v9522_v36 = vsub.f32 %v120_v21, %v9503_v28  ;;  %v9535_v42 = vand.u32 4294901760, %v114_v40  ;;  %v111_v46 = vsel %vm82_vm0, %v61_v41, 0 }
  0x10   :  { %140 = vmatpush.xpose.msra.mxu0 %v9459_v9  ;;  %v189_v22 = vsub.f32 %v9468_v13, %v188_v18  ;;  %v195_v23 = vsub.f32 %v9471_v14, %v194_v19  ;;  %353 = vmatpush.xpose.msra.mxu3 %v9459_v9  ;;  %v201_v31 = vsub.f32 %v9475_v16, %v200_v24  ;;  %v212_v39 = vand.u32 4294901760, %v9512_v33 }
  0x11   :  { %v207_v38 = vsub.f32 %v9496_v25, %v206_v32  ;;  %v218_v43 = vand.u32 4294901760, %v9522_v36  ;;  %v9544_v47 = vsub.f32 %v117_v29, %v9519_v35  ;;  %v9554_v50 = vand.u32 4294901760, %v111_v46 }
  0x12   :  { %v190_v27 = vand.u32 4294901760, %v189_v22  ;;  %296 = vmatpush.xpose.msra.mxu2 %v9471_v14  ;;  %v196_v30 = vand.u32 4294901760, %v195_v23  ;;  %v202_v37 = vand.u32 4294901760, %v201_v31  ;;  %v213_v45 = vsub.f32 %v9512_v33, %v212_v39  ;;  %v56_v22 = vld [vmem:[%s15238_s23 + $0x10] sm:$0xff] }
  0x13   :  { %v208_v44 = vand.u32 4294901760, %v207_v38  ;;  %v219_v49 = vsub.f32 %v9522_v36, %v218_v43  ;;  %v224_v52 = vand.u32 4294901760, %v9544_v47  ;;  %v108_v53 = vsel %vm82_vm0, %v60_v48, 0 }
  0x14   :  { %142 = vmatpush.xpose.msra.mxu0 %v9461_v10  ;;  %191 = vmatpush.xpose.msra.mxu1 %v190_v27  ;;  %v214_v51 = vand.u32 4294901760, %v213_v45  ;;  %v9560_v54 = vsub.f32 %v114_v40, %v9535_v42  ;;  %v9567_v56 = vand.u32 4294901760, %v108_v53  ;;  %v105_v57 = vsel %vm82_vm0, %v59_v55, 0 }
  0x15   :  { %355 = vmatpush.xpose.msra.mxu3 %v9461_v10  ;;  %v220_v58 = vand.u32 4294901760, %v219_v49  ;;  %v225_v59 = vsub.f32 %v9544_v47, %v224_v52  ;;  %v9576_v61 = vsub.f32 %v111_v46, %v9554_v50  ;;  %v9583_v63 = vand.u32 4294901760, %v105_v57  ;;  %v54_v46 = vld [vmem:[%s15238_s23] sm:$0xff] }
  0x16   :  { %299 = vmatpush.xpose.msra.mxu2 %v9475_v16  ;;  %v230_v60 = vand.u32 4294901760, %v9560_v54  ;;  %v102_v0 = vsel %vm82_vm0, %v58_v62, 0  ;;  %v9592_v4 = vsub.f32 %v108_v53, %v9567_v56  ;;  %v99_v21 = vsel %vm82_vm0, %v57_v5, 0 }
  0x17   :  { %v226_v1 = vand.u32 4294901760, %v225_v59  ;;  %v236_v3 = vand.u32 4294901760, %v9576_v61  ;;  %v9599_v6 = vand.u32 4294901760, %v102_v0  ;;  %v9607_v17 = vsub.f32 %v105_v57, %v9583_v63 }
  0x18   :  { %144 = vmatpush.xpose.msra.mxu0 %v9464_v12  ;;  %197 = vmatpush.xpose.msra.mxu1 %v196_v30  ;;  %v231_v2 = vsub.f32 %v9560_v54, %v230_v60  ;;  %v242_v15 = vand.u32 4294901760, %v9592_v4  ;;  %v9622_v29 = vand.u32 4294901760, %v99_v21  ;;  %v96_v31 = vsel %vm82_vm0, %v56_v22, 0 }
  0x19   :  { %357 = vmatpush.xpose.msra.mxu3 %v9464_v12  ;;  %v237_v11 = vsub.f32 %v9576_v61, %v236_v3  ;;  %v9616_v23 = vsub.f32 %v102_v0, %v9599_v6  ;;  %v248_v30 = vand.u32 4294901760, %v9607_v17  ;;  %v9636_v41 = vand.u32 4294901760, %v96_v31 }
  0x1a   :  { %302 = vmatpush.xpose.msra.mxu2 %v9496_v25  ;;  %v232_v7 = vand.u32 4294901760, %v231_v2  ;;  %v243_v27 = vsub.f32 %v9592_v4, %v242_v15  ;;  %v93_v45 = vsel %vm82_vm0, %v55_v34, 0  ;;  %v90_v57 = vsel %vm82_vm0, %v54_v46, 0  ;;  %v71_v34 = vld [vmem:[%s15129_s2 + $0x8] sm:$0xff] }
  0x1b   :  { %v238_v26 = vand.u32 4294901760, %v237_v11  ;;  %v249_v40 = vsub.f32 %v9607_v17, %v248_v30  ;;  %v9655_v55 = vsub.f32 %v96_v31, %v9636_v41  ;;  %v9664_v62 = vand.u32 4294901760, %v90_v57 }
  0x1c   :  { %146 = vmatpush.xpose.msra.mxu0 %v9484_v20  ;;  %203 = vmatpush.xpose.msra.mxu1 %v202_v37  ;;  %v254_v37 = vand.u32 4294901760, %v9616_v23  ;;  %v244_v38 = vand.u32 4294901760, %v243_v27 }
  0x1d   :  { %359 = vmatpush.xpose.msra.mxu3 %v9484_v20  ;;  %v250_v49 = vand.u32 4294901760, %v249_v40  ;;  %v266_v0 = vand.u32 4294901760, %v9655_v55  ;;  %v9678_v11 = vsub.f32 %v90_v57, %v9664_v62 }
  0x1e   :  { %305 = vmatpush.xpose.msra.mxu2 %v9512_v33  ;;  %v255_v48 = vsub.f32 %v9616_v23, %v254_v37 }
  0x1f   :  { %v267_v5 = vsub.f32 %v9655_v55, %v266_v0 }
  0x20   :  { %148 = vmatpush.xpose.msra.mxu0 %v9503_v28  ;;  %209 = vmatpush.xpose.msra.mxu1 %v208_v44  ;;  %v9639_v44 = vsub.f32 %v99_v21, %v9622_v29 }
  0x21   :  { %361 = vmatpush.xpose.msra.mxu3 %v9503_v28  ;;  %v268_v21 = vand.u32 4294901760, %v267_v5 }
  0x22   :  { %308 = vmatpush.xpose.msra.mxu2 %v9522_v36  ;;  %v260_v53 = vand.u32 4294901760, %v9639_v44 }
  0x24   :  { %150 = vmatpush.xpose.msra.mxu0 %v9519_v35  ;;  %215 = vmatpush.xpose.msra.mxu1 %v214_v51  ;;  %v9651_v51 = vand.u32 4294901760, %v93_v45  ;;  %v261_v59 = vsub.f32 %v9639_v44, %v260_v53 }
  0x25   :  { %363 = vmatpush.xpose.msra.mxu3 %v9519_v35 }
  0x26   :  { %311 = vmatpush.xpose.msra.mxu2 %v9544_v47  ;;  %v262_v2 = vand.u32 4294901760, %v261_v59 }
  0x28   :  { %152 = vmatpush.xpose.msra.mxu0 %v9535_v42  ;;  %221 = vmatpush.xpose.msra.mxu1 %v220_v58  ;;  %v256_v58 = vand.u32 4294901760, %v255_v48  ;;  %v70_v48 = vld [vmem:[%s15129_s2] sm:$0xff] }
  0x29   :  { %365 = vmatpush.xpose.msra.mxu3 %v9535_v42 }
  0x2a   :  { %314 = vmatpush.xpose.msra.mxu2 %v9560_v54  ;;  %v511_v54 = vld [vmem:[%s15135_s3] sm:$0xff] }
  0x2c   :  { %154 = vmatpush.xpose.msra.mxu0 %v9554_v50  ;;  %227 = vmatpush.xpose.msra.mxu1 %v226_v1  ;;  %v9668_v1 = vsub.f32 %v93_v45, %v9651_v51  ;;  %v52_v45 = vld [vmem:[%s15130_s1] sm:$0xff] }
  0x2d   :  { %367 = vmatpush.xpose.msra.mxu3 %v9554_v50  ;;  %v84_v13 = vsel %vm82_vm0, %v52_v45, 0 }
  0x2e   :  { %317 = vmatpush.xpose.msra.mxu2 %v9576_v61 }
  0x30   :  { %156 = vmatpush.xpose.msra.mxu0 %v9567_v56  ;;  %233 = vmatpush.xpose.msra.mxu1 %v232_v7  ;;  %v272_v7 = vand.u32 4294901760, %v9668_v1 }
  0x31   :  { %369 = vmatpush.xpose.msra.mxu3 %v9567_v56 }
  0x32   :  { %320 = vmatpush.xpose.msra.mxu2 %v9592_v4  ;;  %v273_v22 = vsub.f32 %v9668_v1, %v272_v7 }
  0x34   :  { %158 = vmatpush.xpose.msra.mxu0 %v9583_v63  ;;  %239 = vmatpush.xpose.msra.mxu1 %v238_v26  ;;  %v278_v26 = vand.u32 4294901760, %v9678_v11  ;;  %v274_v27 = vand.u32 4294901760, %v273_v22 }
  0x35   :  { %371 = vmatpush.xpose.msra.mxu3 %v9583_v63 }
  0x36   :  { %323 = vmatpush.xpose.msra.mxu2 %v9607_v17  ;;  %v279_v31 = vsub.f32 %v9678_v11, %v278_v26 }
  0x38   :  { %160 = vmatpush.xpose.msra.mxu0 %v9599_v6  ;;  %245 = vmatpush.xpose.msra.mxu1 %v244_v38  ;;  %v9353_v38 = vmov 0   ;;  %v280_v40 = vand.u32 4294901760, %v279_v31  ;;  %v819_v31 = vld [vmem:[%s15136_s5 + $0x78] sm:$0xff] }
  0x39   :  { %373 = vmatpush.xpose.msra.mxu3 %v9599_v6  ;;  %9338 = vset.pattern.permute.xlu0 %v9353_v38 }
  0x3a   :  { %326 = vmatpush.xpose.msra.mxu2 %v9616_v23  ;;  %79 = vperm.xlu0 %9338, %v71_v34  }
  0x3b   :  { %9339 = vset.pattern.permute.xlu1 %v9353_v38  ;;  %9340 = vset.pattern.permute.xlu2 %v9353_v38 }
  0x3c   :  { %162 = vmatpush.xpose.msra.mxu0 %v9622_v29  ;;  %251 = vmatpush.xpose.msra.mxu1 %v250_v49 }
  0x3d   :  { %375 = vmatpush.xpose.msra.mxu3 %v9622_v29 }
  0x3e   :  { %329 = vmatpush.xpose.msra.mxu2 %v9639_v44 }
  0x40   :  { %164 = vmatpush.xpose.msra.mxu0 %v9636_v41  ;;  %257 = vmatpush.xpose.msra.mxu1 %v256_v58  ;;  %v6788_v58 = vld [vmem:[%s15131_s9] sm:$0xff] }
  0x41   :  { %377 = vmatpush.xpose.msra.mxu3 %v9636_v41 }
  0x42   :  { %332 = vmatpush.xpose.msra.mxu2 %v9655_v55  ;;  %74 = vperm.xlu0 %9338, %v70_v48   ;;  %v515_v48 = vld [vmem:[%s15132_s4] sm:$0xff] }
  0x44   :  { %166 = vmatpush.xpose.msra.mxu0 %v9651_v51  ;;  %263 = vmatpush.xpose.msra.mxu1 %v262_v2 }
  0x45   :  { %379 = vmatpush.xpose.msra.mxu3 %v9651_v51 }
  0x46   :  { %335 = vmatpush.xpose.msra.mxu2 %v9668_v1 }
  0x48   :  { %168 = vmatpush.xpose.msra.mxu0 %v9664_v62  ;;  %269 = vmatpush.xpose.msra.mxu1 %v268_v21 }
  0x49   :  { %381 = vmatpush.xpose.msra.mxu3 %v9664_v62 }
  0x4a   :  { %338 = vmatpush.xpose.msra.mxu2 %v9678_v11  ;;  %6794 = vperm.xlu0 %9338, %v6788_v58  }
  0x4c   :  { %398 = vmatpush.xpose.msrb.mxu0 %v188_v18  ;;  %275 = vmatpush.xpose.msra.mxu1 %v274_v27  ;;  %v9706_v18 = vand.u32 4294901760, %v84_v13 }
  0x4e   :  { %v170_v46 = vsub.f32 %v84_v13, %v9706_v18 }
  0x50   :  { %402 = vmatpush.xpose.msrb.mxu0 %v194_v19  ;;  %281 = vmatpush.xpose.msra.mxu1 %v280_v40  ;;  %v171_v49 = vand.u32 4294901760, %v170_v46  ;;  %v53_v19 = vld [vmem:[%s15130_s1 + $0x8] sm:$0xff]  ;;  %v513_v40 = vld [vmem:[%s15135_s3 + $0x10] sm:$0xff] }
  0x51   :  { %341 = vmatmul.f32.vlgmr.msra.gmra.mxu2 %v170_v46 }
  0x52   :  { %v172_v14 = vsub.f32 %v170_v46, %v171_v49  ;;  %385 = vmatmul.f32.vlgmr.msra.gmra.mxu3 %v171_v49  ;;  %v818_v46 = vld [vmem:[%s15136_s5 + $0x70] sm:$0xff] }
  0x53   :  { %283 = vmatmul.f32.vlgmr.msra.gmra.mxu1 %v9706_v18  ;;  %v9848_v58 = vand.u32 4294901760, %v818_v46 }
  0x54   :  { %406 = vmatpush.xpose.msrb.mxu0 %v200_v24  ;;  %469 = vmatpush.xpose.msrb.mxu1 %v9457_v8  ;;  %v87_v8 = vsel %vm82_vm0, %v53_v19, 0  ;;  %v173_v16 = vand.u32 4294901760, %v172_v14  ;;  %v547_v14 = vsel %vm539_vm1, %v513_v40, 0 }
  0x55   :  { %v177_v24 = vand.u32 4294901760, %v87_v8 }
  0x56   :  { %174 = vmatmul.f32.vlgmr.msra.gmra.mxu0 %v173_v16  ;;  %v817_v16 = vld [vmem:[%s15136_s5 + $0x68] sm:$0xff] }
  0x57   :  { %v178_v57 = vsub.f32 %v87_v8, %v177_v24 }
  0x58   :  { %410 = vmatpush.xpose.msrb.mxu0 %v206_v32  ;;  %471 = vmatpush.xpose.msrb.mxu1 %v9459_v9 }
  0x59   :  { %v179_v59 = vand.u32 4294901760, %v178_v57  ;;  %346 = vmatmul.f32.gmra.mxu2 %v178_v57 }
  0x5b   :  { %287 = vmatmul.f32.gmra.mxu1 %v177_v24  ;;  %v180_v9 = vsub.f32 %v178_v57, %v179_v59  ;;  %391 = vmatmul.f32.gmra.mxu3 %v179_v59  ;;  %v816_v59 = vld [vmem:[%s15136_s5 + $0x60] sm:$0xff] }
  0x5c   :  { %414 = vmatpush.xpose.msrb.mxu0 %v212_v39  ;;  %473 = vmatpush.xpose.msrb.mxu1 %v9461_v10  ;;  %v6791_v10 = vld [vmem:[%s15131_s9 + $0x18] sm:$0xff] }
  0x5d   :  { %v181_v25 = vand.u32 4294901760, %v180_v9  ;;  %6809 = vperm.xlu0 %9338, %v6791_v10   ;;  %v9854_v9 = vand.u32 4294901760, %v547_v14 }
  0x5f   :  { %182 = vmatmul.f32.gmra.mxu0 %v181_v25  ;;  %v9858_v25 = vand.u32 4294901760, %v817_v16 }
  0x60   :  { %418 = vmatpush.xpose.msrb.mxu0 %v218_v43  ;;  %475 = vmatpush.xpose.msrb.mxu1 %v9464_v12  ;;  %v517_v12 = vld [vmem:[%s15132_s4 + $0x10] sm:$0xff] }
  0x64   :  { %422 = vmatpush.xpose.msrb.mxu0 %v224_v52  ;;  %477 = vmatpush.xpose.msrb.mxu1 %v9484_v20  ;;  %v8584_v20 = vld [vmem:[%s15133_s13 + $0x10] sm:$0xff] }
  0x65   :  { %531 = vperm.xlu0 %9338, %v517_v12   ;;  %v9863_v12 = vsub.f32 %v818_v46, %v9848_v58  ;;  %v810_v46 = vld [vmem:[%s15136_s5 + $0x30] sm:$0xff] }
  0x68   :  { %426 = vmatpush.xpose.msrb.mxu0 %v230_v60  ;;  %479 = vmatpush.xpose.msrb.mxu1 %v9503_v28 }
  0x6c   :  { %430 = vmatpush.xpose.msrb.mxu0 %v236_v3  ;;  %481 = vmatpush.xpose.msrb.mxu1 %v9519_v35  ;;  %v6755_v35 = vld [vmem:[%s15134_s7 + $0x18] sm:$0xff]  ;;  %v541_v3 = vsel %vm539_vm1, %v511_v54, 0  ;;  %v814_v54 = vld [vmem:[%s15136_s5 + $0x50] sm:$0xff] }
  0x6d   :  { %8597 = vperm.xlu0 %9338, %v8584_v20   ;;  %6773 = vperm.xlu1 %9339, %v6755_v35   ;;  %v9785_v17 = vand.u32 4294901760, %v541_v3  ;;  %v9876_v35 = vand.u32 4294901760, %v816_v59 }
  0x6f   :  { %v9788_v44 = vsub.f32 %v541_v3, %v9785_v17 }
  0x70   :  { %434 = vmatpush.xpose.msrb.mxu0 %v242_v15  ;;  %483 = vmatpush.xpose.msrb.mxu1 %v9535_v42 }
  0x71   :  { %v15155_v2 = vand.u32 4294901760, %v9788_v44 }
  0x74   :  { %438 = vmatpush.xpose.msrb.mxu0 %v248_v30  ;;  %485 = vmatpush.xpose.msrb.mxu1 %v9554_v50 }
  0x78   :  { %442 = vmatpush.xpose.msrb.mxu0 %v254_v37  ;;  %487 = vmatpush.xpose.msrb.mxu1 %v9567_v56 }
  0x7c   :  { %446 = vmatpush.xpose.msrb.mxu0 %v260_v53  ;;  %489 = vmatpush.xpose.msrb.mxu1 %v9583_v63  ;;  %v6754_v63 = vld [vmem:[%s15134_s7 + $0x10] sm:$0xff] }
  0x7d   :  { %6768 = vperm.xlu1 %9339, %v6754_v63  }
  0x80   :  { %450 = vmatpush.xpose.msrb.mxu0 %v266_v0  ;;  %491 = vmatpush.xpose.msrb.mxu1 %v9599_v6 }
  0x84   :  { %454 = vmatpush.xpose.msrb.mxu0 %v272_v7  ;;  %493 = vmatpush.xpose.msrb.mxu1 %v9622_v29 }
  0x88   :  { %458 = vmatpush.xpose.msrb.mxu0 %v278_v26  ;;  %495 = vmatpush.xpose.msrb.mxu1 %v9636_v41  ;;  %v573_v26 = vsub.f32 %v9788_v44, %v15155_v2 }
  0x8a   :  { %v574_v13 = vand.u32 4294901760, %v573_v26 }
  0x8b   :  { %460 = vmatmul.f32.vlgmr.msrb.gmra.mxu0 %v9706_v18 }
  0x8c   :  { %497 = vmatpush.xpose.msrb.mxu1 %v9651_v51  ;;  %v512_v51 = vld [vmem:[%s15135_s3 + $0x8] sm:$0xff] }
  0x8d   :  { %v544_v1 = vsel %vm539_vm1, %v512_v51, 0  ;;  %v812_v51 = vld [vmem:[%s15136_s5 + $0x40] sm:$0xff] }
  0x8e   :  { %v9800_v21 = vand.u32 4294901760, %v544_v1 }
  0x90   :  { %499 = vmatpush.xpose.msrb.mxu1 %v9664_v62  ;;  %v6789_v62 = vld [vmem:[%s15131_s9 + $0x8] sm:$0xff]  ;;  %v9812_v38 = vsub.f32 %v544_v1, %v9800_v21 }
  0x91   :  { %6799 = vperm.xlu1 %9339, %v6789_v62  }
  0x93   :  { %464 = vmatmul.f32.gmra.mxu0 %v177_v24  ;;  %501 = vmatmul.f32.vlgmr.msrb.gmra.mxu1 %v9706_v18  ;;  %v9819_v18 = vand.u32 4294901760, %v819_v31 }
  0x95   :  { %v9837_v8 = vsub.f32 %v819_v31, %v9819_v18 }
  0x99   :  { %521 = vperm.xlu1 %9339, %v515_v48  }
  0x9b   :  { %505 = vmatmul.f32.gmra.mxu1 %v177_v24  ;;  %v15148_v24 = vand.u32 4294901760, %v9812_v38 }
  0xac   :  { %v80_v28 = vpop.permute.xlu0 %79 }
  0xb4   :  { %v75_v36 = vpop.permute.xlu0 %74 }
  0xd0   :  { %v284_v33 = vpop.f32.mrf.mxu1 }
  0xd3   :  { %v175_v32 = vpop.f32.mrf.mxu0 }
  0xd4   :  { %v176_v42 = vadd.f32 %v175_v32, %v75_v36  ;;  %v342_v43 = vpop.f32.mrf.mxu2  ;;  %v15159_v32 = vand.u32 4294901760, %v9837_v8  ;;  %v9879_v36 = vsub.f32 %v817_v16, %v9858_v25 }
  0xd5   :  { %v386_v52 = vpop.f32.mrf.mxu3 }
  0xd6   :  { %v285_v47 = vadd.f32 %v284_v33, %v176_v42  ;;  %v9887_v42 = vsub.f32 %v547_v14, %v9854_v9  ;;  %v15156_v63 = vand.u32 4294901760, %v9879_v36 }
  0xd8   :  { %v288_v50 = vpop.f32.mrf.mxu1  ;;  %v343_v60 = vadd.f32 %v342_v43, %v285_v47  ;;  %v514_v43 = vld [vmem:[%s15135_s3 + $0x18] sm:$0xff]  ;;  %v15157_v47 = vand.u32 4294901760, %v9863_v12 }
  0xd9   :  { %v550_v3 = vsel %vm539_vm1, %v514_v43, 0 }
  0xda   :  { %v387_v4 = vadd.f32 %v386_v52, %v343_v60 }
  0xdc   :  { %v183_v39 = vpop.f32.mrf.mxu0  ;;  %v347_v15 = vpop.f32.mrf.mxu2 }
  0xdd   :  { %v184_v56 = vadd.f32 %v183_v39, %v80_v28  ;;  %v581_v28 = vsub.f32 %v9812_v38, %v15148_v24  ;;  %v815_v39 = vld [vmem:[%s15136_s5 + $0x58] sm:$0xff] }
  0xde   :  { %v392_v41 = vpop.f32.mrf.mxu3  ;;  %v9907_v60 = vand.u32 4294901760, %v815_v39 }
  0xdf   :  { %v289_v6 = vadd.f32 %v288_v50, %v184_v56  ;;  %v582_v52 = vand.u32 4294901760, %v581_v28  ;;  %v872_v56 = vsub.f32 %v9837_v8, %v15159_v32 }
  0xe1   :  { %v348_v30 = vadd.f32 %v347_v15, %v289_v6  ;;  %v15147_v6 = vand.u32 4294901760, %v9887_v42  ;;  %v9922_v15 = vand.u32 4294901760, %v814_v54 }
  0xe3   :  { %v393_v0 = vadd.f32 %v392_v41, %v348_v30  ;;  %v873_v30 = vand.u32 4294901760, %v872_v56  ;;  %v9938_v41 = vsub.f32 %v814_v54, %v9922_v15  ;;  %v589_v62 = vsub.f32 %v9887_v42, %v15147_v6 }
  0xe5   :  { %v15151_v40 = vand.u32 4294901760, %v9938_v41 }
  0xe7   :  { %v902_v54 = vsub.f32 %v9938_v41, %v15151_v40 }
 0x108   :  { %v461_v61 = vpop.f32.mrf.mxu0 }
 0x109   :  { %v462_v23 = vadd.f32 %v461_v61, %v387_v4  ;;  %v9910_v61 = vsub.f32 %v816_v59, %v9876_v35  ;;  %v813_v4 = vld [vmem:[%s15136_s5 + $0x48] sm:$0xff] }
 0x110   :  { %v502_v29 = vpop.f32.mrf.mxu1  ;;  %v465_v53 = vpop.f32.mrf.mxu0 }
 0x111   :  { %v503_v37 = vadd.f32 %v502_v29, %v462_v23  ;;  %v466_v5 = vadd.f32 %v465_v53, %v393_v0  ;;  %v9925_v23 = vsub.f32 %v815_v39, %v9907_v60  ;;  %v878_v29 = vsub.f32 %v9863_v12, %v15157_v47 }
 0x112   :  { %v884_v53 = vsub.f32 %v9879_v36, %v15156_v63  ;;  %v9995_v39 = vand.u32 4294901760, %v810_v46 }
 0x113   :  { %v509_v55 = vmax.f32 %v503_v37, 0.0  ;;  %v9931_v37 = vand.u32 4294901760, %v550_v3  ;;  %v879_v0 = vand.u32 4294901760, %v878_v29  ;;  %v808_v29 = vld [vmem:[%s15136_s5 + $0x20] sm:$0xff] }
 0x115   :  { %v9798_v7 = vand.u32 4294901760, %v509_v55  ;;  %v9966_v26 = vsub.f32 %v550_v3, %v9931_v37 }
 0x117   :  { %15239 = vst [vmem:[#allocation2_spill] sm:$0xff] %v9798_v7  ;;  %v9809_v34 = vsub.f32 %v509_v55, %v9798_v7  ;;  %v15154_v55 = vand.u32 4294901760, %v9910_v61 }
 0x118   :  { %v506_v11 = vpop.f32.mrf.mxu1 }
 0x119   :  { %v507_v22 = vadd.f32 %v506_v11, %v466_v5  ;;  %15240 = vst [vmem:[#allocation3_spill] sm:$0xff] %v9809_v34  ;;  %v9834_v19 = vand.u32 4294901760, %v9809_v34  ;;  %v15152_v5 = vand.u32 4294901760, %v9925_v23  ;;  %v9960_v11 = vand.u32 4294901760, %v812_v51 }
 0x11a   :  { %v890_v31 = vsub.f32 %v9910_v61, %v15154_v55 }
 0x11b   :  { %v510_v27 = vmax.f32 %v507_v22, 0.0  ;;  %15242 = vst [vmem:[#allocation5_spill] sm:$0xff] %v9834_v19  ;;  %v626_v20 = vsub.f32 %v9809_v34, %v9834_v19  ;;  %v811_v22 = vld [vmem:[%s15136_s5 + $0x38] sm:$0xff]  ;;  %v9982_v14 = vsub.f32 %v812_v51, %v9960_v11  ;;  %v896_v16 = vsub.f32 %v9925_v23, %v15152_v5  ;;  %v9191_v51 = vld [vmem:[%s15136_s5 + $0xf0] sm:$0xff] }
 0x11c   :  { %v9979_v48 = vand.u32 4294901760, %v811_v22  ;;  %v891_v28 = vand.u32 4294901760, %v890_v31  ;;  %v10038_v31 = vand.u32 4294901760, %v808_v29  ;;  %v9188_v5 = vld [vmem:[%s15136_s5 + $0xd8] sm:$0xff] }
 0x11d   :  { %v9817_v45 = vand.u32 4294901760, %v510_v27  ;;  %v9897_v50 = vand.u32 4294901760, %v626_v20  ;;  %v15146_v20 = vand.u32 4294901760, %v9966_v26  ;;  %v897_v3 = vand.u32 4294901760, %v896_v16 }
 0x11e   :  { %v9998_v43 = vsub.f32 %v811_v22, %v9979_v48  ;;  %15246 = vst [vmem:[#allocation9_spill] sm:$0xff] %v10038_v31 }
 0x11f   :  { %15241 = vst [vmem:[#allocation4_spill] sm:$0xff] %v9817_v45  ;;  %v9828_v49 = vsub.f32 %v510_v27, %v9817_v45  ;;  %567 = vmatpush.msrb.mxu2 %v9817_v45  ;;  %784 = vmatpush.msra.mxu1 %v9817_v45  ;;  %v885_v27 = vand.u32 4294901760, %v884_v53 }
 0x120   :  { %15244 = vst [vmem:[#allocation7_spill] sm:$0xff] %v9897_v50  ;;  %v15153_v22 = vand.u32 4294901760, %v9998_v43 }
 0x121   :  { %569 = vmatpush.msrb.mxu2 %v9798_v7  ;;  %786 = vmatpush.msra.mxu1 %v9798_v7  ;;  %v9846_v57 = vand.u32 4294901760, %v9828_v49 }
 0x122   :  { %575 = vmatmul.f32.vlgmr.msrb.gmra.mxu2 %v574_v13  ;;  %788 = vmatmul.f32.vlgmr.msra.gmra.mxu1 %v9785_v17  ;;  %v590_v13 = vand.u32 4294901760, %v589_v62  ;;  %v597_v62 = vsub.f32 %v9966_v26, %v15146_v20 }
 0x123   :  { %662 = vmatpush.msra.mxu2 %v9828_v49  ;;  %1034 = vmatpush.msrb.mxu1 %v9819_v18  ;;  %v620_v10 = vsub.f32 %v9828_v49, %v9846_v57 }
 0x124   :  { %747 = vmatpush.msra.mxu0 %v9846_v57  ;;  %v598_v6 = vand.u32 4294901760, %v597_v62  ;;  %v920_v62 = vsub.f32 %v9998_v43, %v15153_v22 }
 0x125   :  { %665 = vmatpush.msra.mxu2 %v9809_v34  ;;  %1036 = vmatpush.msrb.mxu1 %v9848_v58  ;;  %v9874_v33 = vand.u32 4294901760, %v620_v10  ;;  %v9192_v10 = vld [vmem:[%s15136_s5 + $0xf8] sm:$0xff] }
 0x126   :  { %751 = vmatpush.msra.mxu0 %v9834_v19  ;;  %v10007_v56 = vand.u32 4294901760, %v9192_v10 }
 0x127   :  { %15243 = vst [vmem:[#allocation6_spill] sm:$0xff] %v9874_v33  ;;  %821 = vmatpush.msrb.mxu2 %v9819_v18  ;;  %753 = vmatmul.f32.vlgmr.msra.gmra.mxu0 %v9785_v17 }
 0x128   :  { %1038 = vmatpush.msrb.mxu1 %v9858_v25  ;;  %976 = vmatpush.msrb.mxu0 %v9837_v8  ;;  %v10047_v16 = vsub.f32 %v9192_v10, %v10007_v56  ;;  %v9189_v10 = vld [vmem:[%s15136_s5 + $0xe0] sm:$0xff] }
 0x129   :  { %622 = vmatpush.msrb.mxu3 %v9874_v33  ;;  %823 = vmatpush.msrb.mxu2 %v9848_v58  ;;  %v10095_v63 = vand.u32 4294901760, %v9189_v10 }
 0x12a   :  { %1040 = vmatpush.msrb.mxu1 %v9876_v35  ;;  %979 = vmatpush.msrb.mxu0 %v9863_v12  ;;  %15247 = vst [vmem:[#allocation10_spill] sm:$0xff] %v10047_v16 }
 0x12b   :  { %628 = vmatpush.msrb.mxu3 %v9897_v50  ;;  %825 = vmatpush.msrb.mxu2 %v9858_v25 }
 0x12c   :  { %630 = vmatmul.f32.vlgmr.msrb.gmra.mxu3 %v9785_v17  ;;  %583 = vmatmul.f32.gmra.mxu2 %v582_v52  ;;  %v9935_v17 = vand.u32 4294901760, %v813_v4  ;;  %v809_v52 = vld [vmem:[%s15136_s5 + $0x28] sm:$0xff] }
 0x12d   :  { %702 = vmatpush.msra.mxu3 %v9817_v45  ;;  %792 = vmatmul.f32.gmra.mxu1 %v9800_v21  ;;  %v10026_v53 = vand.u32 4294901760, %v809_v52  ;;  %v10131_v45 = vsub.f32 %v9189_v10, %v10095_v63 }
 0x12e   :  { %982 = vmatpush.msrb.mxu0 %v9879_v36  ;;  %1042 = vmatpush.msrb.mxu1 %v9907_v60  ;;  %v9955_v1 = vsub.f32 %v813_v4, %v9935_v17  ;;  %v10012_v4 = vsub.f32 %v810_v46, %v9995_v39  ;;  %v807_v46 = vld [vmem:[%s15136_s5 + $0x18] sm:$0xff] }
 0x12f   :  { %827 = vmatpush.msrb.mxu2 %v9876_v35  ;;  %704 = vmatpush.msra.mxu3 %v9798_v7  ;;  %15245 = vst [vmem:[#allocation8_spill] sm:$0xff] %v10026_v53 }
 0x130   :  { %985 = vmatpush.msrb.mxu0 %v9910_v61  ;;  %1044 = vmatpush.msrb.mxu1 %v9922_v15  ;;  %v15150_v59 = vand.u32 4294901760, %v9955_v1 }
 0x131   :  { %829 = vmatpush.msrb.mxu2 %v9907_v60  ;;  %874 = vmatpush.msrb.mxu3 %v873_v30 }
 0x132   :  { %757 = vmatmul.f32.gmra.mxu0 %v9800_v21  ;;  %1046 = vmatpush.msrb.mxu1 %v9935_v17  ;;  %v908_v30 = vsub.f32 %v9955_v1, %v15150_v59 }
 0x133   :  { %988 = vmatpush.msrb.mxu0 %v9925_v23  ;;  %831 = vmatpush.msrb.mxu2 %v9922_v15 }
 0x134   :  { %880 = vmatpush.msrb.mxu3 %v879_v0  ;;  %1048 = vmatpush.msrb.mxu1 %v9960_v11  ;;  %v903_v0 = vand.u32 4294901760, %v902_v54  ;;  %v909_v54 = vand.u32 4294901760, %v908_v30  ;;  %v10067_v30 = vsub.f32 %v808_v29, %v10038_v31  ;;  %v15164_v29 = vand.u32 4294901760, %v10047_v16 }
 0x135   :  { %991 = vmatpush.msrb.mxu0 %v9938_v41  ;;  %833 = vmatpush.msrb.mxu2 %v9935_v17 }
 0x136   :  { %886 = vmatpush.msrb.mxu3 %v885_v27  ;;  %591 = vmatmul.f32.gmra.mxu2 %v590_v13  ;;  %v9190_v27 = vld [vmem:[%s15136_s5 + $0xe8] sm:$0xff]  ;;  %v10041_v13 = vsub.f32 %v809_v52, %v10026_v53  ;;  %v15158_v52 = vand.u32 4294901760, %v10012_v4 }
 0x137   :  { %634 = vmatmul.f32.gmra.mxu3 %v9800_v21  ;;  %796 = vmatmul.f32.gmra.mxu1 %v9854_v9  ;;  %v15149_v21 = vand.u32 4294901760, %v9982_v14  ;;  %v10058_v24 = vand.u32 4294901760, %v9190_v27 }
 0x138   :  { %994 = vmatpush.msrb.mxu0 %v9955_v1  ;;  %1050 = vmatpush.msrb.mxu1 %v9979_v48  ;;  %v15165_v59 = vand.u32 4294901760, %v10041_v13  ;;  %v926_v2 = vsub.f32 %v10012_v4, %v15158_v52  ;;  %v10111_v52 = vand.u32 4294901760, %v9188_v5 }
 0x139   :  { %835 = vmatpush.msrb.mxu2 %v9960_v11  ;;  %892 = vmatpush.msrb.mxu3 %v891_v28  ;;  %v10049_v28 = vand.u32 4294901760, %v9191_v51  ;;  %v914_v20 = vsub.f32 %v9982_v14, %v15149_v21  ;;  %v806_v21 = vld [vmem:[%s15136_s5 + $0x10] sm:$0xff]  ;;  %v10101_v47 = vsub.f32 %v9190_v27, %v10058_v24 }
 0x13a   :  { %997 = vmatpush.msrb.mxu0 %v9982_v14  ;;  %1052 = vmatpush.msrb.mxu1 %v9995_v39  ;;  %v932_v27 = vsub.f32 %v10041_v13, %v15165_v59  ;;  %v927_v33 = vand.u32 4294901760, %v926_v2  ;;  %v9186_v2 = vld [vmem:[%s15136_s5 + $0xc8] sm:$0xff] }
 0x13b   :  { %837 = vmatpush.msrb.mxu2 %v9979_v48  ;;  %898 = vmatpush.msrb.mxu3 %v897_v3  ;;  %v10064_v3 = vand.u32 4294901760, %v807_v46  ;;  %v10083_v40 = vsub.f32 %v9191_v51, %v10049_v28  ;;  %v915_v22 = vand.u32 4294901760, %v914_v20  ;;  %v10098_v51 = vand.u32 4294901760, %v806_v21 }
 0x13c   :  { %761 = vmatmul.f32.gmra.mxu0 %v9854_v9  ;;  %1054 = vmatpush.msrb.mxu1 %v10026_v53  ;;  %v921_v20 = vand.u32 4294901760, %v920_v62  ;;  %v1265_v62 = vsub.f32 %v10047_v16, %v15164_v29 }
 0x13d   :  { %1000 = vmatpush.msrb.mxu0 %v9998_v43  ;;  %839 = vmatpush.msrb.mxu2 %v9995_v39  ;;  %15248 = vst [vmem:[#allocation11_spill] sm:$0xff] %v10064_v3  ;;  %v10090_v55 = vsub.f32 %v807_v46, %v10064_v3  ;;  %v15255_v16 = vand.u32 4294901760, %v10083_v40 }
 0x13e   :  { %904 = vmatpush.msrb.mxu3 %v903_v0  ;;  %1056 = vmatpush.msrb.mxu1 %v10038_v31  ;;  %v805_v0 = vld [vmem:[%s15136_s5 + $0x8] sm:$0xff]  ;;  %15249 = vst [vmem:[#allocation12_spill] sm:$0xff] %v10083_v40  ;;  %v1266_v32 = vand.u32 4294901760, %v1265_v62  ;;  %v10170_v62 = vand.u32 4294901760, %v9186_v2 }
 0x13f   :  { %1003 = vmatpush.msrb.mxu0 %v10012_v4  ;;  %841 = vmatpush.msrb.mxu2 %v10026_v53  ;;  %15250 = vst [vmem:[#allocation13_spill] sm:$0xff] %v10098_v51  ;;  %v10105_v46 = vand.u32 4294901760, %v805_v0  ;;  %v15256_v50 = vand.u32 4294901760, %v10090_v55 }
 0x140   :  { %910 = vmatpush.msrb.mxu3 %v909_v54  ;;  %599 = vmatmul.f32.gmra.mxu2 %v598_v6  ;;  %v804_v54 = vld [vmem:[%s15136_s5] sm:$0xff]  ;;  %v9187_v6 = vld [vmem:[%s15136_s5 + $0xd0] sm:$0xff] }
 0x141   :  { %638 = vmatmul.f32.gmra.mxu3 %v9854_v9  ;;  %800 = vmatmul.f32.gmra.mxu1 %v9931_v37  ;;  %15251 = vst [vmem:[#allocation14_spill] sm:$0xff] %v10105_v46  ;;  %v10116_v9 = vsub.f32 %v806_v21, %v10098_v51  ;;  %v10135_v29 = vand.u32 4294901760, %v804_v54  ;;  %v10138_v59 = vsub.f32 %v805_v0, %v10105_v46  ;;  %v6753_v0 = vld [vmem:[%s15134_s7 + $0x8] sm:$0xff] }
 0x142   :  { %1006 = vmatpush.msrb.mxu0 %v10041_v13  ;;  %1058 = vmatpush.msrb.mxu1 %v10064_v3  ;;  %v10149_v21 = vsub.f32 %v9188_v5, %v10111_v52  ;;  %v9185_v5 = vld [vmem:[%s15136_s5 + $0xc0] sm:$0xff]  ;;  %v944_v7 = vsub.f32 %v10090_v55, %v15256_v50 }
 0x143   :  { %843 = vmatpush.msrb.mxu2 %v10038_v31  ;;  %916 = vmatpush.msrb.mxu3 %v915_v22  ;;  %15252 = vst [vmem:[#allocation15_spill] sm:$0xff] %v10135_v29  ;;  %v15253_v22 = vand.u32 4294901760, %v10067_v30  ;;  %v1271_v31 = vsub.f32 %v10083_v40, %v15255_v16  ;;  %v10175_v16 = vsub.f32 %v804_v54, %v10135_v29  ;;  %v10186_v53 = vand.u32 4294901760, %v9185_v5  ;;  %v9184_v54 = vld [vmem:[%s15136_s5 + $0xb8] sm:$0xff] }
 0x144   :  { %1009 = vmatpush.msrb.mxu0 %v10067_v30  ;;  %1060 = vmatpush.msrb.mxu1 %v10098_v51  ;;  %15254 = vst [vmem:[#allocation16_spill] sm:$0xff] %v10149_v21 }
 0x145   :  { %845 = vmatpush.msrb.mxu2 %v10064_v3  ;;  %922 = vmatpush.msrb.mxu3 %v921_v20  ;;  %v938_v10 = vsub.f32 %v10067_v30, %v15253_v22  ;;  %v10151_v3 = vand.u32 4294901760, %v9187_v6  ;;  %v933_v20 = vand.u32 4294901760, %v932_v27  ;;  %v15257_v22 = vand.u32 4294901760, %v10101_v47 }
 0x146   :  { %765 = vmatmul.f32.gmra.mxu0 %v9931_v37  ;;  %1062 = vmatpush.msrb.mxu1 %v10105_v46 }
 0x147   :  { %1012 = vmatpush.msrb.mxu0 %v10090_v55  ;;  %847 = vmatpush.msrb.mxu2 %v10098_v51  ;;  %v1277_v51 = vsub.f32 %v10101_v47, %v15257_v22  ;;  %v939_v50 = vand.u32 4294901760, %v938_v10  ;;  %v10184_v40 = vsub.f32 %v9187_v6, %v10151_v3  ;;  %v1272_v22 = vand.u32 4294901760, %v1271_v31 }
 0x148   :  { %928 = vmatpush.msrb.mxu3 %v927_v33  ;;  %1064 = vmatpush.msrb.mxu1 %v10135_v29  ;;  %v15258_v33 = vand.u32 4294901760, %v10116_v9  ;;  %v945_v10 = vand.u32 4294901760, %v944_v7  ;;  %v15259_v6 = vand.u32 4294901760, %v10131_v45  ;;  %v15260_v31 = vand.u32 4294901760, %v10138_v59  ;;  %v9183_v7 = vld [vmem:[%s15136_s5 + $0xb0] sm:$0xff] }
 0x149   :  { %1015 = vmatpush.msrb.mxu0 %v10116_v9  ;;  %6763 = vperm.xlu2 %9340, %v6753_v0  }
 0x14a   :  { %849 = vmatpush.msrb.mxu2 %v10105_v46  ;;  %934 = vmatpush.msrb.mxu3 %v933_v20  ;;  %v950_v0 = vsub.f32 %v10116_v9, %v15258_v33  ;;  %v1283_v27 = vsub.f32 %v10131_v45, %v15259_v6  ;;  %v10200_v46 = vsub.f32 %v9186_v2, %v10170_v62  ;;  %v10208_v33 = vand.u32 4294901760, %v9184_v54 }
 0x14b   :  { %1267 = vmatpush.msra.mxu1 %v1266_v32  ;;  %642 = vmatmul.f32.gmra.mxu3 %v9931_v37  ;;  %v1278_v32 = vand.u32 4294901760, %v1277_v51  ;;  %v956_v20 = vsub.f32 %v10138_v59, %v15260_v31  ;;  %v15261_v2 = vand.u32 4294901760, %v10149_v21  ;;  %v9182_v37 = vld [vmem:[%s15136_s5 + $0xa8] sm:$0xff] }
 0x14c   :  { %668 = vmatmul.f32.vlgmr.msra.gmra.mxu2 %v9788_v44  ;;  %1018 = vmatpush.msrb.mxu0 %v10138_v59  ;;  %v951_v31 = vand.u32 4294901760, %v950_v0  ;;  %v10235_v51 = vsub.f32 %v9184_v54, %v10208_v33 }
 0x14d   :  { %1068 = vmatmul.f32.vlgmr.msrb.gmra.mxu1 %v9834_v19  ;;  %851 = vmatpush.msrb.mxu2 %v10135_v29  ;;  %v1289_v6 = vsub.f32 %v10149_v21, %v15261_v2  ;;  %v10219_v19 = vsub.f32 %v9185_v5, %v10186_v53  ;;  %v15262_v29 = vand.u32 4294901760, %v9837_v8  ;;  %v15186_v2 = vand.u32 4294901760, %v10200_v46  ;;  %v9181_v8 = vld [vmem:[%s15136_s5 + $0xa0] sm:$0xff] }
 0x14e   :  { %940 = vmatpush.msrb.mxu3 %v939_v50  ;;  %1273 = vmatpush.msra.mxu1 %v1272_v22  ;;  %v1284_v50 = vand.u32 4294901760, %v1283_v27  ;;  %v10228_v21 = vand.u32 4294901760, %v9183_v7  ;;  %v957_v5 = vand.u32 4294901760, %v956_v20  ;;  %v15263_v22 = vand.u32 4294901760, %v10175_v16  ;;  %v6752_v27 = vld [vmem:[%s15134_s7] sm:$0xff] }
 0x14f   :  { %1021 = vmatpush.msrb.mxu0 %v10175_v16  ;;  %1081 = vmatpush.msra.mxu2 %v15262_v29  ;;  %v15264_v29 = vand.u32 4294901760, %v9863_v12  ;;  %v15189_v54 = vand.u32 4294901760, %v10219_v19  ;;  %v15266_v12 = vand.u32 4294901760, %v9879_v36 }
 0x150   :  { %946 = vmatpush.msrb.mxu3 %v945_v10  ;;  %1279 = vmatpush.msra.mxu1 %v1278_v32  ;;  %v962_v0 = vsub.f32 %v10175_v16, %v15263_v22  ;;  %v1290_v10 = vand.u32 4294901760, %v1289_v6  ;;  %v15265_v32 = vand.u32 4294901760, %v10184_v40  ;;  %v10250_v22 = vand.u32 4294901760, %v9182_v37 }
 0x151   :  { %1214 = vmatpush.msra.mxu0 %v10007_v56  ;;  %1085 = vmatpush.msra.mxu2 %v15264_v29  ;;  %v1301_v29 = vsub.f32 %v10200_v46, %v15186_v2  ;;  %v10259_v6 = vsub.f32 %v9183_v7, %v10228_v21  ;;  %v1307_v7 = vsub.f32 %v10219_v19, %v15189_v54  ;;  %v15267_v2 = vand.u32 4294901760, %v9788_v44 }
 0x152   :  { %1024 = vmatmul.f32.vlgmr.msrb.gmra.mxu0 %v9809_v34  ;;  %v1295_v20 = vsub.f32 %v10184_v40, %v15265_v32  ;;  %952 = vmatpush.msrb.mxu3 %v951_v31  ;;  %v10261_v34 = vand.u32 4294901760, %v9181_v8  ;;  %v9180_v32 = vld [vmem:[%s15136_s5 + $0x98] sm:$0xff]  ;;  %v963_v31 = vand.u32 4294901760, %v962_v0  ;;  %v9179_v0 = vld [vmem:[%s15136_s5 + $0x90] sm:$0xff] }
 0x153   :  { %1216 = vmatpush.msra.mxu0 %v10049_v28  ;;  %1285 = vmatpush.msra.mxu1 %v1284_v50  ;;  %v15187_v50 = vand.u32 4294901760, %v10235_v51 }
 0x154   :  { %1089 = vmatpush.msra.mxu2 %v15266_v12  ;;  %6758 = vperm.xlu2 %9340, %v6752_v27   ;;  %v1296_v36 = vand.u32 4294901760, %v1295_v20  ;;  %v10272_v12 = vsub.f32 %v9182_v37, %v10250_v22  ;;  %v15268_v27 = vand.u32 4294901760, %v9910_v61  ;;  %v15188_v37 = vand.u32 4294901760, %v10259_v6 }
 0x155   :  { %958 = vmatpush.msrb.mxu3 %v957_v5  ;;  %1218 = vmatpush.msra.mxu0 %v10058_v24  ;;  %v10277_v5 = vand.u32 4294901760, %v9180_v32  ;;  %v10287_v20 = vsub.f32 %v9181_v8, %v10261_v34  ;;  %v1313_v44 = vsub.f32 %v10235_v51, %v15187_v50  ;;  %v15269_v61 = vand.u32 4294901760, %v9925_v23  ;;  %v9177_v50 = vld [vmem:[%s15136_s5 + $0x80] sm:$0xff] }
 0x156   :  { %1291 = vmatpush.msra.mxu1 %v1290_v10  ;;  %673 = vmatmul.f32.gmra.mxu2 %v9812_v38  ;;  %v1302_v10 = vand.u32 4294901760, %v1301_v29  ;;  %v1308_v29 = vand.u32 4294901760, %v1307_v7  ;;  %v10299_v8 = vand.u32 4294901760, %v9179_v0  ;;  %v1319_v23 = vsub.f32 %v10259_v6, %v15188_v37 }
 0x157   :  { %708 = vmatmul.f32.vlgmr.msra.gmra.mxu3 %v15267_v2  ;;  %1074 = vmatmul.f32.gmra.mxu1 %v9846_v57  ;;  %v9178_v2 = vld [vmem:[%s15136_s5 + $0x88] sm:$0xff] }
 0x158   :  { %1093 = vmatpush.msra.mxu2 %v15268_v27  ;;  %964 = vmatpush.msrb.mxu3 %v963_v31  ;;  %v15190_v27 = vand.u32 4294901760, %v10272_v12  ;;  %v10304_v31 = vsub.f32 %v9180_v32, %v10277_v5  ;;  %v10314_v7 = vand.u32 4294901760, %v9178_v2  ;;  %v6790_v32 = vld [vmem:[%s15131_s9 + $0x10] sm:$0xff] }
 0x159   :  { %1220 = vmatpush.msra.mxu0 %v10095_v63  ;;  %1297 = vmatpush.msra.mxu1 %v1296_v36  ;;  %v1330_v36 = vand.u32 4294901760, %v10287_v20 }
 0x15a   :  { %1097 = vmatpush.msra.mxu2 %v15269_v61  ;;  %1152 = vmatpush.msra.mxu3 %v9819_v18  ;;  %v15270_v18 = vand.u32 4294901760, %v9938_v41  ;;  %v1314_v61 = vand.u32 4294901760, %v1313_v44  ;;  %v1325_v37 = vsub.f32 %v10272_v12, %v15190_v27  ;;  %v10330_v41 = vsub.f32 %v9179_v0, %v10299_v8 }
 0x15b   :  { %1222 = vmatpush.msra.mxu0 %v10111_v52  ;;  %1303 = vmatpush.msra.mxu1 %v1302_v10  ;;  %v518_v10 = vld [vmem:[%s15132_s4 + $0x18] sm:$0xff]  ;;  %v1336_v54 = vand.u32 4294901760, %v10304_v31  ;;  %v1320_v44 = vand.u32 4294901760, %v1319_v23  ;;  %v10342_v27 = vsub.f32 %v9178_v2, %v10314_v7 }
 0x15c   :  { %1029 = vmatmul.f32.gmra.mxu0 %v9828_v49  ;;  %1101 = vmatpush.msra.mxu2 %v15270_v18  ;;  %v15271_v18 = vand.u32 4294901760, %v9955_v1  ;;  %v15272_v1 = vand.u32 4294901760, %v9812_v38  ;;  %v1342_v0 = vand.u32 4294901760, %v10330_v41 }
 0x15d   :  { %1154 = vmatpush.msra.mxu3 %v9848_v58  ;;  %1224 = vmatpush.msra.mxu0 %v10151_v3  ;;  %v10332_v58 = vand.u32 4294901760, %v9177_v50  ;;  %v1337_v2 = vsub.f32 %v10304_v31, %v1336_v54 }
 0x15e   :  { %1309 = vmatpush.msra.mxu1 %v1308_v29  ;;  %1105 = vmatpush.msra.mxu2 %v15271_v18  ;;  %v1331_v29 = vsub.f32 %v10287_v20, %v1330_v36  ;;  %v15276_v18 = vand.u32 4294901760, %v10041_v13 }
 0x15f   :  { %1156 = vmatpush.msra.mxu3 %v9858_v25  ;;  %6804 = vperm.xlu2 %9340, %v6790_v32   ;;  %v1326_v25 = vand.u32 4294901760, %v1325_v37  ;;  %v10350_v23 = vsub.f32 %v9177_v50, %v10332_v58  ;;  %v15273_v32 = vand.u32 4294901760, %v9982_v14  ;;  %v1348_v37 = vand.u32 4294901760, %v10342_v27 }
 0x160   :  { %536 = vperm.xlu1 %9339, %v518_v10   ;;  %1226 = vmatpush.msra.mxu0 %v10170_v62  ;;  %v1332_v38 = vand.u32 4294901760, %v1331_v29  ;;  %v15274_v10 = vand.u32 4294901760, %v9998_v43  ;;  %v15275_v50 = vand.u32 4294901760, %v10012_v4  ;;  %v516_v43 = vld [vmem:[%s15132_s4 + $0x8] sm:$0xff]  ;;  %v15278_v29 = vand.u32 4294901760, %v10067_v30  ;;  %v15282_v30 = vld [vmem:[#allocation8_spill] sm:$0xff] }
 0x161   :  { %1315 = vmatpush.msra.mxu1 %v1314_v61  ;;  %678 = vmatmul.f32.gmra.mxu2 %v9887_v42  ;;  %v1354_v14 = vand.u32 4294901760, %v10350_v23  ;;  %v1338_v61 = vand.u32 4294901760, %v1337_v2  ;;  %v15291_v2 = vld [vmem:[#allocation12_spill] sm:$0xff] }
 0x162   :  { %714 = vmatmul.f32.gmra.mxu3 %v15272_v1  ;;  %1109 = vmatpush.msra.mxu2 %v15273_v32  ;;  %v15289_v32 = vld [vmem:[#allocation11_spill] sm:$0xff] }
 0x163   :  { %1158 = vmatpush.msra.mxu3 %v9876_v35  ;;  %1228 = vmatpush.msra.mxu0 %v10186_v53  ;;  %v1343_v35 = vsub.f32 %v10330_v41, %v1342_v0  ;;  %v1355_v4 = vsub.f32 %v10350_v23, %v1354_v14 }
 0x164   :  { %1321 = vmatpush.msra.mxu1 %v1320_v44  ;;  %1113 = vmatpush.msra.mxu2 %v15274_v10  ;;  %v15277_v44 = vand.u32 4294901760, %v9887_v42  ;;  %v15280_v42 = vand.u32 4294901760, %v10116_v9  ;;  %v15285_v9 = vld [vmem:[#allocation7_spill] sm:$0xff]  ;;  %v15294_v10 = vld [vmem:[#allocation14_spill] sm:$0xff] }
 0x165   :  { %1160 = vmatpush.msra.mxu3 %v9907_v60  ;;  %1230 = vmatpush.msra.mxu0 %v10208_v33  ;;  %v1349_v60 = vsub.f32 %v10342_v27, %v1348_v37  ;;  %v1356_v1 = vand.u32 4294901760, %v1355_v4 }
 0x166   :  { %1327 = vmatpush.msra.mxu1 %v1326_v25  ;;  %1117 = vmatpush.msra.mxu2 %v15275_v50  ;;  %v15287_v25 = vld [vmem:[#allocation9_spill] sm:$0xff]  ;;  %v15296_v50 = vand.u32 4294901760, %v10101_v47 }
 0x167   :  { %1162 = vmatpush.msra.mxu3 %v9922_v15  ;;  %1232 = vmatpush.msra.mxu0 %v10228_v21  ;;  %v1344_v15 = vand.u32 4294901760, %v1343_v35  ;;  %v1350_v13 = vand.u32 4294901760, %v1349_v60  ;;  %v15295_v35 = vld [vmem:[#allocation4_spill] sm:$0xff]  ;;  %v15299_v60 = vand.u32 4294901760, %v10131_v45 }
 0x168   :  { %1333 = vmatpush.msra.mxu1 %v1332_v38  ;;  %1121 = vmatpush.msra.mxu2 %v15276_v18  ;;  %v15293_v38 = vand.u32 4294901760, %v15291_v2  ;;  %v15300_v18 = vld [vmem:[#allocation16_spill] sm:$0xff] }
 0x169   :  { %1164 = vmatpush.msra.mxu3 %v9935_v17  ;;  %526 = vperm.xlu2 %9340, %v516_v43   ;;  %v15279_v17 = vand.u32 4294901760, %v10090_v55  ;;  %v15283_v55 = vld [vmem:[#allocation2_spill] sm:$0xff] }
 0x16a   :  { %1234 = vmatpush.msra.mxu0 %v10250_v22  ;;  %1339 = vmatpush.msra.mxu1 %v1338_v61  ;;  %v15297_v43 = vld [vmem:[#allocation6_spill] sm:$0xff]  ;;  %v15298_v61 = vld [vmem:[#allocation15_spill] sm:$0xff] }
 0x16b   :  { %683 = vmatmul.f32.gmra.mxu2 %v9966_v26  ;;  %720 = vmatmul.f32.gmra.mxu3 %v15277_v44 }
 0x16c   :  { %1125 = vmatpush.msra.mxu2 %v15278_v29  ;;  %1166 = vmatpush.msra.mxu3 %v9960_v11  ;;  %v15281_v11 = vand.u32 4294901760, %v10138_v59  ;;  %v15288_v59 = vld [vmem:[#allocation10_spill] sm:$0xff] }
 0x16d   :  { %1236 = vmatpush.msra.mxu0 %v10261_v34  ;;  %1345 = vmatpush.msra.mxu1 %v1344_v15 }
 0x16e   :  { %1129 = vmatpush.msra.mxu2 %v15279_v17  ;;  %1168 = vmatpush.msra.mxu3 %v9979_v48  ;;  %v15284_v48 = vand.u32 4294901760, %v9966_v26  ;;  %v15290_v26 = vand.u32 4294901760, %v15288_v59 }
 0x16f   :  { %1238 = vmatpush.msra.mxu0 %v10277_v5  ;;  %1351 = vmatpush.msra.mxu1 %v1350_v13 }
 0x170   :  { %1133 = vmatpush.msra.mxu2 %v15280_v42  ;;  %1170 = vmatpush.msra.mxu3 %v9995_v39  ;;  %v15286_v39 = vand.u32 4294901760, %v10175_v16  ;;  %v15292_v16 = vld [vmem:[#allocation13_spill] sm:$0xff] }
 0x171   :  { %1240 = vmatpush.msra.mxu0 %v10299_v8  ;;  %1357 = vmatpush.msra.mxu1 %v1356_v1 }
 0x172   :  { %1137 = vmatpush.msra.mxu2 %v15281_v11  ;;  %1172 = vmatpush.msra.mxu3 %v15282_v30 }
 0x173   :  { %1359 = vmatmul.f32.vlgmr.msra.gmra.mxu1 %v15283_v55  ;;  %1242 = vmatpush.msra.mxu0 %v10314_v7 }
 0x174   :  { %1545 = vmatpush.msrb.mxu1 %v10007_v56  ;;  %726 = vmatmul.f32.gmra.mxu3 %v15284_v48 }
 0x175   :  { %857 = vmatmul.f32.vlgmr.msrb.gmra.mxu2 %v15285_v9  ;;  %1174 = vmatpush.msra.mxu3 %v15287_v25 }
 0x176   :  { %1141 = vmatpush.msra.mxu2 %v15286_v39  ;;  %1547 = vmatpush.msrb.mxu1 %v10049_v28 }
 0x177   :  { %1244 = vmatpush.msra.mxu0 %v10332_v58  ;;  %1176 = vmatpush.msra.mxu3 %v15289_v32 }
 0x178   :  { %1369 = vmatpush.msrb.mxu2 %v15288_v59  ;;  %1250 = vmatmul.f32.vlgmr.msra.gmra.mxu0 %v15285_v9 }
 0x179   :  { %1549 = vmatpush.msrb.mxu1 %v10058_v24  ;;  %1474 = vmatpush.msrb.mxu0 %v15290_v26 }
 0x17a   :  { %1372 = vmatpush.msrb.mxu2 %v15291_v2  ;;  %1178 = vmatpush.msra.mxu3 %v15292_v16 }
 0x17b   :  { %1551 = vmatpush.msrb.mxu1 %v10095_v63  ;;  %1478 = vmatpush.msrb.mxu0 %v15293_v38 }
 0x17c   :  { %1375 = vmatpush.msrb.mxu2 %v10101_v47  ;;  %1180 = vmatpush.msra.mxu3 %v15294_v10  ;;  %v15301_v47 = vand.u32 4294901760, %v15300_v18 }
 0x17d   :  { %1363 = vmatmul.f32.gmra.mxu1 %v15295_v35  ;;  %1482 = vmatpush.msrb.mxu0 %v15296_v50  ;;  %v9193_v50 = vld [vmem:[%s15137_s6 + $0x20] sm:$0xff] }
 0x17e   :  { %1553 = vmatpush.msrb.mxu1 %v10111_v52  ;;  %1378 = vmatpush.msrb.mxu2 %v10131_v45  ;;  %v15302_v45 = vand.u32 4294901760, %v10184_v40 }
 0x17f   :  { %966 = vmatmul.f32.vlgmr.msrb.gmra.mxu3 %v15283_v55  ;;  %865 = vmatmul.f32.gmra.mxu2 %v15297_v43 }
 0x180   :  { %1182 = vmatpush.msra.mxu3 %v15298_v61  ;;  %1486 = vmatpush.msrb.mxu0 %v15299_v60 }
 0x181   :  { %1555 = vmatpush.msrb.mxu1 %v10151_v3  ;;  %1381 = vmatpush.msrb.mxu2 %v15300_v18  ;;  %v1591_v18 = vsel %vm539_vm1, %v9193_v50, 0 }
 0x182   :  { %1427 = vmatpush.msrb.mxu3 %v10007_v56  ;;  %1258 = vmatmul.f32.gmra.mxu0 %v15297_v43  ;;  %v15303_v56 = vand.u32 4294901760, %v10200_v46 }
 0x183   :  { %1557 = vmatpush.msrb.mxu1 %v10170_v62  ;;  %1490 = vmatpush.msrb.mxu0 %v15301_v47 }
 0x184   :  { %1384 = vmatpush.msrb.mxu2 %v10184_v40  ;;  %1429 = vmatpush.msrb.mxu3 %v10049_v28  ;;  %v15304_v40 = vand.u32 4294901760, %v10219_v19 }
 0x185   :  { %1559 = vmatpush.msrb.mxu1 %v10186_v53  ;;  %1494 = vmatpush.msrb.mxu0 %v15302_v45 }
 0x186   :  { %1387 = vmatpush.msrb.mxu2 %v10200_v46  ;;  %1431 = vmatpush.msrb.mxu3 %v10058_v24  ;;  %v15305_v24 = vand.u32 4294901760, %v10235_v51 }
 0x187   :  { %1561 = vmatpush.msrb.mxu1 %v10208_v33  ;;  %1498 = vmatpush.msrb.mxu0 %v15303_v56 }
 0x188   :  { %1390 = vmatpush.msrb.mxu2 %v10219_v19  ;;  %1433 = vmatpush.msrb.mxu3 %v10095_v63  ;;  %v15306_v63 = vand.u32 4294901760, %v10259_v6  ;;  %v15307_v19 = vand.u32 4294901760, %v10272_v12 }
 0x189   :  { %1143 = vmatmul.f32.vlgmr.msra.gmra.mxu2 %v15283_v55  ;;  %970 = vmatmul.f32.gmra.mxu3 %v15295_v35 }
 0x18a   :  { %1502 = vmatpush.msrb.mxu0 %v15304_v40  ;;  %1563 = vmatpush.msrb.mxu1 %v10228_v21 }
 0x18b   :  { %1393 = vmatpush.msrb.mxu2 %v10235_v51  ;;  %1435 = vmatpush.msrb.mxu3 %v10111_v52 }
 0x18c   :  { %1506 = vmatpush.msrb.mxu0 %v15305_v24  ;;  %1565 = vmatpush.msrb.mxu1 %v10250_v22 }
 0x18d   :  { %1396 = vmatpush.msrb.mxu2 %v10259_v6  ;;  %1437 = vmatpush.msrb.mxu3 %v10151_v3 }
 0x18e   :  { %1510 = vmatpush.msrb.mxu0 %v15306_v63  ;;  %1567 = vmatpush.msrb.mxu1 %v10261_v34 }
 0x18f   :  { %1399 = vmatpush.msrb.mxu2 %v10272_v12  ;;  %1439 = vmatpush.msrb.mxu3 %v10170_v62 }
 0x190   :  { %1514 = vmatpush.msrb.mxu0 %v15307_v19  ;;  %1569 = vmatpush.msrb.mxu1 %v10277_v5 }
 0x191   :  { %1402 = vmatpush.msrb.mxu2 %v10287_v20  ;;  %1441 = vmatpush.msrb.mxu3 %v10186_v53  ;;  %v15308_v53 = vld [vmem:[#allocation3_spill] sm:$0xff] }
 0x192   :  { %1147 = vmatmul.f32.gmra.mxu2 %v15295_v35  ;;  %1184 = vmatmul.f32.vlgmr.msra.gmra.mxu3 %v15283_v55 }
 0x193   :  { %1518 = vmatpush.msrb.mxu0 %v1330_v36  ;;  %1571 = vmatpush.msrb.mxu1 %v10299_v8 }
 0x194   :  { %1405 = vmatpush.msrb.mxu2 %v10304_v31  ;;  %1443 = vmatpush.msrb.mxu3 %v10208_v33 }
 0x195   :  { %1522 = vmatpush.msrb.mxu0 %v1336_v54  ;;  %1573 = vmatpush.msrb.mxu1 %v10314_v7 }
 0x196   :  { %1408 = vmatpush.msrb.mxu2 %v10330_v41  ;;  %1445 = vmatpush.msrb.mxu3 %v10228_v21 }
 0x197   :  { %1526 = vmatpush.msrb.mxu0 %v1342_v0  ;;  %1575 = vmatpush.msrb.mxu1 %v10332_v58 }
 0x198   :  { %1411 = vmatpush.msrb.mxu2 %v10342_v27  ;;  %1447 = vmatpush.msrb.mxu3 %v10250_v22 }
 0x199   :  { %1577 = vmatmul.f32.vlgmr.msrb.gmra.mxu1 %v15283_v55  ;;  %1530 = vmatpush.msrb.mxu0 %v1348_v37 }
 0x19a   :  { %1414 = vmatpush.msrb.mxu2 %v10350_v23  ;;  %1449 = vmatpush.msrb.mxu3 %v10261_v34  ;;  %v15309_v34 = vld [vmem:[#allocation5_spill] sm:$0xff] }
 0x19b   :  { %1417 = vmatmul.f32.vlgmr.msrb.gmra.mxu2 %v15308_v53  ;;  %1188 = vmatmul.f32.gmra.mxu3 %v15295_v35 }
 0x19c   :  { %1534 = vmatpush.msrb.mxu0 %v1354_v14  ;;  %1451 = vmatpush.msrb.mxu3 %v10277_v5 }
 0x19d   :  { %1536 = vmatmul.f32.vlgmr.msrb.gmra.mxu0 %v15283_v55 }
 0x19e   :  { %1453 = vmatpush.msrb.mxu3 %v10299_v8 }
 0x19f   :  { %v10538_v5 = vpop.f32.mrf.mxu1 }
 0x1a0   :  { %1455 = vmatpush.msrb.mxu3 %v10314_v7  ;;  %15322 = vst [vmem:[#allocation16_spill] sm:$0xff] %v10538_v5 }
 0x1a1   :  { %1581 = vmatmul.f32.gmra.mxu1 %v15295_v35 }
 0x1a2   :  { %1457 = vmatpush.msrb.mxu3 %v10332_v58 }
 0x1a3   :  { %1422 = vmatmul.f32.gmra.mxu2 %v9828_v49  ;;  %1461 = vmatmul.f32.vlgmr.msrb.gmra.mxu3 %v15309_v34 }
 0x1a4   :  { %v10532_v22 = vpop.f32.mrf.mxu0 }
 0x1a5   :  { %1540 = vmatmul.f32.gmra.mxu0 %v15295_v35  ;;  %v10513_v28 = vpop.f32.mrf.mxu2  ;;  %15319 = vst [vmem:[#allocation4_spill] sm:$0xff] %v10532_v22 }
 0x1a6   :  { %15310 = vst [vmem:[#allocation8_spill] sm:$0xff] %v10513_v28 }
 0x1aa   :  { %v10546_v31 = vpop.f32.mrf.mxu1 }
 0x1ab   :  { %1467 = vmatmul.f32.gmra.mxu3 %v9846_v57  ;;  %15326 = vst [vmem:[#allocation18_spill] sm:$0xff] %v10546_v31 }
 0x1af   :  { %v10516_v52 = vpop.f32.mrf.mxu2  ;;  %v10518_v3 = vpop.f32.mrf.mxu3 }
 0x1b0   :  { %15311 = vst [vmem:[#allocation2_spill] sm:$0xff] %v10516_v52  ;;  %v10540_v20 = vpop.f32.mrf.mxu0 }
 0x1b1   :  { %15312 = vst [vmem:[#allocation7_spill] sm:$0xff] %v10518_v3 }
 0x1b2   :  { %15323 = vst [vmem:[#allocation3_spill] sm:$0xff] %v10540_v20 }
 0x1b4   :  { %v10554_v58 = vpop.f32.mrf.mxu1 }
 0x1b5   :  { %15330 = vst [vmem:[#allocation22_spill] sm:$0xff] %v10554_v58 }
 0x1b9   :  { %v10520_v46 = vpop.f32.mrf.mxu2  ;;  %v10548_v36 = vpop.f32.mrf.mxu0 }
 0x1ba   :  { %15313 = vst [vmem:[#allocation9_spill] sm:$0xff] %v10520_v46  ;;  %v10522_v21 = vpop.f32.mrf.mxu3 }
 0x1bb   :  { %15314 = vst [vmem:[#allocation10_spill] sm:$0xff] %v10522_v21 }
 0x1bc   :  { %15327 = vst [vmem:[#allocation19_spill] sm:$0xff] %v10548_v36 }
 0x1be   :  { %v10560_v14 = vpop.f32.mrf.mxu1 }
 0x1bf   :  { %15333 = vst [vmem:[#allocation25_spill] sm:$0xff] %v10560_v14 }
 0x1c3   :  { %v10524_v62 = vpop.f32.mrf.mxu2  ;;  %v10556_v0 = vpop.f32.mrf.mxu0 }
 0x1c4   :  { %15315 = vst [vmem:[#allocation11_spill] sm:$0xff] %v10524_v62  ;;  %v10526_v33 = vpop.f32.mrf.mxu3 }
 0x1c5   :  { %15316 = vst [vmem:[#allocation12_spill] sm:$0xff] %v10526_v33 }
 0x1c6   :  { %15331 = vst [vmem:[#allocation23_spill] sm:$0xff] %v10556_v0 }
 0x1ca   :  { %v1069_v29 = vpop.f32.mrf.mxu1 }
 0x1ce   :  { %v10528_v51 = vpop.f32.mrf.mxu3 }
 0x1cf   :  { %15317 = vst [vmem:[#allocation13_spill] sm:$0xff] %v10528_v51  ;;  %v10530_v54 = vpop.f32.mrf.mxu2  ;;  %v1025_v15 = vpop.f32.mrf.mxu0 }
 0x1d0   :  { %15318 = vst [vmem:[#allocation14_spill] sm:$0xff] %v10530_v54  ;;  %v9213_v54 = vld [vmem:[%s15137_s6 + $0x40] sm:$0xff] }
 0x1d4   :  { %v1075_v42 = vpop.f32.mrf.mxu1 }
 0x1d9   :  { %v10534_v6 = vpop.f32.mrf.mxu2  ;;  %v1030_v13 = vpop.f32.mrf.mxu0 }
 0x1da   :  { %15320 = vst [vmem:[#allocation6_spill] sm:$0xff] %v10534_v6  ;;  %v10536_v12 = vpop.f32.mrf.mxu3 }
 0x1db   :  { %15321 = vst [vmem:[#allocation15_spill] sm:$0xff] %v10536_v12 }
 0x1e4   :  { %v10542_v27 = vpop.f32.mrf.mxu2 }
 0x1e5   :  { %15324 = vst [vmem:[#allocation5_spill] sm:$0xff] %v10542_v27  ;;  %v10544_v8 = vpop.f32.mrf.mxu3 }
 0x1e6   :  { %15325 = vst [vmem:[#allocation17_spill] sm:$0xff] %v10544_v8 }
 0x1ee   :  { %v10550_v7 = vpop.f32.mrf.mxu2  ;;  %v10552_v41 = vpop.f32.mrf.mxu3 }
 0x1ef   :  { %15328 = vst [vmem:[#allocation20_spill] sm:$0xff] %v10550_v7 }
 0x1f0   :  { %15329 = vst [vmem:[#allocation21_spill] sm:$0xff] %v10552_v41  ;;  %v1360_v48 = vpop.f32.mrf.mxu1 }
 0x1f5   :  { %v1251_v11 = vpop.f32.mrf.mxu0 }
 0x1f6   :  { %v1361_v60 = vadd.f32 %v1360_v48, %v1251_v11 }
 0x1f7   :  { %v10558_v23 = vpop.f32.mrf.mxu3 }
 0x1f8   :  { %15332 = vst [vmem:[#allocation24_spill] sm:$0xff] %v10558_v23  ;;  %v858_v37 = vpop.f32.mrf.mxu2 }
 0x1fa   :  { %v1364_v16 = vpop.f32.mrf.mxu1 }
 0x1ff   :  { %v1259_v32 = vpop.f32.mrf.mxu0 }
 0x200   :  { %v1365_v11 = vadd.f32 %v1364_v16, %v1259_v32 }
 0x202   :  { %v866_v4 = vpop.f32.mrf.mxu2  ;;  %v967_v44 = vpop.f32.mrf.mxu3 }
 0x203   :  { %v968_v59 = vadd.f32 %v967_v44, %v858_v37  ;;  %v10566_v37 = vand.u32 4294901760, %v1591_v18 }
 0x205   :  { %v1026_v38 = vadd.f32 %v1025_v15, %v968_v59 }
 0x207   :  { %v1070_v47 = vadd.f32 %v1069_v29, %v1026_v38  ;;  %v9194_v29 = vld [vmem:[%s15137_s6 + $0x28] sm:$0xff] }
 0x208   :  { %v1594_v59 = vsel %vm539_vm1, %v9194_v29, 0 }
 0x20c   :  { %v971_v17 = vpop.f32.mrf.mxu3  ;;  %v1144_v1 = vpop.f32.mrf.mxu2 }
 0x20d   :  { %v972_v25 = vadd.f32 %v971_v17, %v866_v4  ;;  %v1145_v40 = vadd.f32 %v1144_v1, %v1070_v47 }
 0x20f   :  { %v1031_v26 = vadd.f32 %v1030_v13, %v972_v25 }
 0x211   :  { %v1076_v61 = vadd.f32 %v1075_v42, %v1031_v26  ;;  %v1621_v42 = vsub.f32 %v1591_v18, %v10566_v37 }
 0x215   :  { %v1185_v30 = vpop.f32.mrf.mxu3  ;;  %v1148_v39 = vpop.f32.mrf.mxu2 }
 0x216   :  { %v1149_v45 = vadd.f32 %v1148_v39, %v1076_v61  ;;  %v1578_v15 = vpop.f32.mrf.mxu1  ;;  %v1186_v44 = vadd.f32 %v1185_v30, %v1145_v40  ;;  %v10579_v61 = vand.u32 4294901760, %v1594_v59 }
 0x218   :  { %v10574_v1 = vand.u32 4294901760, %v1186_v44 }
 0x21a   :  { %v1537_v24 = vpop.f32.mrf.mxu0 }
 0x21e   :  { %v1189_v2 = vpop.f32.mrf.mxu3  ;;  %v1418_v10 = vpop.f32.mrf.mxu2 }
 0x21f   :  { %v1419_v56 = vadd.f32 %v1418_v10, %v1361_v60  ;;  %v1190_v63 = vadd.f32 %v1189_v2, %v1149_v45  ;;  %v1622_v2 = vand.u32 4294901760, %v1621_v42  ;;  %v1938_v10 = vsub.f32 %v1186_v44, %v10574_v1  ;;  %v1582_v47 = vpop.f32.mrf.mxu1  ;;  %v9195_v45 = vld [vmem:[%s15137_s6 + $0x30] sm:$0xff] }
 0x221   :  { %v10568_v17 = vand.u32 4294901760, %v1190_v63  ;;  %v1623_v16 = vsub.f32 %v1621_v42, %v1622_v2  ;;  %v1939_v40 = vand.u32 4294901760, %v1938_v10 }
 0x222   :  { %v1541_v50 = vpop.f32.mrf.mxu0 }
 0x223   :  { %v1932_v26 = vsub.f32 %v1190_v63, %v10568_v17 }
 0x225   :  { %v1933_v32 = vand.u32 4294901760, %v1932_v26 }
 0x226   :  { %v1462_v19 = vpop.f32.mrf.mxu3  ;;  %v1423_v25 = vpop.f32.mrf.mxu2 }
 0x227   :  { %v1463_v4 = vadd.f32 %v1462_v19, %v1419_v56  ;;  %v1424_v48 = vadd.f32 %v1423_v25, %v1365_v11  ;;  %v1934_v44 = vsub.f32 %v1932_v26, %v1933_v32  ;;  %v1940_v25 = vsub.f32 %v1938_v10, %v1939_v40 }
 0x229   :  { %v1538_v13 = vadd.f32 %v1537_v24, %v1463_v4  ;;  %v1629_v24 = vsub.f32 %v1594_v59, %v10579_v61  ;;  %v1597_v4 = vsel %vm539_vm1, %v9195_v45, 0  ;;  %v1935_v59 = vand.u32 4294901760, %v1934_v44 }
 0x22a   :  { %v10586_v11 = vand.u32 4294901760, %v1597_v4 }
 0x22b   :  { %v1579_v39 = vadd.f32 %v1578_v15, %v1538_v13  ;;  %v1624_v15 = vand.u32 4294901760, %v1623_v16  ;;  %v1630_v29 = vand.u32 4294901760, %v1629_v24 }
 0x22d   :  { %v1618_v18 = vand.u32 4294901760, %v1579_v39 }
 0x22e   :  { %v1468_v30 = vpop.f32.mrf.mxu3 }
 0x22f   :  { %v1469_v38 = vadd.f32 %v1468_v30, %v1424_v48  ;;  %v1674_v19 = vsub.f32 %v1579_v39, %v1618_v18  ;;  %v9196_v39 = vld [vmem:[%s15137_s6 + $0x38] sm:$0xff] }
 0x231   :  { %v1542_v60 = vadd.f32 %v1541_v50, %v1469_v38  ;;  %v1675_v30 = vand.u32 4294901760, %v1674_v19  ;;  %v1941_v50 = vand.u32 4294901760, %v1940_v25  ;;  %v1193_v25 = vld [vmem:[%s15137_s6 + $0x8] sm:$0xff] }
 0x233   :  { %v1583_v56 = vadd.f32 %v1582_v47, %v1542_v60  ;;  %v1631_v60 = vsub.f32 %v1629_v24, %v1630_v29  ;;  %v1637_v47 = vsub.f32 %v1597_v4, %v10586_v11  ;;  %v1676_v45 = vsub.f32 %v1674_v19, %v1675_v30 }
 0x235   :  { %v1616_v63 = vand.u32 4294901760, %v1583_v56 }
 0x237   :  { %1617 = vmatpush.msra.mxu2 %v1616_v63  ;;  %1752 = vmatpush.msra.mxu1 %v1616_v63  ;;  %v1668_v13 = vsub.f32 %v1583_v56, %v1616_v63  ;;  %v1600_v56 = vsel %vm539_vm1, %v9196_v39, 0  ;;  %v1194_v39 = vld [vmem:[%s15137_s6 + $0x10] sm:$0xff] }
 0x238   :  { %v10596_v44 = vand.u32 4294901760, %v1600_v56 }
 0x239   :  { %1619 = vmatpush.msra.mxu2 %v1618_v18  ;;  %1712 = vmatpush.msra.mxu0 %v1668_v13  ;;  %v1669_v48 = vand.u32 4294901760, %v1668_v13 }
 0x23a   :  { %1754 = vmatpush.msra.mxu1 %v1618_v18  ;;  %1625 = vmatmul.f32.vlgmr.msra.gmra.mxu2 %v1624_v15  ;;  %v1638_v15 = vand.u32 4294901760, %v1637_v47  ;;  %v1645_v4 = vsub.f32 %v1600_v56, %v10596_v44 }
 0x23b   :  { %1758 = vmatmul.f32.vlgmr.msra.gmra.mxu1 %v1622_v2  ;;  %1715 = vmatpush.msra.mxu0 %v1674_v19  ;;  %v1670_v38 = vsub.f32 %v1668_v13, %v1669_v48  ;;  %v1632_v2 = vand.u32 4294901760, %v1631_v60 }
 0x23c   :  { %1936 = vmatpush.msrb.mxu1 %v1935_v59  ;;  %1797 = vmatpush.msrb.mxu2 %v1669_v48  ;;  %v1639_v19 = vsub.f32 %v1637_v47, %v1638_v15  ;;  %v9211_v48 = vld [vmem:[%s15136_s5 + $0x170] sm:$0xff] }
 0x23d   :  { %1718 = vmatmul.f32.vlgmr.msra.gmra.mxu0 %v1621_v42  ;;  %v1671_v16 = vand.u32 4294901760, %v1670_v38  ;;  %v1677_v42 = vand.u32 4294901760, %v1676_v45  ;;  %v9210_v38 = vld [vmem:[%s15136_s5 + $0x168] sm:$0xff] }
 0x23e   :  { %1881 = vmatpush.msrb.mxu0 %v10568_v17  ;;  %1942 = vmatpush.msrb.mxu1 %v1941_v50  ;;  %v10635_v50 = vand.u32 4294901760, %v9211_v48  ;;  %v10647_v56 = vand.u32 4294901760, %v9210_v38 }
 0x23f   :  { %1801 = vmatpush.msrb.mxu2 %v1675_v30  ;;  %1672 = vmatpush.msra.mxu3 %v1671_v16  ;;  %v1861_v16 = vsel %vm539_vm1, %v1194_v39, 0 }
 0x240   :  { %2098 = vmatpush.msra.mxu1 %v10568_v17  ;;  %1883 = vmatpush.msrb.mxu0 %v10574_v1 }
 0x241   :  { %1976 = vmatpush.msra.mxu2 %v1932_v26  ;;  %1678 = vmatpush.msra.mxu3 %v1677_v42  ;;  %v1192_v26 = vld [vmem:[%s15137_s6] sm:$0xff]  ;;  %v10656_v42 = vsub.f32 %v9211_v48, %v10635_v50 }
 0x242   :  { %2061 = vmatpush.msra.mxu0 %v1933_v32  ;;  %2100 = vmatpush.msra.mxu1 %v10574_v1  ;;  %v1855_v32 = vsel %vm539_vm1, %v1192_v26, 0 }
 0x243   :  { %1979 = vmatpush.msra.mxu2 %v1938_v10  ;;  %1680 = vmatmul.f32.vlgmr.msra.gmra.mxu3 %v10566_v37  ;;  %v1640_v10 = vand.u32 4294901760, %v1639_v19  ;;  %v10607_v13 = vand.u32 4294901760, %v1855_v32 }
 0x244   :  { %2065 = vmatpush.msra.mxu0 %v1939_v40  ;;  %1633 = vmatmul.f32.gmra.mxu2 %v1632_v2  ;;  %v1646_v40 = vand.u32 4294901760, %v1645_v4  ;;  %v9209_v2 = vld [vmem:[%s15136_s5 + $0x160] sm:$0xff] }
 0x245   :  { %1764 = vmatmul.f32.gmra.mxu1 %v1630_v29  ;;  %1834 = vmatpush.msrb.mxu3 %v1616_v63  ;;  %v10661_v26 = vand.u32 4294901760, %v9209_v2 }
 0x246   :  { %1723 = vmatmul.f32.gmra.mxu0 %v1629_v24  ;;  %v1647_v63 = vsub.f32 %v1645_v4, %v1646_v40 }
 0x247   :  { %1836 = vmatpush.msrb.mxu3 %v1618_v18  ;;  %v10614_v18 = vsub.f32 %v1855_v32, %v10607_v13 }
 0x248   :  { %v1648_v24 = vand.u32 4294901760, %v1647_v63 }
 0x249   :  { %2016 = vmatpush.msra.mxu3 %v10568_v17  ;;  %v1858_v17 = vsel %vm539_vm1, %v1193_v25, 0  ;;  %v15191_v30 = vand.u32 4294901760, %v10614_v18  ;;  %v10668_v25 = vsub.f32 %v9210_v38, %v10647_v56 }
 0x24a   :  { %v10620_v29 = vand.u32 4294901760, %v1858_v17 }
 0x24b   :  { %2018 = vmatpush.msra.mxu3 %v10574_v1  ;;  %v9212_v1 = vld [vmem:[%s15136_s5 + $0x178] sm:$0xff] }
 0x24c   :  { %1641 = vmatmul.f32.gmra.mxu2 %v1640_v10  ;;  %1684 = vmatmul.f32.gmra.mxu3 %v10579_v61  ;;  %v10626_v59 = vand.u32 4294901760, %v9212_v1  ;;  %v10638_v60 = vsub.f32 %v1858_v17, %v10620_v29  ;;  %v1195_v17 = vld [vmem:[%s15137_s6 + $0x18] sm:$0xff] }
 0x24d   :  { %1770 = vmatmul.f32.gmra.mxu1 %v1638_v15  ;;  %v9208_v15 = vld [vmem:[%s15136_s5 + $0x158] sm:$0xff] }
 0x24e   :  { %1728 = vmatmul.f32.gmra.mxu0 %v1637_v47  ;;  %v1887_v47 = vsub.f32 %v10614_v18, %v15191_v30  ;;  %v10645_v45 = vsub.f32 %v9212_v1, %v10626_v59  ;;  %v15192_v19 = vand.u32 4294901760, %v10638_v60  ;;  %v10670_v63 = vand.u32 4294901760, %v9208_v15 }
 0x250   :  { %v1888_v32 = vand.u32 4294901760, %v1887_v47  ;;  %v15193_v10 = vand.u32 4294901760, %v10645_v45  ;;  %v1895_v48 = vsub.f32 %v10638_v60, %v15192_v19  ;;  %v10692_v47 = vsub.f32 %v9209_v2, %v10661_v26  ;;  %v9205_v2 = vld [vmem:[%s15136_s5 + $0x140] sm:$0xff] }
 0x251   :  { %v10729_v7 = vand.u32 4294901760, %v9205_v2 }
 0x252   :  { %v2187_v30 = vsub.f32 %v10645_v45, %v15193_v10  ;;  %v15334_v10 = vand.u32 4294901760, %v10656_v42  ;;  %v1896_v14 = vand.u32 4294901760, %v1895_v48  ;;  %v15335_v48 = vand.u32 4294901760, %v10668_v25 }
 0x253   :  { %v10763_v62 = vsub.f32 %v9205_v2, %v10729_v7 }
 0x254   :  { %1649 = vmatmul.f32.gmra.mxu2 %v1648_v24  ;;  %1688 = vmatmul.f32.gmra.mxu3 %v10586_v11  ;;  %v9206_v24 = vld [vmem:[%s15136_s5 + $0x148] sm:$0xff]  ;;  %v2193_v1 = vsub.f32 %v10656_v42, %v15334_v10  ;;  %v2188_v10 = vand.u32 4294901760, %v2187_v30 }
 0x255   :  { %1776 = vmatmul.f32.gmra.mxu1 %v1646_v40  ;;  %v9207_v40 = vld [vmem:[%s15136_s5 + $0x150] sm:$0xff]  ;;  %v10701_v19 = vand.u32 4294901760, %v9206_v24 }
 0x256   :  { %1733 = vmatmul.f32.gmra.mxu0 %v1645_v4  ;;  %v10659_v4 = vand.u32 4294901760, %v1861_v16  ;;  %v10689_v38 = vand.u32 4294901760, %v9207_v40  ;;  %v2194_v30 = vand.u32 4294901760, %v2193_v1 }
 0x257   :  { %v10738_v36 = vsub.f32 %v9206_v24, %v10701_v19  ;;  %v15337_v24 = vand.u32 4294901760, %v10692_v47 }
 0x258   :  { %v10686_v39 = vsub.f32 %v1861_v16, %v10659_v4  ;;  %v1864_v16 = vsel %vm539_vm1, %v1195_v17, 0  ;;  %v10721_v23 = vsub.f32 %v9207_v40, %v10689_v38  ;;  %v2199_v17 = vsub.f32 %v10668_v25, %v15335_v48  ;;  %v9203_v40 = vld [vmem:[%s15136_s5 + $0x130] sm:$0xff] }
 0x259   :  { %v10724_v58 = vand.u32 4294901760, %v1864_v16  ;;  %v2205_v41 = vsub.f32 %v10692_v47, %v15337_v24  ;;  %v10757_v27 = vand.u32 4294901760, %v9203_v40  ;;  %v15339_v46 = vand.u32 4294901760, %v10738_v36 }
 0x25a   :  { %v15336_v0 = vand.u32 4294901760, %v10686_v39  ;;  %v15194_v31 = vand.u32 4294901760, %v10721_v23  ;;  %v2200_v1 = vand.u32 4294901760, %v2199_v17  ;;  %v9201_v17 = vld [vmem:[%s15136_s5 + $0x120] sm:$0xff] }
 0x25b   :  { %v10798_v33 = vand.u32 4294901760, %v9201_v17 }
 0x25c   :  { %1692 = vmatmul.f32.gmra.mxu3 %v10596_v44  ;;  %1803 = vmatmul.f32.vlgmr.msrb.gmra.mxu2 %v10566_v37  ;;  %v1903_v51 = vsub.f32 %v10686_v39, %v15336_v0  ;;  %v9202_v0 = vld [vmem:[%s15136_s5 + $0x128] sm:$0xff] }
 0x25d   :  { %1944 = vmatmul.f32.vlgmr.msrb.gmra.mxu1 %v10607_v13  ;;  %2136 = vmatpush.msrb.mxu2 %v10626_v59 }
 0x25e   :  { %1889 = vmatmul.f32.vlgmr.msrb.gmra.mxu0 %v1888_v32  ;;  %2349 = vmatpush.msrb.mxu1 %v10626_v59  ;;  %v10707_v32 = vsub.f32 %v9208_v15, %v10670_v63  ;;  %v9204_v15 = vld [vmem:[%s15136_s5 + $0x138] sm:$0xff] }
 0x25f   :  { %2138 = vmatpush.msrb.mxu2 %v10635_v50  ;;  %2291 = vmatpush.msrb.mxu0 %v10645_v45  ;;  %v10743_v48 = vand.u32 4294901760, %v9204_v15 }
 0x260   :  { %2351 = vmatpush.msrb.mxu1 %v10635_v50  ;;  %v15338_v24 = vand.u32 4294901760, %v10707_v32 }
 0x261   :  { %2140 = vmatpush.msrb.mxu2 %v10647_v56  ;;  %2294 = vmatpush.msrb.mxu0 %v10656_v42  ;;  %v10776_v2 = vsub.f32 %v9204_v15, %v10743_v48  ;;  %v9200_v15 = vld [vmem:[%s15136_s5 + $0x118] sm:$0xff] }
 0x262   :  { %2353 = vmatpush.msrb.mxu1 %v10647_v56  ;;  %v10808_v20 = vand.u32 4294901760, %v9200_v15 }
 0x263   :  { %2142 = vmatpush.msrb.mxu2 %v10661_v26  ;;  %2297 = vmatpush.msrb.mxu0 %v10668_v25 }
 0x264   :  { %1807 = vmatmul.f32.gmra.mxu2 %v10579_v61  ;;  %1838 = vmatmul.f32.vlgmr.msrb.gmra.mxu3 %v10566_v37  ;;  %v10755_v37 = vsub.f32 %v1864_v16, %v10724_v58  ;;  %v10782_v16 = vand.u32 4294901760, %v9202_v0 }
 0x265   :  { %1948 = vmatmul.f32.gmra.mxu1 %v10620_v29  ;;  %2144 = vmatpush.msrb.mxu2 %v10670_v63 }
 0x266   :  { %1897 = vmatmul.f32.gmra.mxu0 %v1896_v14  ;;  %2189 = vmatpush.msrb.mxu3 %v2188_v10  ;;  %v2211_v14 = vsub.f32 %v10707_v32, %v15338_v24  ;;  %v2206_v10 = vand.u32 4294901760, %v2205_v41  ;;  %v2217_v24 = vsub.f32 %v10721_v23, %v15194_v31  ;;  %v10792_v41 = vsub.f32 %v9203_v40, %v10757_v27  ;;  %v9199_v40 = vld [vmem:[%s15136_s5 + $0x110] sm:$0xff] }
 0x267   :  { %2146 = vmatpush.msrb.mxu2 %v10689_v38  ;;  %2355 = vmatpush.msrb.mxu1 %v10661_v26  ;;  %v15340_v8 = vand.u32 4294901760, %v10755_v37 }
 0x268   :  { %2195 = vmatpush.msrb.mxu3 %v2194_v30  ;;  %2300 = vmatpush.msrb.mxu0 %v10692_v47  ;;  %v1904_v30 = vand.u32 4294901760, %v1903_v51  ;;  %v2212_v31 = vand.u32 4294901760, %v2211_v14  ;;  %v2223_v51 = vsub.f32 %v10738_v36, %v15339_v46  ;;  %v2218_v14 = vand.u32 4294901760, %v2217_v24 }
 0x269   :  { %2148 = vmatpush.msrb.mxu2 %v10701_v19  ;;  %2357 = vmatpush.msrb.mxu1 %v10670_v63  ;;  %v10811_v46 = vsub.f32 %v9202_v0, %v10782_v16  ;;  %v10824_v24 = vand.u32 4294901760, %v9199_v40  ;;  %v15343_v22 = vand.u32 4294901760, %v10792_v41 }
 0x26a   :  { %2201 = vmatpush.msrb.mxu3 %v2200_v1  ;;  %2303 = vmatpush.msrb.mxu0 %v10707_v32  ;;  %v15341_v1 = vand.u32 4294901760, %v10763_v62  ;;  %v2224_v0 = vand.u32 4294901760, %v2223_v51 }
 0x26b   :  { %2150 = vmatpush.msrb.mxu2 %v10729_v7  ;;  %2359 = vmatpush.msrb.mxu1 %v10689_v38  ;;  %v2241_v52 = vsub.f32 %v10792_v41, %v15343_v22  ;;  %v15344_v22 = vand.u32 4294901760, %v10811_v46 }
 0x26c   :  { %1811 = vmatmul.f32.gmra.mxu2 %v10586_v11  ;;  %1842 = vmatmul.f32.gmra.mxu3 %v10579_v61  ;;  %v1911_v61 = vsub.f32 %v10755_v37, %v15340_v8  ;;  %v2229_v5 = vsub.f32 %v10763_v62, %v15341_v1  ;;  %v10828_v8 = vsub.f32 %v9201_v17, %v10798_v33 }
 0x26d   :  { %1952 = vmatmul.f32.gmra.mxu1 %v10659_v4  ;;  %2207 = vmatpush.msrb.mxu3 %v2206_v10  ;;  %v9198_v10 = vld [vmem:[%s15136_s5 + $0x108] sm:$0xff]  ;;  %v10843_v17 = vsub.f32 %v9200_v15, %v10808_v20  ;;  %v10855_v15 = vsub.f32 %v9199_v40, %v10824_v24  ;;  %v2242_v40 = vand.u32 4294901760, %v2241_v52 }
 0x26e   :  { %1905 = vmatmul.f32.gmra.mxu0 %v1904_v30  ;;  %2152 = vmatpush.msrb.mxu2 %v10743_v48  ;;  %v15342_v30 = vand.u32 4294901760, %v10776_v2  ;;  %v10838_v51 = vand.u32 4294901760, %v9198_v10  ;;  %v1912_v21 = vand.u32 4294901760, %v1911_v61  ;;  %v2247_v61 = vsub.f32 %v10811_v46, %v15344_v22 }
 0x26f   :  { %2213 = vmatpush.msrb.mxu3 %v2212_v31  ;;  %2306 = vmatpush.msrb.mxu0 %v10721_v23  ;;  %v9197_v31 = vld [vmem:[%s15136_s5 + $0x100] sm:$0xff]  ;;  %v2264_v12 = vand.u32 4294901760, %v10855_v15 }
 0x270   :  { %2154 = vmatpush.msrb.mxu2 %v10757_v27  ;;  %v2235_v1 = vsub.f32 %v10776_v2, %v15342_v30  ;;  %2361 = vmatpush.msrb.mxu1 %v10701_v19  ;;  %v2230_v30 = vand.u32 4294901760, %v2229_v5  ;;  %v10866_v6 = vsub.f32 %v9198_v10, %v10838_v51 }
 0x271   :  { %2219 = vmatpush.msrb.mxu3 %v2218_v14  ;;  %2309 = vmatpush.msrb.mxu0 %v10738_v36  ;;  %v10850_v14 = vand.u32 4294901760, %v9197_v31 }
 0x272   :  { %2156 = vmatpush.msrb.mxu2 %v10782_v16  ;;  %2363 = vmatpush.msrb.mxu1 %v10729_v7  ;;  %v2236_v5 = vand.u32 4294901760, %v2235_v1  ;;  %v2270_v10 = vand.u32 4294901760, %v10866_v6 }
 0x273   :  { %2225 = vmatpush.msrb.mxu3 %v2224_v0  ;;  %2312 = vmatpush.msrb.mxu0 %v10763_v62  ;;  %v2258_v0 = vand.u32 4294901760, %v10843_v17  ;;  %v10875_v22 = vsub.f32 %v9197_v31, %v10850_v14 }
 0x274   :  { %1815 = vmatmul.f32.gmra.mxu2 %v10596_v44  ;;  %1846 = vmatmul.f32.gmra.mxu3 %v10586_v11  ;;  %v15345_v11 = vand.u32 4294901760, %v10828_v8 }
 0x275   :  { %1956 = vmatmul.f32.gmra.mxu1 %v10724_v58  ;;  %2158 = vmatpush.msrb.mxu2 %v10798_v33  ;;  %v2259_v52 = vsub.f32 %v10843_v17, %v2258_v0 }
 0x276   :  { %1913 = vmatmul.f32.gmra.mxu0 %v1912_v21  ;;  %2231 = vmatpush.msrb.mxu3 %v2230_v30  ;;  %v2253_v1 = vsub.f32 %v10828_v8, %v15345_v11  ;;  %v2248_v21 = vand.u32 4294901760, %v2247_v61  ;;  %v2265_v30 = vsub.f32 %v10855_v15, %v2264_v12  ;;  %v15346_v11 = vand.u32 4294901760, %v10645_v45 }
 0x277   :  { %2160 = vmatpush.msrb.mxu2 %v10808_v20  ;;  %2365 = vmatpush.msrb.mxu1 %v10743_v48  ;;  %v2260_v61 = vand.u32 4294901760, %v2259_v52  ;;  %v15348_v45 = vand.u32 4294901760, %v10668_v25  ;;  %v15351_v25 = vand.u32 4294901760, %v10707_v32 }
 0x278   :  { %2237 = vmatpush.msrb.mxu3 %v2236_v5  ;;  %2315 = vmatpush.msrb.mxu0 %v10776_v2  ;;  %v2254_v31 = vand.u32 4294901760, %v2253_v1  ;;  %v2276_v5 = vand.u32 4294901760, %v10875_v22  ;;  %v2266_v1 = vand.u32 4294901760, %v2265_v30 }
 0x279   :  { %2162 = vmatpush.msrb.mxu2 %v10824_v24  ;;  %2367 = vmatpush.msrb.mxu1 %v10757_v27 }
 0x27a   :  { %2243 = vmatpush.msrb.mxu3 %v2242_v40  ;;  %2318 = vmatpush.msrb.mxu0 %v10792_v41  ;;  %v2271_v40 = vsub.f32 %v10866_v6, %v2270_v10 }
 0x27b   :  { %2164 = vmatpush.msrb.mxu2 %v10838_v51  ;;  %2369 = vmatpush.msrb.mxu1 %v10782_v16 }
 0x27c   :  { %1850 = vmatmul.f32.gmra.mxu3 %v10596_v44  ;;  %1982 = vmatmul.f32.vlgmr.msra.gmra.mxu2 %v10614_v18  ;;  %v2277_v44 = vsub.f32 %v10875_v22, %v2276_v5 }
 0x27d   :  { %2102 = vmatmul.f32.vlgmr.msra.gmra.mxu1 %v10607_v13  ;;  %2249 = vmatpush.msrb.mxu3 %v2248_v21  ;;  %v15347_v21 = vand.u32 4294901760, %v10656_v42  ;;  %v15350_v42 = vand.u32 4294901760, %v10692_v47 }
 0x27e   :  { %2067 = vmatmul.f32.vlgmr.msra.gmra.mxu0 %v10607_v13  ;;  %2166 = vmatpush.msrb.mxu2 %v10850_v14  ;;  %v2272_v13 = vand.u32 4294901760, %v2271_v40  ;;  %v2278_v52 = vand.u32 4294901760, %v2277_v44 }
 0x27f   :  { %2255 = vmatpush.msrb.mxu3 %v2254_v31  ;;  %2321 = vmatpush.msrb.mxu0 %v10811_v46  ;;  %v15349_v31 = vand.u32 4294901760, %v10614_v18  ;;  %v15352_v18 = vand.u32 4294901760, %v10721_v23  ;;  %v15355_v23 = vand.u32 4294901760, %v10763_v62  ;;  %v15359_v62 = vand.u32 4294901760, %v10811_v46 }
 0x280   :  { %2396 = vmatpush.msra.mxu2 %v15346_v11  ;;  %2371 = vmatpush.msrb.mxu1 %v10798_v33 }
 0x281   :  { %2261 = vmatpush.msrb.mxu3 %v2260_v61  ;;  %2324 = vmatpush.msrb.mxu0 %v10828_v8 }
 0x282   :  { %2400 = vmatpush.msra.mxu2 %v15347_v21  ;;  %2373 = vmatpush.msrb.mxu1 %v10808_v20 }
 0x283   :  { %2267 = vmatpush.msrb.mxu3 %v2266_v1  ;;  %2327 = vmatpush.msrb.mxu0 %v10843_v17 }
 0x284   :  { %2404 = vmatpush.msra.mxu2 %v15348_v45  ;;  %2022 = vmatmul.f32.vlgmr.msra.gmra.mxu3 %v15349_v31 }
 0x285   :  { %1987 = vmatmul.f32.gmra.mxu2 %v10638_v60  ;;  %2106 = vmatmul.f32.gmra.mxu1 %v10620_v29 }
 0x286   :  { %2273 = vmatpush.msrb.mxu3 %v2272_v13  ;;  %2071 = vmatmul.f32.gmra.mxu0 %v10620_v29  ;;  %v15353_v29 = vand.u32 4294901760, %v10638_v60  ;;  %v15358_v60 = vand.u32 4294901760, %v10686_v39 }
 0x287   :  { %2408 = vmatpush.msra.mxu2 %v15350_v42  ;;  %2375 = vmatpush.msrb.mxu1 %v10824_v24 }
 0x288   :  { %2279 = vmatpush.msrb.mxu3 %v2278_v52  ;;  %2330 = vmatpush.msrb.mxu0 %v10855_v15 }
 0x289   :  { %2412 = vmatpush.msra.mxu2 %v15351_v25  ;;  %2377 = vmatpush.msrb.mxu1 %v10838_v51 }
 0x28a   :  { %2467 = vmatpush.msra.mxu3 %v10626_v59  ;;  %2333 = vmatpush.msrb.mxu0 %v10866_v6  ;;  %v15354_v59 = vand.u32 4294901760, %v10738_v36  ;;  %v15357_v36 = vand.u32 4294901760, %v10792_v41 }
 0x28b   :  { %2416 = vmatpush.msra.mxu2 %v15352_v18  ;;  %2379 = vmatpush.msrb.mxu1 %v10850_v14 }
 0x28c   :  { %2469 = vmatpush.msra.mxu3 %v10635_v50  ;;  %2336 = vmatpush.msrb.mxu0 %v10875_v22  ;;  %v15356_v50 = vand.u32 4294901760, %v10776_v2 }
 0x28d   :  { %1992 = vmatmul.f32.gmra.mxu2 %v10686_v39  ;;  %2028 = vmatmul.f32.gmra.mxu3 %v15353_v29 }
 0x28e   :  { %2110 = vmatmul.f32.gmra.mxu1 %v10659_v4  ;;  %2420 = vmatpush.msra.mxu2 %v15354_v59 }
 0x28f   :  { %2075 = vmatmul.f32.gmra.mxu0 %v10659_v4  ;;  %2471 = vmatpush.msra.mxu3 %v10647_v56  ;;  %v15360_v56 = vand.u32 4294901760, %v10828_v8  ;;  %v15361_v4 = vand.u32 4294901760, %v10755_v37 }
 0x290   :  { %2424 = vmatpush.msra.mxu2 %v15355_v23 }
 0x291   :  { %2473 = vmatpush.msra.mxu3 %v10661_v26 }
 0x292   :  { %2428 = vmatpush.msra.mxu2 %v15356_v50 }
 0x293   :  { %2475 = vmatpush.msra.mxu3 %v10670_v63 }
 0x294   :  { %2432 = vmatpush.msra.mxu2 %v15357_v36 }
 0x295   :  { %1997 = vmatmul.f32.gmra.mxu2 %v10755_v37  ;;  %2034 = vmatmul.f32.gmra.mxu3 %v15358_v60 }
 0x296   :  { %2114 = vmatmul.f32.gmra.mxu1 %v10724_v58  ;;  %2477 = vmatpush.msra.mxu3 %v10689_v38 }
 0x297   :  { %2079 = vmatmul.f32.gmra.mxu0 %v10724_v58  ;;  %2436 = vmatpush.msra.mxu2 %v15359_v62 }
 0x298   :  { %2479 = vmatpush.msra.mxu3 %v10701_v19 }
 0x299   :  { %2440 = vmatpush.msra.mxu2 %v15360_v56 }
 0x29a   :  { %2481 = vmatpush.msra.mxu3 %v10729_v7 }
 0x29b   :  { %2444 = vmatpush.msra.mxu2 %v2258_v0 }
 0x29c   :  { %2483 = vmatpush.msra.mxu3 %v10743_v48 }
 0x29d   :  { %2040 = vmatmul.f32.gmra.mxu3 %v15361_v4  ;;  %2172 = vmatmul.f32.vlgmr.msrb.gmra.mxu2 %v15285_v9 }
 0x29e   :  { %2383 = vmatmul.f32.vlgmr.msrb.gmra.mxu1 %v15309_v34  ;;  %2448 = vmatpush.msra.mxu2 %v2264_v12 }
 0x29f   :  { %2339 = vmatmul.f32.vlgmr.msrb.gmra.mxu0 %v15308_v53  ;;  %2485 = vmatpush.msra.mxu3 %v10757_v27 }
 0x2a0   :  { %2452 = vmatpush.msra.mxu2 %v2270_v10 }
 0x2a1   :  { %2487 = vmatpush.msra.mxu3 %v10782_v16 }
 0x2a2   :  { %2456 = vmatpush.msra.mxu2 %v2276_v5 }
 0x2a3   :  { %2489 = vmatpush.msra.mxu3 %v10798_v33 }
 0x2a5   :  { %2180 = vmatmul.f32.gmra.mxu2 %v15297_v43  ;;  %2281 = vmatmul.f32.vlgmr.msrb.gmra.mxu3 %v15283_v55 }
 0x2a6   :  { %2389 = vmatmul.f32.gmra.mxu1 %v9846_v57  ;;  %2491 = vmatpush.msra.mxu3 %v10808_v20 }
 0x2a7   :  { %2344 = vmatmul.f32.gmra.mxu0 %v9828_v49 }
 0x2a8   :  { %2493 = vmatpush.msra.mxu3 %v10824_v24 }
 0x2aa   :  { %2495 = vmatpush.msra.mxu3 %v10838_v51 }
 0x2ac   :  { %2497 = vmatpush.msra.mxu3 %v10850_v14 }
 0x2ad   :  { %2285 = vmatmul.f32.gmra.mxu3 %v15295_v35  ;;  %2458 = vmatmul.f32.vlgmr.msra.gmra.mxu2 %v15283_v55 }
 0x2b5   :  { %2462 = vmatmul.f32.gmra.mxu2 %v15295_v35  ;;  %2499 = vmatmul.f32.vlgmr.msra.gmra.mxu3 %v15283_v55 }
 0x2b8   :  { %v10989_v33 = vpop.f32.mrf.mxu1 }
 0x2b9   :  { %15362 = vst [vmem:[#allocation26_spill] sm:$0xff] %v10989_v33 }
 0x2ba   :  { %v10991_v6 = vpop.f32.mrf.mxu0 }
 0x2bb   :  { %15363 = vst [vmem:[#allocation27_spill] sm:$0xff] %v10991_v6 }
 0x2bd   :  { %2503 = vmatmul.f32.gmra.mxu3 %v15295_v35  ;;  %v10994_v12 = vpop.f32.mrf.mxu2 }
 0x2c2   :  { %v10996_v20 = vpop.f32.mrf.mxu1 }
 0x2c3   :  { %15364 = vst [vmem:[#allocation28_spill] sm:$0xff] %v10996_v20  ;;  %v10998_v27 = vpop.f32.mrf.mxu0 }
 0x2c4   :  { %15365 = vst [vmem:[#allocation29_spill] sm:$0xff] %v10998_v27 }
 0x2c6   :  { %v11002_v58 = vpop.f32.mrf.mxu3 }
 0x2c7   :  { %v11000_v7 = vpop.f32.mrf.mxu2 }
 0x2ca   :  { %v11006_v26 = vpop.f32.mrf.mxu1 }
 0x2cb   :  { %v11004_v19 = vpop.f32.mrf.mxu0  ;;  %15367 = vst [vmem:[#allocation31_spill] sm:$0xff] %v11006_v26 }
 0x2cc   :  { %15366 = vst [vmem:[#allocation30_spill] sm:$0xff] %v11004_v19 }
 0x2cf   :  { %v11008_v63 = vpop.f32.mrf.mxu2  ;;  %v11010_v39 = vpop.f32.mrf.mxu3 }
 0x2d2   :  { %v11014_v47 = vpop.f32.mrf.mxu1 }
 0x2d3   :  { %v11012_v38 = vpop.f32.mrf.mxu0  ;;  %15369 = vst [vmem:[#allocation33_spill] sm:$0xff] %v11014_v47  ;;  %v9223_v47 = vld [vmem:[%s15136_s5 + $0x1b0] sm:$0xff] }
 0x2d4   :  { %15368 = vst [vmem:[#allocation32_spill] sm:$0xff] %v11012_v38  ;;  %v11222_v38 = vand.u32 4294901760, %v9223_v47 }
 0x2d7   :  { %v11016_v32 = vpop.f32.mrf.mxu2  ;;  %v11018_v48 = vpop.f32.mrf.mxu3 }
 0x2d8   :  { %15370 = vst [vmem:[#allocation34_spill] sm:$0xff] %v11016_v32 }
 0x2d9   :  { %15371 = vst [vmem:[#allocation35_spill] sm:$0xff] %v11018_v48 }
 0x2da   :  { %v11026_v41 = vpop.f32.mrf.mxu1 }
 0x2db   :  { %v11020_v37 = vpop.f32.mrf.mxu0  ;;  %15375 = vst [vmem:[#allocation39_spill] sm:$0xff] %v11026_v41 }
 0x2dc   :  { %15372 = vst [vmem:[#allocation36_spill] sm:$0xff] %v11020_v37 }
 0x2df   :  { %v11022_v16 = vpop.f32.mrf.mxu3  ;;  %v11024_v2 = vpop.f32.mrf.mxu2 }
 0x2e0   :  { %15373 = vst [vmem:[#allocation37_spill] sm:$0xff] %v11022_v16 }
 0x2e1   :  { %15374 = vst [vmem:[#allocation38_spill] sm:$0xff] %v11024_v2 }
 0x2e2   :  { %v11034_v51 = vpop.f32.mrf.mxu1 }
 0x2e3   :  { %v11028_v46 = vpop.f32.mrf.mxu0  ;;  %15379 = vst [vmem:[#allocation43_spill] sm:$0xff] %v11034_v51 }
 0x2e4   :  { %15376 = vst [vmem:[#allocation40_spill] sm:$0xff] %v11028_v46 }
 0x2e7   :  { %v11030_v24 = vpop.f32.mrf.mxu2  ;;  %v11032_v8 = vpop.f32.mrf.mxu3 }
 0x2e8   :  { %15377 = vst [vmem:[#allocation41_spill] sm:$0xff] %v11030_v24 }
 0x2e9   :  { %15378 = vst [vmem:[#allocation42_spill] sm:$0xff] %v11032_v8 }
 0x2ea   :  { %v11042_v0 = vpop.f32.mrf.mxu1 }
 0x2eb   :  { %v11040_v15 = vpop.f32.mrf.mxu0  ;;  %15383 = vst [vmem:[#allocation47_spill] sm:$0xff] %v11042_v0  ;;  %v9225_v0 = vld [vmem:[%s15136_s5 + $0x1c0] sm:$0xff] }
 0x2ec   :  { %15382 = vst [vmem:[#allocation46_spill] sm:$0xff] %v11040_v15  ;;  %v11182_v46 = vand.u32 4294901760, %v9225_v0 }
 0x2ee   :  { %v11212_v20 = vsub.f32 %v9225_v0, %v11182_v46  ;;  %v9222_v0 = vld [vmem:[%s15136_s5 + $0x1a8] sm:$0xff] }
 0x2ef   :  { %v11036_v17 = vpop.f32.mrf.mxu2  ;;  %v11038_v14 = vpop.f32.mrf.mxu3 }
 0x2f0   :  { %15380 = vst [vmem:[#allocation44_spill] sm:$0xff] %v11036_v17 }
 0x2f1   :  { %15381 = vst [vmem:[#allocation45_spill] sm:$0xff] %v11038_v14 }
 0x2f2   :  { %v11050_v5 = vpop.f32.mrf.mxu1 }
 0x2f3   :  { %v11048_v30 = vpop.f32.mrf.mxu0  ;;  %15387 = vst [vmem:[#allocation51_spill] sm:$0xff] %v11050_v5 }
 0x2f4   :  { %15386 = vst [vmem:[#allocation50_spill] sm:$0xff] %v11048_v30 }
 0x2f7   :  { %v11044_v22 = vpop.f32.mrf.mxu2  ;;  %v11046_v10 = vpop.f32.mrf.mxu3 }
 0x2f8   :  { %15384 = vst [vmem:[#allocation48_spill] sm:$0xff] %v11044_v22 }
 0x2f9   :  { %15385 = vst [vmem:[#allocation49_spill] sm:$0xff] %v11046_v10 }
 0x2fa   :  { %v11062_v21 = vpop.f32.mrf.mxu1 }
 0x2fb   :  { %v11056_v11 = vpop.f32.mrf.mxu0  ;;  %15393 = vst [vmem:[#allocation57_spill] sm:$0xff] %v11062_v21 }
 0x2fc   :  { %15390 = vst [vmem:[#allocation54_spill] sm:$0xff] %v11056_v11  ;;  %v9230_v11 = vld [vmem:[%s15136_s5 + $0x1e8] sm:$0xff] }
 0x2ff   :  { %v11052_v61 = vpop.f32.mrf.mxu3  ;;  %v11054_v40 = vpop.f32.mrf.mxu2 }
 0x300   :  { %15388 = vst [vmem:[#allocation52_spill] sm:$0xff] %v11052_v61 }
 0x301   :  { %15389 = vst [vmem:[#allocation53_spill] sm:$0xff] %v11054_v40 }
 0x302   :  { %v11070_v31 = vpop.f32.mrf.mxu1 }
 0x303   :  { %v11064_v13 = vpop.f32.mrf.mxu0  ;;  %15397 = vst [vmem:[#allocation61_spill] sm:$0xff] %v11070_v31  ;;  %v2513_v31 = vsel %vm539_vm1, %v9213_v54, 0  ;;  %v9214_v54 = vld [vmem:[%s15137_s6 + $0x48] sm:$0xff] }
 0x304   :  { %15394 = vst [vmem:[#allocation58_spill] sm:$0xff] %v11064_v13 }
 0x307   :  { %v11060_v44 = vpop.f32.mrf.mxu3 }
 0x308   :  { %v11058_v1 = vpop.f32.mrf.mxu2  ;;  %15392 = vst [vmem:[#allocation56_spill] sm:$0xff] %v11060_v44 }
 0x309   :  { %15391 = vst [vmem:[#allocation55_spill] sm:$0xff] %v11058_v1 }
 0x30b   :  { %v11078_v29 = vpop.f32.mrf.mxu1 }
 0x30c   :  { %v11076_v18 = vpop.f32.mrf.mxu0  ;;  %15401 = vst [vmem:[#allocation65_spill] sm:$0xff] %v11078_v29 }
 0x30d   :  { %15400 = vst [vmem:[#allocation64_spill] sm:$0xff] %v11076_v18  ;;  %v11093_v18 = vand.u32 4294901760, %v2513_v31 }
 0x310   :  { %v11066_v45 = vpop.f32.mrf.mxu2  ;;  %v11068_v52 = vpop.f32.mrf.mxu3 }
 0x311   :  { %15395 = vst [vmem:[#allocation59_spill] sm:$0xff] %v11066_v45 }
 0x312   :  { %15396 = vst [vmem:[#allocation60_spill] sm:$0xff] %v11068_v52 }
 0x313   :  { %v11084_v36 = vpop.f32.mrf.mxu1 }
 0x314   :  { %v11082_v50 = vpop.f32.mrf.mxu0  ;;  %15404 = vst [vmem:[#allocation68_spill] sm:$0xff] %v11084_v36 }
 0x315   :  { %15403 = vst [vmem:[#allocation67_spill] sm:$0xff] %v11082_v50  ;;  %v9232_v50 = vld [vmem:[%s15136_s5 + $0x1f8] sm:$0xff] }
 0x316   :  { %v11098_v13 = vand.u32 4294901760, %v9232_v50 }
 0x318   :  { %v11072_v42 = vpop.f32.mrf.mxu2  ;;  %v11074_v25 = vpop.f32.mrf.mxu3 }
 0x319   :  { %15398 = vst [vmem:[#allocation62_spill] sm:$0xff] %v11072_v42  ;;  %v2516_v42 = vsel %vm539_vm1, %v9214_v54, 0  ;;  %v9227_v54 = vld [vmem:[%s15136_s5 + $0x1d0] sm:$0xff] }
 0x31a   :  { %15399 = vst [vmem:[#allocation63_spill] sm:$0xff] %v11074_v25 }
 0x31b   :  { %v2384_v29 = vpop.f32.mrf.mxu1 }
 0x31c   :  { %v2340_v4 = vpop.f32.mrf.mxu0 }
 0x320   :  { %v11080_v59 = vpop.f32.mrf.mxu3  ;;  %v2173_v23 = vpop.f32.mrf.mxu2 }
 0x321   :  { %15402 = vst [vmem:[#allocation66_spill] sm:$0xff] %v11080_v59  ;;  %v9229_v59 = vld [vmem:[%s15136_s5 + $0x1e0] sm:$0xff] }
 0x322   :  { %v11120_v52 = vand.u32 4294901760, %v9229_v59 }
 0x323   :  { %v2390_v5 = vpop.f32.mrf.mxu1 }
 0x324   :  { %v2345_v25 = vpop.f32.mrf.mxu0 }
 0x328   :  { %v2181_v60 = vpop.f32.mrf.mxu2  ;;  %v2282_v62 = vpop.f32.mrf.mxu3 }
 0x329   :  { %v2283_v56 = vadd.f32 %v2282_v62, %v2173_v23  ;;  %v9231_v23 = vld [vmem:[%s15136_s5 + $0x1f0] sm:$0xff] }
 0x32b   :  { %v2341_v28 = vadd.f32 %v2340_v4, %v2283_v56  ;;  %v11103_v4 = vand.u32 4294901760, %v9231_v23 }
 0x32d   :  { %v2385_v36 = vadd.f32 %v2384_v29, %v2341_v28  ;;  %v11112_v28 = vsub.f32 %v2513_v31, %v11093_v18  ;;  %v11123_v44 = vsub.f32 %v9231_v23, %v11103_v4  ;;  %v11126_v31 = vand.u32 4294901760, %v2516_v42 }
 0x32f   :  { %v2544_v1 = vand.u32 4294901760, %v11112_v28  ;;  %v11151_v23 = vsub.f32 %v2516_v42, %v11126_v31  ;;  %v15406_v10 = vand.u32 4294901760, %v11123_v44 }
 0x330   :  { %v2286_v3 = vpop.f32.mrf.mxu3  ;;  %v2459_v21 = vpop.f32.mrf.mxu2 }
 0x331   :  { %v2287_v62 = vadd.f32 %v2286_v3, %v2181_v60  ;;  %v2460_v56 = vadd.f32 %v2459_v21, %v2385_v36  ;;  %v11116_v21 = vsub.f32 %v9232_v50, %v11098_v13  ;;  %v11118_v36 = vand.u32 4294901760, %v9230_v11 }
 0x332   :  { %v2545_v41 = vsub.f32 %v11112_v28, %v2544_v1 }
 0x333   :  { %v2346_v29 = vadd.f32 %v2345_v25, %v2287_v62  ;;  %v9228_v25 = vld [vmem:[%s15136_s5 + $0x1d8] sm:$0xff]  ;;  %v15405_v30 = vand.u32 4294901760, %v11116_v21 }
 0x334   :  { %v11144_v51 = vand.u32 4294901760, %v9228_v25  ;;  %v2546_v22 = vand.u32 4294901760, %v2545_v41  ;;  %v9224_v41 = vld [vmem:[%s15136_s5 + $0x1b8] sm:$0xff] }
 0x335   :  { %v2391_v62 = vadd.f32 %v2390_v5, %v2346_v29  ;;  %v9215_v5 = vld [vmem:[%s15137_s6 + $0x50] sm:$0xff]  ;;  %v2849_v15 = vsub.f32 %v11116_v21, %v15405_v30  ;;  %v11214_v33 = vand.u32 4294901760, %v9224_v41 }
 0x336   :  { %v2519_v37 = vsel %vm539_vm1, %v9215_v5, 0 }
 0x337   :  { %v11187_v14 = vand.u32 4294901760, %v2519_v37 }
 0x338   :  { %v2500_v3 = vpop.f32.mrf.mxu3  ;;  %v2463_v45 = vpop.f32.mrf.mxu2 }
 0x339   :  { %v2501_v60 = vadd.f32 %v2500_v3, %v2460_v56  ;;  %v11138_v56 = vsub.f32 %v9230_v11, %v11118_v36  ;;  %v11141_v3 = vsub.f32 %v9229_v59, %v11120_v52  ;;  %v2464_v40 = vadd.f32 %v2463_v45, %v2391_v62  ;;  %v9226_v45 = vld [vmem:[%s15136_s5 + $0x1c8] sm:$0xff] }
 0x33a   :  { %v11153_v11 = vand.u32 4294901760, %v9227_v54 }
 0x33b   :  { %v11131_v50 = vand.u32 4294901760, %v2501_v60  ;;  %v15407_v30 = vand.u32 4294901760, %v11138_v56  ;;  %v15408_v8 = vand.u32 4294901760, %v11141_v3 }
 0x33c   :  { %v11180_v42 = vsub.f32 %v9227_v54, %v11153_v11 }
 0x33d   :  { %v2596_v59 = vsub.f32 %v2501_v60, %v11131_v50  ;;  %v11174_v60 = vsub.f32 %v9228_v25, %v11144_v51  ;;  %v2850_v25 = vand.u32 4294901760, %v2849_v15  ;;  %v2861_v54 = vsub.f32 %v11138_v56, %v15407_v30 }
 0x33e   :  { %v15409_v30 = vand.u32 4294901760, %v11151_v23 }
 0x340   :  { %v2504_v29 = vpop.f32.mrf.mxu3 }
 0x341   :  { %v2505_v62 = vadd.f32 %v2504_v29, %v2464_v40  ;;  %v2855_v40 = vsub.f32 %v11123_v44, %v15406_v10  ;;  %v11176_v29 = vand.u32 4294901760, %v9226_v45  ;;  %v2597_v10 = vand.u32 4294901760, %v2596_v59 }
 0x343   :  { %v11168_v61 = vand.u32 4294901760, %v2505_v62  ;;  %v2856_v24 = vand.u32 4294901760, %v2855_v40  ;;  %v11204_v15 = vsub.f32 %v9226_v45, %v11176_v29  ;;  %v9216_v40 = vld [vmem:[%s15137_s6 + $0x58] sm:$0xff]  ;;  %v2598_v2 = vsub.f32 %v2596_v59, %v2597_v10 }
 0x344   :  { %v2522_v27 = vsel %vm539_vm1, %v9216_v40, 0 }
 0x345   :  { %v2590_v5 = vsub.f32 %v2505_v62, %v11168_v61  ;;  %2539 = vmatpush.msra.mxu0 %v11168_v61  ;;  %2674 = vmatpush.msrb.mxu3 %v11168_v61  ;;  %v2867_v62 = vsub.f32 %v11141_v3, %v15408_v8  ;;  %v2553_v8 = vsub.f32 %v11151_v23, %v15409_v30  ;;  %v2862_v30 = vand.u32 4294901760, %v2861_v54 }
 0x346   :  { %v11241_v54 = vsub.f32 %v9224_v41, %v11214_v33 }
 0x347   :  { %2541 = vmatpush.msra.mxu0 %v11131_v50  ;;  %2634 = vmatpush.msrb.mxu2 %v2590_v5  ;;  %v2591_v17 = vand.u32 4294901760, %v2590_v5  ;;  %v2868_v26 = vand.u32 4294901760, %v2867_v62  ;;  %v11243_v62 = vand.u32 4294901760, %v9222_v0 }
 0x348   :  { %2676 = vmatpush.msrb.mxu3 %v11131_v50  ;;  %2547 = vmatmul.f32.vlgmr.msra.gmra.mxu0 %v2546_v22  ;;  %v11220_v22 = vsub.f32 %v2519_v37, %v11187_v14  ;;  %v11248_v37 = vsub.f32 %v9223_v47, %v11222_v38  ;;  %v9219_v47 = vld [vmem:[%s15136_s5 + $0x190] sm:$0xff] }
 0x349   :  { %2680 = vmatmul.f32.vlgmr.msrb.gmra.mxu3 %v2544_v1  ;;  %2637 = vmatpush.msrb.mxu2 %v2596_v59  ;;  %v2592_v45 = vsub.f32 %v2590_v5, %v2591_v17  ;;  %v15410_v1 = vand.u32 4294901760, %v11174_v60  ;;  %v9221_v5 = vld [vmem:[%s15136_s5 + $0x1a0] sm:$0xff] }
 0x34a   :  { %2851 = vmatpush.msra.mxu3 %v2850_v25  ;;  %2719 = vmatpush.msrb.mxu0 %v2591_v17  ;;  %v2554_v17 = vand.u32 4294901760, %v2553_v8  ;;  %v15411_v25 = vand.u32 4294901760, %v11180_v42  ;;  %v15196_v40 = vand.u32 4294901760, %v11220_v22  ;;  %v11254_v41 = vand.u32 4294901760, %v9221_v5 }
 0x34b   :  { %2640 = vmatmul.f32.vlgmr.msrb.gmra.mxu2 %v11112_v28  ;;  %v2593_v19 = vand.u32 4294901760, %v2592_v45  ;;  %v2873_v59 = vsub.f32 %v11174_v60, %v15410_v1  ;;  %v2599_v45 = vand.u32 4294901760, %v2598_v2  ;;  %v15195_v1 = vand.u32 4294901760, %v11212_v20 }
 0x34c   :  { %2798 = vmatpush.msra.mxu2 %v11098_v13  ;;  %2857 = vmatpush.msra.mxu3 %v2856_v24  ;;  %v2879_v28 = vsub.f32 %v11180_v42, %v15411_v25  ;;  %v9220_v24 = vld [vmem:[%s15136_s5 + $0x198] sm:$0xff]  ;;  %v11256_v8 = vand.u32 4294901760, %v2522_v27  ;;  %v15412_v2 = vand.u32 4294901760, %v11204_v15  ;;  %v11268_v25 = vsub.f32 %v9222_v0, %v11243_v62  ;;  %v9218_v0 = vld [vmem:[%s15136_s5 + $0x188] sm:$0xff] }
 0x34d   :  { %2723 = vmatpush.msrb.mxu0 %v2597_v10  ;;  %2594 = vmatpush.msra.mxu1 %v2593_v19  ;;  %v2874_v19 = vand.u32 4294901760, %v2873_v59  ;;  %v2561_v6 = vsub.f32 %v11220_v22, %v15196_v40  ;;  %v11307_v16 = vand.u32 4294901760, %v9218_v0  ;;  %v15418_v48 = vand.u32 4294901760, %v11220_v22 }
 0x34e   :  { %2800 = vmatpush.msra.mxu2 %v11103_v4  ;;  %2863 = vmatpush.msra.mxu3 %v2862_v30  ;;  %v2885_v10 = vsub.f32 %v11204_v15, %v15412_v2  ;;  %v2880_v59 = vand.u32 4294901760, %v2879_v28  ;;  %v2891_v2 = vsub.f32 %v11212_v20, %v15195_v1  ;;  %v15413_v30 = vand.u32 4294901760, %v11151_v23 }
 0x34f   :  { %2600 = vmatpush.msra.mxu1 %v2599_v45  ;;  %2953 = vmatpush.msra.mxu0 %v11116_v21  ;;  %v11270_v45 = vand.u32 4294901760, %v9220_v24  ;;  %v11290_v28 = vsub.f32 %v2522_v27, %v11256_v8  ;;  %v11292_v1 = vand.u32 4294901760, %v9219_v47  ;;  %v11328_v32 = vsub.f32 %v9218_v0, %v11307_v16 }
 0x350   :  { %2802 = vmatpush.msra.mxu2 %v11118_v36  ;;  %2869 = vmatpush.msra.mxu3 %v2868_v26  ;;  %v2886_v40 = vand.u32 4294901760, %v2885_v10  ;;  %v9217_v26 = vld [vmem:[%s15136_s5 + $0x180] sm:$0xff]  ;;  %v2562_v10 = vand.u32 4294901760, %v2561_v6 }
 0x351   :  { %2555 = vmatmul.f32.gmra.mxu0 %v2554_v17  ;;  %2602 = vmatmul.f32.vlgmr.msra.gmra.mxu1 %v11093_v18  ;;  %v11287_v17 = vsub.f32 %v9221_v5, %v11254_v41  ;;  %v11316_v27 = vsub.f32 %v9219_v47, %v11292_v1 }
 0x352   :  { %2686 = vmatmul.f32.gmra.mxu3 %v15413_v30  ;;  %2756 = vmatpush.msrb.mxu1 %v11168_v61  ;;  %v15414_v61 = vand.u32 4294901760, %v11241_v54  ;;  %v11305_v30 = vsub.f32 %v9220_v24, %v11270_v45  ;;  %v11318_v24 = vand.u32 4294901760, %v9217_v26 }
 0x353   :  { %2804 = vmatpush.msra.mxu2 %v11120_v52  ;;  %2875 = vmatpush.msra.mxu3 %v2874_v19  ;;  %v2892_v19 = vand.u32 4294901760, %v2891_v2 }
 0x354   :  { %2645 = vmatmul.f32.gmra.mxu2 %v11151_v23  ;;  %2758 = vmatpush.msrb.mxu1 %v11131_v50  ;;  %v2897_v5 = vsub.f32 %v11241_v54, %v15414_v61  ;;  %v15415_v23 = vand.u32 4294901760, %v11248_v37  ;;  %v2568_v61 = vand.u32 4294901760, %v11290_v28 }
 0x355   :  { %2806 = vmatpush.msra.mxu2 %v11144_v51  ;;  %2881 = vmatpush.msra.mxu3 %v2880_v59  ;;  %v15416_v59 = vand.u32 4294901760, %v11268_v25 }
 0x356   :  { %v2903_v50 = vsub.f32 %v11248_v37, %v15415_v23  ;;  %2956 = vmatpush.msra.mxu0 %v11123_v44  ;;  %3011 = vmatpush.msra.mxu1 %v11098_v13  ;;  %v2898_v6 = vand.u32 4294901760, %v2897_v5  ;;  %v11340_v23 = vsub.f32 %v9217_v26, %v11318_v24 }
 0x357   :  { %2808 = vmatpush.msra.mxu2 %v11153_v11  ;;  %2887 = vmatpush.msra.mxu3 %v2886_v40  ;;  %v2909_v2 = vsub.f32 %v11268_v25, %v15416_v59  ;;  %v15417_v40 = vand.u32 4294901760, %v11287_v17  ;;  %v2569_v59 = vsub.f32 %v11290_v28, %v2568_v61 }
 0x358   :  { %2959 = vmatpush.msra.mxu0 %v11138_v56  ;;  %3013 = vmatpush.msra.mxu1 %v11103_v4  ;;  %v2904_v47 = vand.u32 4294901760, %v2903_v50 }
 0x359   :  { %2810 = vmatpush.msra.mxu2 %v11176_v29  ;;  %2893 = vmatpush.msra.mxu3 %v2892_v19  ;;  %v2915_v5 = vsub.f32 %v11287_v17, %v15417_v40  ;;  %v2910_v19 = vand.u32 4294901760, %v2909_v2  ;;  %v2932_v40 = vand.u32 4294901760, %v11328_v32  ;;  %v2570_v0 = vand.u32 4294901760, %v2569_v59 }
 0x35a   :  { %2563 = vmatmul.f32.gmra.mxu0 %v2562_v10  ;;  %2606 = vmatmul.f32.gmra.mxu1 %v11126_v31  ;;  %v15419_v10 = vand.u32 4294901760, %v11305_v30 }
 0x35b   :  { %2692 = vmatmul.f32.gmra.mxu3 %v15418_v48  ;;  %2812 = vmatpush.msra.mxu2 %v11182_v46  ;;  %v2916_v26 = vand.u32 4294901760, %v2915_v5  ;;  %v15420_v48 = vand.u32 4294901760, %v11316_v27 }
 0x35c   :  { %2899 = vmatpush.msra.mxu3 %v2898_v6  ;;  %2650 = vmatmul.f32.gmra.mxu2 %v11220_v22  ;;  %v2921_v50 = vsub.f32 %v11305_v30, %v15419_v10  ;;  %v2938_v22 = vand.u32 4294901760, %v11340_v23 }
 0x35d   :  { %2814 = vmatpush.msra.mxu2 %v11214_v33  ;;  %2962 = vmatpush.msra.mxu0 %v11141_v3  ;;  %v2927_v6 = vsub.f32 %v11316_v27, %v15420_v48 }
 0x35e   :  { %2905 = vmatpush.msra.mxu3 %v2904_v47  ;;  %3015 = vmatpush.msra.mxu1 %v11118_v36  ;;  %v2922_v2 = vand.u32 4294901760, %v2921_v50  ;;  %v2933_v47 = vsub.f32 %v11328_v32, %v2932_v40  ;;  %v2939_v59 = vsub.f32 %v11340_v23, %v2938_v22 }
 0x35f   :  { %2816 = vmatpush.msra.mxu2 %v11222_v38  ;;  %2965 = vmatpush.msra.mxu0 %v11174_v60  ;;  %v2928_v5 = vand.u32 4294901760, %v2927_v6  ;;  %v9233_v6 = vld [vmem:[%s15137_s6 + $0x60] sm:$0xff] }
 0x360   :  { %2911 = vmatpush.msra.mxu3 %v2910_v19  ;;  %3017 = vmatpush.msra.mxu1 %v11120_v52  ;;  %v2934_v19 = vand.u32 4294901760, %v2933_v47 }
 0x361   :  { %2818 = vmatpush.msra.mxu2 %v11243_v62  ;;  %2968 = vmatpush.msra.mxu0 %v11180_v42 }
 0x362   :  { %2917 = vmatpush.msra.mxu3 %v2916_v26  ;;  %2571 = vmatmul.f32.gmra.mxu0 %v2570_v0  ;;  %v2940_v0 = vand.u32 4294901760, %v2939_v59 }
 0x363   :  { %2610 = vmatmul.f32.gmra.mxu1 %v11187_v14  ;;  %2698 = vmatmul.f32.gmra.mxu3 %v2568_v61  ;;  %v15422_v61 = vand.u32 4294901760, %v11123_v44  ;;  %v15425_v44 = vand.u32 4294901760, %v11174_v60 }
 0x364   :  { %2820 = vmatpush.msra.mxu2 %v11254_v41  ;;  %2923 = vmatpush.msra.mxu3 %v2922_v2  ;;  %v3175_v2 = vsel %vm539_vm1, %v9233_v6, 0 }
 0x365   :  { %2655 = vmatmul.f32.gmra.mxu2 %v11290_v28  ;;  %2971 = vmatpush.msra.mxu0 %v11204_v15  ;;  %v15421_v28 = vand.u32 4294901760, %v11116_v21  ;;  %v15429_v21 = vand.u32 4294901760, %v11241_v54 }
 0x366   :  { %2822 = vmatpush.msra.mxu2 %v11270_v45  ;;  %2929 = vmatpush.msra.mxu3 %v2928_v5  ;;  %v9252_v5 = vld [vmem:[%s15136_s5 + $0x278] sm:$0xff] }
 0x367   :  { %2974 = vmatpush.msra.mxu0 %v11212_v20  ;;  %3019 = vmatpush.msra.mxu1 %v11144_v51 }
 0x368   :  { %2824 = vmatpush.msra.mxu2 %v11292_v1  ;;  %2935 = vmatpush.msra.mxu3 %v2934_v19 }
 0x369   :  { %2977 = vmatpush.msra.mxu0 %v11241_v54  ;;  %3021 = vmatpush.msra.mxu1 %v11153_v11 }
 0x36a   :  { %2826 = vmatpush.msra.mxu2 %v11307_v16  ;;  %2941 = vmatpush.msra.mxu3 %v2940_v0  ;;  %v11521_v0 = vand.u32 4294901760, %v3175_v2 }
 0x36b   :  { %2614 = vmatmul.f32.gmra.mxu1 %v11256_v8  ;;  %2725 = vmatmul.f32.vlgmr.msrb.gmra.mxu0 %v11093_v18 }
 0x36c   :  { %3129 = vmatpush.msrb.mxu3 %v11098_v13  ;;  %2828 = vmatpush.msra.mxu2 %v11318_v24  ;;  %v15423_v13 = vand.u32 4294901760, %v11138_v56 }
 0x36d   :  { %2943 = vmatmul.f32.vlgmr.msra.gmra.mxu3 %v15283_v55  ;;  %2834 = vmatmul.f32.vlgmr.msra.gmra.mxu2 %v15285_v9 }
 0x36e   :  { %3058 = vmatpush.msrb.mxu2 %v15421_v28  ;;  %3131 = vmatpush.msrb.mxu3 %v11103_v4  ;;  %v15424_v4 = vand.u32 4294901760, %v11141_v3  ;;  %v9251_v28 = vld [vmem:[%s15136_s5 + $0x270] sm:$0xff] }
 0x36f   :  { %2980 = vmatpush.msra.mxu0 %v11248_v37  ;;  %3023 = vmatpush.msra.mxu1 %v11176_v29 }
 0x370   :  { %3062 = vmatpush.msrb.mxu2 %v15422_v61  ;;  %3133 = vmatpush.msrb.mxu3 %v11118_v36  ;;  %v15434_v36 = vmov %v15420_v48 }
 0x371   :  { %2983 = vmatpush.msra.mxu0 %v11268_v25  ;;  %3025 = vmatpush.msra.mxu1 %v11182_v46 }
 0x372   :  { %3066 = vmatpush.msrb.mxu2 %v15423_v13  ;;  %3135 = vmatpush.msrb.mxu3 %v11120_v52  ;;  %v15426_v52 = vand.u32 4294901760, %v11180_v42 }
 0x373   :  { %2760 = vmatmul.f32.vlgmr.msrb.gmra.mxu1 %v11093_v18  ;;  %2729 = vmatmul.f32.gmra.mxu0 %v11126_v31  ;;  %v15428_v18 = vand.u32 4294901760, %v11212_v20  ;;  %v15432_v20 = vand.u32 4294901760, %v11287_v17 }
 0x374   :  { %3070 = vmatpush.msrb.mxu2 %v15424_v4  ;;  %3137 = vmatpush.msrb.mxu3 %v11144_v51  ;;  %v15427_v51 = vand.u32 4294901760, %v11204_v15  ;;  %v11526_v4 = vand.u32 4294901760, %v9252_v5 }
 0x375   :  { %2947 = vmatmul.f32.gmra.mxu3 %v15295_v35  ;;  %2842 = vmatmul.f32.gmra.mxu2 %v15297_v43 }
 0x376   :  { %3074 = vmatpush.msrb.mxu2 %v15425_v44  ;;  %3139 = vmatpush.msrb.mxu3 %v11153_v11  ;;  %v9234_v44 = vld [vmem:[%s15137_s6 + $0x68] sm:$0xff] }
 0x377   :  { %2986 = vmatpush.msra.mxu0 %v11287_v17  ;;  %3027 = vmatpush.msra.mxu1 %v11214_v33 }
 0x378   :  { %3078 = vmatpush.msrb.mxu2 %v15426_v52  ;;  %3141 = vmatpush.msrb.mxu3 %v11176_v29 }
 0x379   :  { %2989 = vmatpush.msra.mxu0 %v11305_v30  ;;  %3029 = vmatpush.msra.mxu1 %v11222_v38 }
 0x37a   :  { %3082 = vmatpush.msrb.mxu2 %v15427_v51  ;;  %3143 = vmatpush.msrb.mxu3 %v11182_v46  ;;  %v15430_v46 = vand.u32 4294901760, %v11248_v37  ;;  %v11531_v51 = vand.u32 4294901760, %v9251_v28 }
 0x37b   :  { %2764 = vmatmul.f32.gmra.mxu1 %v11126_v31  ;;  %2733 = vmatmul.f32.gmra.mxu0 %v11187_v14 }
 0x37c   :  { %3086 = vmatpush.msrb.mxu2 %v15428_v18  ;;  %3145 = vmatpush.msrb.mxu3 %v11214_v33  ;;  %v15431_v33 = vand.u32 4294901760, %v11268_v25  ;;  %v9250_v18 = vld [vmem:[%s15136_s5 + $0x268] sm:$0xff] }
 0x37d   :  { %2992 = vmatpush.msra.mxu0 %v11316_v27  ;;  %3031 = vmatpush.msra.mxu1 %v11243_v62 }
 0x37e   :  { %3090 = vmatpush.msrb.mxu2 %v15429_v21  ;;  %3147 = vmatpush.msrb.mxu3 %v11222_v38  ;;  %v15433_v38 = vmov %v15419_v10  ;;  %v9249_v21 = vld [vmem:[%s15136_s5 + $0x260] sm:$0xff] }
 0x37f   :  { %2995 = vmatpush.msra.mxu0 %v11328_v32  ;;  %3033 = vmatpush.msra.mxu1 %v11254_v41 }
 0x380   :  { %3094 = vmatpush.msrb.mxu2 %v15430_v46  ;;  %3149 = vmatpush.msrb.mxu3 %v11243_v62 }
 0x381   :  { %2998 = vmatpush.msra.mxu0 %v11340_v23  ;;  %3035 = vmatpush.msra.mxu1 %v11270_v45 }
 0x382   :  { %3098 = vmatpush.msrb.mxu2 %v15431_v33  ;;  %3151 = vmatpush.msrb.mxu3 %v11254_v41  ;;  %v11540_v33 = vsub.f32 %v3175_v2, %v11521_v0 }
 0x383   :  { %2768 = vmatmul.f32.gmra.mxu1 %v11187_v14  ;;  %2737 = vmatmul.f32.gmra.mxu0 %v11256_v8 }
 0x384   :  { %3102 = vmatpush.msrb.mxu2 %v15432_v20  ;;  %3153 = vmatpush.msrb.mxu3 %v11270_v45 }
 0x385   :  { %3037 = vmatpush.msra.mxu1 %v11292_v1 }
 0x386   :  { %3106 = vmatpush.msrb.mxu2 %v15433_v38  ;;  %3155 = vmatpush.msrb.mxu3 %v11292_v1 }
 0x387   :  { %3039 = vmatpush.msra.mxu1 %v11307_v16 }
 0x388   :  { %3110 = vmatpush.msrb.mxu2 %v15434_v36  ;;  %3157 = vmatpush.msrb.mxu3 %v11307_v16  ;;  %v3178_v36 = vsel %vm539_vm1, %v9234_v44, 0 }
 0x389   :  { %3041 = vmatpush.msra.mxu1 %v11318_v24  ;;  %v11554_v2 = vand.u32 4294901760, %v3178_v36 }
 0x38a   :  { %3114 = vmatpush.msrb.mxu2 %v2932_v40  ;;  %3159 = vmatpush.msrb.mxu3 %v11318_v24 }
 0x38b   :  { %3161 = vmatmul.f32.vlgmr.msrb.gmra.mxu3 %v15283_v55  ;;  %2772 = vmatmul.f32.gmra.mxu1 %v11256_v8 }
 0x38c   :  { %3118 = vmatpush.msrb.mxu2 %v2938_v22  ;;  %3001 = vmatmul.f32.vlgmr.msra.gmra.mxu0 %v15308_v53 }
 0x38d   :  { %3120 = vmatmul.f32.vlgmr.msrb.gmra.mxu2 %v15283_v55 }
 0x393   :  { %3165 = vmatmul.f32.gmra.mxu3 %v15295_v35  ;;  %3045 = vmatmul.f32.vlgmr.msra.gmra.mxu1 %v15309_v34 }
 0x394   :  { %3006 = vmatmul.f32.gmra.mxu0 %v9828_v49 }
 0x395   :  { %3124 = vmatmul.f32.gmra.mxu2 %v15295_v35 }
 0x39b   :  { %3051 = vmatmul.f32.gmra.mxu1 %v9846_v57 }
 0x3c5   :  { %v11466_v32 = vpop.f32.mrf.mxu0 }
 0x3c6   :  { %15435 = vst [vmem:[#allocation69_spill] sm:$0xff] %v11466_v32 }
 0x3cc   :  { %v11478_v11 = vpop.f32.mrf.mxu3 }
 0x3cd   :  { %15441 = vst [vmem:[#allocation75_spill] sm:$0xff] %v11478_v11 }
 0x3ce   :  { %v11468_v16 = vpop.f32.mrf.mxu0  ;;  %v11470_v14 = vpop.f32.mrf.mxu1 }
 0x3cf   :  { %15436 = vst [vmem:[#allocation70_spill] sm:$0xff] %v11468_v16  ;;  %v11472_v31 = vpop.f32.mrf.mxu2 }
 0x3d0   :  { %15437 = vst [vmem:[#allocation71_spill] sm:$0xff] %v11470_v14 }
 0x3d1   :  { %15438 = vst [vmem:[#allocation72_spill] sm:$0xff] %v11472_v31 }
 0x3d5   :  { %v11486_v15 = vpop.f32.mrf.mxu3 }
 0x3d6   :  { %15445 = vst [vmem:[#allocation79_spill] sm:$0xff] %v11486_v15 }
 0x3d7   :  { %v11474_v56 = vpop.f32.mrf.mxu0  ;;  %v11476_v3 = vpop.f32.mrf.mxu1 }
 0x3d8   :  { %15439 = vst [vmem:[#allocation73_spill] sm:$0xff] %v11474_v56  ;;  %v11484_v29 = vpop.f32.mrf.mxu2 }
 0x3d9   :  { %15440 = vst [vmem:[#allocation74_spill] sm:$0xff] %v11476_v3 }
 0x3da   :  { %15444 = vst [vmem:[#allocation78_spill] sm:$0xff] %v11484_v29 }
 0x3de   :  { %v11494_v1 = vpop.f32.mrf.mxu3 }
 0x3df   :  { %v11480_v42 = vpop.f32.mrf.mxu0  ;;  %15449 = vst [vmem:[#allocation83_spill] sm:$0xff] %v11494_v1 }
 0x3e0   :  { %15442 = vst [vmem:[#allocation76_spill] sm:$0xff] %v11480_v42  ;;  %v11482_v60 = vpop.f32.mrf.mxu1  ;;  %v11492_v62 = vpop.f32.mrf.mxu2 }
 0x3e1   :  { %15443 = vst [vmem:[#allocation77_spill] sm:$0xff] %v11482_v60 }
 0x3e2   :  { %15448 = vst [vmem:[#allocation82_spill] sm:$0xff] %v11492_v62 }
 0x3e6   :  { %v11502_v45 = vpop.f32.mrf.mxu3 }
 0x3e7   :  { %15453 = vst [vmem:[#allocation87_spill] sm:$0xff] %v11502_v45 }
 0x3e8   :  { %v11488_v37 = vpop.f32.mrf.mxu1  ;;  %v11490_v54 = vpop.f32.mrf.mxu0 }
 0x3e9   :  { %15446 = vst [vmem:[#allocation80_spill] sm:$0xff] %v11488_v37  ;;  %v11500_v25 = vpop.f32.mrf.mxu2 }
 0x3ea   :  { %15447 = vst [vmem:[#allocation81_spill] sm:$0xff] %v11490_v54 }
 0x3eb   :  { %15452 = vst [vmem:[#allocation86_spill] sm:$0xff] %v11500_v25 }
 0x3f0   :  { %v11496_v41 = vpop.f32.mrf.mxu1  ;;  %v11498_v8 = vpop.f32.mrf.mxu0 }
 0x3f1   :  { %15450 = vst [vmem:[#allocation84_spill] sm:$0xff] %v11496_v41  ;;  %v2835_v30 = vpop.f32.mrf.mxu2  ;;  %v2944_v23 = vpop.f32.mrf.mxu3 }
 0x3f2   :  { %15451 = vst [vmem:[#allocation85_spill] sm:$0xff] %v11498_v8  ;;  %v2945_v22 = vadd.f32 %v2944_v23, %v2835_v30  ;;  %v11544_v30 = vsub.f32 %v9252_v5, %v11526_v4  ;;  %v11546_v23 = vand.u32 4294901760, %v9250_v18 }
 0x3f8   :  { %v11504_v17 = vpop.f32.mrf.mxu1  ;;  %v11506_v27 = vpop.f32.mrf.mxu0 }
 0x3f9   :  { %15454 = vst [vmem:[#allocation88_spill] sm:$0xff] %v11504_v17  ;;  %v2843_v50 = vpop.f32.mrf.mxu2  ;;  %v2948_v26 = vpop.f32.mrf.mxu3 }
 0x3fa   :  { %15455 = vst [vmem:[#allocation89_spill] sm:$0xff] %v11506_v27  ;;  %v2949_v20 = vadd.f32 %v2948_v26, %v2843_v50  ;;  %v9248_v50 = vld [vmem:[%s15136_s5 + $0x258] sm:$0xff] }
 0x400   :  { %v11508_v24 = vpop.f32.mrf.mxu1  ;;  %v11510_v10 = vpop.f32.mrf.mxu0 }
 0x401   :  { %15456 = vst [vmem:[#allocation90_spill] sm:$0xff] %v11508_v24  ;;  %v15459_v24 = vand.u32 4294901760, %v11544_v30 }
 0x402   :  { %15457 = vst [vmem:[#allocation91_spill] sm:$0xff] %v11510_v10 }
 0x403   :  { %v3511_v10 = vsub.f32 %v11544_v30, %v15459_v24 }
 0x408   :  { %v11512_v40 = vpop.f32.mrf.mxu1 }
 0x409   :  { %15458 = vst [vmem:[#allocation92_spill] sm:$0xff] %v11512_v40  ;;  %v3002_v48 = vpop.f32.mrf.mxu0 }
 0x40a   :  { %v3003_v47 = vadd.f32 %v3002_v48, %v2945_v22  ;;  %v11548_v48 = vand.u32 4294901760, %v9249_v21  ;;  %v11551_v22 = vsub.f32 %v9251_v28, %v11531_v51  ;;  %v11579_v28 = vsub.f32 %v3178_v36, %v11554_v2 }
 0x40c   :  { %v11569_v44 = vsub.f32 %v9249_v21, %v11548_v48  ;;  %v9246_v21 = vld [vmem:[%s15136_s5 + $0x248] sm:$0xff] }
 0x40d   :  { %v11604_v45 = vand.u32 4294901760, %v9246_v21 }
 0x40e   :  { %v3162_v13 = vpop.f32.mrf.mxu3  ;;  %v15462_v54 = vand.u32 4294901760, %v11569_v44 }
 0x410   :  { %v3121_v59 = vpop.f32.mrf.mxu2  ;;  %v3046_v19 = vpop.f32.mrf.mxu1  ;;  %v3529_v15 = vsub.f32 %v11569_v44, %v15462_v54 }
 0x411   :  { %v3047_v61 = vadd.f32 %v3046_v19, %v3003_v47  ;;  %v3007_v46 = vpop.f32.mrf.mxu0  ;;  %v9247_v19 = vld [vmem:[%s15136_s5 + $0x250] sm:$0xff] }
 0x412   :  { %v3008_v6 = vadd.f32 %v3007_v46, %v2949_v20  ;;  %v11572_v20 = vand.u32 4294901760, %v9248_v50  ;;  %v9245_v46 = vld [vmem:[%s15136_s5 + $0x240] sm:$0xff]  ;;  %v3530_v29 = vand.u32 4294901760, %v3529_v15 }
 0x413   :  { %v3122_v52 = vadd.f32 %v3121_v59, %v3047_v61  ;;  %v3206_v59 = vand.u32 4294901760, %v11540_v33  ;;  %v11610_v17 = vand.u32 4294901760, %v9245_v46 }
 0x415   :  { %v3163_v38 = vadd.f32 %v3162_v13, %v3122_v52  ;;  %v11566_v13 = vsub.f32 %v9250_v18, %v11546_v23  ;;  %v3207_v40 = vsub.f32 %v11540_v33, %v3206_v59  ;;  %v11581_v18 = vand.u32 4294901760, %v9247_v19 }
 0x416   :  { %v11640_v31 = vsub.f32 %v9245_v46, %v11610_v17  ;;  %v9242_v46 = vld [vmem:[%s15136_s5 + $0x228] sm:$0xff] }
 0x417   :  { %v11559_v5 = vand.u32 4294901760, %v3163_v38  ;;  %v3208_v8 = vand.u32 4294901760, %v3207_v40  ;;  %v11608_v36 = vsub.f32 %v9247_v19, %v11581_v18  ;;  %v9244_v40 = vld [vmem:[%s15136_s5 + $0x238] sm:$0xff]  ;;  %v15461_v24 = vand.u32 4294901760, %v11566_v13 }
 0x418   :  { %v3052_v47 = vpop.f32.mrf.mxu1  ;;  %v3125_v61 = vpop.f32.mrf.mxu2  ;;  %v11642_v37 = vand.u32 4294901760, %v9244_v40 }
 0x419   :  { %v3053_v26 = vadd.f32 %v3052_v47, %v3008_v6  ;;  %v9235_v6 = vld [vmem:[%s15137_s6 + $0x70] sm:$0xff]  ;;  %v3166_v47 = vpop.f32.mrf.mxu3  ;;  %v3523_v19 = vsub.f32 %v11566_v13, %v15461_v24  ;;  %v15463_v24 = vand.u32 4294901760, %v11579_v28  ;;  %v15465_v15 = vand.u32 4294901760, %v11608_v36 }
 0x41a   :  { %v3181_v27 = vsel %vm539_vm1, %v9235_v6, 0 }
 0x41b   :  { %v3126_v52 = vadd.f32 %v3125_v61, %v3053_v26  ;;  %v3258_v61 = vsub.f32 %v3163_v38, %v11559_v5  ;;  %v11615_v1 = vand.u32 4294901760, %v3181_v27  ;;  %v3215_v54 = vsub.f32 %v11579_v28, %v15463_v24 }
 0x41c   :  { %v3524_v24 = vand.u32 4294901760, %v3523_v19  ;;  %v11671_v19 = vand.u32 4294901760, %v9242_v46 }
 0x41d   :  { %v3167_v26 = vadd.f32 %v3166_v47, %v3126_v52  ;;  %v15460_v52 = vand.u32 4294901760, %v11551_v22  ;;  %v11602_v47 = vsub.f32 %v9248_v50, %v11572_v20  ;;  %v3512_v50 = vand.u32 4294901760, %v3511_v10 }
 0x41e   :  { %v11632_v10 = vsub.f32 %v9246_v21, %v11604_v45 }
 0x41f   :  { %v11596_v41 = vand.u32 4294901760, %v3167_v26  ;;  %v3517_v38 = vsub.f32 %v11551_v22, %v15460_v52  ;;  %v3259_v52 = vand.u32 4294901760, %v3258_v61 }
 0x421   :  { %3201 = vmatpush.msrb.mxu0 %v11596_v41  ;;  %3336 = vmatpush.msra.mxu3 %v11596_v41  ;;  %v3252_v6 = vsub.f32 %v3167_v26, %v11596_v41  ;;  %v9243_v26 = vld [vmem:[%s15136_s5 + $0x230] sm:$0xff]  ;;  %v3518_v25 = vand.u32 4294901760, %v3517_v38  ;;  %v9236_v38 = vld [vmem:[%s15137_s6 + $0x78] sm:$0xff]  ;;  %v3260_v62 = vsub.f32 %v3258_v61, %v3259_v52 }
 0x422   :  { %v11650_v42 = vand.u32 4294901760, %v9243_v26  ;;  %v3184_v56 = vsel %vm539_vm1, %v9236_v38, 0 }
 0x423   :  { %3203 = vmatpush.msrb.mxu0 %v11559_v5  ;;  %3296 = vmatpush.msra.mxu2 %v3252_v6  ;;  %v3253_v11 = vand.u32 4294901760, %v3252_v6 }
 0x424   :  { %3338 = vmatpush.msra.mxu3 %v11559_v5  ;;  %3209 = vmatmul.f32.vlgmr.msrb.gmra.mxu0 %v3208_v8  ;;  %v11648_v8 = vsub.f32 %v3181_v27, %v11615_v1  ;;  %v11676_v27 = vsub.f32 %v9243_v26, %v11650_v42  ;;  %v9239_v26 = vld [vmem:[%s15136_s5 + $0x210] sm:$0xff] }
 0x425   :  { %3342 = vmatmul.f32.vlgmr.msra.gmra.mxu3 %v3206_v59  ;;  %3299 = vmatpush.msra.mxu2 %v3258_v61  ;;  %v3254_v21 = vsub.f32 %v3252_v6, %v3253_v11  ;;  %v15464_v59 = vand.u32 4294901760, %v11602_v47  ;;  %v9241_v6 = vld [vmem:[%s15136_s5 + $0x220] sm:$0xff] }
 0x426   :  { %3513 = vmatpush.msrb.mxu3 %v3512_v50  ;;  %3381 = vmatpush.msra.mxu0 %v3253_v11  ;;  %v3216_v11 = vand.u32 4294901760, %v3215_v54  ;;  %v11669_v50 = vsub.f32 %v9244_v40, %v11642_v37  ;;  %v15198_v38 = vand.u32 4294901760, %v11648_v8  ;;  %v11682_v40 = vand.u32 4294901760, %v9241_v6 }
 0x427   :  { %3302 = vmatmul.f32.vlgmr.msra.gmra.mxu2 %v11540_v33  ;;  %v3255_v60 = vand.u32 4294901760, %v3254_v21  ;;  %v3535_v61 = vsub.f32 %v11602_v47, %v15464_v59  ;;  %v3541_v33 = vsub.f32 %v11608_v36, %v15465_v15  ;;  %v3261_v21 = vand.u32 4294901760, %v3260_v62 }
 0x428   :  { %3460 = vmatpush.msrb.mxu2 %v11526_v4  ;;  %3519 = vmatpush.msrb.mxu3 %v3518_v25  ;;  %v15197_v59 = vand.u32 4294901760, %v11640_v31  ;;  %v9240_v25 = vld [vmem:[%s15136_s5 + $0x218] sm:$0xff]  ;;  %v11684_v54 = vand.u32 4294901760, %v3184_v56  ;;  %v15466_v62 = vand.u32 4294901760, %v11632_v10  ;;  %v11696_v15 = vsub.f32 %v9242_v46, %v11671_v19  ;;  %v9238_v46 = vld [vmem:[%s15136_s5 + $0x208] sm:$0xff] }
 0x429   :  { %3385 = vmatpush.msra.mxu0 %v3259_v52  ;;  %3256 = vmatpush.msrb.mxu1 %v3255_v60  ;;  %v3536_v60 = vand.u32 4294901760, %v3535_v61  ;;  %v3542_v61 = vand.u32 4294901760, %v3541_v33  ;;  %v3223_v3 = vsub.f32 %v11648_v8, %v15198_v38  ;;  %v11735_v16 = vand.u32 4294901760, %v9238_v46 }
 0x42a   :  { %3462 = vmatpush.msrb.mxu2 %v11531_v51  ;;  %3525 = vmatpush.msrb.mxu3 %v3524_v24  ;;  %v3547_v52 = vsub.f32 %v11632_v10, %v15466_v62  ;;  %v3553_v62 = vsub.f32 %v11640_v31, %v15197_v59  ;;  %v15467_v24 = vand.u32 4294901760, %v11579_v28  ;;  %v11718_v33 = vsub.f32 %v3184_v56, %v11684_v54 }
 0x42b   :  { %3262 = vmatpush.msrb.mxu1 %v3261_v21  ;;  %3615 = vmatpush.msrb.mxu0 %v11544_v30  ;;  %v11698_v21 = vand.u32 4294901760, %v9240_v25  ;;  %v11720_v59 = vand.u32 4294901760, %v9239_v26  ;;  %v11756_v14 = vsub.f32 %v9238_v46, %v11735_v16  ;;  %v15472_v32 = vand.u32 4294901760, %v11648_v8 }
 0x42c   :  { %3464 = vmatpush.msrb.mxu2 %v11546_v23  ;;  %3531 = vmatpush.msrb.mxu3 %v3530_v29  ;;  %v3548_v38 = vand.u32 4294901760, %v3547_v52  ;;  %v9237_v29 = vld [vmem:[%s15136_s5 + $0x200] sm:$0xff]  ;;  %v3224_v52 = vand.u32 4294901760, %v3223_v3 }
 0x42d   :  { %3217 = vmatmul.f32.gmra.mxu0 %v3216_v11  ;;  %3264 = vmatmul.f32.vlgmr.msrb.gmra.mxu1 %v11521_v0  ;;  %v11715_v11 = vsub.f32 %v9241_v6, %v11682_v40  ;;  %v11744_v56 = vsub.f32 %v9239_v26, %v11720_v59 }
 0x42e   :  { %3348 = vmatmul.f32.gmra.mxu3 %v15467_v24  ;;  %3418 = vmatpush.msra.mxu1 %v11596_v41  ;;  %v15468_v41 = vand.u32 4294901760, %v11669_v50  ;;  %v11733_v24 = vsub.f32 %v9240_v25, %v11698_v21  ;;  %v11746_v25 = vand.u32 4294901760, %v9237_v29 }
 0x42f   :  { %3466 = vmatpush.msrb.mxu2 %v11548_v48  ;;  %3537 = vmatpush.msrb.mxu3 %v3536_v60  ;;  %v3554_v60 = vand.u32 4294901760, %v3553_v62 }
 0x430   :  { %3307 = vmatmul.f32.gmra.mxu2 %v11579_v28  ;;  %3420 = vmatpush.msra.mxu1 %v11559_v5  ;;  %v3559_v6 = vsub.f32 %v11669_v50, %v15468_v41  ;;  %v15469_v28 = vand.u32 4294901760, %v11676_v27  ;;  %v3230_v41 = vand.u32 4294901760, %v11718_v33 }
 0x431   :  { %3468 = vmatpush.msrb.mxu2 %v11572_v20  ;;  %3543 = vmatpush.msrb.mxu3 %v3542_v61  ;;  %v15470_v61 = vand.u32 4294901760, %v11696_v15 }
 0x432   :  { %v3565_v5 = vsub.f32 %v11676_v27, %v15469_v28  ;;  %3618 = vmatpush.msrb.mxu0 %v11551_v22  ;;  %3673 = vmatpush.msrb.mxu1 %v11526_v4  ;;  %v3560_v3 = vand.u32 4294901760, %v3559_v6  ;;  %v11768_v28 = vsub.f32 %v9237_v29, %v11746_v25 }
 0x433   :  { %3470 = vmatpush.msrb.mxu2 %v11581_v18  ;;  %3549 = vmatpush.msrb.mxu3 %v3548_v38  ;;  %v3571_v62 = vsub.f32 %v11696_v15, %v15470_v61  ;;  %v15471_v38 = vand.u32 4294901760, %v11715_v11  ;;  %v3231_v61 = vsub.f32 %v11718_v33, %v3230_v41 }
 0x434   :  { %3621 = vmatpush.msrb.mxu0 %v11566_v13  ;;  %3675 = vmatpush.msrb.mxu1 %v11531_v51  ;;  %v3566_v26 = vand.u32 4294901760, %v3565_v5 }
 0x435   :  { %3472 = vmatpush.msrb.mxu2 %v11604_v45  ;;  %3555 = vmatpush.msrb.mxu3 %v3554_v60  ;;  %v3577_v6 = vsub.f32 %v11715_v11, %v15471_v38  ;;  %v3572_v60 = vand.u32 4294901760, %v3571_v62  ;;  %v3594_v38 = vand.u32 4294901760, %v11756_v14  ;;  %v3232_v46 = vand.u32 4294901760, %v3231_v61 }
 0x436   :  { %3225 = vmatmul.f32.gmra.mxu0 %v3224_v52  ;;  %3268 = vmatmul.f32.gmra.mxu1 %v11554_v2  ;;  %v15473_v52 = vand.u32 4294901760, %v11733_v24 }
 0x437   :  { %3354 = vmatmul.f32.gmra.mxu3 %v15472_v32  ;;  %3474 = vmatpush.msrb.mxu2 %v11610_v17  ;;  %v3578_v29 = vand.u32 4294901760, %v3577_v6  ;;  %v15474_v32 = vand.u32 4294901760, %v11744_v56 }
 0x438   :  { %3561 = vmatpush.msrb.mxu3 %v3560_v3  ;;  %3312 = vmatmul.f32.gmra.mxu2 %v11648_v8  ;;  %v3583_v5 = vsub.f32 %v11733_v24, %v15473_v52  ;;  %v3600_v8 = vand.u32 4294901760, %v11768_v28 }
 0x439   :  { %3476 = vmatpush.msrb.mxu2 %v11642_v37  ;;  %3624 = vmatpush.msrb.mxu0 %v11569_v44  ;;  %v3589_v3 = vsub.f32 %v11744_v56, %v15474_v32 }
 0x43a   :  { %3567 = vmatpush.msrb.mxu3 %v3566_v26  ;;  %3677 = vmatpush.msrb.mxu1 %v11546_v23  ;;  %v3584_v62 = vand.u32 4294901760, %v3583_v5  ;;  %v3595_v26 = vsub.f32 %v11756_v14, %v3594_v38  ;;  %v3601_v61 = vsub.f32 %v11768_v28, %v3600_v8 }
 0x43b   :  { %3478 = vmatpush.msrb.mxu2 %v11650_v42  ;;  %3627 = vmatpush.msrb.mxu0 %v11602_v47  ;;  %v3590_v6 = vand.u32 4294901760, %v3589_v3  ;;  %v9253_v3 = vld [vmem:[%s15137_s6 + $0x80] sm:$0xff] }
 0x43c   :  { %3573 = vmatpush.msrb.mxu3 %v3572_v60  ;;  %3679 = vmatpush.msrb.mxu1 %v11548_v48  ;;  %v3596_v60 = vand.u32 4294901760, %v3595_v26 }
 0x43d   :  { %3480 = vmatpush.msrb.mxu2 %v11671_v19  ;;  %3630 = vmatpush.msrb.mxu0 %v11608_v36 }
 0x43e   :  { %3579 = vmatpush.msrb.mxu3 %v3578_v29  ;;  %3233 = vmatmul.f32.gmra.mxu0 %v3232_v46  ;;  %v3602_v46 = vand.u32 4294901760, %v3601_v61 }
 0x43f   :  { %3272 = vmatmul.f32.gmra.mxu1 %v11615_v1  ;;  %3360 = vmatmul.f32.gmra.mxu3 %v3230_v41  ;;  %v15476_v41 = vand.u32 4294901760, %v11551_v22  ;;  %v15488_v22 = vmov %v15474_v32 }
 0x440   :  { %3482 = vmatpush.msrb.mxu2 %v11682_v40  ;;  %3585 = vmatpush.msrb.mxu3 %v3584_v62  ;;  %v3837_v62 = vsel %vm539_vm1, %v9253_v3, 0 }
 0x441   :  { %3317 = vmatmul.f32.gmra.mxu2 %v11718_v33  ;;  %3633 = vmatpush.msrb.mxu0 %v11632_v10  ;;  %v15475_v33 = vand.u32 4294901760, %v11544_v30  ;;  %v15479_v30 = vand.u32 4294901760, %v11602_v47 }
 0x442   :  { %3484 = vmatpush.msrb.mxu2 %v11698_v21  ;;  %3591 = vmatpush.msrb.mxu3 %v3590_v6  ;;  %v9272_v6 = vld [vmem:[%s15136_s5 + $0x2f8] sm:$0xff] }
 0x443   :  { %3636 = vmatpush.msrb.mxu0 %v11640_v31  ;;  %3681 = vmatpush.msrb.mxu1 %v11572_v20 }
 0x444   :  { %3486 = vmatpush.msrb.mxu2 %v11720_v59  ;;  %3597 = vmatpush.msrb.mxu3 %v3596_v60 }
 0x445   :  { %3639 = vmatpush.msrb.mxu0 %v11669_v50  ;;  %3683 = vmatpush.msrb.mxu1 %v11581_v18 }
 0x446   :  { %3488 = vmatpush.msrb.mxu2 %v11735_v16  ;;  %3603 = vmatpush.msrb.mxu3 %v3602_v46  ;;  %v11949_v46 = vand.u32 4294901760, %v3837_v62 }
 0x447   :  { %3276 = vmatmul.f32.gmra.mxu1 %v11684_v54  ;;  %3387 = vmatmul.f32.vlgmr.msra.gmra.mxu0 %v11521_v0 }
 0x448   :  { %3791 = vmatpush.msra.mxu3 %v11526_v4  ;;  %3490 = vmatpush.msrb.mxu2 %v11746_v25  ;;  %v15477_v4 = vand.u32 4294901760, %v11566_v13 }
 0x449   :  { %3605 = vmatmul.f32.vlgmr.msrb.gmra.mxu3 %v15283_v55  ;;  %3496 = vmatmul.f32.vlgmr.msrb.gmra.mxu2 %v15285_v9 }
 0x44a   :  { %3720 = vmatpush.msra.mxu2 %v15475_v33  ;;  %3793 = vmatpush.msra.mxu3 %v11531_v51  ;;  %v15478_v51 = vand.u32 4294901760, %v11569_v44  ;;  %v9271_v33 = vld [vmem:[%s15136_s5 + $0x2f0] sm:$0xff] }
 0x44b   :  { %3642 = vmatpush.msrb.mxu0 %v11676_v27  ;;  %3685 = vmatpush.msrb.mxu1 %v11604_v45 }
 0x44c   :  { %3724 = vmatpush.msra.mxu2 %v15476_v41  ;;  %3795 = vmatpush.msra.mxu3 %v11546_v23  ;;  %v15480_v23 = vand.u32 4294901760, %v11608_v36 }
 0x44d   :  { %3645 = vmatpush.msrb.mxu0 %v11696_v15  ;;  %3687 = vmatpush.msrb.mxu1 %v11610_v17 }
 0x44e   :  { %3728 = vmatpush.msra.mxu2 %v15477_v4  ;;  %3797 = vmatpush.msra.mxu3 %v11548_v48  ;;  %v15482_v48 = vand.u32 4294901760, %v11640_v31  ;;  %v15485_v31 = vand.u32 4294901760, %v11696_v15 }
 0x44f   :  { %3422 = vmatmul.f32.vlgmr.msra.gmra.mxu1 %v11521_v0  ;;  %3391 = vmatmul.f32.gmra.mxu0 %v11554_v2  ;;  %v15481_v0 = vand.u32 4294901760, %v11632_v10 }
 0x450   :  { %3732 = vmatpush.msra.mxu2 %v15478_v51  ;;  %3799 = vmatpush.msra.mxu3 %v11572_v20  ;;  %v11954_v51 = vand.u32 4294901760, %v9272_v6 }
 0x451   :  { %3609 = vmatmul.f32.gmra.mxu3 %v15295_v35  ;;  %3504 = vmatmul.f32.gmra.mxu2 %v15297_v43 }
 0x452   :  { %3736 = vmatpush.msra.mxu2 %v15479_v30  ;;  %3801 = vmatpush.msra.mxu3 %v11581_v18  ;;  %v9254_v30 = vld [vmem:[%s15137_s6 + $0x88] sm:$0xff] }
 0x453   :  { %3648 = vmatpush.msrb.mxu0 %v11715_v11  ;;  %3689 = vmatpush.msrb.mxu1 %v11642_v37 }
 0x454   :  { %3740 = vmatpush.msra.mxu2 %v15480_v23  ;;  %3803 = vmatpush.msra.mxu3 %v11604_v45  ;;  %v15483_v45 = vand.u32 4294901760, %v11669_v50 }
 0x455   :  { %3651 = vmatpush.msrb.mxu0 %v11733_v24  ;;  %3691 = vmatpush.msrb.mxu1 %v11650_v42 }
 0x456   :  { %3744 = vmatpush.msra.mxu2 %v15481_v0  ;;  %3805 = vmatpush.msra.mxu3 %v11610_v17  ;;  %v15484_v17 = vand.u32 4294901760, %v11676_v27  ;;  %v11959_v0 = vand.u32 4294901760, %v9271_v33 }
 0x457   :  { %3426 = vmatmul.f32.gmra.mxu1 %v11554_v2  ;;  %3395 = vmatmul.f32.gmra.mxu0 %v11615_v1 }
 0x458   :  { %3748 = vmatpush.msra.mxu2 %v15482_v48  ;;  %3807 = vmatpush.msra.mxu3 %v11642_v37  ;;  %v15487_v37 = vmov %v15473_v52  ;;  %v9270_v48 = vld [vmem:[%s15136_s5 + $0x2e8] sm:$0xff] }
 0x459   :  { %3654 = vmatpush.msrb.mxu0 %v11744_v56  ;;  %3693 = vmatpush.msrb.mxu1 %v11671_v19 }
 0x45a   :  { %3752 = vmatpush.msra.mxu2 %v15483_v45  ;;  %3809 = vmatpush.msra.mxu3 %v11650_v42  ;;  %v15486_v42 = vand.u32 4294901760, %v11715_v11  ;;  %v9269_v45 = vld [vmem:[%s15136_s5 + $0x2e0] sm:$0xff] }
 0x45b   :  { %3657 = vmatpush.msrb.mxu0 %v11756_v14  ;;  %3695 = vmatpush.msrb.mxu1 %v11682_v40 }
 0x45c   :  { %3756 = vmatpush.msra.mxu2 %v15484_v17  ;;  %3811 = vmatpush.msra.mxu3 %v11671_v19 }
 0x45d   :  { %3660 = vmatpush.msrb.mxu0 %v11768_v28  ;;  %3697 = vmatpush.msrb.mxu1 %v11698_v21 }
 0x45e   :  { %3760 = vmatpush.msra.mxu2 %v15485_v31  ;;  %3813 = vmatpush.msra.mxu3 %v11682_v40  ;;  %v11968_v31 = vsub.f32 %v3837_v62, %v11949_v46 }
 0x45f   :  { %3430 = vmatmul.f32.gmra.mxu1 %v11615_v1  ;;  %3399 = vmatmul.f32.gmra.mxu0 %v11684_v54 }
 0x460   :  { %3764 = vmatpush.msra.mxu2 %v15486_v42  ;;  %3815 = vmatpush.msra.mxu3 %v11698_v21 }
 0x461   :  { %3699 = vmatpush.msrb.mxu1 %v11720_v59 }
 0x462   :  { %3768 = vmatpush.msra.mxu2 %v15487_v37  ;;  %3817 = vmatpush.msra.mxu3 %v11720_v59 }
 0x463   :  { %3701 = vmatpush.msrb.mxu1 %v11735_v16 }
 0x464   :  { %3772 = vmatpush.msra.mxu2 %v15488_v22  ;;  %3819 = vmatpush.msra.mxu3 %v11735_v16  ;;  %v3840_v22 = vsel %vm539_vm1, %v9254_v30, 0 }
 0x465   :  { %3703 = vmatpush.msrb.mxu1 %v11746_v25  ;;  %v11982_v62 = vand.u32 4294901760, %v3840_v22 }
 0x466   :  { %3776 = vmatpush.msra.mxu2 %v3594_v38  ;;  %3821 = vmatpush.msra.mxu3 %v11746_v25 }
 0x467   :  { %3823 = vmatmul.f32.vlgmr.msra.gmra.mxu3 %v15283_v55  ;;  %3434 = vmatmul.f32.gmra.mxu1 %v11684_v54 }
 0x468   :  { %3780 = vmatpush.msra.mxu2 %v3600_v8  ;;  %3663 = vmatmul.f32.vlgmr.msrb.gmra.mxu0 %v15308_v53 }
 0x469   :  { %3782 = vmatmul.f32.vlgmr.msra.gmra.mxu2 %v15283_v55 }
 0x46f   :  { %3827 = vmatmul.f32.gmra.mxu3 %v15295_v35  ;;  %3707 = vmatmul.f32.vlgmr.msrb.gmra.mxu1 %v15309_v34 }
 0x470   :  { %3668 = vmatmul.f32.gmra.mxu0 %v9828_v49 }
 0x471   :  { %3786 = vmatmul.f32.gmra.mxu2 %v15295_v35 }
 0x477   :  { %3713 = vmatmul.f32.gmra.mxu1 %v9846_v57 }
 0x4a1   :  { %v11894_v16 = vpop.f32.mrf.mxu0 }
 0x4a2   :  { %15489 = vst [vmem:[#allocation93_spill] sm:$0xff] %v11894_v16 }
 0x4a8   :  { %v11906_v20 = vpop.f32.mrf.mxu3 }
 0x4a9   :  { %15495 = vst [vmem:[#allocation99_spill] sm:$0xff] %v11906_v20 }
 0x4aa   :  { %v11896_v14 = vpop.f32.mrf.mxu0  ;;  %v11898_v1 = vpop.f32.mrf.mxu1 }
 0x4ab   :  { %15490 = vst [vmem:[#allocation94_spill] sm:$0xff] %v11896_v14  ;;  %v11900_v2 = vpop.f32.mrf.mxu2 }
 0x4ac   :  { %15491 = vst [vmem:[#allocation95_spill] sm:$0xff] %v11898_v1 }
 0x4ad   :  { %15492 = vst [vmem:[#allocation96_spill] sm:$0xff] %v11900_v2 }
 0x4b1   :  { %v11914_v10 = vpop.f32.mrf.mxu3 }
 0x4b2   :  { %15499 = vst [vmem:[#allocation103_spill] sm:$0xff] %v11914_v10 }
 0x4b3   :  { %v11902_v13 = vpop.f32.mrf.mxu0  ;;  %v11904_v44 = vpop.f32.mrf.mxu1 }
 0x4b4   :  { %15493 = vst [vmem:[#allocation97_spill] sm:$0xff] %v11902_v13  ;;  %v11912_v47 = vpop.f32.mrf.mxu2 }
 0x4b5   :  { %15494 = vst [vmem:[#allocation98_spill] sm:$0xff] %v11904_v44 }
 0x4b6   :  { %15498 = vst [vmem:[#allocation102_spill] sm:$0xff] %v11912_v47 }
 0x4ba   :  { %v11922_v59 = vpop.f32.mrf.mxu3 }
 0x4bb   :  { %v11908_v18 = vpop.f32.mrf.mxu0  ;;  %15503 = vst [vmem:[#allocation107_spill] sm:$0xff] %v11922_v59 }
 0x4bc   :  { %15496 = vst [vmem:[#allocation100_spill] sm:$0xff] %v11908_v18  ;;  %v11910_v36 = vpop.f32.mrf.mxu1  ;;  %v11920_v19 = vpop.f32.mrf.mxu2 }
 0x4bd   :  { %15497 = vst [vmem:[#allocation101_spill] sm:$0xff] %v11910_v36 }
 0x4be   :  { %15502 = vst [vmem:[#allocation106_spill] sm:$0xff] %v11920_v19 }
 0x4c2   :  { %v11930_v21 = vpop.f32.mrf.mxu3 }
 0x4c3   :  { %15507 = vst [vmem:[#allocation111_spill] sm:$0xff] %v11930_v21 }
 0x4c4   :  { %v11916_v27 = vpop.f32.mrf.mxu1  ;;  %v11918_v50 = vpop.f32.mrf.mxu0 }
 0x4c5   :  { %15500 = vst [vmem:[#allocation104_spill] sm:$0xff] %v11916_v27  ;;  %v11928_v15 = vpop.f32.mrf.mxu2 }
 0x4c6   :  { %15501 = vst [vmem:[#allocation105_spill] sm:$0xff] %v11918_v50 }
 0x4c7   :  { %15506 = vst [vmem:[#allocation110_spill] sm:$0xff] %v11928_v15 }
 0x4cc   :  { %v11924_v40 = vpop.f32.mrf.mxu1  ;;  %v11926_v54 = vpop.f32.mrf.mxu0 }
 0x4cd   :  { %15504 = vst [vmem:[#allocation108_spill] sm:$0xff] %v11924_v40  ;;  %v3497_v24 = vpop.f32.mrf.mxu2  ;;  %v3606_v28 = vpop.f32.mrf.mxu3 }
 0x4ce   :  { %15505 = vst [vmem:[#allocation109_spill] sm:$0xff] %v11926_v54  ;;  %v3607_v8 = vadd.f32 %v3606_v28, %v3497_v24  ;;  %v11972_v24 = vsub.f32 %v9272_v6, %v11954_v51  ;;  %v11974_v28 = vand.u32 4294901760, %v9270_v48 }
 0x4d4   :  { %v11932_v11 = vpop.f32.mrf.mxu1  ;;  %v11934_v56 = vpop.f32.mrf.mxu0 }
 0x4d5   :  { %15508 = vst [vmem:[#allocation112_spill] sm:$0xff] %v11932_v11  ;;  %v3505_v5 = vpop.f32.mrf.mxu2  ;;  %v3610_v29 = vpop.f32.mrf.mxu3 }
 0x4d6   :  { %15509 = vst [vmem:[#allocation113_spill] sm:$0xff] %v11934_v56  ;;  %v3611_v42 = vadd.f32 %v3610_v29, %v3505_v5  ;;  %v9268_v5 = vld [vmem:[%s15136_s5 + $0x2d8] sm:$0xff] }
 0x4dc   :  { %v11936_v25 = vpop.f32.mrf.mxu1  ;;  %v11938_v52 = vpop.f32.mrf.mxu0 }
 0x4dd   :  { %15510 = vst [vmem:[#allocation114_spill] sm:$0xff] %v11936_v25  ;;  %v15513_v25 = vand.u32 4294901760, %v11972_v24 }
 0x4de   :  { %15511 = vst [vmem:[#allocation115_spill] sm:$0xff] %v11938_v52 }
 0x4df   :  { %v4173_v52 = vsub.f32 %v11972_v24, %v15513_v25 }
 0x4e4   :  { %v11940_v38 = vpop.f32.mrf.mxu1 }
 0x4e5   :  { %15512 = vst [vmem:[#allocation116_spill] sm:$0xff] %v11940_v38  ;;  %v3664_v32 = vpop.f32.mrf.mxu0 }
 0x4e6   :  { %v3665_v26 = vadd.f32 %v3664_v32, %v3607_v8  ;;  %v11976_v32 = vand.u32 4294901760, %v9269_v45  ;;  %v11979_v8 = vsub.f32 %v9271_v33, %v11959_v0  ;;  %v12007_v33 = vsub.f32 %v3840_v22, %v11982_v62 }
 0x4e8   :  { %v11997_v30 = vsub.f32 %v9269_v45, %v11976_v32  ;;  %v9266_v45 = vld [vmem:[%s15136_s5 + $0x2c8] sm:$0xff] }
 0x4e9   :  { %v12032_v21 = vand.u32 4294901760, %v9266_v45 }
 0x4ea   :  { %v3824_v4 = vpop.f32.mrf.mxu3  ;;  %v15516_v50 = vand.u32 4294901760, %v11997_v30 }
 0x4ec   :  { %v3783_v61 = vpop.f32.mrf.mxu2  ;;  %v3708_v60 = vpop.f32.mrf.mxu1  ;;  %v4191_v10 = vsub.f32 %v11997_v30, %v15516_v50 }
 0x4ed   :  { %v3709_v41 = vadd.f32 %v3708_v60, %v3665_v26  ;;  %v3669_v17 = vpop.f32.mrf.mxu0  ;;  %v9267_v60 = vld [vmem:[%s15136_s5 + $0x2d0] sm:$0xff] }
 0x4ee   :  { %v3670_v3 = vadd.f32 %v3669_v17, %v3611_v42  ;;  %v12000_v42 = vand.u32 4294901760, %v9268_v5  ;;  %v9265_v17 = vld [vmem:[%s15136_s5 + $0x2c0] sm:$0xff]  ;;  %v4192_v47 = vand.u32 4294901760, %v4191_v10 }
 0x4ef   :  { %v3784_v23 = vadd.f32 %v3783_v61, %v3709_v41  ;;  %v3868_v61 = vand.u32 4294901760, %v11968_v31  ;;  %v12038_v56 = vand.u32 4294901760, %v9265_v17 }
 0x4f1   :  { %v3825_v37 = vadd.f32 %v3824_v4, %v3784_v23  ;;  %v11994_v4 = vsub.f32 %v9270_v48, %v11974_v28  ;;  %v3869_v38 = vsub.f32 %v11968_v31, %v3868_v61  ;;  %v12009_v48 = vand.u32 4294901760, %v9267_v60 }
 0x4f2   :  { %v12068_v2 = vsub.f32 %v9265_v17, %v12038_v56  ;;  %v9262_v17 = vld [vmem:[%s15136_s5 + $0x2a8] sm:$0xff] }
 0x4f3   :  { %v11987_v6 = vand.u32 4294901760, %v3825_v37  ;;  %v3870_v59 = vand.u32 4294901760, %v3869_v38  ;;  %v12036_v22 = vsub.f32 %v9267_v60, %v12009_v48  ;;  %v9264_v38 = vld [vmem:[%s15136_s5 + $0x2b8] sm:$0xff]  ;;  %v15515_v25 = vand.u32 4294901760, %v11994_v4 }
 0x4f4   :  { %v3714_v26 = vpop.f32.mrf.mxu1  ;;  %v3787_v41 = vpop.f32.mrf.mxu2  ;;  %v12070_v27 = vand.u32 4294901760, %v9264_v38 }
 0x4f5   :  { %v3715_v29 = vadd.f32 %v3714_v26, %v3670_v3  ;;  %v9255_v3 = vld [vmem:[%s15137_s6 + $0x90] sm:$0xff]  ;;  %v3828_v26 = vpop.f32.mrf.mxu3  ;;  %v4185_v60 = vsub.f32 %v11994_v4, %v15515_v25  ;;  %v15517_v25 = vand.u32 4294901760, %v12007_v33  ;;  %v15519_v10 = vand.u32 4294901760, %v12036_v22 }
 0x4f6   :  { %v3843_v11 = vsel %vm539_vm1, %v9255_v3, 0 }
 0x4f7   :  { %v3788_v23 = vadd.f32 %v3787_v41, %v3715_v29  ;;  %v3920_v41 = vsub.f32 %v3825_v37, %v11987_v6  ;;  %v12043_v54 = vand.u32 4294901760, %v3843_v11  ;;  %v3877_v50 = vsub.f32 %v12007_v33, %v15517_v25 }
 0x4f8   :  { %v4186_v25 = vand.u32 4294901760, %v4185_v60  ;;  %v12099_v60 = vand.u32 4294901760, %v9262_v17 }
 0x4f9   :  { %v3829_v29 = vadd.f32 %v3828_v26, %v3788_v23  ;;  %v15514_v23 = vand.u32 4294901760, %v11979_v8  ;;  %v12030_v26 = vsub.f32 %v9268_v5, %v12000_v42  ;;  %v4174_v5 = vand.u32 4294901760, %v4173_v52 }
 0x4fa   :  { %v12060_v52 = vsub.f32 %v9266_v45, %v12032_v21 }
 0x4fb   :  { %v12024_v40 = vand.u32 4294901760, %v3829_v29  ;;  %v4179_v37 = vsub.f32 %v11979_v8, %v15514_v23  ;;  %v3921_v23 = vand.u32 4294901760, %v3920_v41 }
 0x4fd   :  { %3863 = vmatpush.msra.mxu0 %v12024_v40  ;;  %3998 = vmatpush.msrb.mxu3 %v12024_v40  ;;  %v3914_v3 = vsub.f32 %v3829_v29, %v12024_v40  ;;  %v9263_v29 = vld [vmem:[%s15136_s5 + $0x2b0] sm:$0xff]  ;;  %v4180_v15 = vand.u32 4294901760, %v4179_v37  ;;  %v9256_v37 = vld [vmem:[%s15137_s6 + $0x98] sm:$0xff]  ;;  %v3922_v19 = vsub.f32 %v3920_v41, %v3921_v23 }
 0x4fe   :  { %v12078_v18 = vand.u32 4294901760, %v9263_v29  ;;  %v3846_v13 = vsel %vm539_vm1, %v9256_v37, 0 }
 0x4ff   :  { %3865 = vmatpush.msra.mxu0 %v11987_v6  ;;  %3958 = vmatpush.msrb.mxu2 %v3914_v3  ;;  %v3915_v20 = vand.u32 4294901760, %v3914_v3 }
 0x500   :  { %4000 = vmatpush.msrb.mxu3 %v11987_v6  ;;  %3871 = vmatmul.f32.vlgmr.msra.gmra.mxu0 %v3870_v59  ;;  %v12076_v59 = vsub.f32 %v3843_v11, %v12043_v54  ;;  %v12104_v11 = vsub.f32 %v9263_v29, %v12078_v18  ;;  %v9259_v29 = vld [vmem:[%s15136_s5 + $0x290] sm:$0xff] }
 0x501   :  { %4004 = vmatmul.f32.vlgmr.msrb.gmra.mxu3 %v3868_v61  ;;  %3961 = vmatpush.msrb.mxu2 %v3920_v41  ;;  %v3916_v45 = vsub.f32 %v3914_v3, %v3915_v20  ;;  %v15518_v61 = vand.u32 4294901760, %v12030_v26  ;;  %v9261_v3 = vld [vmem:[%s15136_s5 + $0x2a0] sm:$0xff] }
 0x502   :  { %4175 = vmatpush.msra.mxu3 %v4174_v5  ;;  %4043 = vmatpush.msrb.mxu0 %v3915_v20  ;;  %v3878_v20 = vand.u32 4294901760, %v3877_v50  ;;  %v12097_v5 = vsub.f32 %v9264_v38, %v12070_v27  ;;  %v15200_v37 = vand.u32 4294901760, %v12076_v59  ;;  %v12110_v38 = vand.u32 4294901760, %v9261_v3 }
 0x503   :  { %3964 = vmatmul.f32.vlgmr.msrb.gmra.mxu2 %v11968_v31  ;;  %v3917_v36 = vand.u32 4294901760, %v3916_v45  ;;  %v4197_v41 = vsub.f32 %v12030_v26, %v15518_v61  ;;  %v4203_v31 = vsub.f32 %v12036_v22, %v15519_v10  ;;  %v3923_v45 = vand.u32 4294901760, %v3922_v19 }
 0x504   :  { %4122 = vmatpush.msra.mxu2 %v11954_v51  ;;  %4181 = vmatpush.msra.mxu3 %v4180_v15  ;;  %v15199_v61 = vand.u32 4294901760, %v12068_v2  ;;  %v9260_v15 = vld [vmem:[%s15136_s5 + $0x298] sm:$0xff]  ;;  %v12112_v50 = vand.u32 4294901760, %v3846_v13  ;;  %v15520_v19 = vand.u32 4294901760, %v12060_v52  ;;  %v12124_v10 = vsub.f32 %v9262_v17, %v12099_v60  ;;  %v9258_v17 = vld [vmem:[%s15136_s5 + $0x288] sm:$0xff] }
 0x505   :  { %4047 = vmatpush.msrb.mxu0 %v3921_v23  ;;  %3918 = vmatpush.msra.mxu1 %v3917_v36  ;;  %v4198_v36 = vand.u32 4294901760, %v4197_v41  ;;  %v4204_v41 = vand.u32 4294901760, %v4203_v31  ;;  %v3885_v44 = vsub.f32 %v12076_v59, %v15200_v37  ;;  %v12163_v14 = vand.u32 4294901760, %v9258_v17 }
 0x506   :  { %4124 = vmatpush.msra.mxu2 %v11959_v0  ;;  %4187 = vmatpush.msra.mxu3 %v4186_v25  ;;  %v4209_v23 = vsub.f32 %v12060_v52, %v15520_v19  ;;  %v4215_v19 = vsub.f32 %v12068_v2, %v15199_v61  ;;  %v15521_v25 = vand.u32 4294901760, %v12007_v33  ;;  %v12146_v31 = vsub.f32 %v3846_v13, %v12112_v50 }
 0x507   :  { %3924 = vmatpush.msra.mxu1 %v3923_v45  ;;  %4277 = vmatpush.msra.mxu0 %v11972_v24  ;;  %v12126_v45 = vand.u32 4294901760, %v9260_v15  ;;  %v12148_v61 = vand.u32 4294901760, %v9259_v29  ;;  %v12184_v1 = vsub.f32 %v9258_v17, %v12163_v14  ;;  %v15526_v16 = vand.u32 4294901760, %v12076_v59 }
 0x508   :  { %4126 = vmatpush.msra.mxu2 %v11974_v28  ;;  %4193 = vmatpush.msra.mxu3 %v4192_v47  ;;  %v4210_v37 = vand.u32 4294901760, %v4209_v23  ;;  %v9257_v47 = vld [vmem:[%s15136_s5 + $0x280] sm:$0xff]  ;;  %v3886_v23 = vand.u32 4294901760, %v3885_v44 }
 0x509   :  { %3879 = vmatmul.f32.gmra.mxu0 %v3878_v20  ;;  %3926 = vmatmul.f32.vlgmr.msra.gmra.mxu1 %v11949_v46  ;;  %v12143_v20 = vsub.f32 %v9261_v3, %v12110_v38  ;;  %v12172_v13 = vsub.f32 %v9259_v29, %v12148_v61 }
 0x50a   :  { %4010 = vmatmul.f32.gmra.mxu3 %v15521_v25  ;;  %4080 = vmatpush.msrb.mxu1 %v12024_v40  ;;  %v15522_v40 = vand.u32 4294901760, %v12097_v5  ;;  %v12161_v25 = vsub.f32 %v9260_v15, %v12126_v45  ;;  %v12174_v15 = vand.u32 4294901760, %v9257_v47 }
 0x50b   :  { %4128 = vmatpush.msra.mxu2 %v11976_v32  ;;  %4199 = vmatpush.msra.mxu3 %v4198_v36  ;;  %v4216_v36 = vand.u32 4294901760, %v4215_v19 }
 0x50c   :  { %3969 = vmatmul.f32.gmra.mxu2 %v12007_v33  ;;  %4082 = vmatpush.msrb.mxu1 %v11987_v6  ;;  %v4221_v3 = vsub.f32 %v12097_v5, %v15522_v40  ;;  %v15523_v33 = vand.u32 4294901760, %v12104_v11  ;;  %v3892_v40 = vand.u32 4294901760, %v12146_v31 }
 0x50d   :  { %4130 = vmatpush.msra.mxu2 %v12000_v42  ;;  %4205 = vmatpush.msra.mxu3 %v4204_v41  ;;  %v15524_v41 = vand.u32 4294901760, %v12124_v10 }
 0x50e   :  { %v4227_v6 = vsub.f32 %v12104_v11, %v15523_v33  ;;  %4280 = vmatpush.msra.mxu0 %v11979_v8  ;;  %4335 = vmatpush.msra.mxu1 %v11954_v51  ;;  %v4222_v44 = vand.u32 4294901760, %v4221_v3  ;;  %v12196_v33 = vsub.f32 %v9257_v47, %v12174_v15 }
 0x50f   :  { %4132 = vmatpush.msra.mxu2 %v12009_v48  ;;  %4211 = vmatpush.msra.mxu3 %v4210_v37  ;;  %v4233_v19 = vsub.f32 %v12124_v10, %v15524_v41  ;;  %v15525_v37 = vand.u32 4294901760, %v12143_v20  ;;  %v3893_v41 = vsub.f32 %v12146_v31, %v3892_v40 }
 0x510   :  { %4283 = vmatpush.msra.mxu0 %v11994_v4  ;;  %4337 = vmatpush.msra.mxu1 %v11959_v0  ;;  %v4228_v29 = vand.u32 4294901760, %v4227_v6 }
 0x511   :  { %4134 = vmatpush.msra.mxu2 %v12032_v21  ;;  %4217 = vmatpush.msra.mxu3 %v4216_v36  ;;  %v4239_v3 = vsub.f32 %v12143_v20, %v15525_v37  ;;  %v4234_v36 = vand.u32 4294901760, %v4233_v19  ;;  %v4256_v37 = vand.u32 4294901760, %v12184_v1  ;;  %v3894_v17 = vand.u32 4294901760, %v3893_v41 }
 0x512   :  { %3887 = vmatmul.f32.gmra.mxu0 %v3886_v23  ;;  %3930 = vmatmul.f32.gmra.mxu1 %v11982_v62  ;;  %v15527_v23 = vand.u32 4294901760, %v12161_v25 }
 0x513   :  { %4016 = vmatmul.f32.gmra.mxu3 %v15526_v16  ;;  %4136 = vmatpush.msra.mxu2 %v12038_v56  ;;  %v4240_v47 = vand.u32 4294901760, %v4239_v3  ;;  %v15528_v16 = vand.u32 4294901760, %v12172_v13 }
 0x514   :  { %4223 = vmatpush.msra.mxu3 %v4222_v44  ;;  %3974 = vmatmul.f32.gmra.mxu2 %v12076_v59  ;;  %v4245_v6 = vsub.f32 %v12161_v25, %v15527_v23  ;;  %v4262_v59 = vand.u32 4294901760, %v12196_v33 }
 0x515   :  { %4138 = vmatpush.msra.mxu2 %v12070_v27  ;;  %4286 = vmatpush.msra.mxu0 %v11997_v30  ;;  %v4251_v44 = vsub.f32 %v12172_v13, %v15528_v16 }
 0x516   :  { %4229 = vmatpush.msra.mxu3 %v4228_v29  ;;  %4339 = vmatpush.msra.mxu1 %v11974_v28  ;;  %v4246_v19 = vand.u32 4294901760, %v4245_v6  ;;  %v4257_v29 = vsub.f32 %v12184_v1, %v4256_v37  ;;  %v4263_v41 = vsub.f32 %v12196_v33, %v4262_v59 }
 0x517   :  { %4140 = vmatpush.msra.mxu2 %v12078_v18  ;;  %4289 = vmatpush.msra.mxu0 %v12030_v26  ;;  %v4252_v3 = vand.u32 4294901760, %v4251_v44  ;;  %v9273_v44 = vld [vmem:[%s15137_s6 + $0xa0] sm:$0xff] }
 0x518   :  { %4235 = vmatpush.msra.mxu3 %v4234_v36  ;;  %4341 = vmatpush.msra.mxu1 %v11976_v32  ;;  %v4258_v36 = vand.u32 4294901760, %v4257_v29 }
 0x519   :  { %4142 = vmatpush.msra.mxu2 %v12099_v60  ;;  %4292 = vmatpush.msra.mxu0 %v12036_v22 }
 0x51a   :  { %4241 = vmatpush.msra.mxu3 %v4240_v47  ;;  %3895 = vmatmul.f32.gmra.mxu0 %v3894_v17  ;;  %v4264_v17 = vand.u32 4294901760, %v4263_v41 }
 0x51b   :  { %3934 = vmatmul.f32.gmra.mxu1 %v12043_v54  ;;  %4022 = vmatmul.f32.gmra.mxu3 %v3892_v40  ;;  %v15530_v40 = vand.u32 4294901760, %v11979_v8  ;;  %v15542_v8 = vmov %v15528_v16 }
 0x51c   :  { %4144 = vmatpush.msra.mxu2 %v12110_v38  ;;  %4247 = vmatpush.msra.mxu3 %v4246_v19  ;;  %v4499_v19 = vsel %vm539_vm1, %v9273_v44, 0 }
 0x51d   :  { %3979 = vmatmul.f32.gmra.mxu2 %v12146_v31  ;;  %4295 = vmatpush.msra.mxu0 %v12060_v52  ;;  %v15529_v31 = vand.u32 4294901760, %v11972_v24  ;;  %v15533_v24 = vand.u32 4294901760, %v12030_v26 }
 0x51e   :  { %4146 = vmatpush.msra.mxu2 %v12126_v45  ;;  %4253 = vmatpush.msra.mxu3 %v4252_v3  ;;  %v9292_v3 = vld [vmem:[%s15136_s5 + $0x378] sm:$0xff] }
 0x51f   :  { %4298 = vmatpush.msra.mxu0 %v12068_v2  ;;  %4343 = vmatpush.msra.mxu1 %v12000_v42 }
 0x520   :  { %4148 = vmatpush.msra.mxu2 %v12148_v61  ;;  %4259 = vmatpush.msra.mxu3 %v4258_v36 }
 0x521   :  { %4301 = vmatpush.msra.mxu0 %v12097_v5  ;;  %4345 = vmatpush.msra.mxu1 %v12009_v48 }
 0x522   :  { %4150 = vmatpush.msra.mxu2 %v12163_v14  ;;  %4265 = vmatpush.msra.mxu3 %v4264_v17  ;;  %v12377_v17 = vand.u32 4294901760, %v4499_v19 }
 0x523   :  { %3938 = vmatmul.f32.gmra.mxu1 %v12112_v50  ;;  %4049 = vmatmul.f32.vlgmr.msrb.gmra.mxu0 %v11949_v46 }
 0x524   :  { %4453 = vmatpush.msrb.mxu3 %v11954_v51  ;;  %4152 = vmatpush.msra.mxu2 %v12174_v15  ;;  %v15531_v51 = vand.u32 4294901760, %v11994_v4 }
 0x525   :  { %4267 = vmatmul.f32.vlgmr.msra.gmra.mxu3 %v15283_v55  ;;  %4158 = vmatmul.f32.vlgmr.msra.gmra.mxu2 %v15285_v9 }
 0x526   :  { %4382 = vmatpush.msrb.mxu2 %v15529_v31  ;;  %4455 = vmatpush.msrb.mxu3 %v11959_v0  ;;  %v15532_v0 = vand.u32 4294901760, %v11997_v30  ;;  %v9291_v31 = vld [vmem:[%s15136_s5 + $0x370] sm:$0xff] }
 0x527   :  { %4304 = vmatpush.msra.mxu0 %v12104_v11  ;;  %4347 = vmatpush.msra.mxu1 %v12032_v21 }
 0x528   :  { %4386 = vmatpush.msrb.mxu2 %v15530_v40  ;;  %4457 = vmatpush.msrb.mxu3 %v11974_v28  ;;  %v15534_v28 = vand.u32 4294901760, %v12036_v22 }
 0x529   :  { %4307 = vmatpush.msra.mxu0 %v12124_v10  ;;  %4349 = vmatpush.msra.mxu1 %v12038_v56 }
 0x52a   :  { %4390 = vmatpush.msrb.mxu2 %v15531_v51  ;;  %4459 = vmatpush.msrb.mxu3 %v11976_v32  ;;  %v15536_v32 = vand.u32 4294901760, %v12068_v2  ;;  %v15539_v2 = vand.u32 4294901760, %v12124_v10 }
 0x52b   :  { %4084 = vmatmul.f32.vlgmr.msrb.gmra.mxu1 %v11949_v46  ;;  %4053 = vmatmul.f32.gmra.mxu0 %v11982_v62  ;;  %v15535_v46 = vand.u32 4294901760, %v12060_v52 }
 0x52c   :  { %4394 = vmatpush.msrb.mxu2 %v15532_v0  ;;  %4461 = vmatpush.msrb.mxu3 %v12000_v42  ;;  %v12382_v0 = vand.u32 4294901760, %v9292_v3 }
 0x52d   :  { %4271 = vmatmul.f32.gmra.mxu3 %v15295_v35  ;;  %4166 = vmatmul.f32.gmra.mxu2 %v15297_v43 }
 0x52e   :  { %4398 = vmatpush.msrb.mxu2 %v15533_v24  ;;  %4463 = vmatpush.msrb.mxu3 %v12009_v48  ;;  %v9274_v24 = vld [vmem:[%s15137_s6 + $0xa8] sm:$0xff] }
 0x52f   :  { %4310 = vmatpush.msra.mxu0 %v12143_v20  ;;  %4351 = vmatpush.msra.mxu1 %v12070_v27 }
 0x530   :  { %4402 = vmatpush.msrb.mxu2 %v15534_v28  ;;  %4465 = vmatpush.msrb.mxu3 %v12032_v21  ;;  %v15537_v21 = vand.u32 4294901760, %v12097_v5 }
 0x531   :  { %4313 = vmatpush.msra.mxu0 %v12161_v25  ;;  %4353 = vmatpush.msra.mxu1 %v12078_v18 }
 0x532   :  { %4406 = vmatpush.msrb.mxu2 %v15535_v46  ;;  %4467 = vmatpush.msrb.mxu3 %v12038_v56  ;;  %v15538_v56 = vand.u32 4294901760, %v12104_v11  ;;  %v12387_v46 = vand.u32 4294901760, %v9291_v31 }
 0x533   :  { %4088 = vmatmul.f32.gmra.mxu1 %v11982_v62  ;;  %4057 = vmatmul.f32.gmra.mxu0 %v12043_v54 }
 0x534   :  { %4410 = vmatpush.msrb.mxu2 %v15536_v32  ;;  %4469 = vmatpush.msrb.mxu3 %v12070_v27  ;;  %v15541_v27 = vmov %v15527_v23  ;;  %v9290_v32 = vld [vmem:[%s15136_s5 + $0x368] sm:$0xff] }
 0x535   :  { %4316 = vmatpush.msra.mxu0 %v12172_v13  ;;  %4355 = vmatpush.msra.mxu1 %v12099_v60 }
 0x536   :  { %4414 = vmatpush.msrb.mxu2 %v15537_v21  ;;  %4471 = vmatpush.msrb.mxu3 %v12078_v18  ;;  %v15540_v18 = vand.u32 4294901760, %v12143_v20  ;;  %v9289_v21 = vld [vmem:[%s15136_s5 + $0x360] sm:$0xff] }
 0x537   :  { %4319 = vmatpush.msra.mxu0 %v12184_v1  ;;  %4357 = vmatpush.msra.mxu1 %v12110_v38 }
 0x538   :  { %4418 = vmatpush.msrb.mxu2 %v15538_v56  ;;  %4473 = vmatpush.msrb.mxu3 %v12099_v60 }
 0x539   :  { %4322 = vmatpush.msra.mxu0 %v12196_v33  ;;  %4359 = vmatpush.msra.mxu1 %v12126_v45 }
 0x53a   :  { %4422 = vmatpush.msrb.mxu2 %v15539_v2  ;;  %4475 = vmatpush.msrb.mxu3 %v12110_v38  ;;  %v12396_v2 = vsub.f32 %v4499_v19, %v12377_v17 }
 0x53b   :  { %4092 = vmatmul.f32.gmra.mxu1 %v12043_v54  ;;  %4061 = vmatmul.f32.gmra.mxu0 %v12112_v50 }
 0x53c   :  { %4426 = vmatpush.msrb.mxu2 %v15540_v18  ;;  %4477 = vmatpush.msrb.mxu3 %v12126_v45 }
 0x53d   :  { %4361 = vmatpush.msra.mxu1 %v12148_v61 }
 0x53e   :  { %4430 = vmatpush.msrb.mxu2 %v15541_v27  ;;  %4479 = vmatpush.msrb.mxu3 %v12148_v61 }
 0x53f   :  { %4363 = vmatpush.msra.mxu1 %v12163_v14 }
 0x540   :  { %4434 = vmatpush.msrb.mxu2 %v15542_v8  ;;  %4481 = vmatpush.msrb.mxu3 %v12163_v14  ;;  %v4502_v8 = vsel %vm539_vm1, %v9274_v24, 0 }
 0x541   :  { %4365 = vmatpush.msra.mxu1 %v12174_v15  ;;  %v12410_v19 = vand.u32 4294901760, %v4502_v8 }
 0x542   :  { %4438 = vmatpush.msrb.mxu2 %v4256_v37  ;;  %4483 = vmatpush.msrb.mxu3 %v12174_v15 }
 0x543   :  { %4485 = vmatmul.f32.vlgmr.msrb.gmra.mxu3 %v15283_v55  ;;  %4096 = vmatmul.f32.gmra.mxu1 %v12112_v50 }
 0x544   :  { %4442 = vmatpush.msrb.mxu2 %v4262_v59  ;;  %4325 = vmatmul.f32.vlgmr.msra.gmra.mxu0 %v15308_v53 }
 0x545   :  { %4444 = vmatmul.f32.vlgmr.msrb.gmra.mxu2 %v15283_v55 }
 0x54b   :  { %4489 = vmatmul.f32.gmra.mxu3 %v15295_v35  ;;  %4369 = vmatmul.f32.vlgmr.msra.gmra.mxu1 %v15309_v34 }
 0x54c   :  { %4330 = vmatmul.f32.gmra.mxu0 %v9828_v49 }
 0x54d   :  { %4448 = vmatmul.f32.gmra.mxu2 %v15295_v35 }
 0x553   :  { %4375 = vmatmul.f32.gmra.mxu1 %v9846_v57 }
 0x57d   :  { %v12322_v14 = vpop.f32.mrf.mxu0 }
 0x57e   :  { %15543 = vst [vmem:[#allocation117_spill] sm:$0xff] %v12322_v14 }
 0x584   :  { %v12334_v42 = vpop.f32.mrf.mxu3 }
 0x585   :  { %15549 = vst [vmem:[#allocation123_spill] sm:$0xff] %v12334_v42 }
 0x586   :  { %v12324_v1 = vpop.f32.mrf.mxu0  ;;  %v12326_v54 = vpop.f32.mrf.mxu1 }
 0x587   :  { %15544 = vst [vmem:[#allocation118_spill] sm:$0xff] %v12324_v1  ;;  %v12328_v62 = vpop.f32.mrf.mxu2 }
 0x588   :  { %15545 = vst [vmem:[#allocation119_spill] sm:$0xff] %v12326_v54 }
 0x589   :  { %15546 = vst [vmem:[#allocation120_spill] sm:$0xff] %v12328_v62 }
 0x58d   :  { %v12342_v52 = vpop.f32.mrf.mxu3 }
 0x58e   :  { %15553 = vst [vmem:[#allocation127_spill] sm:$0xff] %v12342_v52 }
 0x58f   :  { %v12330_v4 = vpop.f32.mrf.mxu0  ;;  %v12332_v30 = vpop.f32.mrf.mxu1 }
 0x590   :  { %15547 = vst [vmem:[#allocation121_spill] sm:$0xff] %v12330_v4  ;;  %v12340_v26 = vpop.f32.mrf.mxu2 }
 0x591   :  { %15548 = vst [vmem:[#allocation122_spill] sm:$0xff] %v12332_v30 }
 0x592   :  { %15552 = vst [vmem:[#allocation126_spill] sm:$0xff] %v12340_v26 }
 0x596   :  { %v12350_v61 = vpop.f32.mrf.mxu3 }
 0x597   :  { %v12336_v48 = vpop.f32.mrf.mxu0  ;;  %15557 = vst [vmem:[#allocation131_spill] sm:$0xff] %v12350_v61 }
 0x598   :  { %15550 = vst [vmem:[#allocation124_spill] sm:$0xff] %v12336_v48  ;;  %v12338_v22 = vpop.f32.mrf.mxu1  ;;  %v12348_v60 = vpop.f32.mrf.mxu2 }
 0x599   :  { %15551 = vst [vmem:[#allocation125_spill] sm:$0xff] %v12338_v22 }
 0x59a   :  { %15556 = vst [vmem:[#allocation130_spill] sm:$0xff] %v12348_v60 }
 0x59e   :  { %v12358_v45 = vpop.f32.mrf.mxu3 }
 0x59f   :  { %15561 = vst [vmem:[#allocation135_spill] sm:$0xff] %v12358_v45 }
 0x5a0   :  { %v12344_v11 = vpop.f32.mrf.mxu1  ;;  %v12346_v5 = vpop.f32.mrf.mxu0 }
 0x5a1   :  { %15554 = vst [vmem:[#allocation128_spill] sm:$0xff] %v12344_v11  ;;  %v12356_v10 = vpop.f32.mrf.mxu2 }
 0x5a2   :  { %15555 = vst [vmem:[#allocation129_spill] sm:$0xff] %v12346_v5 }
 0x5a3   :  { %15560 = vst [vmem:[#allocation134_spill] sm:$0xff] %v12356_v10 }
 0x5a8   :  { %v12352_v38 = vpop.f32.mrf.mxu1  ;;  %v12354_v50 = vpop.f32.mrf.mxu0 }
 0x5a9   :  { %15558 = vst [vmem:[#allocation132_spill] sm:$0xff] %v12352_v38  ;;  %v4159_v25 = vpop.f32.mrf.mxu2  ;;  %v4268_v33 = vpop.f32.mrf.mxu3 }
 0x5aa   :  { %15559 = vst [vmem:[#allocation133_spill] sm:$0xff] %v12354_v50  ;;  %v4269_v59 = vadd.f32 %v4268_v33, %v4159_v25  ;;  %v12400_v25 = vsub.f32 %v9292_v3, %v12382_v0  ;;  %v12402_v33 = vand.u32 4294901760, %v9290_v32 }
 0x5b0   :  { %v12360_v20 = vpop.f32.mrf.mxu1  ;;  %v12362_v13 = vpop.f32.mrf.mxu0 }
 0x5b1   :  { %15562 = vst [vmem:[#allocation136_spill] sm:$0xff] %v12360_v20  ;;  %v4167_v6 = vpop.f32.mrf.mxu2  ;;  %v4272_v47 = vpop.f32.mrf.mxu3 }
 0x5b2   :  { %15563 = vst [vmem:[#allocation137_spill] sm:$0xff] %v12362_v13  ;;  %v4273_v18 = vadd.f32 %v4272_v47, %v4167_v6  ;;  %v9288_v6 = vld [vmem:[%s15136_s5 + $0x358] sm:$0xff] }
 0x5b8   :  { %v12364_v15 = vpop.f32.mrf.mxu1  ;;  %v12366_v23 = vpop.f32.mrf.mxu0 }
 0x5b9   :  { %15564 = vst [vmem:[#allocation138_spill] sm:$0xff] %v12364_v15 }
 0x5ba   :  { %15565 = vst [vmem:[#allocation139_spill] sm:$0xff] %v12366_v23  ;;  %v15567_v23 = vand.u32 4294901760, %v12400_v25 }
 0x5bc   :  { %v4835_v15 = vsub.f32 %v12400_v25, %v15567_v23 }
 0x5c0   :  { %v12368_v37 = vpop.f32.mrf.mxu1 }
 0x5c1   :  { %15566 = vst [vmem:[#allocation140_spill] sm:$0xff] %v12368_v37  ;;  %v4326_v16 = vpop.f32.mrf.mxu0 }
 0x5c2   :  { %v4327_v29 = vadd.f32 %v4326_v16, %v4269_v59  ;;  %v12404_v16 = vand.u32 4294901760, %v9289_v21  ;;  %v12407_v59 = vsub.f32 %v9291_v31, %v12387_v46  ;;  %v12435_v31 = vsub.f32 %v4502_v8, %v12410_v19 }
 0x5c4   :  { %v12425_v24 = vsub.f32 %v9289_v21, %v12404_v16  ;;  %v9286_v21 = vld [vmem:[%s15136_s5 + $0x348] sm:$0xff] }
 0x5c5   :  { %v12460_v13 = vand.u32 4294901760, %v9286_v21 }
 0x5c6   :  { %v4486_v51 = vpop.f32.mrf.mxu3  ;;  %v15570_v61 = vand.u32 4294901760, %v12425_v24 }
 0x5c8   :  { %v4445_v41 = vpop.f32.mrf.mxu2  ;;  %v4370_v36 = vpop.f32.mrf.mxu1  ;;  %v4853_v52 = vsub.f32 %v12425_v24, %v15570_v61 }
 0x5c9   :  { %v4371_v40 = vadd.f32 %v4370_v36, %v4327_v29  ;;  %v4331_v56 = vpop.f32.mrf.mxu0  ;;  %v9287_v36 = vld [vmem:[%s15136_s5 + $0x350] sm:$0xff] }
 0x5ca   :  { %v4332_v44 = vadd.f32 %v4331_v56, %v4273_v18  ;;  %v12428_v18 = vand.u32 4294901760, %v9288_v6  ;;  %v9285_v56 = vld [vmem:[%s15136_s5 + $0x340] sm:$0xff]  ;;  %v4854_v26 = vand.u32 4294901760, %v4853_v52 }
 0x5cb   :  { %v4446_v28 = vadd.f32 %v4445_v41, %v4371_v40  ;;  %v4530_v41 = vand.u32 4294901760, %v12396_v2  ;;  %v12466_v20 = vand.u32 4294901760, %v9285_v56 }
 0x5cd   :  { %v4487_v27 = vadd.f32 %v4486_v51, %v4446_v28  ;;  %v12422_v51 = vsub.f32 %v9290_v32, %v12402_v33  ;;  %v4531_v37 = vsub.f32 %v12396_v2, %v4530_v41  ;;  %v12437_v32 = vand.u32 4294901760, %v9287_v36 }
 0x5ce   :  { %v12496_v62 = vsub.f32 %v9285_v56, %v12466_v20  ;;  %v9282_v56 = vld [vmem:[%s15136_s5 + $0x328] sm:$0xff] }
 0x5cf   :  { %v12415_v3 = vand.u32 4294901760, %v4487_v27  ;;  %v4532_v50 = vand.u32 4294901760, %v4531_v37  ;;  %v12464_v8 = vsub.f32 %v9287_v36, %v12437_v32  ;;  %v9284_v37 = vld [vmem:[%s15136_s5 + $0x338] sm:$0xff]  ;;  %v15569_v23 = vand.u32 4294901760, %v12422_v51 }
 0x5d0   :  { %v4376_v29 = vpop.f32.mrf.mxu1  ;;  %v4449_v40 = vpop.f32.mrf.mxu2  ;;  %v12498_v11 = vand.u32 4294901760, %v9284_v37 }
 0x5d1   :  { %v4377_v47 = vadd.f32 %v4376_v29, %v4332_v44  ;;  %v9275_v44 = vld [vmem:[%s15137_s6 + $0xb0] sm:$0xff]  ;;  %v4490_v29 = vpop.f32.mrf.mxu3  ;;  %v4847_v36 = vsub.f32 %v12422_v51, %v15569_v23  ;;  %v15571_v23 = vand.u32 4294901760, %v12435_v31  ;;  %v15573_v52 = vand.u32 4294901760, %v12464_v8 }
 0x5d2   :  { %v4505_v38 = vsel %vm539_vm1, %v9275_v44, 0 }
 0x5d3   :  { %v4450_v28 = vadd.f32 %v4449_v40, %v4377_v47  ;;  %v4582_v40 = vsub.f32 %v4487_v27, %v12415_v3  ;;  %v12471_v5 = vand.u32 4294901760, %v4505_v38  ;;  %v4539_v61 = vsub.f32 %v12435_v31, %v15571_v23 }
 0x5d4   :  { %v4848_v23 = vand.u32 4294901760, %v4847_v36  ;;  %v12527_v36 = vand.u32 4294901760, %v9282_v56 }
 0x5d5   :  { %v4491_v47 = vadd.f32 %v4490_v29, %v4450_v28  ;;  %v15568_v28 = vand.u32 4294901760, %v12407_v59  ;;  %v12458_v29 = vsub.f32 %v9288_v6, %v12428_v18  ;;  %v4836_v6 = vand.u32 4294901760, %v4835_v15 }
 0x5d6   :  { %v12488_v15 = vsub.f32 %v9286_v21, %v12460_v13 }
 0x5d7   :  { %v12452_v45 = vand.u32 4294901760, %v4491_v47  ;;  %v4841_v27 = vsub.f32 %v12407_v59, %v15568_v28  ;;  %v4583_v28 = vand.u32 4294901760, %v4582_v40 }
 0x5d9   :  { %4525 = vmatpush.msrb.mxu0 %v12452_v45  ;;  %4660 = vmatpush.msra.mxu3 %v12452_v45  ;;  %v4576_v44 = vsub.f32 %v4491_v47, %v12452_v45  ;;  %v9283_v47 = vld [vmem:[%s15136_s5 + $0x330] sm:$0xff]  ;;  %v4842_v10 = vand.u32 4294901760, %v4841_v27  ;;  %v9276_v27 = vld [vmem:[%s15137_s6 + $0xb8] sm:$0xff]  ;;  %v4584_v60 = vsub.f32 %v4582_v40, %v4583_v28 }
 0x5da   :  { %v12506_v48 = vand.u32 4294901760, %v9283_v47  ;;  %v4508_v4 = vsel %vm539_vm1, %v9276_v27, 0 }
 0x5db   :  { %4527 = vmatpush.msrb.mxu0 %v12415_v3  ;;  %4620 = vmatpush.msra.mxu2 %v4576_v44  ;;  %v4577_v42 = vand.u32 4294901760, %v4576_v44 }
 0x5dc   :  { %4662 = vmatpush.msra.mxu3 %v12415_v3  ;;  %4533 = vmatmul.f32.vlgmr.msrb.gmra.mxu0 %v4532_v50  ;;  %v12504_v50 = vsub.f32 %v4505_v38, %v12471_v5  ;;  %v12532_v38 = vsub.f32 %v9283_v47, %v12506_v48  ;;  %v9279_v47 = vld [vmem:[%s15136_s5 + $0x310] sm:$0xff] }
 0x5dd   :  { %4666 = vmatmul.f32.vlgmr.msra.gmra.mxu3 %v4530_v41  ;;  %4623 = vmatpush.msra.mxu2 %v4582_v40  ;;  %v4578_v21 = vsub.f32 %v4576_v44, %v4577_v42  ;;  %v15572_v41 = vand.u32 4294901760, %v12458_v29  ;;  %v9281_v44 = vld [vmem:[%s15136_s5 + $0x320] sm:$0xff] }
 0x5de   :  { %4837 = vmatpush.msrb.mxu3 %v4836_v6  ;;  %4705 = vmatpush.msra.mxu0 %v4577_v42  ;;  %v4540_v42 = vand.u32 4294901760, %v4539_v61  ;;  %v12525_v6 = vsub.f32 %v9284_v37, %v12498_v11  ;;  %v15202_v27 = vand.u32 4294901760, %v12504_v50  ;;  %v12538_v37 = vand.u32 4294901760, %v9281_v44 }
 0x5df   :  { %4626 = vmatmul.f32.vlgmr.msra.gmra.mxu2 %v12396_v2  ;;  %v4579_v22 = vand.u32 4294901760, %v4578_v21  ;;  %v4859_v40 = vsub.f32 %v12458_v29, %v15572_v41  ;;  %v4865_v2 = vsub.f32 %v12464_v8, %v15573_v52  ;;  %v4585_v21 = vand.u32 4294901760, %v4584_v60 }
 0x5e0   :  { %4784 = vmatpush.msrb.mxu2 %v12382_v0  ;;  %4843 = vmatpush.msrb.mxu3 %v4842_v10  ;;  %v15201_v41 = vand.u32 4294901760, %v12496_v62  ;;  %v9280_v10 = vld [vmem:[%s15136_s5 + $0x318] sm:$0xff]  ;;  %v12540_v61 = vand.u32 4294901760, %v4508_v4  ;;  %v15574_v60 = vand.u32 4294901760, %v12488_v15  ;;  %v12552_v52 = vsub.f32 %v9282_v56, %v12527_v36  ;;  %v9278_v56 = vld [vmem:[%s15136_s5 + $0x308] sm:$0xff] }
 0x5e1   :  { %4709 = vmatpush.msra.mxu0 %v4583_v28  ;;  %4580 = vmatpush.msrb.mxu1 %v4579_v22  ;;  %v4860_v22 = vand.u32 4294901760, %v4859_v40  ;;  %v4866_v40 = vand.u32 4294901760, %v4865_v2  ;;  %v4547_v30 = vsub.f32 %v12504_v50, %v15202_v27  ;;  %v12591_v1 = vand.u32 4294901760, %v9278_v56 }
 0x5e2   :  { %4786 = vmatpush.msrb.mxu2 %v12387_v46  ;;  %4849 = vmatpush.msrb.mxu3 %v4848_v23  ;;  %v4871_v28 = vsub.f32 %v12488_v15, %v15574_v60  ;;  %v4877_v60 = vsub.f32 %v12496_v62, %v15201_v41  ;;  %v15575_v23 = vand.u32 4294901760, %v12435_v31  ;;  %v12574_v2 = vsub.f32 %v4508_v4, %v12540_v61 }
 0x5e3   :  { %4586 = vmatpush.msrb.mxu1 %v4585_v21  ;;  %4939 = vmatpush.msrb.mxu0 %v12400_v25  ;;  %v12554_v21 = vand.u32 4294901760, %v9280_v10  ;;  %v12576_v41 = vand.u32 4294901760, %v9279_v47  ;;  %v12612_v54 = vsub.f32 %v9278_v56, %v12591_v1  ;;  %v15580_v14 = vand.u32 4294901760, %v12504_v50 }
 0x5e4   :  { %4788 = vmatpush.msrb.mxu2 %v12402_v33  ;;  %4855 = vmatpush.msrb.mxu3 %v4854_v26  ;;  %v4872_v27 = vand.u32 4294901760, %v4871_v28  ;;  %v9277_v26 = vld [vmem:[%s15136_s5 + $0x300] sm:$0xff]  ;;  %v4548_v28 = vand.u32 4294901760, %v4547_v30 }
 0x5e5   :  { %4541 = vmatmul.f32.gmra.mxu0 %v4540_v42  ;;  %4588 = vmatmul.f32.vlgmr.msrb.gmra.mxu1 %v12377_v17  ;;  %v12571_v42 = vsub.f32 %v9281_v44, %v12538_v37  ;;  %v12600_v4 = vsub.f32 %v9279_v47, %v12576_v41 }
 0x5e6   :  { %4672 = vmatmul.f32.gmra.mxu3 %v15575_v23  ;;  %4742 = vmatpush.msra.mxu1 %v12452_v45  ;;  %v15576_v45 = vand.u32 4294901760, %v12525_v6  ;;  %v12589_v23 = vsub.f32 %v9280_v10, %v12554_v21  ;;  %v12602_v10 = vand.u32 4294901760, %v9277_v26 }
 0x5e7   :  { %4790 = vmatpush.msrb.mxu2 %v12404_v16  ;;  %4861 = vmatpush.msrb.mxu3 %v4860_v22  ;;  %v4878_v22 = vand.u32 4294901760, %v4877_v60 }
 0x5e8   :  { %4631 = vmatmul.f32.gmra.mxu2 %v12435_v31  ;;  %4744 = vmatpush.msra.mxu1 %v12415_v3  ;;  %v4883_v44 = vsub.f32 %v12525_v6, %v15576_v45  ;;  %v15577_v31 = vand.u32 4294901760, %v12532_v38  ;;  %v4554_v45 = vand.u32 4294901760, %v12574_v2 }
 0x5e9   :  { %4792 = vmatpush.msrb.mxu2 %v12428_v18  ;;  %4867 = vmatpush.msrb.mxu3 %v4866_v40  ;;  %v15578_v40 = vand.u32 4294901760, %v12552_v52 }
 0x5ea   :  { %v4889_v3 = vsub.f32 %v12532_v38, %v15577_v31  ;;  %4942 = vmatpush.msrb.mxu0 %v12407_v59  ;;  %4997 = vmatpush.msrb.mxu1 %v12382_v0  ;;  %v4884_v30 = vand.u32 4294901760, %v4883_v44  ;;  %v12624_v31 = vsub.f32 %v9277_v26, %v12602_v10 }
 0x5eb   :  { %4794 = vmatpush.msrb.mxu2 %v12437_v32  ;;  %4873 = vmatpush.msrb.mxu3 %v4872_v27  ;;  %v4895_v60 = vsub.f32 %v12552_v52, %v15578_v40  ;;  %v15579_v27 = vand.u32 4294901760, %v12571_v42  ;;  %v4555_v40 = vsub.f32 %v12574_v2, %v4554_v45 }
 0x5ec   :  { %4945 = vmatpush.msrb.mxu0 %v12422_v51  ;;  %4999 = vmatpush.msrb.mxu1 %v12387_v46  ;;  %v4890_v47 = vand.u32 4294901760, %v4889_v3 }
 0x5ed   :  { %4796 = vmatpush.msrb.mxu2 %v12460_v13  ;;  %4879 = vmatpush.msrb.mxu3 %v4878_v22  ;;  %v4901_v44 = vsub.f32 %v12571_v42, %v15579_v27  ;;  %v4896_v22 = vand.u32 4294901760, %v4895_v60  ;;  %v4918_v27 = vand.u32 4294901760, %v12612_v54  ;;  %v4556_v56 = vand.u32 4294901760, %v4555_v40 }
 0x5ee   :  { %4549 = vmatmul.f32.gmra.mxu0 %v4548_v28  ;;  %4592 = vmatmul.f32.gmra.mxu1 %v12410_v19  ;;  %v15581_v28 = vand.u32 4294901760, %v12589_v23 }
 0x5ef   :  { %4678 = vmatmul.f32.gmra.mxu3 %v15580_v14  ;;  %4798 = vmatpush.msrb.mxu2 %v12466_v20  ;;  %v4902_v26 = vand.u32 4294901760, %v4901_v44  ;;  %v15582_v14 = vand.u32 4294901760, %v12600_v4 }
 0x5f0   :  { %4885 = vmatpush.msrb.mxu3 %v4884_v30  ;;  %4636 = vmatmul.f32.gmra.mxu2 %v12504_v50  ;;  %v4907_v3 = vsub.f32 %v12589_v23, %v15581_v28  ;;  %v4924_v50 = vand.u32 4294901760, %v12624_v31 }
 0x5f1   :  { %4800 = vmatpush.msrb.mxu2 %v12498_v11  ;;  %4948 = vmatpush.msrb.mxu0 %v12425_v24  ;;  %v4913_v30 = vsub.f32 %v12600_v4, %v15582_v14 }
 0x5f2   :  { %4891 = vmatpush.msrb.mxu3 %v4890_v47  ;;  %5001 = vmatpush.msrb.mxu1 %v12402_v33  ;;  %v4908_v60 = vand.u32 4294901760, %v4907_v3  ;;  %v4919_v47 = vsub.f32 %v12612_v54, %v4918_v27  ;;  %v4925_v40 = vsub.f32 %v12624_v31, %v4924_v50 }
 0x5f3   :  { %4802 = vmatpush.msrb.mxu2 %v12506_v48  ;;  %4951 = vmatpush.msrb.mxu0 %v12458_v29  ;;  %v4914_v44 = vand.u32 4294901760, %v4913_v30  ;;  %v9293_v30 = vld [vmem:[%s15137_s6 + $0xc0] sm:$0xff] }
 0x5f4   :  { %4897 = vmatpush.msrb.mxu3 %v4896_v22  ;;  %5003 = vmatpush.msrb.mxu1 %v12404_v16  ;;  %v4920_v22 = vand.u32 4294901760, %v4919_v47 }
 0x5f5   :  { %4804 = vmatpush.msrb.mxu2 %v12527_v36  ;;  %4954 = vmatpush.msrb.mxu0 %v12464_v8 }
 0x5f6   :  { %4903 = vmatpush.msrb.mxu3 %v4902_v26  ;;  %4557 = vmatmul.f32.gmra.mxu0 %v4556_v56  ;;  %v4926_v56 = vand.u32 4294901760, %v4925_v40 }
 0x5f7   :  { %4596 = vmatmul.f32.gmra.mxu1 %v12471_v5  ;;  %4684 = vmatmul.f32.gmra.mxu3 %v4554_v45  ;;  %v15584_v45 = vand.u32 4294901760, %v12407_v59  ;;  %v15596_v59 = vmov %v15582_v14 }
 0x5f8   :  { %4806 = vmatpush.msrb.mxu2 %v12538_v37  ;;  %4909 = vmatpush.msrb.mxu3 %v4908_v60  ;;  %v5161_v60 = vsel %vm539_vm1, %v9293_v30, 0 }
 0x5f9   :  { %4641 = vmatmul.f32.gmra.mxu2 %v12574_v2  ;;  %4957 = vmatpush.msrb.mxu0 %v12488_v15  ;;  %v15583_v2 = vand.u32 4294901760, %v12400_v25  ;;  %v15587_v25 = vand.u32 4294901760, %v12458_v29 }
 0x5fa   :  { %4808 = vmatpush.msrb.mxu2 %v12554_v21  ;;  %4915 = vmatpush.msrb.mxu3 %v4914_v44  ;;  %v9312_v44 = vld [vmem:[%s15136_s5 + $0x3f8] sm:$0xff] }
 0x5fb   :  { %4960 = vmatpush.msrb.mxu0 %v12496_v62  ;;  %5005 = vmatpush.msrb.mxu1 %v12428_v18 }
 0x5fc   :  { %4810 = vmatpush.msrb.mxu2 %v12576_v41  ;;  %4921 = vmatpush.msrb.mxu3 %v4920_v22 }
 0x5fd   :  { %4963 = vmatpush.msrb.mxu0 %v12525_v6  ;;  %5007 = vmatpush.msrb.mxu1 %v12437_v32 }
 0x5fe   :  { %4812 = vmatpush.msrb.mxu2 %v12591_v1  ;;  %4927 = vmatpush.msrb.mxu3 %v4926_v56  ;;  %v12805_v56 = vand.u32 4294901760, %v5161_v60 }
 0x5ff   :  { %4600 = vmatmul.f32.gmra.mxu1 %v12540_v61  ;;  %4711 = vmatmul.f32.vlgmr.msra.gmra.mxu0 %v12377_v17 }
 0x600   :  { %5115 = vmatpush.msra.mxu3 %v12382_v0  ;;  %4814 = vmatpush.msrb.mxu2 %v12602_v10  ;;  %v15585_v0 = vand.u32 4294901760, %v12422_v51 }
 0x601   :  { %4929 = vmatmul.f32.vlgmr.msrb.gmra.mxu3 %v15283_v55  ;;  %4820 = vmatmul.f32.vlgmr.msrb.gmra.mxu2 %v15285_v9 }
 0x602   :  { %5044 = vmatpush.msra.mxu2 %v15583_v2  ;;  %5117 = vmatpush.msra.mxu3 %v12387_v46  ;;  %v15586_v46 = vand.u32 4294901760, %v12425_v24  ;;  %v9311_v2 = vld [vmem:[%s15136_s5 + $0x3f0] sm:$0xff] }
 0x603   :  { %4966 = vmatpush.msrb.mxu0 %v12532_v38  ;;  %5009 = vmatpush.msrb.mxu1 %v12460_v13 }
 0x604   :  { %5048 = vmatpush.msra.mxu2 %v15584_v45  ;;  %5119 = vmatpush.msra.mxu3 %v12402_v33  ;;  %v15588_v33 = vand.u32 4294901760, %v12464_v8 }
 0x605   :  { %4969 = vmatpush.msrb.mxu0 %v12552_v52  ;;  %5011 = vmatpush.msrb.mxu1 %v12466_v20 }
 0x606   :  { %5052 = vmatpush.msra.mxu2 %v15585_v0  ;;  %5121 = vmatpush.msra.mxu3 %v12404_v16  ;;  %v15590_v16 = vand.u32 4294901760, %v12496_v62  ;;  %v15593_v62 = vand.u32 4294901760, %v12552_v52 }
 0x607   :  { %4746 = vmatmul.f32.vlgmr.msra.gmra.mxu1 %v12377_v17  ;;  %4715 = vmatmul.f32.gmra.mxu0 %v12410_v19  ;;  %v15589_v17 = vand.u32 4294901760, %v12488_v15 }
 0x608   :  { %5056 = vmatpush.msra.mxu2 %v15586_v46  ;;  %5123 = vmatpush.msra.mxu3 %v12428_v18  ;;  %v12810_v46 = vand.u32 4294901760, %v9312_v44 }
 0x609   :  { %4933 = vmatmul.f32.gmra.mxu3 %v15295_v35  ;;  %4828 = vmatmul.f32.gmra.mxu2 %v15297_v43 }
 0x60a   :  { %5060 = vmatpush.msra.mxu2 %v15587_v25  ;;  %5125 = vmatpush.msra.mxu3 %v12437_v32  ;;  %v9294_v25 = vld [vmem:[%s15137_s6 + $0xc8] sm:$0xff] }
 0x60b   :  { %4972 = vmatpush.msrb.mxu0 %v12571_v42  ;;  %5013 = vmatpush.msrb.mxu1 %v12498_v11 }
 0x60c   :  { %5064 = vmatpush.msra.mxu2 %v15588_v33  ;;  %5127 = vmatpush.msra.mxu3 %v12460_v13  ;;  %v15591_v13 = vand.u32 4294901760, %v12525_v6 }
 0x60d   :  { %4975 = vmatpush.msrb.mxu0 %v12589_v23  ;;  %5015 = vmatpush.msrb.mxu1 %v12506_v48 }
 0x60e   :  { %5068 = vmatpush.msra.mxu2 %v15589_v17  ;;  %5129 = vmatpush.msra.mxu3 %v12466_v20  ;;  %v15592_v20 = vand.u32 4294901760, %v12532_v38  ;;  %v12815_v17 = vand.u32 4294901760, %v9311_v2 }
 0x60f   :  { %4750 = vmatmul.f32.gmra.mxu1 %v12410_v19  ;;  %4719 = vmatmul.f32.gmra.mxu0 %v12471_v5 }
 0x610   :  { %5072 = vmatpush.msra.mxu2 %v15590_v16  ;;  %5131 = vmatpush.msra.mxu3 %v12498_v11  ;;  %v15595_v11 = vmov %v15581_v28  ;;  %v9310_v16 = vld [vmem:[%s15136_s5 + $0x3e8] sm:$0xff] }
 0x611   :  { %4978 = vmatpush.msrb.mxu0 %v12600_v4  ;;  %5017 = vmatpush.msrb.mxu1 %v12527_v36 }
 0x612   :  { %5076 = vmatpush.msra.mxu2 %v15591_v13  ;;  %5133 = vmatpush.msra.mxu3 %v12506_v48  ;;  %v15594_v48 = vand.u32 4294901760, %v12571_v42  ;;  %v9309_v13 = vld [vmem:[%s15136_s5 + $0x3e0] sm:$0xff] }
 0x613   :  { %4981 = vmatpush.msrb.mxu0 %v12612_v54  ;;  %5019 = vmatpush.msrb.mxu1 %v12538_v37 }
 0x614   :  { %5080 = vmatpush.msra.mxu2 %v15592_v20  ;;  %5135 = vmatpush.msra.mxu3 %v12527_v36 }
 0x615   :  { %4984 = vmatpush.msrb.mxu0 %v12624_v31  ;;  %5021 = vmatpush.msrb.mxu1 %v12554_v21 }
 0x616   :  { %5084 = vmatpush.msra.mxu2 %v15593_v62  ;;  %5137 = vmatpush.msra.mxu3 %v12538_v37  ;;  %v12824_v62 = vsub.f32 %v5161_v60, %v12805_v56 }
 0x617   :  { %4754 = vmatmul.f32.gmra.mxu1 %v12471_v5  ;;  %4723 = vmatmul.f32.gmra.mxu0 %v12540_v61 }
 0x618   :  { %5088 = vmatpush.msra.mxu2 %v15594_v48  ;;  %5139 = vmatpush.msra.mxu3 %v12554_v21 }
 0x619   :  { %5023 = vmatpush.msrb.mxu1 %v12576_v41 }
 0x61a   :  { %5092 = vmatpush.msra.mxu2 %v15595_v11  ;;  %5141 = vmatpush.msra.mxu3 %v12576_v41 }
 0x61b   :  { %5025 = vmatpush.msrb.mxu1 %v12591_v1 }
 0x61c   :  { %5096 = vmatpush.msra.mxu2 %v15596_v59  ;;  %5143 = vmatpush.msra.mxu3 %v12591_v1  ;;  %v5164_v59 = vsel %vm539_vm1, %v9294_v25, 0 }
 0x61d   :  { %5027 = vmatpush.msrb.mxu1 %v12602_v10  ;;  %v12838_v60 = vand.u32 4294901760, %v5164_v59 }
 0x61e   :  { %5100 = vmatpush.msra.mxu2 %v4918_v27  ;;  %5145 = vmatpush.msra.mxu3 %v12602_v10 }
 0x61f   :  { %5147 = vmatmul.f32.vlgmr.msra.gmra.mxu3 %v15283_v55  ;;  %4758 = vmatmul.f32.gmra.mxu1 %v12540_v61 }
 0x620   :  { %5104 = vmatpush.msra.mxu2 %v4924_v50  ;;  %4987 = vmatmul.f32.vlgmr.msrb.gmra.mxu0 %v15308_v53 }
 0x621   :  { %5106 = vmatmul.f32.vlgmr.msra.gmra.mxu2 %v15283_v55 }
 0x627   :  { %5151 = vmatmul.f32.gmra.mxu3 %v15295_v35  ;;  %5031 = vmatmul.f32.vlgmr.msrb.gmra.mxu1 %v15309_v34 }
 0x628   :  { %4992 = vmatmul.f32.gmra.mxu0 %v9828_v49 }
 0x629   :  { %5110 = vmatmul.f32.gmra.mxu2 %v15295_v35 }
 0x62f   :  { %5037 = vmatmul.f32.gmra.mxu1 %v9846_v57 }
 0x659   :  { %v12750_v1 = vpop.f32.mrf.mxu0 }
 0x65a   :  { %15597 = vst [vmem:[#allocation141_spill] sm:$0xff] %v12750_v1 }
 0x660   :  { %v12762_v18 = vpop.f32.mrf.mxu3 }
 0x661   :  { %15603 = vst [vmem:[#allocation147_spill] sm:$0xff] %v12762_v18 }
 0x662   :  { %v12752_v54 = vpop.f32.mrf.mxu0  ;;  %v12754_v5 = vpop.f32.mrf.mxu1 }
 0x663   :  { %15598 = vst [vmem:[#allocation142_spill] sm:$0xff] %v12752_v54  ;;  %v12756_v19 = vpop.f32.mrf.mxu2 }
 0x664   :  { %15599 = vst [vmem:[#allocation143_spill] sm:$0xff] %v12754_v5 }
 0x665   :  { %15600 = vst [vmem:[#allocation144_spill] sm:$0xff] %v12756_v19 }
 0x669   :  { %v12770_v15 = vpop.f32.mrf.mxu3 }
 0x66a   :  { %15607 = vst [vmem:[#allocation151_spill] sm:$0xff] %v12770_v15 }
 0x66b   :  { %v12758_v51 = vpop.f32.mrf.mxu0  ;;  %v12760_v24 = vpop.f32.mrf.mxu1 }
 0x66c   :  { %15601 = vst [vmem:[#allocation145_spill] sm:$0xff] %v12758_v51  ;;  %v12768_v29 = vpop.f32.mrf.mxu2 }
 0x66d   :  { %15602 = vst [vmem:[#allocation146_spill] sm:$0xff] %v12760_v24 }
 0x66e   :  { %15606 = vst [vmem:[#allocation150_spill] sm:$0xff] %v12768_v29 }
 0x672   :  { %v12778_v41 = vpop.f32.mrf.mxu3 }
 0x673   :  { %v12764_v32 = vpop.f32.mrf.mxu0  ;;  %15611 = vst [vmem:[#allocation155_spill] sm:$0xff] %v12778_v41 }
 0x674   :  { %15604 = vst [vmem:[#allocation148_spill] sm:$0xff] %v12764_v32  ;;  %v12766_v8 = vpop.f32.mrf.mxu1  ;;  %v12776_v36 = vpop.f32.mrf.mxu2 }
 0x675   :  { %15605 = vst [vmem:[#allocation149_spill] sm:$0xff] %v12766_v8 }
 0x676   :  { %15610 = vst [vmem:[#allocation154_spill] sm:$0xff] %v12776_v36 }
 0x67a   :  { %v12786_v21 = vpop.f32.mrf.mxu3 }
 0x67b   :  { %15615 = vst [vmem:[#allocation159_spill] sm:$0xff] %v12786_v21 }
 0x67c   :  { %v12772_v38 = vpop.f32.mrf.mxu1  ;;  %v12774_v6 = vpop.f32.mrf.mxu0 }
 0x67d   :  { %15608 = vst [vmem:[#allocation152_spill] sm:$0xff] %v12772_v38  ;;  %v12784_v52 = vpop.f32.mrf.mxu2 }
 0x67e   :  { %15609 = vst [vmem:[#allocation153_spill] sm:$0xff] %v12774_v6 }
 0x67f   :  { %15614 = vst [vmem:[#allocation158_spill] sm:$0xff] %v12784_v52 }
 0x684   :  { %v12780_v37 = vpop.f32.mrf.mxu1  ;;  %v12782_v61 = vpop.f32.mrf.mxu0 }
 0x685   :  { %15612 = vst [vmem:[#allocation156_spill] sm:$0xff] %v12780_v37  ;;  %v4821_v23 = vpop.f32.mrf.mxu2  ;;  %v4930_v31 = vpop.f32.mrf.mxu3 }
 0x686   :  { %15613 = vst [vmem:[#allocation157_spill] sm:$0xff] %v12782_v61  ;;  %v4931_v50 = vadd.f32 %v4930_v31, %v4821_v23  ;;  %v12828_v23 = vsub.f32 %v9312_v44, %v12810_v46  ;;  %v12830_v31 = vand.u32 4294901760, %v9310_v16 }
 0x68c   :  { %v12788_v42 = vpop.f32.mrf.mxu1  ;;  %v12790_v4 = vpop.f32.mrf.mxu0 }
 0x68d   :  { %15616 = vst [vmem:[#allocation160_spill] sm:$0xff] %v12788_v42  ;;  %v4829_v3 = vpop.f32.mrf.mxu2  ;;  %v4934_v26 = vpop.f32.mrf.mxu3 }
 0x68e   :  { %15617 = vst [vmem:[#allocation161_spill] sm:$0xff] %v12790_v4  ;;  %v4935_v48 = vadd.f32 %v4934_v26, %v4829_v3  ;;  %v9308_v3 = vld [vmem:[%s15136_s5 + $0x3d8] sm:$0xff] }
 0x694   :  { %v12792_v10 = vpop.f32.mrf.mxu1  ;;  %v12794_v28 = vpop.f32.mrf.mxu0 }
 0x695   :  { %15618 = vst [vmem:[#allocation162_spill] sm:$0xff] %v12792_v10 }
 0x696   :  { %15619 = vst [vmem:[#allocation163_spill] sm:$0xff] %v12794_v28  ;;  %v15621_v28 = vand.u32 4294901760, %v12828_v23 }
 0x698   :  { %v5497_v21 = vsub.f32 %v12828_v23, %v15621_v28 }
 0x69c   :  { %v12796_v27 = vpop.f32.mrf.mxu1 }
 0x69d   :  { %15620 = vst [vmem:[#allocation164_spill] sm:$0xff] %v12796_v27  ;;  %v4988_v14 = vpop.f32.mrf.mxu0 }
 0x69e   :  { %v4989_v47 = vadd.f32 %v4988_v14, %v4931_v50  ;;  %v12832_v14 = vand.u32 4294901760, %v9309_v13  ;;  %v12835_v50 = vsub.f32 %v9311_v2, %v12815_v17  ;;  %v12863_v2 = vsub.f32 %v5164_v59, %v12838_v60 }
 0x6a0   :  { %v12853_v25 = vsub.f32 %v9309_v13, %v12832_v14  ;;  %v9306_v13 = vld [vmem:[%s15136_s5 + $0x3c8] sm:$0xff] }
 0x6a1   :  { %v12888_v37 = vand.u32 4294901760, %v9306_v13 }
 0x6a2   :  { %v5148_v0 = vpop.f32.mrf.mxu3  ;;  %v15624_v52 = vand.u32 4294901760, %v12853_v25 }
 0x6a4   :  { %v5107_v40 = vpop.f32.mrf.mxu2  ;;  %v5032_v22 = vpop.f32.mrf.mxu1  ;;  %v5515_v15 = vsub.f32 %v12853_v25, %v15624_v52 }
 0x6a5   :  { %v5033_v45 = vadd.f32 %v5032_v22, %v4989_v47  ;;  %v4993_v20 = vpop.f32.mrf.mxu0  ;;  %v9307_v22 = vld [vmem:[%s15136_s5 + $0x3d0] sm:$0xff] }
 0x6a6   :  { %v4994_v30 = vadd.f32 %v4993_v20, %v4935_v48  ;;  %v12856_v48 = vand.u32 4294901760, %v9308_v3  ;;  %v9305_v20 = vld [vmem:[%s15136_s5 + $0x3c0] sm:$0xff]  ;;  %v5516_v32 = vand.u32 4294901760, %v5515_v15 }
 0x6a7   :  { %v5108_v33 = vadd.f32 %v5107_v40, %v5033_v45  ;;  %v5192_v40 = vand.u32 4294901760, %v12824_v62  ;;  %v12894_v10 = vand.u32 4294901760, %v9305_v20 }
 0x6a9   :  { %v5149_v11 = vadd.f32 %v5148_v0, %v5108_v33  ;;  %v12850_v0 = vsub.f32 %v9310_v16, %v12830_v31  ;;  %v5193_v27 = vsub.f32 %v12824_v62, %v5192_v40  ;;  %v12865_v16 = vand.u32 4294901760, %v9307_v22 }
 0x6aa   :  { %v12924_v36 = vsub.f32 %v9305_v20, %v12894_v10  ;;  %v9302_v20 = vld [vmem:[%s15136_s5 + $0x3a8] sm:$0xff] }
 0x6ab   :  { %v12843_v44 = vand.u32 4294901760, %v5149_v11  ;;  %v5194_v61 = vand.u32 4294901760, %v5193_v27  ;;  %v12892_v59 = vsub.f32 %v9307_v22, %v12865_v16  ;;  %v9304_v27 = vld [vmem:[%s15136_s5 + $0x3b8] sm:$0xff]  ;;  %v15623_v28 = vand.u32 4294901760, %v12850_v0 }
 0x6ac   :  { %v5038_v47 = vpop.f32.mrf.mxu1  ;;  %v5111_v45 = vpop.f32.mrf.mxu2  ;;  %v12926_v29 = vand.u32 4294901760, %v9304_v27 }
 0x6ad   :  { %v5039_v26 = vadd.f32 %v5038_v47, %v4994_v30  ;;  %v9295_v30 = vld [vmem:[%s15137_s6 + $0xd0] sm:$0xff]  ;;  %v5152_v47 = vpop.f32.mrf.mxu3  ;;  %v5509_v22 = vsub.f32 %v12850_v0, %v15623_v28  ;;  %v15625_v28 = vand.u32 4294901760, %v12863_v2  ;;  %v15627_v15 = vand.u32 4294901760, %v12892_v59 }
 0x6ae   :  { %v5167_v42 = vsel %vm539_vm1, %v9295_v30, 0 }
 0x6af   :  { %v5112_v33 = vadd.f32 %v5111_v45, %v5039_v26  ;;  %v5244_v45 = vsub.f32 %v5149_v11, %v12843_v44  ;;  %v12899_v41 = vand.u32 4294901760, %v5167_v42  ;;  %v5201_v52 = vsub.f32 %v12863_v2, %v15625_v28 }
 0x6b0   :  { %v5510_v28 = vand.u32 4294901760, %v5509_v22  ;;  %v12955_v22 = vand.u32 4294901760, %v9302_v20 }
 0x6b1   :  { %v5153_v26 = vadd.f32 %v5152_v47, %v5112_v33  ;;  %v15622_v33 = vand.u32 4294901760, %v12835_v50  ;;  %v12886_v47 = vsub.f32 %v9308_v3, %v12856_v48  ;;  %v5498_v3 = vand.u32 4294901760, %v5497_v21 }
 0x6b2   :  { %v12916_v21 = vsub.f32 %v9306_v13, %v12888_v37 }
 0x6b3   :  { %v12880_v4 = vand.u32 4294901760, %v5153_v26  ;;  %v5503_v11 = vsub.f32 %v12835_v50, %v15622_v33  ;;  %v5245_v33 = vand.u32 4294901760, %v5244_v45 }
 0x6b5   :  { %5187 = vmatpush.msra.mxu0 %v12880_v4  ;;  %5322 = vmatpush.msrb.mxu3 %v12880_v4  ;;  %v5238_v30 = vsub.f32 %v5153_v26, %v12880_v4  ;;  %v9303_v26 = vld [vmem:[%s15136_s5 + $0x3b0] sm:$0xff]  ;;  %v5504_v18 = vand.u32 4294901760, %v5503_v11  ;;  %v9296_v11 = vld [vmem:[%s15137_s6 + $0xd8] sm:$0xff]  ;;  %v5246_v38 = vsub.f32 %v5244_v45, %v5245_v33 }
 0x6b6   :  { %v12934_v19 = vand.u32 4294901760, %v9303_v26  ;;  %v5170_v51 = vsel %vm539_vm1, %v9296_v11, 0 }
 0x6b7   :  { %5189 = vmatpush.msra.mxu0 %v12843_v44  ;;  %5282 = vmatpush.msrb.mxu2 %v5238_v30  ;;  %v5239_v6 = vand.u32 4294901760, %v5238_v30 }
 0x6b8   :  { %5324 = vmatpush.msrb.mxu3 %v12843_v44  ;;  %5195 = vmatmul.f32.vlgmr.msra.gmra.mxu0 %v5194_v61  ;;  %v12932_v61 = vsub.f32 %v5167_v42, %v12899_v41  ;;  %v12960_v42 = vsub.f32 %v9303_v26, %v12934_v19  ;;  %v9299_v26 = vld [vmem:[%s15136_s5 + $0x390] sm:$0xff] }
 0x6b9   :  { %5328 = vmatmul.f32.vlgmr.msrb.gmra.mxu3 %v5192_v40  ;;  %5285 = vmatpush.msrb.mxu2 %v5244_v45  ;;  %v5240_v13 = vsub.f32 %v5238_v30, %v5239_v6  ;;  %v15626_v40 = vand.u32 4294901760, %v12886_v47  ;;  %v9301_v30 = vld [vmem:[%s15136_s5 + $0x3a0] sm:$0xff] }
 0x6ba   :  { %5499 = vmatpush.msra.mxu3 %v5498_v3  ;;  %5367 = vmatpush.msrb.mxu0 %v5239_v6  ;;  %v5202_v6 = vand.u32 4294901760, %v5201_v52  ;;  %v12953_v3 = vsub.f32 %v9304_v27, %v12926_v29  ;;  %v15204_v11 = vand.u32 4294901760, %v12932_v61  ;;  %v12966_v27 = vand.u32 4294901760, %v9301_v30 }
 0x6bb   :  { %5288 = vmatmul.f32.vlgmr.msrb.gmra.mxu2 %v12824_v62  ;;  %v5241_v8 = vand.u32 4294901760, %v5240_v13  ;;  %v5521_v45 = vsub.f32 %v12886_v47, %v15626_v40  ;;  %v5527_v62 = vsub.f32 %v12892_v59, %v15627_v15  ;;  %v5247_v13 = vand.u32 4294901760, %v5246_v38 }
 0x6bc   :  { %5446 = vmatpush.msra.mxu2 %v12810_v46  ;;  %5505 = vmatpush.msra.mxu3 %v5504_v18  ;;  %v15203_v40 = vand.u32 4294901760, %v12924_v36  ;;  %v9300_v18 = vld [vmem:[%s15136_s5 + $0x398] sm:$0xff]  ;;  %v12968_v52 = vand.u32 4294901760, %v5170_v51  ;;  %v15628_v38 = vand.u32 4294901760, %v12916_v21  ;;  %v12980_v15 = vsub.f32 %v9302_v20, %v12955_v22  ;;  %v9298_v20 = vld [vmem:[%s15136_s5 + $0x388] sm:$0xff] }
 0x6bd   :  { %5371 = vmatpush.msrb.mxu0 %v5245_v33  ;;  %5242 = vmatpush.msra.mxu1 %v5241_v8  ;;  %v5522_v8 = vand.u32 4294901760, %v5521_v45  ;;  %v5528_v45 = vand.u32 4294901760, %v5527_v62  ;;  %v5209_v24 = vsub.f32 %v12932_v61, %v15204_v11  ;;  %v13019_v54 = vand.u32 4294901760, %v9298_v20 }
 0x6be   :  { %5448 = vmatpush.msra.mxu2 %v12815_v17  ;;  %5511 = vmatpush.msra.mxu3 %v5510_v28  ;;  %v5533_v33 = vsub.f32 %v12916_v21, %v15628_v38  ;;  %v5539_v38 = vsub.f32 %v12924_v36, %v15203_v40  ;;  %v15629_v28 = vand.u32 4294901760, %v12863_v2  ;;  %v13002_v62 = vsub.f32 %v5170_v51, %v12968_v52 }
 0x6bf   :  { %5248 = vmatpush.msra.mxu1 %v5247_v13  ;;  %5601 = vmatpush.msra.mxu0 %v12828_v23  ;;  %v12982_v13 = vand.u32 4294901760, %v9300_v18  ;;  %v13004_v40 = vand.u32 4294901760, %v9299_v26  ;;  %v13040_v5 = vsub.f32 %v9298_v20, %v13019_v54  ;;  %v15634_v1 = vand.u32 4294901760, %v12932_v61 }
 0x6c0   :  { %5450 = vmatpush.msra.mxu2 %v12830_v31  ;;  %5517 = vmatpush.msra.mxu3 %v5516_v32  ;;  %v5534_v11 = vand.u32 4294901760, %v5533_v33  ;;  %v9297_v32 = vld [vmem:[%s15136_s5 + $0x380] sm:$0xff]  ;;  %v5210_v33 = vand.u32 4294901760, %v5209_v24 }
 0x6c1   :  { %5203 = vmatmul.f32.gmra.mxu0 %v5202_v6  ;;  %5250 = vmatmul.f32.vlgmr.msra.gmra.mxu1 %v12805_v56  ;;  %v12999_v6 = vsub.f32 %v9301_v30, %v12966_v27  ;;  %v13028_v51 = vsub.f32 %v9299_v26, %v13004_v40 }
 0x6c2   :  { %5334 = vmatmul.f32.gmra.mxu3 %v15629_v28  ;;  %5404 = vmatpush.msrb.mxu1 %v12880_v4  ;;  %v15630_v4 = vand.u32 4294901760, %v12953_v3  ;;  %v13017_v28 = vsub.f32 %v9300_v18, %v12982_v13  ;;  %v13030_v18 = vand.u32 4294901760, %v9297_v32 }
 0x6c3   :  { %5452 = vmatpush.msra.mxu2 %v12832_v14  ;;  %5523 = vmatpush.msra.mxu3 %v5522_v8  ;;  %v5540_v8 = vand.u32 4294901760, %v5539_v38 }
 0x6c4   :  { %5293 = vmatmul.f32.gmra.mxu2 %v12863_v2  ;;  %5406 = vmatpush.msrb.mxu1 %v12843_v44  ;;  %v5545_v30 = vsub.f32 %v12953_v3, %v15630_v4  ;;  %v15631_v2 = vand.u32 4294901760, %v12960_v42  ;;  %v5216_v4 = vand.u32 4294901760, %v13002_v62 }
 0x6c5   :  { %5454 = vmatpush.msra.mxu2 %v12856_v48  ;;  %5529 = vmatpush.msra.mxu3 %v5528_v45  ;;  %v15632_v45 = vand.u32 4294901760, %v12980_v15 }
 0x6c6   :  { %v5551_v44 = vsub.f32 %v12960_v42, %v15631_v2  ;;  %5604 = vmatpush.msra.mxu0 %v12835_v50  ;;  %5659 = vmatpush.msra.mxu1 %v12810_v46  ;;  %v5546_v24 = vand.u32 4294901760, %v5545_v30  ;;  %v13052_v2 = vsub.f32 %v9297_v32, %v13030_v18 }
 0x6c7   :  { %5456 = vmatpush.msra.mxu2 %v12865_v16  ;;  %5535 = vmatpush.msra.mxu3 %v5534_v11  ;;  %v5557_v38 = vsub.f32 %v12980_v15, %v15632_v45  ;;  %v15633_v11 = vand.u32 4294901760, %v12999_v6  ;;  %v5217_v45 = vsub.f32 %v13002_v62, %v5216_v4 }
 0x6c8   :  { %5607 = vmatpush.msra.mxu0 %v12850_v0  ;;  %5661 = vmatpush.msra.mxu1 %v12815_v17  ;;  %v5552_v26 = vand.u32 4294901760, %v5551_v44 }
 0x6c9   :  { %5458 = vmatpush.msra.mxu2 %v12888_v37  ;;  %5541 = vmatpush.msra.mxu3 %v5540_v8  ;;  %v5563_v30 = vsub.f32 %v12999_v6, %v15633_v11  ;;  %v5558_v8 = vand.u32 4294901760, %v5557_v38  ;;  %v5580_v11 = vand.u32 4294901760, %v13040_v5  ;;  %v5218_v20 = vand.u32 4294901760, %v5217_v45 }
 0x6ca   :  { %5211 = vmatmul.f32.gmra.mxu0 %v5210_v33  ;;  %5254 = vmatmul.f32.gmra.mxu1 %v12838_v60  ;;  %v15635_v33 = vand.u32 4294901760, %v13017_v28 }
 0x6cb   :  { %5340 = vmatmul.f32.gmra.mxu3 %v15634_v1  ;;  %5460 = vmatpush.msra.mxu2 %v12894_v10  ;;  %v5564_v32 = vand.u32 4294901760, %v5563_v30  ;;  %v15636_v1 = vand.u32 4294901760, %v13028_v51 }
 0x6cc   :  { %5547 = vmatpush.msra.mxu3 %v5546_v24  ;;  %5298 = vmatmul.f32.gmra.mxu2 %v12932_v61  ;;  %v5569_v44 = vsub.f32 %v13017_v28, %v15635_v33  ;;  %v5586_v61 = vand.u32 4294901760, %v13052_v2 }
 0x6cd   :  { %5462 = vmatpush.msra.mxu2 %v12926_v29  ;;  %5610 = vmatpush.msra.mxu0 %v12853_v25  ;;  %v5575_v24 = vsub.f32 %v13028_v51, %v15636_v1 }
 0x6ce   :  { %5553 = vmatpush.msra.mxu3 %v5552_v26  ;;  %5663 = vmatpush.msra.mxu1 %v12830_v31  ;;  %v5570_v38 = vand.u32 4294901760, %v5569_v44  ;;  %v5581_v26 = vsub.f32 %v13040_v5, %v5580_v11  ;;  %v5587_v45 = vsub.f32 %v13052_v2, %v5586_v61 }
 0x6cf   :  { %5464 = vmatpush.msra.mxu2 %v12934_v19  ;;  %5613 = vmatpush.msra.mxu0 %v12886_v47  ;;  %v5576_v30 = vand.u32 4294901760, %v5575_v24  ;;  %v9313_v24 = vld [vmem:[%s15137_s6 + $0xe0] sm:$0xff] }
 0x6d0   :  { %5559 = vmatpush.msra.mxu3 %v5558_v8  ;;  %5665 = vmatpush.msra.mxu1 %v12832_v14  ;;  %v5582_v8 = vand.u32 4294901760, %v5581_v26 }
 0x6d1   :  { %5466 = vmatpush.msra.mxu2 %v12955_v22  ;;  %5616 = vmatpush.msra.mxu0 %v12892_v59 }
 0x6d2   :  { %5565 = vmatpush.msra.mxu3 %v5564_v32  ;;  %5219 = vmatmul.f32.gmra.mxu0 %v5218_v20  ;;  %v5588_v20 = vand.u32 4294901760, %v5587_v45 }
 0x6d3   :  { %5258 = vmatmul.f32.gmra.mxu1 %v12899_v41  ;;  %5346 = vmatmul.f32.gmra.mxu3 %v5216_v4  ;;  %v15638_v4 = vand.u32 4294901760, %v12835_v50  ;;  %v15650_v50 = vmov %v15636_v1 }
 0x6d4   :  { %5468 = vmatpush.msra.mxu2 %v12966_v27  ;;  %5571 = vmatpush.msra.mxu3 %v5570_v38  ;;  %v5823_v38 = vsel %vm539_vm1, %v9313_v24, 0 }
 0x6d5   :  { %5303 = vmatmul.f32.gmra.mxu2 %v13002_v62  ;;  %5619 = vmatpush.msra.mxu0 %v12916_v21  ;;  %v15637_v62 = vand.u32 4294901760, %v12828_v23  ;;  %v15641_v23 = vand.u32 4294901760, %v12886_v47 }
 0x6d6   :  { %5470 = vmatpush.msra.mxu2 %v12982_v13  ;;  %5577 = vmatpush.msra.mxu3 %v5576_v30  ;;  %v9332_v30 = vld [vmem:[%s15136_s5 + $0x478] sm:$0xff] }
 0x6d7   :  { %5622 = vmatpush.msra.mxu0 %v12924_v36  ;;  %5667 = vmatpush.msra.mxu1 %v12856_v48 }
 0x6d8   :  { %5472 = vmatpush.msra.mxu2 %v13004_v40  ;;  %5583 = vmatpush.msra.mxu3 %v5582_v8 }
 0x6d9   :  { %5625 = vmatpush.msra.mxu0 %v12953_v3  ;;  %5669 = vmatpush.msra.mxu1 %v12865_v16 }
 0x6da   :  { %5474 = vmatpush.msra.mxu2 %v13019_v54  ;;  %5589 = vmatpush.msra.mxu3 %v5588_v20  ;;  %v13233_v20 = vand.u32 4294901760, %v5823_v38 }
 0x6db   :  { %5262 = vmatmul.f32.gmra.mxu1 %v12968_v52  ;;  %5373 = vmatmul.f32.vlgmr.msrb.gmra.mxu0 %v12805_v56 }
 0x6dc   :  { %5777 = vmatpush.msrb.mxu3 %v12810_v46  ;;  %5476 = vmatpush.msra.mxu2 %v13030_v18  ;;  %v15639_v46 = vand.u32 4294901760, %v12850_v0 }
 0x6dd   :  { %5591 = vmatmul.f32.vlgmr.msra.gmra.mxu3 %v15283_v55  ;;  %5482 = vmatmul.f32.vlgmr.msra.gmra.mxu2 %v15285_v9 }
 0x6de   :  { %5706 = vmatpush.msrb.mxu2 %v15637_v62  ;;  %5779 = vmatpush.msrb.mxu3 %v12815_v17  ;;  %v15640_v17 = vand.u32 4294901760, %v12853_v25  ;;  %v9331_v62 = vld [vmem:[%s15136_s5 + $0x470] sm:$0xff] }
 0x6df   :  { %5628 = vmatpush.msra.mxu0 %v12960_v42  ;;  %5671 = vmatpush.msra.mxu1 %v12888_v37 }
 0x6e0   :  { %5710 = vmatpush.msrb.mxu2 %v15638_v4  ;;  %5781 = vmatpush.msrb.mxu3 %v12830_v31  ;;  %v15642_v31 = vand.u32 4294901760, %v12892_v59 }
 0x6e1   :  { %5631 = vmatpush.msra.mxu0 %v12980_v15  ;;  %5673 = vmatpush.msra.mxu1 %v12894_v10 }
 0x6e2   :  { %5714 = vmatpush.msrb.mxu2 %v15639_v46  ;;  %5783 = vmatpush.msrb.mxu3 %v12832_v14  ;;  %v15644_v14 = vand.u32 4294901760, %v12924_v36  ;;  %v15649_v36 = vmov %v15635_v33 }
 0x6e3   :  { %5408 = vmatmul.f32.vlgmr.msrb.gmra.mxu1 %v12805_v56  ;;  %5377 = vmatmul.f32.gmra.mxu0 %v12838_v60  ;;  %v15643_v56 = vand.u32 4294901760, %v12916_v21 }
 0x6e4   :  { %5718 = vmatpush.msrb.mxu2 %v15640_v17  ;;  %5785 = vmatpush.msrb.mxu3 %v12856_v48  ;;  %v13238_v17 = vand.u32 4294901760, %v9332_v30 }
 0x6e5   :  { %5595 = vmatmul.f32.gmra.mxu3 %v15295_v35  ;;  %5490 = vmatmul.f32.gmra.mxu2 %v15297_v43 }
 0x6e6   :  { %5722 = vmatpush.msrb.mxu2 %v15641_v23  ;;  %5787 = vmatpush.msrb.mxu3 %v12865_v16  ;;  %v9314_v23 = vld [vmem:[%s15137_s6 + $0xe8] sm:$0xff] }
 0x6e7   :  { %5634 = vmatpush.msra.mxu0 %v12999_v6  ;;  %5675 = vmatpush.msra.mxu1 %v12926_v29 }
 0x6e8   :  { %5726 = vmatpush.msrb.mxu2 %v15642_v31  ;;  %5789 = vmatpush.msrb.mxu3 %v12888_v37  ;;  %v15645_v37 = vand.u32 4294901760, %v12953_v3 }
 0x6e9   :  { %5637 = vmatpush.msra.mxu0 %v13017_v28  ;;  %5677 = vmatpush.msra.mxu1 %v12934_v19 }
 0x6ea   :  { %5730 = vmatpush.msrb.mxu2 %v15643_v56  ;;  %5791 = vmatpush.msrb.mxu3 %v12894_v10  ;;  %v15646_v10 = vand.u32 4294901760, %v12960_v42  ;;  %v13243_v56 = vand.u32 4294901760, %v9331_v62 }
 0x6eb   :  { %5412 = vmatmul.f32.gmra.mxu1 %v12838_v60  ;;  %5381 = vmatmul.f32.gmra.mxu0 %v12899_v41 }
 0x6ec   :  { %5734 = vmatpush.msrb.mxu2 %v15644_v14  ;;  %5793 = vmatpush.msrb.mxu3 %v12926_v29  ;;  %v15647_v29 = vand.u32 4294901760, %v12980_v15  ;;  %v9330_v14 = vld [vmem:[%s15136_s5 + $0x468] sm:$0xff] }
 0x6ed   :  { %5640 = vmatpush.msra.mxu0 %v13028_v51  ;;  %5679 = vmatpush.msra.mxu1 %v12955_v22 }
 0x6ee   :  { %5738 = vmatpush.msrb.mxu2 %v15645_v37  ;;  %5795 = vmatpush.msrb.mxu3 %v12934_v19  ;;  %v15648_v19 = vand.u32 4294901760, %v12999_v6  ;;  %v9329_v37 = vld [vmem:[%s15136_s5 + $0x460] sm:$0xff] }
 0x6ef   :  { %5643 = vmatpush.msra.mxu0 %v13040_v5  ;;  %5681 = vmatpush.msra.mxu1 %v12966_v27 }
 0x6f0   :  { %5742 = vmatpush.msrb.mxu2 %v15646_v10  ;;  %5797 = vmatpush.msrb.mxu3 %v12955_v22 }
 0x6f1   :  { %5646 = vmatpush.msra.mxu0 %v13052_v2  ;;  %5683 = vmatpush.msra.mxu1 %v12982_v13 }
 0x6f2   :  { %5746 = vmatpush.msrb.mxu2 %v15647_v29  ;;  %5799 = vmatpush.msrb.mxu3 %v12966_v27  ;;  %v13252_v29 = vsub.f32 %v5823_v38, %v13233_v20 }
 0x6f3   :  { %5416 = vmatmul.f32.gmra.mxu1 %v12899_v41  ;;  %5385 = vmatmul.f32.gmra.mxu0 %v12968_v52 }
 0x6f4   :  { %5750 = vmatpush.msrb.mxu2 %v15648_v19  ;;  %5801 = vmatpush.msrb.mxu3 %v12982_v13 }
 0x6f5   :  { %5685 = vmatpush.msra.mxu1 %v13004_v40 }
 0x6f6   :  { %5754 = vmatpush.msrb.mxu2 %v15649_v36  ;;  %5803 = vmatpush.msrb.mxu3 %v13004_v40 }
 0x6f7   :  { %5687 = vmatpush.msra.mxu1 %v13019_v54 }
 0x6f8   :  { %5758 = vmatpush.msrb.mxu2 %v15650_v50  ;;  %5805 = vmatpush.msrb.mxu3 %v13019_v54  ;;  %v5826_v50 = vsel %vm539_vm1, %v9314_v23, 0 }
 0x6f9   :  { %5689 = vmatpush.msra.mxu1 %v13030_v18  ;;  %v13266_v38 = vand.u32 4294901760, %v5826_v50 }
 0x6fa   :  { %5762 = vmatpush.msrb.mxu2 %v5580_v11  ;;  %5807 = vmatpush.msrb.mxu3 %v13030_v18 }
 0x6fb   :  { %5809 = vmatmul.f32.vlgmr.msrb.gmra.mxu3 %v15283_v55  ;;  %5420 = vmatmul.f32.gmra.mxu1 %v12968_v52 }
 0x6fc   :  { %5766 = vmatpush.msrb.mxu2 %v5586_v61  ;;  %5649 = vmatmul.f32.vlgmr.msra.gmra.mxu0 %v15308_v53 }
 0x6fd   :  { %5768 = vmatmul.f32.vlgmr.msrb.gmra.mxu2 %v15283_v55 }
 0x703   :  { %5813 = vmatmul.f32.gmra.mxu3 %v15295_v35  ;;  %5693 = vmatmul.f32.vlgmr.msra.gmra.mxu1 %v15309_v34 }
 0x704   :  { %5654 = vmatmul.f32.gmra.mxu0 %v9828_v49 }
 0x705   :  { %5772 = vmatmul.f32.gmra.mxu2 %v15295_v35 }
 0x70b   :  { %5699 = vmatmul.f32.gmra.mxu1 %v9846_v57 }
 0x735   :  { %v13178_v54 = vpop.f32.mrf.mxu0 }
 0x736   :  { %15651 = vst [vmem:[#allocation165_spill] sm:$0xff] %v13178_v54 }
 0x73c   :  { %v13190_v48 = vpop.f32.mrf.mxu3 }
 0x73d   :  { %15657 = vst [vmem:[#allocation171_spill] sm:$0xff] %v13190_v48 }
 0x73e   :  { %v13180_v5 = vpop.f32.mrf.mxu0  ;;  %v13182_v41 = vpop.f32.mrf.mxu1 }
 0x73f   :  { %15652 = vst [vmem:[#allocation166_spill] sm:$0xff] %v13180_v5  ;;  %v13184_v60 = vpop.f32.mrf.mxu2 }
 0x740   :  { %15653 = vst [vmem:[#allocation167_spill] sm:$0xff] %v13182_v41 }
 0x741   :  { %15654 = vst [vmem:[#allocation168_spill] sm:$0xff] %v13184_v60 }
 0x745   :  { %v13198_v21 = vpop.f32.mrf.mxu3 }
 0x746   :  { %15661 = vst [vmem:[#allocation175_spill] sm:$0xff] %v13198_v21 }
 0x747   :  { %v13186_v0 = vpop.f32.mrf.mxu0  ;;  %v13188_v25 = vpop.f32.mrf.mxu1 }
 0x748   :  { %15655 = vst [vmem:[#allocation169_spill] sm:$0xff] %v13186_v0  ;;  %v13196_v47 = vpop.f32.mrf.mxu2 }
 0x749   :  { %15656 = vst [vmem:[#allocation170_spill] sm:$0xff] %v13188_v25 }
 0x74a   :  { %15660 = vst [vmem:[#allocation174_spill] sm:$0xff] %v13196_v47 }
 0x74e   :  { %v13206_v40 = vpop.f32.mrf.mxu3 }
 0x74f   :  { %v13192_v16 = vpop.f32.mrf.mxu0  ;;  %15665 = vst [vmem:[#allocation179_spill] sm:$0xff] %v13206_v40 }
 0x750   :  { %15658 = vst [vmem:[#allocation172_spill] sm:$0xff] %v13192_v16  ;;  %v13194_v59 = vpop.f32.mrf.mxu1  ;;  %v13204_v22 = vpop.f32.mrf.mxu2 }
 0x751   :  { %15659 = vst [vmem:[#allocation173_spill] sm:$0xff] %v13194_v59 }
 0x752   :  { %15664 = vst [vmem:[#allocation178_spill] sm:$0xff] %v13204_v22 }
 0x756   :  { %v13214_v13 = vpop.f32.mrf.mxu3 }
 0x757   :  { %15669 = vst [vmem:[#allocation183_spill] sm:$0xff] %v13214_v13 }
 0x758   :  { %v13200_v42 = vpop.f32.mrf.mxu1  ;;  %v13202_v3 = vpop.f32.mrf.mxu0 }
 0x759   :  { %15662 = vst [vmem:[#allocation176_spill] sm:$0xff] %v13200_v42  ;;  %v13212_v15 = vpop.f32.mrf.mxu2 }
 0x75a   :  { %15663 = vst [vmem:[#allocation177_spill] sm:$0xff] %v13202_v3 }
 0x75b   :  { %15668 = vst [vmem:[#allocation182_spill] sm:$0xff] %v13212_v15 }
 0x760   :  { %v13208_v27 = vpop.f32.mrf.mxu1  ;;  %v13210_v52 = vpop.f32.mrf.mxu0 }
 0x761   :  { %15666 = vst [vmem:[#allocation180_spill] sm:$0xff] %v13208_v27  ;;  %v5483_v28 = vpop.f32.mrf.mxu2  ;;  %v5592_v2 = vpop.f32.mrf.mxu3 }
 0x762   :  { %15667 = vst [vmem:[#allocation181_spill] sm:$0xff] %v13210_v52  ;;  %v5593_v61 = vadd.f32 %v5592_v2, %v5483_v28  ;;  %v13256_v28 = vsub.f32 %v9332_v30, %v13238_v17  ;;  %v13258_v2 = vand.u32 4294901760, %v9330_v14 }
 0x768   :  { %v13216_v6 = vpop.f32.mrf.mxu1  ;;  %v13218_v51 = vpop.f32.mrf.mxu0 }
 0x769   :  { %15670 = vst [vmem:[#allocation184_spill] sm:$0xff] %v13216_v6  ;;  %v5491_v44 = vpop.f32.mrf.mxu2  ;;  %v5596_v32 = vpop.f32.mrf.mxu3 }
 0x76a   :  { %15671 = vst [vmem:[#allocation185_spill] sm:$0xff] %v13218_v51  ;;  %v5597_v19 = vadd.f32 %v5596_v32, %v5491_v44  ;;  %v9328_v44 = vld [vmem:[%s15136_s5 + $0x458] sm:$0xff] }
 0x770   :  { %v13220_v18 = vpop.f32.mrf.mxu1  ;;  %v13222_v33 = vpop.f32.mrf.mxu0 }
 0x771   :  { %15672 = vst [vmem:[#allocation186_spill] sm:$0xff] %v13220_v18 }
 0x772   :  { %15673 = vst [vmem:[#allocation187_spill] sm:$0xff] %v13222_v33  ;;  %v15675_v33 = vand.u32 4294901760, %v13256_v28 }
 0x774   :  { %v6159_v13 = vsub.f32 %v13256_v28, %v15675_v33 }
 0x778   :  { %v13224_v11 = vpop.f32.mrf.mxu1 }
 0x779   :  { %15674 = vst [vmem:[#allocation188_spill] sm:$0xff] %v13224_v11  ;;  %v5650_v1 = vpop.f32.mrf.mxu0 }
 0x77a   :  { %v5651_v26 = vadd.f32 %v5650_v1, %v5593_v61  ;;  %v13260_v1 = vand.u32 4294901760, %v9329_v37  ;;  %v13263_v61 = vsub.f32 %v9331_v62, %v13243_v56  ;;  %v13291_v62 = vsub.f32 %v5826_v50, %v13266_v38 }
 0x77c   :  { %v13281_v23 = vsub.f32 %v9329_v37, %v13260_v1  ;;  %v9326_v37 = vld [vmem:[%s15136_s5 + $0x448] sm:$0xff] }
 0x77d   :  { %v13316_v51 = vand.u32 4294901760, %v9326_v37 }
 0x77e   :  { %v5810_v46 = vpop.f32.mrf.mxu3  ;;  %v15678_v3 = vand.u32 4294901760, %v13281_v23 }
 0x780   :  { %v5769_v45 = vpop.f32.mrf.mxu2  ;;  %v5694_v8 = vpop.f32.mrf.mxu1  ;;  %v6177_v52 = vsub.f32 %v13281_v23, %v15678_v3 }
 0x781   :  { %v5695_v4 = vadd.f32 %v5694_v8, %v5651_v26  ;;  %v5655_v10 = vpop.f32.mrf.mxu0  ;;  %v9327_v8 = vld [vmem:[%s15136_s5 + $0x450] sm:$0xff] }
 0x782   :  { %v5656_v24 = vadd.f32 %v5655_v10, %v5597_v19  ;;  %v13284_v19 = vand.u32 4294901760, %v9328_v44  ;;  %v9325_v10 = vld [vmem:[%s15136_s5 + $0x440] sm:$0xff]  ;;  %v6178_v21 = vand.u32 4294901760, %v6177_v52 }
 0x783   :  { %v5770_v31 = vadd.f32 %v5769_v45, %v5695_v4  ;;  %v5854_v45 = vand.u32 4294901760, %v13252_v29  ;;  %v13322_v18 = vand.u32 4294901760, %v9325_v10 }
 0x785   :  { %v5811_v36 = vadd.f32 %v5810_v46, %v5770_v31  ;;  %v13278_v46 = vsub.f32 %v9330_v14, %v13258_v2  ;;  %v5855_v11 = vsub.f32 %v13252_v29, %v5854_v45  ;;  %v13293_v14 = vand.u32 4294901760, %v9327_v8 }
 0x786   :  { %v13352_v22 = vsub.f32 %v9325_v10, %v13322_v18  ;;  %v9322_v10 = vld [vmem:[%s15136_s5 + $0x428] sm:$0xff] }
 0x787   :  { %v13271_v30 = vand.u32 4294901760, %v5811_v36  ;;  %v5856_v6 = vand.u32 4294901760, %v5855_v11  ;;  %v13320_v50 = vsub.f32 %v9327_v8, %v13293_v14  ;;  %v9324_v11 = vld [vmem:[%s15136_s5 + $0x438] sm:$0xff]  ;;  %v15677_v33 = vand.u32 4294901760, %v13278_v46 }
 0x788   :  { %v5700_v26 = vpop.f32.mrf.mxu1  ;;  %v5773_v4 = vpop.f32.mrf.mxu2  ;;  %v13354_v60 = vand.u32 4294901760, %v9324_v11 }
 0x789   :  { %v5701_v32 = vadd.f32 %v5700_v26, %v5656_v24  ;;  %v9315_v24 = vld [vmem:[%s15137_s6 + $0xf0] sm:$0xff]  ;;  %v5814_v26 = vpop.f32.mrf.mxu3  ;;  %v6171_v8 = vsub.f32 %v13278_v46, %v15677_v33  ;;  %v15679_v33 = vand.u32 4294901760, %v13291_v62  ;;  %v15681_v52 = vand.u32 4294901760, %v13320_v50 }
 0x78a   :  { %v5829_v27 = vsel %vm539_vm1, %v9315_v24, 0 }
 0x78b   :  { %v5774_v31 = vadd.f32 %v5773_v4, %v5701_v32  ;;  %v5906_v4 = vsub.f32 %v5811_v36, %v13271_v30  ;;  %v13327_v40 = vand.u32 4294901760, %v5829_v27  ;;  %v5863_v3 = vsub.f32 %v13291_v62, %v15679_v33 }
 0x78c   :  { %v6172_v33 = vand.u32 4294901760, %v6171_v8  ;;  %v13383_v8 = vand.u32 4294901760, %v9322_v10 }
 0x78d   :  { %v5815_v32 = vadd.f32 %v5814_v26, %v5774_v31  ;;  %v15676_v31 = vand.u32 4294901760, %v13263_v61  ;;  %v13314_v26 = vsub.f32 %v9328_v44, %v13284_v19  ;;  %v6160_v44 = vand.u32 4294901760, %v6159_v13 }
 0x78e   :  { %v13344_v13 = vsub.f32 %v9326_v37, %v13316_v51 }
 0x78f   :  { %v13308_v15 = vand.u32 4294901760, %v5815_v32  ;;  %v6165_v36 = vsub.f32 %v13263_v61, %v15676_v31  ;;  %v5907_v31 = vand.u32 4294901760, %v5906_v4 }
 0x791   :  { %5849 = vmatpush.msrb.mxu0 %v13308_v15  ;;  %5984 = vmatpush.msra.mxu3 %v13308_v15  ;;  %v5900_v24 = vsub.f32 %v5815_v32, %v13308_v15  ;;  %v9323_v32 = vld [vmem:[%s15136_s5 + $0x430] sm:$0xff]  ;;  %v6166_v16 = vand.u32 4294901760, %v6165_v36  ;;  %v9316_v36 = vld [vmem:[%s15137_s6 + $0xf8] sm:$0xff]  ;;  %v5908_v48 = vsub.f32 %v5906_v4, %v5907_v31 }
 0x792   :  { %v13362_v47 = vand.u32 4294901760, %v9323_v32  ;;  %v5832_v0 = vsel %vm539_vm1, %v9316_v36, 0 }
 0x793   :  { %5851 = vmatpush.msrb.mxu0 %v13271_v30  ;;  %5944 = vmatpush.msra.mxu2 %v5900_v24  ;;  %v5901_v42 = vand.u32 4294901760, %v5900_v24 }
 0x794   :  { %5986 = vmatpush.msra.mxu3 %v13271_v30  ;;  %5857 = vmatmul.f32.vlgmr.msrb.gmra.mxu0 %v5856_v6  ;;  %v13360_v6 = vsub.f32 %v5829_v27, %v13327_v40  ;;  %v13388_v27 = vsub.f32 %v9323_v32, %v13362_v47  ;;  %v9319_v32 = vld [vmem:[%s15136_s5 + $0x410] sm:$0xff] }
 0x795   :  { %5990 = vmatmul.f32.vlgmr.msra.gmra.mxu3 %v5854_v45  ;;  %5947 = vmatpush.msra.mxu2 %v5906_v4  ;;  %v5902_v37 = vsub.f32 %v5900_v24, %v5901_v42  ;;  %v15680_v45 = vand.u32 4294901760, %v13314_v26  ;;  %v9321_v24 = vld [vmem:[%s15136_s5 + $0x420] sm:$0xff] }
 0x796   :  { %6161 = vmatpush.msrb.mxu3 %v6160_v44  ;;  %6029 = vmatpush.msra.mxu0 %v5901_v42  ;;  %v5864_v42 = vand.u32 4294901760, %v5863_v3  ;;  %v13381_v44 = vsub.f32 %v9324_v11, %v13354_v60  ;;  %v15206_v36 = vand.u32 4294901760, %v13360_v6  ;;  %v13394_v11 = vand.u32 4294901760, %v9321_v24 }
 0x797   :  { %5950 = vmatmul.f32.vlgmr.msra.gmra.mxu2 %v13252_v29  ;;  %v5903_v59 = vand.u32 4294901760, %v5902_v37  ;;  %v6183_v4 = vsub.f32 %v13314_v26, %v15680_v45  ;;  %v6189_v29 = vsub.f32 %v13320_v50, %v15681_v52  ;;  %v5909_v37 = vand.u32 4294901760, %v5908_v48 }
 0x798   :  { %6108 = vmatpush.msrb.mxu2 %v13238_v17  ;;  %6167 = vmatpush.msrb.mxu3 %v6166_v16  ;;  %v15205_v45 = vand.u32 4294901760, %v13352_v22  ;;  %v9320_v16 = vld [vmem:[%s15136_s5 + $0x418] sm:$0xff]  ;;  %v13396_v3 = vand.u32 4294901760, %v5832_v0  ;;  %v13408_v52 = vsub.f32 %v9322_v10, %v13383_v8  ;;  %v5871_v41 = vsub.f32 %v13360_v6, %v15206_v36  ;;  %v9318_v10 = vld [vmem:[%s15136_s5 + $0x408] sm:$0xff] }
 0x799   :  { %6033 = vmatpush.msra.mxu0 %v5907_v31  ;;  %5904 = vmatpush.msrb.mxu1 %v5903_v59  ;;  %v6184_v48 = vand.u32 4294901760, %v6183_v4  ;;  %v15682_v59 = vand.u32 4294901760, %v13344_v13  ;;  %v6190_v4 = vand.u32 4294901760, %v6189_v29  ;;  %v13447_v54 = vand.u32 4294901760, %v9318_v10 }
 0x79a   :  { %6110 = vmatpush.msrb.mxu2 %v13243_v56  ;;  %6173 = vmatpush.msrb.mxu3 %v6172_v33  ;;  %v15683_v33 = vand.u32 4294901760, %v13291_v62  ;;  %v13430_v29 = vsub.f32 %v5832_v0, %v13396_v3  ;;  %v15688_v5 = vand.u32 4294901760, %v13360_v6 }
 0x79b   :  { %5910 = vmatpush.msrb.mxu1 %v5909_v37  ;;  %v6195_v31 = vsub.f32 %v13344_v13, %v15682_v59  ;;  %6263 = vmatpush.msrb.mxu0 %v13256_v28  ;;  %v13410_v37 = vand.u32 4294901760, %v9320_v16  ;;  %v6201_v59 = vsub.f32 %v13352_v22, %v15205_v45  ;;  %v13432_v45 = vand.u32 4294901760, %v9319_v32 }
 0x79c   :  { %6112 = vmatpush.msrb.mxu2 %v13258_v2  ;;  %6179 = vmatpush.msrb.mxu3 %v6178_v21  ;;  %v9317_v21 = vld [vmem:[%s15136_s5 + $0x400] sm:$0xff]  ;;  %v13468_v25 = vsub.f32 %v9318_v10, %v13447_v54 }
 0x79d   :  { %5865 = vmatmul.f32.gmra.mxu0 %v5864_v42  ;;  %5912 = vmatmul.f32.vlgmr.msrb.gmra.mxu1 %v13233_v20  ;;  %v13427_v42 = vsub.f32 %v9321_v24, %v13394_v11  ;;  %v6196_v36 = vand.u32 4294901760, %v6195_v31  ;;  %v5872_v31 = vand.u32 4294901760, %v5871_v41  ;;  %v13456_v0 = vsub.f32 %v9319_v32, %v13432_v45 }
 0x79e   :  { %5996 = vmatmul.f32.gmra.mxu3 %v15683_v33  ;;  %6066 = vmatpush.msra.mxu1 %v13308_v15  ;;  %v15684_v15 = vand.u32 4294901760, %v13381_v44  ;;  %v13445_v33 = vsub.f32 %v9320_v16, %v13410_v37  ;;  %v13458_v16 = vand.u32 4294901760, %v9317_v21 }
 0x79f   :  { %6114 = vmatpush.msrb.mxu2 %v13260_v1  ;;  %6185 = vmatpush.msrb.mxu3 %v6184_v48  ;;  %v6202_v48 = vand.u32 4294901760, %v6201_v59 }
 0x7a0   :  { %5955 = vmatmul.f32.gmra.mxu2 %v13291_v62  ;;  %6068 = vmatpush.msra.mxu1 %v13271_v30  ;;  %v6207_v24 = vsub.f32 %v13381_v44, %v15684_v15  ;;  %v15685_v62 = vand.u32 4294901760, %v13388_v27  ;;  %v5878_v15 = vand.u32 4294901760, %v13430_v29 }
 0x7a1   :  { %6116 = vmatpush.msrb.mxu2 %v13284_v19  ;;  %6191 = vmatpush.msrb.mxu3 %v6190_v4  ;;  %v15686_v4 = vand.u32 4294901760, %v13408_v52 }
 0x7a2   :  { %v6213_v30 = vsub.f32 %v13388_v27, %v15685_v62  ;;  %6266 = vmatpush.msrb.mxu0 %v13263_v61  ;;  %6321 = vmatpush.msrb.mxu1 %v13238_v17  ;;  %v6208_v41 = vand.u32 4294901760, %v6207_v24  ;;  %v13480_v62 = vsub.f32 %v9317_v21, %v13458_v16 }
 0x7a3   :  { %6118 = vmatpush.msrb.mxu2 %v13293_v14  ;;  %6197 = vmatpush.msrb.mxu3 %v6196_v36  ;;  %v6219_v59 = vsub.f32 %v13408_v52, %v15686_v4  ;;  %v15687_v36 = vand.u32 4294901760, %v13427_v42  ;;  %v5879_v4 = vsub.f32 %v13430_v29, %v5878_v15 }
 0x7a4   :  { %6269 = vmatpush.msrb.mxu0 %v13278_v46  ;;  %6323 = vmatpush.msrb.mxu1 %v13243_v56  ;;  %v6214_v32 = vand.u32 4294901760, %v6213_v30 }
 0x7a5   :  { %6120 = vmatpush.msrb.mxu2 %v13316_v51  ;;  %6203 = vmatpush.msrb.mxu3 %v6202_v48  ;;  %v6225_v24 = vsub.f32 %v13427_v42, %v15687_v36  ;;  %v6220_v48 = vand.u32 4294901760, %v6219_v59  ;;  %v6242_v36 = vand.u32 4294901760, %v13468_v25  ;;  %v5880_v10 = vand.u32 4294901760, %v5879_v4 }
 0x7a6   :  { %5873 = vmatmul.f32.gmra.mxu0 %v5872_v31  ;;  %5916 = vmatmul.f32.gmra.mxu1 %v13266_v38  ;;  %v15689_v31 = vand.u32 4294901760, %v13445_v33 }
 0x7a7   :  { %6002 = vmatmul.f32.gmra.mxu3 %v15688_v5  ;;  %6122 = vmatpush.msrb.mxu2 %v13322_v18  ;;  %v6226_v21 = vand.u32 4294901760, %v6225_v24  ;;  %v15690_v5 = vand.u32 4294901760, %v13456_v0 }
 0x7a8   :  { %6209 = vmatpush.msrb.mxu3 %v6208_v41  ;;  %5960 = vmatmul.f32.gmra.mxu2 %v13360_v6  ;;  %v6231_v30 = vsub.f32 %v13445_v33, %v15689_v31  ;;  %v6248_v6 = vand.u32 4294901760, %v13480_v62 }
 0x7a9   :  { %6124 = vmatpush.msrb.mxu2 %v13354_v60  ;;  %6272 = vmatpush.msrb.mxu0 %v13281_v23  ;;  %v6237_v41 = vsub.f32 %v13456_v0, %v15690_v5 }
 0x7aa   :  { %6215 = vmatpush.msrb.mxu3 %v6214_v32  ;;  %6325 = vmatpush.msrb.mxu1 %v13258_v2  ;;  %v6232_v59 = vand.u32 4294901760, %v6231_v30  ;;  %v6243_v32 = vsub.f32 %v13468_v25, %v6242_v36  ;;  %v6249_v4 = vsub.f32 %v13480_v62, %v6248_v6 }
 0x7ab   :  { %6126 = vmatpush.msrb.mxu2 %v13362_v47  ;;  %6275 = vmatpush.msrb.mxu0 %v13314_v26  ;;  %v6238_v24 = vand.u32 4294901760, %v6237_v41 }
 0x7ac   :  { %6221 = vmatpush.msrb.mxu3 %v6220_v48  ;;  %6327 = vmatpush.msrb.mxu1 %v13260_v1  ;;  %v6244_v48 = vand.u32 4294901760, %v6243_v32 }
 0x7ad   :  { %6128 = vmatpush.msrb.mxu2 %v13383_v8  ;;  %6278 = vmatpush.msrb.mxu0 %v13320_v50 }
 0x7ae   :  { %6227 = vmatpush.msrb.mxu3 %v6226_v21  ;;  %5881 = vmatmul.f32.gmra.mxu0 %v5880_v10  ;;  %v6250_v10 = vand.u32 4294901760, %v6249_v4 }
 0x7af   :  { %5920 = vmatmul.f32.gmra.mxu1 %v13327_v40  ;;  %6008 = vmatmul.f32.gmra.mxu3 %v5878_v15  ;;  %v15692_v15 = vand.u32 4294901760, %v13263_v61 }
 0x7b0   :  { %6130 = vmatpush.msrb.mxu2 %v13394_v11  ;;  %6233 = vmatpush.msrb.mxu3 %v6232_v59 }
 0x7b1   :  { %5965 = vmatmul.f32.gmra.mxu2 %v13430_v29  ;;  %6281 = vmatpush.msrb.mxu0 %v13344_v13  ;;  %v15691_v29 = vand.u32 4294901760, %v13256_v28  ;;  %v15696_v28 = vand.u32 4294901760, %v13320_v50 }
 0x7b2   :  { %6132 = vmatpush.msrb.mxu2 %v13410_v37  ;;  %6239 = vmatpush.msrb.mxu3 %v6238_v24 }
 0x7b3   :  { %6284 = vmatpush.msrb.mxu0 %v13352_v22  ;;  %6329 = vmatpush.msrb.mxu1 %v13284_v19 }
 0x7b4   :  { %6134 = vmatpush.msrb.mxu2 %v13432_v45  ;;  %6245 = vmatpush.msrb.mxu3 %v6244_v48 }
 0x7b5   :  { %6287 = vmatpush.msrb.mxu0 %v13381_v44  ;;  %6331 = vmatpush.msrb.mxu1 %v13293_v14 }
 0x7b6   :  { %6136 = vmatpush.msrb.mxu2 %v13447_v54  ;;  %6251 = vmatpush.msrb.mxu3 %v6250_v10 }
 0x7b7   :  { %5924 = vmatmul.f32.gmra.mxu1 %v13396_v3  ;;  %6035 = vmatmul.f32.vlgmr.msra.gmra.mxu0 %v13233_v20 }
 0x7b8   :  { %6439 = vmatpush.msra.mxu3 %v13238_v17  ;;  %6138 = vmatpush.msrb.mxu2 %v13458_v16  ;;  %v15693_v17 = vand.u32 4294901760, %v13278_v46 }
 0x7b9   :  { %6253 = vmatmul.f32.vlgmr.msrb.gmra.mxu3 %v15283_v55  ;;  %6144 = vmatmul.f32.vlgmr.msrb.gmra.mxu2 %v15285_v9  ;;  %v15694_v9 = vand.u32 4294901760, %v13281_v23 }
 0x7ba   :  { %6368 = vmatpush.msra.mxu2 %v15691_v29  ;;  %6441 = vmatpush.msra.mxu3 %v13243_v56  ;;  %v15695_v56 = vand.u32 4294901760, %v13314_v26 }
 0x7bb   :  { %6290 = vmatpush.msrb.mxu0 %v13388_v27  ;;  %6333 = vmatpush.msrb.mxu1 %v13316_v51 }
 0x7bc   :  { %6372 = vmatpush.msra.mxu2 %v15692_v15  ;;  %6443 = vmatpush.msra.mxu3 %v13258_v2  ;;  %v15704_v2 = vmov %v15690_v5 }
 0x7bd   :  { %6293 = vmatpush.msrb.mxu0 %v13408_v52  ;;  %6335 = vmatpush.msrb.mxu1 %v13322_v18 }
 0x7be   :  { %6376 = vmatpush.msra.mxu2 %v15693_v17  ;;  %6445 = vmatpush.msra.mxu3 %v13260_v1 }
 0x7bf   :  { %6070 = vmatmul.f32.vlgmr.msra.gmra.mxu1 %v13233_v20  ;;  %6039 = vmatmul.f32.gmra.mxu0 %v13266_v38  ;;  %v15697_v20 = vand.u32 4294901760, %v13344_v13 }
 0x7c0   :  { %6380 = vmatpush.msra.mxu2 %v15694_v9  ;;  %6447 = vmatpush.msra.mxu3 %v13284_v19 }
 0x7c1   :  { %6257 = vmatmul.f32.gmra.mxu3 %v15295_v35  ;;  %6152 = vmatmul.f32.gmra.mxu2 %v15297_v43  ;;  %v15698_v43 = vand.u32 4294901760, %v13352_v22  ;;  %v15703_v22 = vmov %v15689_v31 }
 0x7c2   :  { %6384 = vmatpush.msra.mxu2 %v15695_v56  ;;  %6449 = vmatpush.msra.mxu3 %v13293_v14 }
 0x7c3   :  { %6296 = vmatpush.msrb.mxu0 %v13427_v42  ;;  %6337 = vmatpush.msrb.mxu1 %v13354_v60 }
 0x7c4   :  { %6388 = vmatpush.msra.mxu2 %v15696_v28  ;;  %6451 = vmatpush.msra.mxu3 %v13316_v51  ;;  %v15699_v51 = vand.u32 4294901760, %v13381_v44 }
 0x7c5   :  { %6299 = vmatpush.msrb.mxu0 %v13445_v33  ;;  %6339 = vmatpush.msrb.mxu1 %v13362_v47  ;;  %v9333_v33 = vld [vmem:[%s15137_s6 + $0x100] sm:$0xff] }
 0x7c6   :  { %6392 = vmatpush.msra.mxu2 %v15697_v20  ;;  %6453 = vmatpush.msra.mxu3 %v13322_v18  ;;  %v15700_v18 = vand.u32 4294901760, %v13388_v27 }
 0x7c7   :  { %6074 = vmatmul.f32.gmra.mxu1 %v13266_v38  ;;  %6043 = vmatmul.f32.gmra.mxu0 %v13327_v40 }
 0x7c8   :  { %6396 = vmatpush.msra.mxu2 %v15698_v43  ;;  %6455 = vmatpush.msra.mxu3 %v13354_v60  ;;  %v15701_v60 = vand.u32 4294901760, %v13408_v52  ;;  %v9335_v43 = vld [vmem:[%s15137_s6 + $0x110] sm:$0xff] }
 0x7c9   :  { %6302 = vmatpush.msrb.mxu0 %v13456_v0  ;;  %6341 = vmatpush.msrb.mxu1 %v13383_v8 }
 0x7ca   :  { %6400 = vmatpush.msra.mxu2 %v15699_v51  ;;  %6457 = vmatpush.msra.mxu3 %v13362_v47  ;;  %v15702_v47 = vand.u32 4294901760, %v13427_v42 }
 0x7cb   :  { %6305 = vmatpush.msrb.mxu0 %v13468_v25  ;;  %6343 = vmatpush.msrb.mxu1 %v13394_v11 }
 0x7cc   :  { %6404 = vmatpush.msra.mxu2 %v15700_v18  ;;  %6459 = vmatpush.msra.mxu3 %v13383_v8 }
 0x7cd   :  { %6308 = vmatpush.msrb.mxu0 %v13480_v62  ;;  %6345 = vmatpush.msrb.mxu1 %v13410_v37  ;;  %v6485_v62 = vsel %vm539_vm1, %v9333_v33, 0 }
 0x7ce   :  { %6408 = vmatpush.msra.mxu2 %v15701_v60  ;;  %6461 = vmatpush.msra.mxu3 %v13394_v11  ;;  %v13658_v21 = vand.u32 4294901760, %v6485_v62 }
 0x7cf   :  { %6078 = vmatmul.f32.gmra.mxu1 %v13327_v40  ;;  %6047 = vmatmul.f32.gmra.mxu0 %v13396_v3 }
 0x7d0   :  { %6412 = vmatpush.msra.mxu2 %v15702_v47  ;;  %6463 = vmatpush.msra.mxu3 %v13410_v37  ;;  %v6515_v24 = vsub.f32 %v6485_v62, %v13658_v21  ;;  %v9336_v62 = vld [vmem:[%s15137_s6 + $0x118] sm:$0xff] }
 0x7d1   :  { %6347 = vmatpush.msrb.mxu1 %v13432_v45 }
 0x7d2   :  { %6416 = vmatpush.msra.mxu2 %v15703_v22  ;;  %6465 = vmatpush.msra.mxu3 %v13432_v45  ;;  %v6516_v17 = vand.u32 4294901760, %v6515_v24 }
 0x7d3   :  { %6349 = vmatpush.msrb.mxu1 %v13447_v54 }
 0x7d4   :  { %6420 = vmatpush.msra.mxu2 %v15704_v2  ;;  %6467 = vmatpush.msra.mxu3 %v13447_v54  ;;  %v6517_v60 = vsub.f32 %v6515_v24, %v6516_v17 }
 0x7d5   :  { %6351 = vmatpush.msrb.mxu1 %v13458_v16 }
 0x7d6   :  { %6424 = vmatpush.msra.mxu2 %v6242_v36  ;;  %6469 = vmatpush.msra.mxu3 %v13458_v16 }
 0x7d7   :  { %6471 = vmatmul.f32.vlgmr.msra.gmra.mxu3 %v15283_v55  ;;  %6082 = vmatmul.f32.gmra.mxu1 %v13396_v3 }
 0x7d8   :  { %6428 = vmatpush.msra.mxu2 %v6248_v6  ;;  %6311 = vmatmul.f32.vlgmr.msrb.gmra.mxu0 %v15308_v53  ;;  %v9334_v6 = vld [vmem:[%s15137_s6 + $0x108] sm:$0xff] }
 0x7d9   :  { %6430 = vmatmul.f32.vlgmr.msra.gmra.mxu2 %v15283_v55  ;;  %v6488_v10 = vsel %vm539_vm1, %v9334_v6, 0  ;;  %v6494_v6 = vsel %vm539_vm1, %v9336_v62, 0  ;;  %v15718_v62 = vld [vmem:[#allocation26_spill] sm:$0xff] }
 0x7da   :  { %v13665_v9 = vand.u32 4294901760, %v6488_v10 }
 0x7dc   :  { %v6523_v47 = vsub.f32 %v6488_v10, %v13665_v9 }
 0x7df   :  { %6475 = vmatmul.f32.gmra.mxu3 %v15295_v35  ;;  %6355 = vmatmul.f32.vlgmr.msrb.gmra.mxu1 %v15309_v34 }
 0x7e0   :  { %6316 = vmatmul.f32.gmra.mxu0 %v9828_v49 }
 0x7e1   :  { %6434 = vmatmul.f32.gmra.mxu2 %v15295_v35 }
 0x7e7   :  { %6361 = vmatmul.f32.gmra.mxu1 %v9846_v57 }
 0x811   :  { %v13606_v54 = vpop.f32.mrf.mxu0 }
 0x818   :  { %v13618_v61 = vpop.f32.mrf.mxu3 }
 0x81a   :  { %v13608_v25 = vpop.f32.mrf.mxu0  ;;  %v13610_v40 = vpop.f32.mrf.mxu1 }
 0x81b   :  { %v13612_v1 = vpop.f32.mrf.mxu2 }
 0x821   :  { %v13626_v57 = vpop.f32.mrf.mxu3 }
 0x823   :  { %v13614_v53 = vpop.f32.mrf.mxu0  ;;  %v13616_v55 = vpop.f32.mrf.mxu1 }
 0x824   :  { %v13624_v35 = vpop.f32.mrf.mxu2 }
 0x82a   :  { %v13634_v19 = vpop.f32.mrf.mxu3 }
 0x82b   :  { %v13620_v49 = vpop.f32.mrf.mxu0 }
 0x82c   :  { %v13622_v34 = vpop.f32.mrf.mxu1  ;;  %v13632_v23 = vpop.f32.mrf.mxu2 }
 0x832   :  { %v13642_v13 = vpop.f32.mrf.mxu3 }
 0x833   :  { %15707 = vst [vmem:[#allocation191_spill] sm:$0xff] %v13642_v13  ;;  %v15807_v13 = vld [vmem:[#allocation124_spill] sm:$0xff] }
 0x834   :  { %v13628_v38 = vpop.f32.mrf.mxu1  ;;  %v13630_v46 = vpop.f32.mrf.mxu0 }
 0x835   :  { %v13640_v26 = vpop.f32.mrf.mxu2 }
 0x836   :  { %15706 = vst [vmem:[#allocation190_spill] sm:$0xff] %v13640_v26  ;;  %v15820_v26 = vld [vmem:[#allocation116_spill] sm:$0xff] }
 0x83c   :  { %v13636_v14 = vpop.f32.mrf.mxu1  ;;  %v13638_v50 = vpop.f32.mrf.mxu0 }
 0x83d   :  { %15705 = vst [vmem:[#allocation189_spill] sm:$0xff] %v13636_v14  ;;  %v6145_v8 = vpop.f32.mrf.mxu2  ;;  %v6254_v11 = vpop.f32.mrf.mxu3 }
 0x83e   :  { %v6255_v16 = vadd.f32 %v6254_v11, %v6145_v8  ;;  %v6491_v8 = vsel %vm539_vm1, %v9335_v43, 0  ;;  %v8582_v43 = vld [vmem:[%s15133_s13] sm:$0xff] }
 0x83f   :  { %8587 = vperm.xlu2 %9340, %v8582_v43  }
 0x844   :  { %v13644_v27 = vpop.f32.mrf.mxu1  ;;  %v13646_v44 = vpop.f32.mrf.mxu0 }
 0x845   :  { %v6153_v52 = vpop.f32.mrf.mxu2  ;;  %v6258_v42 = vpop.f32.mrf.mxu3 }
 0x846   :  { %v6259_v4 = vadd.f32 %v6258_v42, %v6153_v52  ;;  %v6518_v52 = vand.u32 4294901760, %v6517_v60  ;;  %v6524_v42 = vand.u32 4294901760, %v6523_v47  ;;  %v15711_v60 = vld [vmem:[#allocation35_spill] sm:$0xff] }
 0x84c   :  { %v13648_v45 = vpop.f32.mrf.mxu1  ;;  %v13650_v3 = vpop.f32.mrf.mxu0 }
 0x84d   :  { %15708 = vst [vmem:[#allocation192_spill] sm:$0xff] %v13648_v45 }
 0x84e   :  { %15709 = vst [vmem:[#allocation193_spill] sm:$0xff] %v13650_v3 }
 0x854   :  { %v13652_v37 = vpop.f32.mrf.mxu1 }
 0x855   :  { %15710 = vst [vmem:[#allocation194_spill] sm:$0xff] %v13652_v37  ;;  %v6312_v0 = vpop.f32.mrf.mxu0 }
 0x856   :  { %v6313_v31 = vadd.f32 %v6312_v0, %v6255_v16  ;;  %v6530_v0 = vand.u32 4294901760, %v6491_v8 }
 0x85a   :  { %v6472_v41 = vpop.f32.mrf.mxu3 }
 0x85c   :  { %v6431_v30 = vpop.f32.mrf.mxu2  ;;  %v6356_v36 = vpop.f32.mrf.mxu1 }
 0x85d   :  { %v6357_v5 = vadd.f32 %v6356_v36, %v6313_v31  ;;  %v6317_v32 = vpop.f32.mrf.mxu0  ;;  %v6531_v36 = vsub.f32 %v6491_v8, %v6530_v0 }
 0x85e   :  { %v6318_v29 = vadd.f32 %v6317_v32, %v6259_v4 }
 0x85f   :  { %v6432_v59 = vadd.f32 %v6431_v30, %v6357_v5  ;;  %v6525_v30 = vsub.f32 %v6523_v47, %v6524_v42  ;;  %v6532_v4 = vand.u32 4294901760, %v6531_v36 }
 0x861   :  { %v6473_v48 = vadd.f32 %v6472_v41, %v6432_v59  ;;  %v6526_v32 = vand.u32 4294901760, %v6525_v30  ;;  %v15720_v30 = vld [vmem:[#allocation31_spill] sm:$0xff] }
 0x862   :  { %v6476_v18 = vpop.f32.mrf.mxu3 }
 0x863   :  { %v6512_v28 = vand.u32 4294901760, %v6473_v48 }
 0x864   :  { %v6362_v15 = vpop.f32.mrf.mxu1  ;;  %v6435_v20 = vpop.f32.mrf.mxu2 }
 0x865   :  { %v6363_v56 = vadd.f32 %v6362_v15, %v6318_v29  ;;  %v6568_v2 = vsub.f32 %v6473_v48, %v6512_v28  ;;  %v6538_v48 = vand.u32 4294901760, %v6494_v6  ;;  %v6533_v29 = vsub.f32 %v6531_v36, %v6532_v4 }
 0x867   :  { %v6436_v51 = vadd.f32 %v6435_v20, %v6363_v56  ;;  %v6569_v16 = vand.u32 4294901760, %v6568_v2  ;;  %v6539_v15 = vsub.f32 %v6494_v6, %v6538_v48  ;;  %v6534_v56 = vand.u32 4294901760, %v6533_v29  ;;  %v15726_v29 = vld [vmem:[#allocation45_spill] sm:$0xff] }
 0x869   :  { %v6477_v22 = vadd.f32 %v6476_v18, %v6436_v51  ;;  %v6570_v41 = vsub.f32 %v6568_v2, %v6569_v16  ;;  %v1682_v51 = vadd.f32 %v11002_v58, %v10994_v12  ;;  %v1686_v18 = vadd.f32 %v11010_v39, %v11000_v7  ;;  %v15719_v12 = vld [vmem:[#allocation28_spill] sm:$0xff]  ;;  %v15721_v39 = vld [vmem:[#allocation38_spill] sm:$0xff] }
 0x86b   :  { %v6510_v11 = vand.u32 4294901760, %v6477_v22  ;;  %v6571_v10 = vand.u32 4294901760, %v6570_v41  ;;  %v15723_v41 = vld [vmem:[#allocation44_spill] sm:$0xff] }
 0x86d   :  { %6511 = vmatpush.msra.mxu0 %v6510_v11  ;;  %6646 = vmatpush.msrb.mxu3 %v6510_v11  ;;  %v6562_v33 = vsub.f32 %v6477_v22, %v6510_v11  ;;  %v15712_v22 = vld [vmem:[#allocation34_spill] sm:$0xff] }
 0x86f   :  { %6513 = vmatpush.msra.mxu0 %v6512_v28  ;;  %6606 = vmatpush.msrb.mxu2 %v6562_v33  ;;  %v6563_v31 = vand.u32 4294901760, %v6562_v33 }
 0x870   :  { %6648 = vmatpush.msrb.mxu3 %v6512_v28  ;;  %6519 = vmatmul.f32.vlgmr.msra.gmra.mxu0 %v6518_v52  ;;  %v15715_v52 = vld [vmem:[#allocation29_spill] sm:$0xff] }
 0x871   :  { %6609 = vmatpush.msrb.mxu2 %v6568_v2  ;;  %6691 = vmatpush.msrb.mxu0 %v6563_v31  ;;  %v6564_v5 = vsub.f32 %v6562_v33, %v6563_v31  ;;  %v15713_v2 = vld [vmem:[#allocation37_spill] sm:$0xff] }
 0x872   :  { %6612 = vmatmul.f32.vlgmr.msrb.gmra.mxu2 %v6515_v24  ;;  %6652 = vmatmul.f32.vlgmr.msrb.gmra.mxu3 %v6516_v17  ;;  %v6540_v24 = vand.u32 4294901760, %v6539_v15  ;;  %v1694_v8 = vadd.f32 %v15713_v2, %v15712_v22  ;;  %v15732_v22 = vld [vmem:[#allocation46_spill] sm:$0xff] }
 0x873   :  { %6695 = vmatpush.msrb.mxu0 %v6569_v16  ;;  %v6565_v59 = vand.u32 4294901760, %v6564_v5 }
 0x874   :  { %v6541_v17 = vsub.f32 %v6539_v15, %v6540_v24 }
 0x875   :  { %6566 = vmatpush.msra.mxu1 %v6565_v59  ;;  %v15724_v59 = vld [vmem:[#allocation33_spill] sm:$0xff] }
 0x876   :  { %v6542_v20 = vand.u32 4294901760, %v6541_v17  ;;  %v15728_v17 = vld [vmem:[#allocation49_spill] sm:$0xff] }
 0x877   :  { %6572 = vmatpush.msra.mxu1 %v6571_v10 }
 0x878   :  { %6527 = vmatmul.f32.gmra.mxu0 %v6526_v32  ;;  %6574 = vmatmul.f32.vlgmr.msra.gmra.mxu1 %v13658_v21 }
 0x879   :  { %6728 = vmatpush.msrb.mxu1 %v6510_v11  ;;  %v15714_v11 = vld [vmem:[#allocation27_spill] sm:$0xff] }
 0x87a   :  { %6617 = vmatmul.f32.gmra.mxu2 %v6523_v47  ;;  %6658 = vmatmul.f32.gmra.mxu3 %v6524_v42  ;;  %v1690_v47 = vadd.f32 %v15711_v60, %v11008_v63  ;;  %v1725_v42 = vadd.f32 %v15715_v52, %v1686_v18  ;;  %v15722_v63 = vld [vmem:[#allocation41_spill] sm:$0xff]  ;;  %v15731_v60 = vld [vmem:[#allocation40_spill] sm:$0xff] }
 0x87b   :  { %6730 = vmatpush.msrb.mxu1 %v6512_v28  ;;  %v8583_v28 = vld [vmem:[%s15133_s13 + $0x8] sm:$0xff] }
 0x87c   :  { %8592 = vperm.xlu1 %9339, %v8583_v28   ;;  %v1766_v58 = vadd.f32 %v15719_v12, %v1725_v42  ;;  %v15729_v28 = vld [vmem:[#allocation52_spill] sm:$0xff]  ;;  %v15734_v42 = vld [vmem:[#allocation39_spill] sm:$0xff] }
 0x87e   :  { %v1809_v5 = vadd.f32 %v15722_v63, %v1766_v58  ;;  %v15738_v58 = vld [vmem:[#allocation55_spill] sm:$0xff] }
 0x880   :  { %6535 = vmatmul.f32.gmra.mxu0 %v6534_v56  ;;  %6578 = vmatmul.f32.gmra.mxu1 %v13665_v9  ;;  %v15727_v56 = vld [vmem:[#allocation48_spill] sm:$0xff] }
 0x882   :  { %6622 = vmatmul.f32.gmra.mxu2 %v6531_v36  ;;  %6664 = vmatmul.f32.gmra.mxu3 %v6532_v4 }
 0x888   :  { %6543 = vmatmul.f32.gmra.mxu0 %v6542_v20  ;;  %6582 = vmatmul.f32.gmra.mxu1 %v6530_v0 }
 0x88a   :  { %6627 = vmatmul.f32.gmra.mxu2 %v6539_v15  ;;  %6670 = vmatmul.f32.gmra.mxu3 %v6540_v24  ;;  %v1844_v15 = vadd.f32 %v15726_v29, %v1809_v5  ;;  %v15741_v5 = vld [vmem:[#allocation69_spill] sm:$0xff] }
 0x890   :  { %6586 = vmatmul.f32.gmra.mxu1 %v6538_v48  ;;  %6697 = vmatmul.f32.vlgmr.msrb.gmra.mxu0 %v13658_v21 }
 0x898   :  { %6701 = vmatmul.f32.gmra.mxu0 %v13665_v9  ;;  %6732 = vmatmul.f32.vlgmr.msrb.gmra.mxu1 %v13658_v21  ;;  %v1720_v21 = vadd.f32 %v15714_v11, %v1682_v51  ;;  %v15730_v51 = vld [vmem:[#allocation36_spill] sm:$0xff] }
 0x89a   :  { %v1760_v31 = vadd.f32 %v15718_v62, %v1720_v21 }
 0x89c   :  { %v1805_v36 = vadd.f32 %v15721_v39, %v1760_v31  ;;  %v15737_v31 = vld [vmem:[#allocation53_spill] sm:$0xff] }
 0x8a0   :  { %6705 = vmatmul.f32.gmra.mxu0 %v6530_v0  ;;  %6736 = vmatmul.f32.gmra.mxu1 %v13665_v9  ;;  %v15716_v9 = vld [vmem:[#allocation30_spill] sm:$0xff] }
 0x8a1   :  { %v1730_v33 = vadd.f32 %v15716_v9, %v1690_v47  ;;  %v1899_v47 = vadd.f32 %v15731_v60, %v1844_v15  ;;  %v15746_v15 = vld [vmem:[#allocation60_spill] sm:$0xff] }
 0x8a2   :  { %v15751_v60 = vld [vmem:[#allocation76_spill] sm:$0xff] }
 0x8a3   :  { %v1772_v7 = vadd.f32 %v15720_v30, %v1730_v33  ;;  %v15735_v33 = vld [vmem:[#allocation43_spill] sm:$0xff] }
 0x8a5   :  { %v1813_v6 = vadd.f32 %v15723_v41, %v1772_v7  ;;  %v15739_v7 = vld [vmem:[#allocation59_spill] sm:$0xff] }
 0x8a6   :  { %v15742_v41 = vld [vmem:[#allocation71_spill] sm:$0xff] }
 0x8a7   :  { %v1848_v20 = vadd.f32 %v15728_v17, %v1813_v6  ;;  %v2604_v6 = vadd.f32 %v15742_v41, %v15741_v5  ;;  %v15762_v41 = vld [vmem:[#allocation64_spill] sm:$0xff] }
 0x8a8   :  { %6709 = vmatmul.f32.gmra.mxu0 %v6538_v48  ;;  %6740 = vmatmul.f32.gmra.mxu1 %v6530_v0  ;;  %v15717_v0 = vld [vmem:[#allocation32_spill] sm:$0xff] }
 0x8a9   :  { %v1735_v16 = vadd.f32 %v15717_v0, %v1694_v8  ;;  %v1907_v2 = vadd.f32 %v15732_v22, %v1848_v20  ;;  %v15733_v8 = vld [vmem:[#allocation50_spill] sm:$0xff]  ;;  %v1950_v0 = vadd.f32 %v15735_v33, %v1899_v47  ;;  %v15748_v20 = vld [vmem:[#allocation63_spill] sm:$0xff]  ;;  %v15752_v47 = vld [vmem:[#allocation80_spill] sm:$0xff] }
 0x8aa   :  { %v2616_v22 = vadd.f32 %v15752_v47, %v15751_v60  ;;  %v15756_v33 = vld [vmem:[#allocation95_spill] sm:$0xff] }
 0x8ab   :  { %v1778_v32 = vadd.f32 %v15724_v59, %v1735_v16  ;;  %v15736_v16 = vld [vmem:[#allocation47_spill] sm:$0xff]  ;;  %v1989_v30 = vadd.f32 %v15738_v58, %v1950_v0  ;;  %v15743_v59 = vld [vmem:[#allocation56_spill] sm:$0xff] }
 0x8ac   :  { %v1954_v62 = vadd.f32 %v15736_v16, %v1907_v2  ;;  %v15753_v2 = vld [vmem:[#allocation66_spill] sm:$0xff]  ;;  %v15769_v47 = vld [vmem:[#allocation67_spill] sm:$0xff] }
 0x8ad   :  { %v1817_v24 = vadd.f32 %v15727_v56, %v1778_v32  ;;  %v2030_v56 = vadd.f32 %v15746_v15, %v1989_v30  ;;  %v15757_v16 = vld [vmem:[#allocation94_spill] sm:$0xff] }
 0x8ae   :  { %v1994_v39 = vadd.f32 %v15739_v7, %v1954_v62  ;;  %v15758_v62 = vld [vmem:[#allocation98_spill] sm:$0xff] }
 0x8af   :  { %v1852_v43 = vadd.f32 %v15729_v28, %v1817_v24  ;;  %v15747_v24 = vld [vmem:[#allocation62_spill] sm:$0xff] }
 0x8b0   :  { %6744 = vmatmul.f32.gmra.mxu1 %v6538_v48  ;;  %v15725_v48 = vld [vmem:[#allocation42_spill] sm:$0xff]  ;;  %v2036_v28 = vadd.f32 %v15748_v20, %v1994_v39 }
 0x8b1   :  { %v1840_v10 = vadd.f32 %v15725_v48, %v1805_v36  ;;  %v1915_v11 = vadd.f32 %v15733_v8, %v1852_v43  ;;  %v15740_v36 = vld [vmem:[#allocation51_spill] sm:$0xff]  ;;  %v15744_v48 = vld [vmem:[#allocation70_spill] sm:$0xff]  ;;  %v15749_v43 = vld [vmem:[#allocation73_spill] sm:$0xff] }
 0x8b2   :  { %v15759_v30 = vld [vmem:[#allocation54_spill] sm:$0xff] }
 0x8b3   :  { %v1891_v18 = vadd.f32 %v15730_v51, %v1840_v10  ;;  %v1958_v63 = vadd.f32 %v15740_v36, %v1915_v11  ;;  %v15745_v10 = vld [vmem:[#allocation74_spill] sm:$0xff]  ;;  %v15750_v51 = vld [vmem:[#allocation77_spill] sm:$0xff]  ;;  %v15754_v11 = vld [vmem:[#allocation72_spill] sm:$0xff] }
 0x8b4   :  { %v2608_v29 = vadd.f32 %v15745_v10, %v15744_v48  ;;  %v15760_v39 = vld [vmem:[#allocation78_spill] sm:$0xff] }
 0x8b5   :  { %v1946_v9 = vadd.f32 %v15734_v42, %v1891_v18  ;;  %v1999_v17 = vadd.f32 %v15747_v24, %v1958_v63  ;;  %v2612_v18 = vadd.f32 %v15750_v51, %v15749_v43  ;;  %v2642_v42 = vadd.f32 %v15754_v11, %v2604_v6  ;;  %v15761_v63 = vld [vmem:[#allocation58_spill] sm:$0xff]  ;;  %v15765_v24 = vld [vmem:[#allocation97_spill] sm:$0xff]  ;;  %v15767_v43 = vld [vmem:[#allocation100_spill] sm:$0xff] }
 0x8b6   :  { %v2647_v36 = vadd.f32 %v15760_v39, %v2608_v29  ;;  %v2073_v5 = vadd.f32 %v15761_v63, %v2030_v56  ;;  %v15763_v48 = vld [vmem:[#allocation82_spill] sm:$0xff]  ;;  %v15768_v51 = vld [vmem:[#allocation104_spill] sm:$0xff]  ;;  %v15770_v11 = vld [vmem:[#allocation75_spill] sm:$0xff] }
 0x8b7   :  { %v1984_v12 = vadd.f32 %v15737_v31, %v1946_v9  ;;  %v2042_v8 = vadd.f32 %v15753_v2, %v1999_v17  ;;  %v15755_v9 = vld [vmem:[#allocation93_spill] sm:$0xff]  ;;  %v3270_v31 = vadd.f32 %v15758_v62, %v15757_v16  ;;  %v2652_v6 = vadd.f32 %v15763_v48, %v2612_v18  ;;  %v15764_v10 = vld [vmem:[#allocation86_spill] sm:$0xff]  ;;  %v15773_v16 = vld [vmem:[#allocation79_spill] sm:$0xff] }
 0x8b8   :  { %v3266_v0 = vadd.f32 %v15756_v33, %v15755_v9  ;;  %v2657_v15 = vadd.f32 %v15764_v10, %v2616_v22  ;;  %v15766_v17 = vld [vmem:[#allocation101_spill] sm:$0xff]  ;;  %v3278_v60 = vadd.f32 %v15768_v51, %v15767_v43  ;;  %v15771_v9 = vld [vmem:[#allocation96_spill] sm:$0xff]  ;;  %v15772_v33 = vld [vmem:[#allocation102_spill] sm:$0xff] }
 0x8b9   :  { %v2024_v32 = vadd.f32 %v15743_v59, %v1984_v12  ;;  %v2077_v59 = vadd.f32 %v15762_v41, %v2036_v28  ;;  %v3274_v20 = vadd.f32 %v15766_v17, %v15765_v24  ;;  %v2081_v2 = vadd.f32 %v15769_v47, %v2042_v8  ;;  %v15774_v62 = vld [vmem:[#allocation57_spill] sm:$0xff]  ;;  %v15776_v39 = vld [vmem:[#allocation83_spill] sm:$0xff]  ;;  %v15781_v51 = vld [vmem:[#allocation106_spill] sm:$0xff] }
 0x8ba   :  { %v3304_v29 = vadd.f32 %v15771_v9, %v3266_v0  ;;  %v3309_v56 = vadd.f32 %v15772_v33, %v3270_v31  ;;  %v2688_v28 = vadd.f32 %v15773_v16, %v2647_v36  ;;  %v2694_v63 = vadd.f32 %v15776_v39, %v2652_v6  ;;  %v15777_v41 = vld [vmem:[#allocation61_spill] sm:$0xff]  ;;  %v15780_v43 = vld [vmem:[#allocation87_spill] sm:$0xff]  ;;  %v15782_v47 = vld [vmem:[#allocation110_spill] sm:$0xff] }
 0x8bb   :  { %v2069_v7 = vadd.f32 %v15759_v30, %v2024_v32  ;;  %v2682_v32 = vadd.f32 %v15770_v11, %v2642_v42  ;;  %v15775_v30 = vld [vmem:[#allocation81_spill] sm:$0xff]  ;;  %v2108_v48 = vadd.f32 %v15777_v41, %v2073_v5  ;;  %v2700_v42 = vadd.f32 %v15780_v43, %v2657_v15  ;;  %v15783_v36 = vld [vmem:[#allocation84_spill] sm:$0xff]  ;;  %v15785_v33 = vld [vmem:[#allocation99_spill] sm:$0xff] }
 0x8bc   :  { %v15778_v10 = vld [vmem:[#allocation65_spill] sm:$0xff]  ;;  %v3314_v0 = vadd.f32 %v15781_v51, %v3274_v20  ;;  %v3319_v31 = vadd.f32 %v15782_v47, %v3278_v60  ;;  %v15784_v9 = vld [vmem:[#allocation68_spill] sm:$0xff]  ;;  %v3344_v6 = vadd.f32 %v15785_v33, %v3304_v29  ;;  %v15786_v16 = vld [vmem:[#allocation103_spill] sm:$0xff] }
 0x8bd   :  { %v2104_v18 = vadd.f32 %v15774_v62, %v2069_v7  ;;  %v2727_v22 = vadd.f32 %v15775_v30, %v2682_v32  ;;  %v2112_v24 = vadd.f32 %v15778_v10, %v2077_v59  ;;  %v15779_v17 = vld [vmem:[#allocation85_spill] sm:$0xff]  ;;  %v2116_v32 = vadd.f32 %v15784_v9, %v2081_v2  ;;  %v15789_v30 = vld [vmem:[#allocation88_spill] sm:$0xff]  ;;  %v15790_v39 = vld [vmem:[#allocation91_spill] sm:$0xff] }
 0x8be   :  { %v2731_v8 = vadd.f32 %v15779_v17, %v2688_v28  ;;  %v3350_v5 = vadd.f32 %v15786_v16, %v3309_v56  ;;  %v15788_v28 = vld [vmem:[#allocation89_spill] sm:$0xff]  ;;  %v2739_v60 = vadd.f32 %v15790_v39, %v2700_v42  ;;  %v15792_v10 = vld [vmem:[#allocation119_spill] sm:$0xff]  ;;  %v15795_v29 = vld [vmem:[#allocation118_spill] sm:$0xff] }
 0x8bf   :  { %v2762_v7 = vadd.f32 %v15783_v36, %v2727_v22  ;;  %v2735_v15 = vadd.f32 %v15788_v28, %v2694_v63  ;;  %v15791_v41 = vld [vmem:[#allocation117_spill] sm:$0xff]  ;;  %v15796_v47 = vld [vmem:[#allocation122_spill] sm:$0xff]  ;;  %v15800_v63 = vld [vmem:[#allocation107_spill] sm:$0xff] }
 0x8c0   :  { %v2766_v20 = vadd.f32 %v15789_v30, %v2731_v8  ;;  %v3928_v17 = vadd.f32 %v15792_v10, %v15791_v41  ;;  %v15793_v22 = vld [vmem:[#allocation105_spill] sm:$0xff]  ;;  %v3932_v56 = vadd.f32 %v15796_v47, %v15795_v29  ;;  %v15799_v16 = vld [vmem:[#allocation90_spill] sm:$0xff]  ;;  %v3356_v28 = vadd.f32 %v15800_v63, %v3314_v0  ;;  %v15801_v8 = vld [vmem:[#allocation111_spill] sm:$0xff] }
 0x8c1   :  { %v3389_v43 = vadd.f32 %v15793_v22, %v3344_v6  ;;  %v15794_v2 = vld [vmem:[#allocation109_spill] sm:$0xff]  ;;  %v2770_v37 = vadd.f32 %v15799_v16, %v2735_v15  ;;  %v3362_v30 = vadd.f32 %v15801_v8, %v3319_v31  ;;  %v15803_v39 = vld [vmem:[#allocation143_spill] sm:$0xff]  ;;  %v15804_v41 = vld [vmem:[#allocation92_spill] sm:$0xff] }
 0x8c2   :  { %v3393_v51 = vadd.f32 %v15794_v2, %v3350_v5  ;;  %v15797_v36 = vld [vmem:[#allocation121_spill] sm:$0xff]  ;;  %v2774_v10 = vadd.f32 %v15804_v41, %v2739_v60  ;;  %v15805_v6 = vld [vmem:[#allocation108_spill] sm:$0xff]  ;;  %v15813_v63 = vld [vmem:[#allocation142_spill] sm:$0xff] }
 0x8c3   :  { %v15798_v9 = vld [vmem:[#allocation125_spill] sm:$0xff]  ;;  %v3424_v22 = vadd.f32 %v15805_v6, %v3389_v43  ;;  %v15806_v5 = vld [vmem:[#allocation112_spill] sm:$0xff]  ;;  %v15814_v8 = vld [vmem:[#allocation146_spill] sm:$0xff] }
 0x8c4   :  { %v3936_v33 = vadd.f32 %v15798_v9, %v15797_v36  ;;  %v15802_v42 = vld [vmem:[#allocation141_spill] sm:$0xff]  ;;  %v3428_v2 = vadd.f32 %v15806_v5, %v3393_v51  ;;  %v15808_v29 = vld [vmem:[#allocation128_spill] sm:$0xff]  ;;  %v15811_v9 = vld [vmem:[#allocation115_spill] sm:$0xff] }
 0x8c5   :  { %v4590_v3 = vadd.f32 %v15803_v39, %v15802_v42  ;;  %v3940_v47 = vadd.f32 %v15808_v29, %v15807_v13  ;;  %v15810_v36 = vld [vmem:[#allocation113_spill] sm:$0xff]  ;;  %v3401_v0 = vadd.f32 %v15811_v9, %v3362_v30  ;;  %v15812_v16 = vld [vmem:[#allocation120_spill] sm:$0xff]  ;;  %v4594_v42 = vadd.f32 %v15814_v8, %v15813_v63  ;;  %v15815_v60 = vld [vmem:[#allocation126_spill] sm:$0xff] }
 0x8c6   :  { %v3397_v15 = vadd.f32 %v15810_v36, %v3356_v28  ;;  %v3966_v31 = vadd.f32 %v15812_v16, %v3928_v17  ;;  %v2776_v39 = vadd.f32 %v2762_v7, %v2104_v18  ;;  %v3971_v41 = vadd.f32 %v15815_v60, %v3932_v56  ;;  %v15816_v43 = vld [vmem:[#allocation130_spill] sm:$0xff]  ;;  %v15817_v51 = vld [vmem:[#allocation145_spill] sm:$0xff]  ;;  %v15821_v36 = vld [vmem:[#allocation144_spill] sm:$0xff] }
 0x8c7   :  { %v3976_v6 = vadd.f32 %v15816_v43, %v3936_v33  ;;  %v15818_v5 = vld [vmem:[#allocation149_spill] sm:$0xff]  ;;  %v2777_v13 = vadd.f32 %v2766_v20, %v2108_v48  ;;  %v15819_v29 = vld [vmem:[#allocation114_spill] sm:$0xff]  ;;  %v3436_v28 = vadd.f32 %v15820_v26, %v3401_v0  ;;  %v4628_v30 = vadd.f32 %v15821_v36, %v4590_v3  ;;  %v15823_v33 = vld [vmem:[#allocation123_spill] sm:$0xff] }
 0x8c8   :  { %v4598_v45 = vadd.f32 %v15818_v5, %v15817_v51  ;;  %v3432_v14 = vadd.f32 %v15819_v29, %v3397_v15  ;;  %v2778_v9 = vadd.f32 %v2770_v37, %v2112_v24  ;;  %v2779_v17 = vadd.f32 %v2774_v10, %v2116_v32  ;;  %v15822_v16 = vld [vmem:[#allocation134_spill] sm:$0xff]  ;;  %v15825_v20 = vld [vmem:[#allocation127_spill] sm:$0xff]  ;;  %v15828_v37 = vld [vmem:[#allocation148_spill] sm:$0xff] }
 0x8c9   :  { %v3438_v7 = vadd.f32 %v3424_v22, %v2776_v39  ;;  %v3439_v56 = vadd.f32 %v3428_v2, %v2777_v13  ;;  %v4006_v8 = vadd.f32 %v15823_v33, %v3966_v31  ;;  %v15824_v60 = vld [vmem:[#allocation150_spill] sm:$0xff]  ;;  %v4012_v15 = vadd.f32 %v15825_v20, %v3971_v41  ;;  %v15826_v43 = vld [vmem:[#allocation131_spill] sm:$0xff]  ;;  %v15829_v24 = vld [vmem:[#allocation152_spill] sm:$0xff] }
 0x8ca   :  { %v4633_v48 = vadd.f32 %v15824_v60, %v4594_v42  ;;  %v4018_v26 = vadd.f32 %v15826_v43, %v3976_v6  ;;  %v15827_v0 = vld [vmem:[#allocation154_spill] sm:$0xff]  ;;  %v4602_v32 = vadd.f32 %v15829_v24, %v15828_v37  ;;  %v13832_v51 = vadd.f32 %v3436_v28, %v2779_v17  ;;  %v15830_v5 = vld [vmem:[#allocation129_spill] sm:$0xff]  ;;  %v15831_v2 = vld [vmem:[#allocation147_spill] sm:$0xff] }
 0x8cb   :  { %v4638_v3 = vadd.f32 %v15827_v0, %v4598_v45  ;;  %v4051_v22 = vadd.f32 %v15830_v5, %v4006_v8  ;;  %v4668_v39 = vadd.f32 %v15831_v2, %v4628_v30  ;;  %v15832_v31 = vld [vmem:[#allocation133_spill] sm:$0xff]  ;;  %v15834_v41 = vld [vmem:[#allocation135_spill] sm:$0xff]  ;;  %v15835_v6 = vld [vmem:[#allocation166_spill] sm:$0xff] }
 0x8cc   :  { %v4055_v13 = vadd.f32 %v15832_v31, %v4012_v15  ;;  %v15833_v42 = vld [vmem:[#allocation137_spill] sm:$0xff]  ;;  %v15837_v33 = vld [vmem:[#allocation132_spill] sm:$0xff]  ;;  %v15841_v17 = vld [vmem:[#allocation167_spill] sm:$0xff] }
 0x8cd   :  { %v4059_v29 = vadd.f32 %v15833_v42, %v4018_v26  ;;  %v4086_v60 = vadd.f32 %v15837_v33, %v4051_v22  ;;  %v15838_v20 = vld [vmem:[#allocation153_spill] sm:$0xff]  ;;  %v15842_v0 = vld [vmem:[#allocation136_spill] sm:$0xff]  ;;  %v15843_v37 = vld [vmem:[#allocation138_spill] sm:$0xff] }
 0x8ce   :  { %v4713_v43 = vadd.f32 %v15838_v20, %v4668_v39  ;;  %v4090_v30 = vadd.f32 %v15842_v0, %v4055_v13  ;;  %v15844_v24 = vld [vmem:[#allocation158_spill] sm:$0xff]  ;;  %v15845_v5 = vld [vmem:[#allocation155_spill] sm:$0xff]  ;;  %v15846_v31 = vld [vmem:[#allocation157_spill] sm:$0xff] }
 0x8cf   :  { %v4094_v15 = vadd.f32 %v15843_v37, %v4059_v29  ;;  %v4643_v26 = vadd.f32 %v15844_v24, %v4602_v32  ;;  %v15849_v39 = vld [vmem:[#allocation173_spill] sm:$0xff]  ;;  %v15851_v13 = vld [vmem:[#allocation174_spill] sm:$0xff]  ;;  %v5914_v32 = vadd.f32 %v13610_v40, %v13606_v54  ;;  %v15853_v0 = vld [vmem:[#allocation168_spill] sm:$0xff] }
 0x8d0   :  { %v15850_v33 = vld [vmem:[#allocation161_spill] sm:$0xff]  ;;  %v15854_v24 = vld [vmem:[#allocation139_spill] sm:$0xff] }
 0x8d1   :  { %v15856_v40 = vld [vmem:[#allocation159_spill] sm:$0xff] }
 0x8ed   :  { %v13707_v4 = vpop.f32.mrf.mxu0 }
 0x8f5   :  { %v13718_v21 = vpop.f32.mrf.mxu0  ;;  %v13720_v52 = vpop.f32.mrf.mxu1 }
 0x8f6   :  { %v13775_v11 = vpop.f32.mrf.mxu2 }
 0x8fd   :  { %v13747_v12 = vpop.f32.mrf.mxu0  ;;  %v13749_v58 = vpop.f32.mrf.mxu1 }
 0x8fe   :  { %v6618_v10 = vpop.f32.mrf.mxu2 }
 0x905   :  { %v13781_v62 = vpop.f32.mrf.mxu0  ;;  %v13783_v59 = vpop.f32.mrf.mxu1 }
 0x906   :  { %15787 = vst [vmem:[#allocation35_spill] sm:$0xff] %v13781_v62  ;;  %v13806_v62 = vpop.f32.mrf.mxu3 }
 0x907   :  { %15809 = vst [vmem:[#allocation34_spill] sm:$0xff] %v13806_v62  ;;  %v3981_v62 = vadd.f32 %v15822_v16, %v3940_v47  ;;  %v3440_v47 = vadd.f32 %v3432_v14, %v2778_v9  ;;  %v15836_v16 = vld [vmem:[#allocation170_spill] sm:$0xff]  ;;  %v15839_v14 = vld [vmem:[#allocation151_spill] sm:$0xff]  ;;  %v15840_v9 = vld [vmem:[#allocation165_spill] sm:$0xff] }
 0x908   :  { %v5256_v45 = vadd.f32 %v15836_v16, %v15835_v6  ;;  %v4674_v28 = vadd.f32 %v15839_v14, %v4633_v48  ;;  %v5252_v8 = vadd.f32 %v15841_v17, %v15840_v9  ;;  %v15848_v6 = vld [vmem:[#allocation169_spill] sm:$0xff]  ;;  %v5918_v48 = vadd.f32 %v13616_v55, %v13608_v25  ;;  %v15852_v9 = vld [vmem:[#allocation160_spill] sm:$0xff] }
 0x909   :  { %v4024_v36 = vadd.f32 %v15834_v41, %v3981_v62  ;;  %v4680_v62 = vadd.f32 %v15845_v5, %v4638_v3  ;;  %v15847_v41 = vld [vmem:[#allocation156_spill] sm:$0xff]  ;;  %v5260_v16 = vadd.f32 %v15849_v39, %v15848_v6  ;;  %v5922_v3 = vadd.f32 %v13622_v34, %v13614_v53  ;;  %v15857_v53 = vld [vmem:[#allocation178_spill] sm:$0xff]  ;;  %v15860_v6 = vld [vmem:[#allocation163_spill] sm:$0xff] }
 0x90a   :  { %v4717_v42 = vadd.f32 %v15846_v31, %v4674_v28  ;;  %v4748_v22 = vadd.f32 %v15847_v41, %v4713_v43  ;;  %v5295_v14 = vadd.f32 %v15851_v13, %v5256_v45  ;;  %v4100_v43 = vadd.f32 %v4086_v60, %v3438_v7 }
 0x90b   :  { %v4721_v20 = vadd.f32 %v15850_v33, %v4680_v62  ;;  %v5290_v37 = vadd.f32 %v15853_v0, %v5252_v8  ;;  %v6580_v25 = vadd.f32 %v13749_v58, %v13718_v21  ;;  %v4101_v55 = vadd.f32 %v4090_v30, %v3439_v56  ;;  %v15855_v62 = vld [vmem:[#allocation162_spill] sm:$0xff]  ;;  %v15858_v8 = vld [vmem:[#allocation175_spill] sm:$0xff]  ;;  %v6623_v56 = vpop.f32.mrf.mxu2  ;;  %v15864_v33 = vld [vmem:[#allocation177_spill] sm:$0xff] }
 0x90c   :  { %v4752_v17 = vadd.f32 %v15852_v9, %v4717_v42  ;;  %v4063_v45 = vadd.f32 %v15854_v24, %v4024_v36  ;;  %v4102_v5 = vadd.f32 %v4094_v15, %v3440_v47  ;;  %v4686_v31 = vadd.f32 %v15856_v40, %v4643_v26  ;;  %v15859_v36 = vld [vmem:[#allocation171_spill] sm:$0xff] }
 0x90d   :  { %v13821_v63 = vpop.f32.mrf.mxu1  ;;  %v13823_v18 = vpop.f32.mrf.mxu0  ;;  %v4756_v54 = vadd.f32 %v15855_v62, %v4721_v20  ;;  %v5300_v34 = vadd.f32 %v15857_v53, %v5260_v16  ;;  %v5957_v41 = vadd.f32 %v13624_v35, %v5918_v48  ;;  %v6576_v7 = vadd.f32 %v13720_v52, %v13707_v4  ;;  %v15861_v16 = vld [vmem:[#allocation172_spill] sm:$0xff]  ;;  %v15865_v20 = vld [vmem:[#allocation179_spill] sm:$0xff] }
 0x90e   :  { %v6659_v2 = vpop.f32.mrf.mxu3  ;;  %v4762_v60 = vadd.f32 %v4748_v22, %v4100_v43  ;;  %v5336_v42 = vadd.f32 %v15858_v8, %v5295_v14  ;;  %v5952_v21 = vadd.f32 %v13612_v1, %v5914_v32  ;;  %v5962_v58 = vadd.f32 %v13632_v23, %v5922_v3  ;;  %v15862_v4 = vld [vmem:[#allocation176_spill] sm:$0xff]  ;;  %v15863_v22 = vld [vmem:[#allocation181_spill] sm:$0xff] }
 0x90f   :  { %v4763_v47 = vadd.f32 %v4752_v17, %v4101_v55  ;;  %v5330_v30 = vadd.f32 %v15859_v36, %v5290_v37  ;;  %v6619_v15 = vadd.f32 %v6618_v10, %v6580_v25  ;;  %v6584_v26 = vadd.f32 %v13783_v59, %v13747_v12  ;;  %v15866_v10 = vld [vmem:[#allocation184_spill] sm:$0xff]  ;;  %v15867_v17 = vld [vmem:[#allocation185_spill] sm:$0xff] }
 0x910   :  { %v4725_v35 = vadd.f32 %v15860_v6, %v4686_v31  ;;  %v4764_v39 = vadd.f32 %v4756_v54, %v4102_v5  ;;  %v5264_v52 = vadd.f32 %v15862_v4, %v15861_v16  ;;  %v5379_v48 = vadd.f32 %v15863_v22, %v5336_v42  ;;  %v15869_v5 = vld [vmem:[#allocation180_spill] sm:$0xff]  ;;  %v15871_v31 = vld [vmem:[#allocation34_spill] sm:$0xff]  ;;  %v15873_v8 = vld [vmem:[#allocation189_spill] sm:$0xff] }
 0x911   :  { %v5375_v1 = vadd.f32 %v15864_v33, %v5330_v30  ;;  %v5342_v23 = vadd.f32 %v15865_v20, %v5300_v34  ;;  %v5998_v13 = vadd.f32 %v13626_v57, %v5957_v41  ;;  %v6614_v14 = vadd.f32 %v13775_v11, %v6576_v7  ;;  %v13896_v57 = vpop.permute.xlu1 %6773  ;;  %v15868_v11 = vld [vmem:[#allocation182_spill] sm:$0xff]  ;;  %v15878_v16 = vld [vmem:[#allocation183_spill] sm:$0xff] }
 0x912   :  { %v5414_v32 = vadd.f32 %v15866_v10, %v5379_v48  ;;  %v5926_v12 = vadd.f32 %v13628_v38, %v13620_v49  ;;  %v5992_v59 = vadd.f32 %v13618_v61, %v5952_v21  ;;  %v6004_v3 = vadd.f32 %v13634_v19, %v5962_v58  ;;  %v15870_v19 = vld [vmem:[#allocation186_spill] sm:$0xff]  ;;  %v15874_v21 = vld [vmem:[#allocation192_spill] sm:$0xff] }
 0x913   :  { %v5383_v0 = vadd.f32 %v15867_v17, %v5342_v23  ;;  %v6041_v37 = vadd.f32 %v13638_v50, %v5998_v13  ;;  %v6660_v25 = vadd.f32 %v6659_v2, %v6619_v15  ;;  %v6624_v55 = vadd.f32 %v6623_v56, %v6584_v26  ;;  %v6764_v2 = vpop.permute.xlu2 %6763  ;;  %v15872_v41 = vld [vmem:[#allocation190_spill] sm:$0xff]  ;;  %v15876_v15 = vld [vmem:[#allocation140_spill] sm:$0xff]  ;;  %v6628_v4 = vpop.f32.mrf.mxu2 }
 0x914   :  { %v5305_v24 = vadd.f32 %v15868_v11, %v5264_v52  ;;  %v5410_v62 = vadd.f32 %v15869_v5, %v5375_v1  ;;  %v6037_v49 = vadd.f32 %v13630_v46, %v5992_v59  ;;  %v6045_v61 = vadd.f32 %v13646_v44, %v6004_v3  ;;  %v15875_v46 = vld [vmem:[#allocation35_spill] sm:$0xff]  ;;  %v15877_v26 = vld [vmem:[#allocation164_spill] sm:$0xff]  ;;  %v15882_v59 = vld [vmem:[#allocation193_spill] sm:$0xff] }
 0x915   :  { %v6702_v29 = vpop.f32.mrf.mxu0  ;;  %v13862_v28 = vpop.f32.mrf.mxu1  ;;  %v5418_v54 = vadd.f32 %v15870_v19, %v5383_v0  ;;  %v6076_v40 = vadd.f32 %v13644_v27, %v6041_v37  ;;  %v6654_v53 = vadd.f32 %v15871_v31, %v6614_v14  ;;  %v5425_v34 = vadd.f32 %v5414_v32, %v4763_v47  ;;  %v15879_v1 = vld [vmem:[#allocation187_spill] sm:$0xff]  ;;  %v15881_v32 = vld [vmem:[#allocation188_spill] sm:$0xff] }
 0x916   :  { %v6665_v43 = vpop.f32.mrf.mxu3  ;;  %v6703_v50 = vadd.f32 %v6702_v29, %v6660_v25  ;;  %v5967_v7 = vadd.f32 %v15872_v41, %v5926_v12  ;;  %v6072_v42 = vadd.f32 %v15873_v8, %v6037_v49  ;;  %v6080_v58 = vadd.f32 %v15874_v21, %v6045_v61  ;;  %v6785_v31 = vld [vmem:[%s15138_s8 + $0x8] sm:$0xff] }
 0x917   :  { %v6666_v56 = vadd.f32 %v6665_v43, %v6624_v55  ;;  %v6588_v44 = vadd.f32 %v13821_v63, %v15875_v46  ;;  %v6699_v36 = vadd.f32 %v13823_v18, %v6654_v53  ;;  %v4098_v27 = vadd.f32 %v15876_v15, %v4063_v45  ;;  %v15880_v63 = vld [vmem:[#allocation191_spill] sm:$0xff]  ;;  %v6784_v45 = vld [vmem:[%s15138_s8] sm:$0xff]  ;;  %v6786_v15 = vld [vmem:[%s15138_s8 + $0x10] sm:$0xff] }
 0x918   :  { %v4760_v6 = vadd.f32 %v15877_v26, %v4725_v35  ;;  %v5424_v29 = vadd.f32 %v5410_v62, %v4762_v60  ;;  %v5348_v47 = vadd.f32 %v15878_v16, %v5305_v24  ;;  %v5426_v52 = vadd.f32 %v5418_v54, %v4764_v39  ;;  %v15883_v55 = vld [vmem:[#allocation194_spill] sm:$0xff] }
 0x919   :  { %v6087_v22 = vadd.f32 %v6076_v40, %v5425_v34  ;;  %v6734_v48 = vadd.f32 %v13862_v28, %v6699_v36  ;;  %v6010_v13 = vadd.f32 %v15880_v63, %v5967_v7  ;;  %v6629_v35 = vadd.f32 %v6628_v4, %v6588_v44  ;;  %v6769_v0 = vpop.permute.xlu1 %6768 }
 0x91a   :  { %v5387_v20 = vadd.f32 %v15879_v1, %v5348_v47  ;;  %v6086_v23 = vadd.f32 %v6072_v42, %v5424_v29  ;;  %v6088_v60 = vadd.f32 %v6080_v58, %v5426_v52  ;;  %v4103_v39 = vadd.f32 %v4098_v27, %v13832_v51 }
 0x91b   :  { %v6049_v3 = vadd.f32 %v15882_v59, %v6010_v13  ;;  %v6814_v17 = vsel %vm6812_vm2, %v6784_v45, 0  ;;  %v6759_v49 = vpop.permute.xlu2 %6758  ;;  %v6817_v42 = vsel %vm6812_vm2, %v6785_v31, 0  ;;  %v6820_v4 = vsel %vm6812_vm2, %v6786_v15, 0  ;;  %v6787_v13 = vld [vmem:[%s15138_s8 + $0x18] sm:$0xff] }
 0x91c   :  { %v5422_v28 = vadd.f32 %v15881_v32, %v5387_v20  ;;  %v6748_v43 = vadd.f32 %v6734_v48, %v6086_v23  ;;  %v4765_v37 = vadd.f32 %v4760_v6, %v4103_v39  ;;  %v13925_v61 = vand.u32 4294901760, %v6814_v17 }
 0x91d   :  { %v6737_v9 = vpop.f32.mrf.mxu1  ;;  %v6706_v38 = vpop.f32.mrf.mxu0  ;;  %v6084_v11 = vadd.f32 %v15883_v55, %v6049_v3  ;;  %v13937_v46 = vand.u32 4294901760, %v6817_v42  ;;  %v13951_v1 = vand.u32 4294901760, %v6820_v4  ;;  %v6823_v39 = vsel %vm6812_vm2, %v6787_v13, 0  ;;  %v7141_v55 = vld [vmem:[%s15139_s11 + $0x30] sm:$0xff] }
 0x91e   :  { %v6738_v30 = vadd.f32 %v6737_v9, %v6703_v50  ;;  %v6707_v33 = vadd.f32 %v6706_v38, %v6666_v56  ;;  %v6671_v12 = vpop.f32.mrf.mxu3  ;;  %v5427_v51 = vadd.f32 %v5422_v28, %v4765_v37  ;;  %v6776_v38 = vadd.f32 %v6759_v49, %v6748_v43 }
 0x91f   :  { %v6672_v24 = vadd.f32 %v6671_v12, %v6629_v35  ;;  %v6846_v41 = vsub.f32 %v6814_v17, %v13925_v61  ;;  %v6862_v35 = vsub.f32 %v6820_v4, %v13951_v1  ;;  %v6869_v59 = vand.u32 4294901760, %v6823_v39 }
 0x920   :  { %v6749_v14 = vadd.f32 %v6738_v30, %v6087_v22  ;;  %v6089_v53 = vadd.f32 %v6084_v11, %v5427_v51  ;;  %v6780_v7 = vmax.f32 %v6776_v38, 0.0  ;;  %v7167_v11 = vand.u32 4294901760, %v7141_v55 }
 0x921   :  { %v6847_v56 = vand.u32 4294901760, %v6846_v41  ;;  %v6863_v12 = vand.u32 4294901760, %v6862_v35 }
 0x922   :  { %v6777_v5 = vadd.f32 %v6764_v2, %v6749_v14  ;;  %v13940_v30 = vand.u32 4294901760, %v6780_v7 }
 0x923   :  { %v6848_v6 = vsub.f32 %v6846_v41, %v6847_v56  ;;  %v6864_v43 = vsub.f32 %v6862_v35, %v6863_v12 }
 0x924   :  { %v6781_v50 = vmax.f32 %v6777_v5, 0.0  ;;  %v6909_v16 = vsub.f32 %v6780_v7, %v13940_v30 }
 0x925   :  { %v6741_v18 = vpop.f32.mrf.mxu1  ;;  %v6710_v25 = vpop.f32.mrf.mxu0  ;;  %v6849_v48 = vand.u32 4294901760, %v6848_v6  ;;  %v6865_v17 = vand.u32 4294901760, %v6864_v43 }
 0x926   :  { %v6742_v10 = vadd.f32 %v6741_v18, %v6707_v33  ;;  %v6711_v19 = vadd.f32 %v6710_v25, %v6672_v24  ;;  %v13935_v58 = vand.u32 4294901760, %v6781_v50  ;;  %v6910_v63 = vand.u32 4294901760, %v6909_v16  ;;  %v7139_v24 = vld [vmem:[%s15139_s11 + $0x20] sm:$0xff] }
 0x927   :  { %v7169_v49 = vand.u32 4294901760, %v7139_v24 }
 0x928   :  { %v6750_v9 = vadd.f32 %v6742_v10, %v6088_v60  ;;  %v6903_v26 = vsub.f32 %v6781_v50, %v13935_v58  ;;  %v6911_v10 = vsub.f32 %v6909_v16, %v6910_v63 }
 0x929   :  { %v7227_v38 = vsub.f32 %v7139_v24, %v7169_v49 }
 0x92a   :  { %v6778_v62 = vadd.f32 %v6769_v0, %v6750_v9  ;;  %v6904_v22 = vand.u32 4294901760, %v6903_v26  ;;  %v6912_v3 = vand.u32 4294901760, %v6911_v10  ;;  %v6870_v9 = vsub.f32 %v6823_v39, %v6869_v59 }
 0x92b   :  { %v7228_v31 = vand.u32 4294901760, %v7227_v38 }
 0x92c   :  { %v6782_v54 = vmax.f32 %v6778_v62, 0.0  ;;  %v6905_v45 = vsub.f32 %v6903_v26, %v6904_v22  ;;  %v6871_v0 = vand.u32 4294901760, %v6870_v9  ;;  %v7221_v62 = vsub.f32 %v7141_v55, %v7167_v11  ;;  %v6805_v55 = vpop.permute.xlu2 %6804 }
 0x92d   :  { %v6745_v40 = vpop.f32.mrf.mxu1 }
 0x92e   :  { %v6746_v34 = vadd.f32 %v6745_v40, %v6711_v19  ;;  %v13931_v8 = vand.u32 4294901760, %v6782_v54  ;;  %v6906_v32 = vand.u32 4294901760, %v6905_v45  ;;  %v6872_v37 = vsub.f32 %v6870_v9, %v6871_v0 }
 0x92f   :  { %v7222_v51 = vand.u32 4294901760, %v7221_v62 }
 0x930   :  { %v6751_v2 = vadd.f32 %v6746_v34, %v6089_v53  ;;  %v6897_v36 = vsub.f32 %v6782_v54, %v13931_v8  ;;  %v6873_v25 = vand.u32 4294901760, %v6872_v37  ;;  %v7135_v54 = vld [vmem:[%s15139_s11] sm:$0xff] }
 0x931   :  { %v7223_v40 = vsub.f32 %v7221_v62, %v7222_v51  ;;  %v7173_v50 = vand.u32 4294901760, %v7135_v54 }
 0x932   :  { %v6779_v21 = vadd.f32 %v13896_v57, %v6751_v2  ;;  %v6854_v57 = vsub.f32 %v6817_v42, %v13937_v46  ;;  %v6898_v47 = vand.u32 4294901760, %v6897_v36 }
 0x933   :  { %v7224_v34 = vand.u32 4294901760, %v7223_v40  ;;  %v7239_v2 = vsub.f32 %v7135_v54, %v7173_v50 }
 0x934   :  { %v6783_v44 = vmax.f32 %v6779_v21, 0.0  ;;  %v6855_v33 = vand.u32 4294901760, %v6854_v57  ;;  %v6899_v23 = vsub.f32 %v6897_v36, %v6898_v47 }
 0x936   :  { %v6837_v27 = vand.u32 4294901760, %v6783_v44  ;;  %v6856_v60 = vsub.f32 %v6854_v57, %v6855_v33  ;;  %v6900_v14 = vand.u32 4294901760, %v6899_v23 }
 0x938   :  { %6838 = vmatpush.msra.mxu2 %v6837_v27  ;;  %6989 = vmatpush.msra.mxu1 %v6837_v27  ;;  %v6891_v29 = vsub.f32 %v6783_v44, %v6837_v27  ;;  %v6857_v28 = vand.u32 4294901760, %v6856_v60 }
 0x93a   :  { %6840 = vmatpush.msra.mxu2 %v13931_v8  ;;  %6945 = vmatpush.msra.mxu0 %v6891_v29  ;;  %v6892_v52 = vand.u32 4294901760, %v6891_v29 }
 0x93b   :  { %6991 = vmatpush.msra.mxu1 %v13931_v8 }
 0x93c   :  { %6842 = vmatpush.msra.mxu2 %v13935_v58  ;;  %6948 = vmatpush.msra.mxu0 %v6897_v36  ;;  %v6893_v20 = vsub.f32 %v6891_v29, %v6892_v52 }
 0x93d   :  { %6993 = vmatpush.msra.mxu1 %v13935_v58 }
 0x93e   :  { %6844 = vmatpush.msra.mxu2 %v13940_v30  ;;  %6951 = vmatpush.msra.mxu0 %v6903_v26  ;;  %v6894_v18 = vand.u32 4294901760, %v6893_v20 }
 0x93f   :  { %6995 = vmatpush.msra.mxu1 %v13940_v30  ;;  %6850 = vmatmul.f32.vlgmr.msra.gmra.mxu2 %v6849_v48  ;;  %v7142_v48 = vld [vmem:[%s15139_s11 + $0x38] sm:$0xff] }
 0x940   :  { %7036 = vmatpush.msrb.mxu2 %v6892_v52  ;;  %6895 = vmatpush.msra.mxu3 %v6894_v18  ;;  %v13993_v20 = vand.u32 4294901760, %v7142_v48 }
 0x941   :  { %6954 = vmatpush.msra.mxu0 %v6909_v16  ;;  %6999 = vmatmul.f32.vlgmr.msra.gmra.mxu1 %v6847_v56  ;;  %v7240_v56 = vand.u32 4294901760, %v7239_v2 }
 0x942   :  { %7040 = vmatpush.msrb.mxu2 %v6898_v47  ;;  %6901 = vmatpush.msra.mxu3 %v6900_v14  ;;  %v14000_v13 = vsub.f32 %v7142_v48, %v13993_v20 }
 0x943   :  { %6957 = vmatmul.f32.vlgmr.msra.gmra.mxu0 %v6846_v41  ;;  %v7229_v41 = vsub.f32 %v7227_v38, %v7228_v31  ;;  %7225 = vmatpush.msrb.mxu1 %v7224_v34  ;;  %v7241_v44 = vsub.f32 %v7239_v2, %v7240_v56 }
 0x944   :  { %7044 = vmatpush.msrb.mxu2 %v6904_v22  ;;  %6907 = vmatpush.msra.mxu3 %v6906_v32  ;;  %v7500_v10 = vand.u32 4294901760, %v14000_v13 }
 0x945   :  { %7168 = vmatpush.msrb.mxu0 %v7167_v11  ;;  %v7230_v21 = vand.u32 4294901760, %v7229_v41  ;;  %v7242_v36 = vand.u32 4294901760, %v7241_v44 }
 0x946   :  { %7048 = vmatpush.msrb.mxu2 %v6910_v63  ;;  %6913 = vmatpush.msra.mxu3 %v6912_v3  ;;  %v7140_v63 = vld [vmem:[%s15139_s11 + $0x28] sm:$0xff]  ;;  %v7501_v43 = vsub.f32 %v14000_v13, %v7500_v10 }
 0x947   :  { %6858 = vmatmul.f32.gmra.mxu2 %v6857_v28  ;;  %6915 = vmatmul.f32.vlgmr.msra.gmra.mxu3 %v13925_v61  ;;  %v14002_v18 = vand.u32 4294901760, %v7140_v63 }
 0x948   :  { %7079 = vmatpush.msrb.mxu3 %v6837_v27  ;;  %7275 = vmatpush.msra.mxu2 %v7221_v62 }
 0x949   :  { %7005 = vmatmul.f32.gmra.mxu1 %v6855_v33  ;;  %7170 = vmatpush.msrb.mxu0 %v7169_v49  ;;  %v6800_v33 = vpop.permute.xlu1 %6799  ;;  %v14012_v32 = vsub.f32 %v7140_v63, %v14002_v18 }
 0x94a   :  { %7081 = vmatpush.msrb.mxu3 %v13931_v8  ;;  %7278 = vmatpush.msra.mxu2 %v7227_v38 }
 0x94b   :  { %6962 = vmatmul.f32.gmra.mxu0 %v6854_v57  ;;  %7231 = vmatpush.msrb.mxu1 %v7230_v21  ;;  %v6795_v57 = vpop.permute.xlu0 %6794 }
 0x94c   :  { %7083 = vmatpush.msrb.mxu3 %v13935_v58 }
 0x94e   :  { %7085 = vmatpush.msrb.mxu3 %v13940_v30 }
 0x94f   :  { %6866 = vmatmul.f32.gmra.mxu2 %v6865_v17  ;;  %6919 = vmatmul.f32.gmra.mxu3 %v13937_v46 }
 0x950   :  { %7319 = vmatpush.msra.mxu3 %v7167_v11 }
 0x951   :  { %7011 = vmatmul.f32.gmra.mxu1 %v6863_v12  ;;  %v7136_v12 = vld [vmem:[%s15139_s11 + $0x8] sm:$0xff] }
 0x952   :  { %7321 = vmatpush.msra.mxu3 %v7169_v49  ;;  %v14020_v17 = vand.u32 4294901760, %v7136_v12 }
 0x953   :  { %6967 = vmatmul.f32.gmra.mxu0 %v6862_v35  ;;  %v7138_v35 = vld [vmem:[%s15139_s11 + $0x18] sm:$0xff] }
 0x954   :  { %v14009_v39 = vand.u32 4294901760, %v7138_v35  ;;  %v14029_v62 = vsub.f32 %v7136_v12, %v14020_v17 }
 0x956   :  { %v7518_v40 = vand.u32 4294901760, %v14029_v62 }
 0x957   :  { %6874 = vmatmul.f32.gmra.mxu2 %v6873_v25  ;;  %6923 = vmatmul.f32.gmra.mxu3 %v13951_v1 }
 0x958   :  { %v7519_v41 = vsub.f32 %v14029_v62, %v7518_v40 }
 0x959   :  { %7017 = vmatmul.f32.gmra.mxu1 %v6871_v0  ;;  %v14023_v0 = vsub.f32 %v7138_v35, %v14009_v39 }
 0x95a   :  { %v7520_v21 = vand.u32 4294901760, %v7519_v41 }
 0x95b   :  { %6972 = vmatmul.f32.gmra.mxu0 %v6870_v9  ;;  %v7506_v9 = vand.u32 4294901760, %v14012_v32 }
 0x95d   :  { %v7507_v24 = vsub.f32 %v14012_v32, %v7506_v9 }
 0x95f   :  { %6927 = vmatmul.f32.gmra.mxu3 %v6869_v59  ;;  %7050 = vmatmul.f32.vlgmr.msrb.gmra.mxu2 %v13925_v61 }
 0x967   :  { %7054 = vmatmul.f32.gmra.mxu2 %v13937_v46  ;;  %7087 = vmatmul.f32.vlgmr.msrb.gmra.mxu3 %v13925_v61  ;;  %v7137_v61 = vld [vmem:[%s15139_s11 + $0x10] sm:$0xff] }
 0x968   :  { %v7171_v19 = vand.u32 4294901760, %v7137_v61 }
 0x96a   :  { %v7233_v53 = vsub.f32 %v7137_v61, %v7171_v19  ;;  %7323 = vmatpush.msra.mxu3 %v7171_v19  ;;  %7172 = vmatpush.msrb.mxu0 %v7171_v19 }
 0x96c   :  { %v7234_v7 = vand.u32 4294901760, %v7233_v53  ;;  %7281 = vmatpush.msra.mxu2 %v7233_v53  ;;  %7325 = vmatpush.msra.mxu3 %v7173_v50 }
 0x96d   :  { %7174 = vmatpush.msrb.mxu0 %v7173_v50 }
 0x96e   :  { %v7235_v58 = vsub.f32 %v7233_v53, %v7234_v7  ;;  %7284 = vmatpush.msra.mxu2 %v7239_v2 }
 0x96f   :  { %7058 = vmatmul.f32.gmra.mxu2 %v13951_v1  ;;  %7091 = vmatmul.f32.gmra.mxu3 %v13937_v46 }
 0x970   :  { %7366 = vmatpush.msra.mxu0 %v7222_v51  ;;  %v7236_v46 = vand.u32 4294901760, %v7235_v58  ;;  %7446 = vmatpush.msrb.mxu2 %v13993_v20 }
 0x972   :  { %7370 = vmatpush.msra.mxu0 %v7228_v31  ;;  %7237 = vmatpush.msrb.mxu1 %v7236_v46  ;;  %v6810_v46 = vpop.permute.xlu0 %6809 }
 0x973   :  { %7448 = vmatpush.msrb.mxu2 %v14002_v18 }
 0x974   :  { %7374 = vmatpush.msra.mxu0 %v7234_v7  ;;  %7243 = vmatpush.msrb.mxu1 %v7242_v36 }
 0x975   :  { %7450 = vmatpush.msrb.mxu2 %v14009_v39 }
 0x976   :  { %7409 = vmatpush.msra.mxu1 %v7167_v11  ;;  %7378 = vmatpush.msra.mxu0 %v7240_v56  ;;  %v7502_v11 = vand.u32 4294901760, %v7501_v43 }
 0x977   :  { %7062 = vmatmul.f32.gmra.mxu2 %v6869_v59  ;;  %7095 = vmatmul.f32.gmra.mxu3 %v13951_v1 }
 0x978   :  { %7411 = vmatpush.msra.mxu1 %v7169_v49  ;;  %7452 = vmatpush.msrb.mxu2 %v14020_v17 }
 0x979   :  { %7503 = vmatpush.msrb.mxu3 %v7502_v11 }
 0x97a   :  { %7413 = vmatpush.msra.mxu1 %v7171_v19  ;;  %v7508_v19 = vand.u32 4294901760, %v7507_v24 }
 0x97c   :  { %7415 = vmatpush.msra.mxu1 %v7173_v50  ;;  %7509 = vmatpush.msrb.mxu3 %v7508_v19 }
 0x97f   :  { %7099 = vmatmul.f32.gmra.mxu3 %v6869_v59 }
 0x9be   :  { %v7000_v16 = vpop.f32.mrf.mxu1 }
 0x9c0   :  { %v6958_v27 = vpop.f32.mrf.mxu0 }
 0x9c2   :  { %v6851_v5 = vpop.f32.mrf.mxu2 }
 0x9c3   :  { %v6852_v29 = vadd.f32 %v6851_v5, %v6795_v57  ;;  %v7512_v5 = vand.u32 4294901760, %v14023_v0 }
 0x9c5   :  { %v7513_v54 = vsub.f32 %v14023_v0, %v7512_v5 }
 0x9c6   :  { %v7006_v14 = vpop.f32.mrf.mxu1 }
 0x9c7   :  { %v7514_v34 = vand.u32 4294901760, %v7513_v54 }
 0x9c8   :  { %v6963_v1 = vpop.f32.mrf.mxu0 }
 0x9c9   :  { %7515 = vmatpush.msrb.mxu3 %v7514_v34 }
 0x9ca   :  { %v6859_v8 = vpop.f32.mrf.mxu2  ;;  %v6916_v42 = vpop.f32.mrf.mxu3 }
 0x9cb   :  { %v6917_v47 = vadd.f32 %v6916_v42, %v6852_v29  ;;  %v6860_v23 = vadd.f32 %v6859_v8, %v6800_v33  ;;  %7521 = vmatpush.msrb.mxu3 %v7520_v21 }
 0x9cd   :  { %v6959_v22 = vadd.f32 %v6958_v27, %v6917_v47 }
 0x9ce   :  { %v7012_v2 = vpop.f32.mrf.mxu1 }
 0x9cf   :  { %v7001_v45 = vadd.f32 %v7000_v16, %v6959_v22 }
 0x9d0   :  { %v6968_v51 = vpop.f32.mrf.mxu0 }
 0x9d2   :  { %v6867_v30 = vpop.f32.mrf.mxu2  ;;  %v6920_v15 = vpop.f32.mrf.mxu3 }
 0x9d3   :  { %v6921_v60 = vadd.f32 %v6920_v15, %v6860_v23  ;;  %v6868_v49 = vadd.f32 %v6867_v30, %v6805_v55 }
 0x9d5   :  { %v6964_v37 = vadd.f32 %v6963_v1, %v6921_v60 }
 0x9d6   :  { %v7018_v33 = vpop.f32.mrf.mxu1 }
 0x9d7   :  { %v7007_v31 = vadd.f32 %v7006_v14, %v6964_v37 }
 0x9d8   :  { %v6973_v16 = vpop.f32.mrf.mxu0 }
 0x9da   :  { %v13986_v26 = vpop.f32.mrf.mxu2  ;;  %v6924_v6 = vpop.f32.mrf.mxu3 }
 0x9db   :  { %v6925_v53 = vadd.f32 %v6924_v6, %v6868_v49  ;;  %v6876_v30 = vadd.f32 %v13986_v26, %v6810_v46 }
 0x9dd   :  { %v6969_v58 = vadd.f32 %v6968_v51, %v6925_v53 }
 0x9df   :  { %v7013_v57 = vadd.f32 %v7012_v2, %v6969_v58  ;;  %v7123_v2 = vld [vmem:[%s15140_s10 + $0xa0] sm:$0xff] }
 0x9e2   :  { %v13988_v4 = vpop.f32.mrf.mxu3  ;;  %v7051_v52 = vpop.f32.mrf.mxu2 }
 0x9e3   :  { %v7052_v28 = vadd.f32 %v7051_v52, %v7001_v45  ;;  %v6929_v29 = vadd.f32 %v13988_v4, %v6876_v30 }
 0x9e5   :  { %v6974_v4 = vadd.f32 %v6973_v16, %v6929_v29  ;;  %v7119_v29 = vld [vmem:[%s15140_s10 + $0x80] sm:$0xff] }
 0x9ea   :  { %v7055_v59 = vpop.f32.mrf.mxu2  ;;  %v7088_v3 = vpop.f32.mrf.mxu3 }
 0x9eb   :  { %v7089_v25 = vadd.f32 %v7088_v3, %v7052_v28  ;;  %v7056_v7 = vadd.f32 %v7055_v59, %v7007_v31  ;;  %v7133_v59 = vld [vmem:[%s15140_s10 + $0xf0] sm:$0xff] }
 0x9ec   :  { %v14109_v43 = vand.u32 4294901760, %v7133_v59 }
 0x9ed   :  { %v7144_v61 = vsel %vm6812_vm2, %v7089_v25, 0  ;;  %v7129_v25 = vld [vmem:[%s15140_s10 + $0xd0] sm:$0xff] }
 0x9ee   :  { %v14032_v38 = vand.u32 4294901760, %v7144_v61 }
 0x9f0   :  { %v14037_v50 = vsub.f32 %v7144_v61, %v14032_v38  ;;  %7245 = vmatmul.f32.vlgmr.msrb.gmra.mxu1 %v14032_v38 }
 0x9f1   :  { %7597 = vmatpush.msrb.mxu1 %v13993_v20 }
 0x9f2   :  { %v7092_v8 = vpop.f32.mrf.mxu3  ;;  %7287 = vmatmul.f32.vlgmr.msra.gmra.mxu2 %v14037_v50  ;;  %v14044_v42 = vand.u32 4294901760, %v14037_v50  ;;  %v7059_v44 = vpop.f32.mrf.mxu2 }
 0x9f3   :  { %v7093_v56 = vadd.f32 %v7092_v8, %v7056_v7  ;;  %7599 = vmatpush.msrb.mxu1 %v14002_v18  ;;  %7644 = vmatpush.msra.mxu2 %v7500_v10  ;;  %v7060_v47 = vadd.f32 %v7059_v44, %v7013_v57  ;;  %v7121_v44 = vld [vmem:[%s15140_s10 + $0x90] sm:$0xff] }
 0x9f4   :  { %7329 = vmatmul.f32.vlgmr.msra.gmra.mxu3 %v14044_v42  ;;  %v7178_v36 = vsub.f32 %v14037_v50, %v14044_v42 }
 0x9f5   :  { %v7147_v15 = vsel %vm6812_vm2, %v7093_v56, 0  ;;  %7601 = vmatpush.msrb.mxu1 %v14009_v39  ;;  %7648 = vmatpush.msra.mxu2 %v7506_v9  ;;  %v7131_v9 = vld [vmem:[%s15140_s10 + $0xe0] sm:$0xff]  ;;  %v14173_v56 = vand.u32 4294901760, %v7123_v2 }
 0x9f6   :  { %v14053_v27 = vand.u32 4294901760, %v7147_v15  ;;  %v14055_v6 = vand.u32 4294901760, %v7178_v36  ;;  %7687 = vmatpush.msra.mxu3 %v13993_v20  ;;  %v14121_v37 = vand.u32 4294901760, %v7131_v9 }
 0x9f7   :  { %7603 = vmatpush.msrb.mxu1 %v14020_v17  ;;  %7652 = vmatpush.msra.mxu2 %v7512_v5  ;;  %v14133_v5 = vand.u32 4294901760, %v7129_v25 }
 0x9f8   :  { %v14061_v26 = vsub.f32 %v7147_v15, %v14053_v27  ;;  %7180 = vmatmul.f32.vlgmr.msrb.gmra.mxu0 %v14055_v6  ;;  %7249 = vmatmul.f32.gmra.mxu1 %v14053_v27  ;;  %v14131_v24 = vsub.f32 %v7131_v9, %v14121_v37  ;;  %v14183_v15 = vsub.f32 %v7123_v2, %v14173_v56 }
 0x9f9   :  { %7689 = vmatpush.msra.mxu3 %v14002_v18  ;;  %7553 = vmatpush.msrb.mxu0 %v14000_v13  ;;  %v7019_v18 = vadd.f32 %v7018_v33, %v6974_v4  ;;  %v14145_v19 = vsub.f32 %v7129_v25, %v14133_v5  ;;  %v14202_v4 = vand.u32 4294901760, %v7119_v29  ;;  %v7117_v33 = vld [vmem:[%s15140_s10 + $0x70] sm:$0xff] }
 0x9fa   :  { %v7096_v52 = vpop.f32.mrf.mxu3  ;;  %7292 = vmatmul.f32.gmra.mxu2 %v14061_v26  ;;  %v14068_v22 = vand.u32 4294901760, %v14061_v26  ;;  %v7063_v23 = vpop.f32.mrf.mxu2  ;;  %v15222_v51 = vand.u32 4294901760, %v14131_v24 }
 0x9fb   :  { %v7097_v48 = vadd.f32 %v7096_v52, %v7060_v47  ;;  %7656 = vmatpush.msra.mxu2 %v7518_v40  ;;  %7691 = vmatpush.msra.mxu3 %v14009_v39  ;;  %v7064_v60 = vadd.f32 %v7063_v23, %v7019_v18  ;;  %v7125_v40 = vld [vmem:[%s15140_s10 + $0xb0] sm:$0xff]  ;;  %v15220_v34 = vand.u32 4294901760, %v14145_v19  ;;  %v15216_v47 = vand.u32 4294901760, %v14183_v15 }
 0x9fc   :  { %7335 = vmatmul.f32.gmra.mxu3 %v14068_v22  ;;  %v7186_v1 = vsub.f32 %v14061_v26, %v14068_v22  ;;  %7556 = vmatpush.msrb.mxu0 %v14012_v32  ;;  %v7785_v53 = vsub.f32 %v14131_v24, %v15222_v51  ;;  %v14158_v41 = vand.u32 4294901760, %v7125_v40  ;;  %v14216_v18 = vsub.f32 %v7119_v29, %v14202_v4 }
 0x9fd   :  { %v7150_v20 = vsel %vm6812_vm2, %v7097_v48, 0  ;;  %7693 = vmatpush.msra.mxu3 %v14020_v17  ;;  %v7791_v21 = vsub.f32 %v14145_v19, %v15220_v34 }
 0x9fe   :  { %v14078_v63 = vand.u32 4294901760, %v7150_v20  ;;  %v14080_v13 = vand.u32 4294901760, %v7186_v1  ;;  %7559 = vmatpush.msrb.mxu0 %v14023_v0  ;;  %v14119_v0 = vsub.f32 %v7133_v59, %v14109_v43  ;;  %v7786_v8 = vand.u32 4294901760, %v7785_v53 }
 0x9ff   :  { %v14171_v58 = vsub.f32 %v7125_v40, %v14158_v41  ;;  %v7792_v36 = vand.u32 4294901760, %v7791_v21 }
 0xa00   :  { %v14084_v45 = vsub.f32 %v7150_v20, %v14078_v63  ;;  %7188 = vmatmul.f32.gmra.mxu0 %v14080_v13  ;;  %7253 = vmatmul.f32.gmra.mxu1 %v14078_v63  ;;  %v15223_v11 = vand.u32 4294901760, %v14119_v0  ;;  %v7809_v20 = vsub.f32 %v14183_v15, %v15216_v47 }
 0xa01   :  { %7562 = vmatpush.msrb.mxu0 %v14029_v62  ;;  %v7127_v62 = vld [vmem:[%s15140_s10 + $0xc0] sm:$0xff]  ;;  %v15218_v30 = vand.u32 4294901760, %v14171_v58 }
 0xa02   :  { %v7100_v35 = vpop.f32.mrf.mxu3  ;;  %7297 = vmatmul.f32.gmra.mxu2 %v14084_v45  ;;  %v14091_v14 = vand.u32 4294901760, %v14084_v45  ;;  %v7779_v61 = vsub.f32 %v14119_v0, %v15223_v11  ;;  %v14147_v54 = vand.u32 4294901760, %v7127_v62  ;;  %v15895_v11 = vld [vmem:[#allocation10_spill] sm:$0xff] }
 0xa03   :  { %v7101_v10 = vadd.f32 %v7100_v35, %v7064_v60  ;;  %v7803_v16 = vsub.f32 %v14171_v58, %v15218_v30  ;;  %v14219_v60 = vand.u32 4294901760, %v7117_v33  ;;  %v7115_v35 = vld [vmem:[%s15140_s10 + $0x60] sm:$0xff] }
 0xa04   :  { %7341 = vmatmul.f32.gmra.mxu3 %v14091_v14  ;;  %v7194_v39 = vsub.f32 %v14084_v45, %v14091_v14  ;;  %v7780_v31 = vand.u32 4294901760, %v7779_v61  ;;  %v14161_v7 = vsub.f32 %v7127_v62, %v14147_v54  ;;  %v14230_v59 = vand.u32 4294901760, %v7115_v35 }
 0xa05   :  { %v7153_v32 = vsel %vm6812_vm2, %v7101_v10, 0  ;;  %v7804_v1 = vand.u32 4294901760, %v7803_v16  ;;  %v7810_v10 = vand.u32 4294901760, %v7809_v20  ;;  %v14234_v9 = vsub.f32 %v7117_v33, %v14219_v60 }
 0xa06   :  { %v14097_v28 = vand.u32 4294901760, %v7153_v32  ;;  %v14099_v12 = vand.u32 4294901760, %v7194_v39  ;;  %v15219_v46 = vand.u32 4294901760, %v14161_v7  ;;  %v14245_v62 = vsub.f32 %v7115_v35, %v14230_v59 }
 0xa07   :  { %v15212_v40 = vand.u32 4294901760, %v14234_v9 }
 0xa08   :  { %v14105_v3 = vsub.f32 %v7153_v32, %v14097_v28  ;;  %7196 = vmatmul.f32.gmra.mxu0 %v14099_v12  ;;  %7257 = vmatmul.f32.gmra.mxu1 %v14097_v28  ;;  %v7797_v57 = vsub.f32 %v14161_v7, %v15219_v46  ;;  %v15214_v32 = vand.u32 4294901760, %v14216_v18  ;;  %v15211_v2 = vand.u32 4294901760, %v14245_v62  ;;  %v15889_v46 = vld [vmem:[#allocation14_spill] sm:$0xff] }
 0xa0a   :  { %7302 = vmatmul.f32.gmra.mxu2 %v14105_v3  ;;  %v14116_v17 = vand.u32 4294901760, %v14105_v3  ;;  %v7798_v48 = vand.u32 4294901760, %v7797_v57  ;;  %v7833_v57 = vsub.f32 %v14245_v62, %v15211_v2 }
 0xa0c   :  { %7347 = vmatmul.f32.gmra.mxu3 %v14116_v17  ;;  %v7202_v55 = vsub.f32 %v14105_v3, %v14116_v17 }
 0xa0e   :  { %v14138_v49 = vand.u32 4294901760, %v7202_v55  ;;  %v7821_v55 = vsub.f32 %v14216_v18, %v15214_v32  ;;  %v7130_v32 = vld [vmem:[%s15140_s10 + $0xd8] sm:$0xff] }
 0xa10   :  { %7204 = vmatmul.f32.gmra.mxu0 %v14138_v49  ;;  %7417 = vmatmul.f32.vlgmr.msra.gmra.mxu1 %v14032_v38  ;;  %v7822_v53 = vand.u32 4294901760, %v7821_v55 }
 0xa11   :  { %7781 = vmatpush.msra.mxu1 %v7780_v31  ;;  %v7111_v31 = vld [vmem:[%s15140_s10 + $0x40] sm:$0xff] }
 0xa12   :  { %7458 = vmatmul.f32.vlgmr.msrb.gmra.mxu2 %v14055_v6  ;;  %v14185_v6 = vand.u32 4294901760, %v7121_v44  ;;  %v14260_v21 = vand.u32 4294901760, %v7111_v31 }
 0xa13   :  { %7891 = vmatpush.msrb.mxu2 %v14119_v0  ;;  %7787 = vmatpush.msra.mxu1 %v7786_v8 }
 0xa14   :  { %7523 = vmatmul.f32.vlgmr.msrb.gmra.mxu3 %v14032_v38  ;;  %v14200_v52 = vsub.f32 %v7121_v44, %v14185_v6  ;;  %v7827_v44 = vsub.f32 %v14234_v9, %v15212_v40  ;;  %v14276_v16 = vsub.f32 %v7111_v31, %v14260_v21 }
 0xa15   :  { %7894 = vmatpush.msrb.mxu2 %v14131_v24  ;;  %7959 = vmatpush.msrb.mxu3 %v14109_v43 }
 0xa16   :  { %7793 = vmatpush.msra.mxu1 %v7792_v36  ;;  %v15215_v23 = vand.u32 4294901760, %v14200_v52  ;;  %v7109_v36 = vld [vmem:[%s15140_s10 + $0x30] sm:$0xff]  ;;  %v7828_v33 = vand.u32 4294901760, %v7827_v44  ;;  %v15207_v35 = vand.u32 4294901760, %v14276_v16  ;;  %v7103_v44 = vld [vmem:[%s15140_s10] sm:$0xff] }
 0xa17   :  { %7897 = vmatpush.msrb.mxu2 %v14145_v19  ;;  %7961 = vmatpush.msrb.mxu3 %v14121_v37 }
 0xa18   :  { %7380 = vmatmul.f32.vlgmr.msra.gmra.mxu0 %v14032_v38  ;;  %7421 = vmatmul.f32.gmra.mxu1 %v14053_v27  ;;  %v7815_v39 = vsub.f32 %v14200_v52, %v15215_v23  ;;  %v7845_v31 = vsub.f32 %v14276_v16, %v15207_v35  ;;  %v15886_v23 = vld [vmem:[#allocation8_spill] sm:$0xff] }
 0xa19   :  { %7799 = vmatpush.msra.mxu1 %v7798_v48  ;;  %7712 = vmatpush.msra.mxu0 %v14109_v43  ;;  %v14278_v48 = vand.u32 4294901760, %v7109_v36 }
 0xa1a   :  { %7466 = vmatmul.f32.gmra.mxu2 %v14080_v13  ;;  %7963 = vmatpush.msrb.mxu3 %v14133_v5  ;;  %v7113_v13 = vld [vmem:[%s15140_s10 + $0x50] sm:$0xff]  ;;  %v7816_v25 = vand.u32 4294901760, %v7815_v39  ;;  %v7834_v39 = vand.u32 4294901760, %v7833_v57 }
 0xa1b   :  { %7805 = vmatpush.msra.mxu1 %v7804_v1  ;;  %7900 = vmatpush.msrb.mxu2 %v14161_v7  ;;  %v14247_v61 = vand.u32 4294901760, %v7113_v13  ;;  %v7107_v1 = vld [vmem:[%s15140_s10 + $0x20] sm:$0xff] }
 0xa1c   :  { %7527 = vmatmul.f32.gmra.mxu3 %v14053_v27  ;;  %7714 = vmatpush.msra.mxu0 %v14121_v37 }
 0xa1d   :  { %7811 = vmatpush.msra.mxu1 %v7810_v10  ;;  %7903 = vmatpush.msrb.mxu2 %v14171_v58  ;;  %v14258_v8 = vsub.f32 %v7113_v13, %v14247_v61  ;;  %v14291_v10 = vsub.f32 %v7109_v36, %v14278_v48  ;;  %v14295_v13 = vand.u32 4294901760, %v7107_v1 }
 0xa1e   :  { %7965 = vmatpush.msrb.mxu3 %v14147_v54  ;;  %7716 = vmatpush.msra.mxu0 %v14133_v5 }
 0xa1f   :  { %7817 = vmatpush.msra.mxu1 %v7816_v25  ;;  %7906 = vmatpush.msrb.mxu2 %v14183_v15  ;;  %v15209_v29 = vand.u32 4294901760, %v14258_v8  ;;  %v15208_v25 = vand.u32 4294901760, %v14291_v10 }
 0xa20   :  { %7384 = vmatmul.f32.gmra.mxu0 %v14053_v27  ;;  %7425 = vmatmul.f32.gmra.mxu1 %v14078_v63 }
 0xa21   :  { %7967 = vmatpush.msrb.mxu3 %v14158_v41  ;;  %7718 = vmatpush.msra.mxu0 %v14147_v54  ;;  %v7839_v20 = vsub.f32 %v14258_v8, %v15209_v29 }
 0xa22   :  { %7474 = vmatmul.f32.gmra.mxu2 %v14099_v12  ;;  %7823 = vmatpush.msra.mxu1 %v7822_v53  ;;  %v7105_v12 = vld [vmem:[%s15140_s10 + $0x10] sm:$0xff]  ;;  %v14310_v53 = vsub.f32 %v7107_v1, %v14295_v13  ;;  %v7851_v1 = vsub.f32 %v14291_v10, %v15208_v25 }
 0xa23   :  { %7909 = vmatpush.msrb.mxu2 %v14200_v52  ;;  %7969 = vmatpush.msrb.mxu3 %v14173_v56  ;;  %v14303_v55 = vand.u32 4294901760, %v7105_v12  ;;  %v7840_v36 = vand.u32 4294901760, %v7839_v20 }
 0xa24   :  { %7531 = vmatmul.f32.gmra.mxu3 %v14078_v63  ;;  %7720 = vmatpush.msra.mxu0 %v14158_v41  ;;  %v15210_v35 = vand.u32 4294901760, %v14310_v53 }
 0xa25   :  { %7829 = vmatpush.msra.mxu1 %v7828_v33  ;;  %7912 = vmatpush.msrb.mxu2 %v14216_v18  ;;  %v14318_v57 = vsub.f32 %v7105_v12, %v14303_v55  ;;  %v14320_v33 = vand.u32 4294901760, %v7103_v44 }
 0xa26   :  { %7971 = vmatpush.msrb.mxu3 %v14185_v6  ;;  %7722 = vmatpush.msra.mxu0 %v14173_v56  ;;  %v7857_v25 = vsub.f32 %v14310_v53, %v15210_v35  ;;  %v7132_v35 = vld [vmem:[%s15140_s10 + $0xe8] sm:$0xff] }
 0xa27   :  { %15884 = vst [vmem:[#allocation37_spill] sm:$0xff] %v14318_v57  ;;  %7835 = vmatpush.msra.mxu1 %v7834_v39  ;;  %7915 = vmatpush.msrb.mxu2 %v14234_v9  ;;  %v14330_v20 = vsub.f32 %v7103_v44, %v14320_v33  ;;  %v7846_v39 = vand.u32 4294901760, %v7845_v31  ;;  %v15213_v12 = vand.u32 4294901760, %v14318_v57  ;;  %v7852_v44 = vand.u32 4294901760, %v7851_v1  ;;  %v7134_v31 = vld [vmem:[%s15140_s10 + $0xf8] sm:$0xff] }
 0xa28   :  { %7388 = vmatmul.f32.gmra.mxu0 %v14078_v63  ;;  %7429 = vmatmul.f32.gmra.mxu1 %v14097_v28  ;;  %v7858_v2 = vand.u32 4294901760, %v7857_v25 }
 0xa29   :  { %15885 = vst [vmem:[#allocation27_spill] sm:$0xff] %v14330_v20  ;;  %7973 = vmatpush.msrb.mxu3 %v14202_v4  ;;  %7724 = vmatpush.msra.mxu0 %v14185_v6  ;;  %v15217_v29 = vand.u32 4294901760, %v14330_v20  ;;  %v7863_v1 = vsub.f32 %v14318_v57, %v15213_v12  ;;  %v14365_v12 = vand.u32 4294901760, %v7132_v35 }
 0xa2a   :  { %7482 = vmatmul.f32.gmra.mxu2 %v14138_v49  ;;  %7841 = vmatpush.msra.mxu1 %v7840_v36  ;;  %v14347_v49 = vand.u32 4294901760, %v7134_v31  ;;  %v522_v36 = vpop.permute.xlu1 %521 }
 0xa2b   :  { %7918 = vmatpush.msrb.mxu2 %v14245_v62  ;;  %7975 = vmatpush.msrb.mxu3 %v14219_v60  ;;  %v577_v47 = vadd.f32 %v15886_v23, %v522_v36  ;;  %v7864_v25 = vand.u32 4294901760, %v7863_v1  ;;  %v14385_v36 = vsub.f32 %v7132_v35, %v14365_v12  ;;  %v15888_v1 = vld [vmem:[#allocation7_spill] sm:$0xff] }
 0xa2c   :  { %7535 = vmatmul.f32.gmra.mxu3 %v14097_v28  ;;  %7726 = vmatpush.msra.mxu0 %v14202_v4  ;;  %v14363_v40 = vsub.f32 %v7134_v31, %v14347_v49  ;;  %v7128_v31 = vld [vmem:[%s15140_s10 + $0xc8] sm:$0xff] }
 0xa2d   :  { %7847 = vmatpush.msra.mxu1 %v7846_v39  ;;  %7921 = vmatpush.msrb.mxu2 %v14258_v8  ;;  %v7869_v39 = vsub.f32 %v14330_v20, %v15217_v29  ;;  %15887 = vst [vmem:[#allocation29_spill] sm:$0xff] %v14385_v36  ;;  %v632_v29 = vadd.f32 %v15888_v1, %v577_v47  ;;  %v14394_v30 = vand.u32 4294901760, %v7128_v31  ;;  %v15224_v35 = vand.u32 4294901760, %v14385_v36 }
 0xa2e   :  { %7977 = vmatpush.msrb.mxu3 %v14230_v59  ;;  %7728 = vmatpush.msra.mxu0 %v14219_v60 }
 0xa2f   :  { %7853 = vmatpush.msra.mxu1 %v7852_v44  ;;  %7924 = vmatpush.msrb.mxu2 %v14276_v16  ;;  %v14376_v44 = vand.u32 4294901760, %v7130_v32  ;;  %v7870_v23 = vand.u32 4294901760, %v7869_v39  ;;  %v527_v39 = vpop.permute.xlu2 %526  ;;  %v670_v34 = vadd.f32 %v15889_v46, %v632_v29  ;;  %v7124_v46 = vld [vmem:[%s15140_s10 + $0xa8] sm:$0xff] }
 0xa30   :  { %7392 = vmatmul.f32.gmra.mxu0 %v14097_v28  ;;  %7607 = vmatmul.f32.vlgmr.msrb.gmra.mxu1 %v14044_v42  ;;  %v15221_v42 = vand.u32 4294901760, %v14363_v40  ;;  %v15890_v29 = vld [vmem:[#allocation15_spill] sm:$0xff] }
 0xa31   :  { %7979 = vmatpush.msrb.mxu3 %v14247_v61  ;;  %7730 = vmatpush.msra.mxu0 %v14230_v59  ;;  %v710_v1 = vadd.f32 %v15890_v29, %v670_v34  ;;  %v14424_v34 = vand.u32 4294901760, %v7124_v46 }
 0xa32   :  { %7658 = vmatmul.f32.vlgmr.msra.gmra.mxu2 %v14032_v38  ;;  %7859 = vmatpush.msra.mxu1 %v7858_v2  ;;  %v7126_v2 = vld [vmem:[%s15140_s10 + $0xb8] sm:$0xff]  ;;  %v8213_v47 = vsub.f32 %v14363_v40, %v15221_v42  ;;  %v14419_v42 = vsub.f32 %v7128_v31, %v14394_v30  ;;  %v8219_v31 = vsub.f32 %v14385_v36, %v15224_v35  ;;  %v15898_v36 = vld [vmem:[#allocation16_spill] sm:$0xff] }
 0xa33   :  { %7927 = vmatpush.msrb.mxu2 %v14291_v10  ;;  %7981 = vmatpush.msrb.mxu3 %v14260_v21 }
 0xa34   :  { %7695 = vmatmul.f32.vlgmr.msra.gmra.mxu3 %v14032_v38  ;;  %7732 = vmatpush.msra.mxu0 %v14247_v61  ;;  %v14400_v38 = vsub.f32 %v7130_v32, %v14376_v44  ;;  %v15891_v32 = vld [vmem:[#allocation2_spill] sm:$0xff]  ;;  %15892 = vst [vmem:[#allocation30_spill] sm:$0xff] %v14419_v42 }
 0xa35   :  { %7865 = vmatpush.msra.mxu1 %v7864_v25  ;;  %7930 = vmatpush.msrb.mxu2 %v14310_v53  ;;  %v14407_v25 = vand.u32 4294901760, %v7126_v2 }
 0xa36   :  { %7983 = vmatpush.msrb.mxu3 %v14278_v48  ;;  %7734 = vmatpush.msra.mxu0 %v14260_v21 }
 0xa37   :  { %7871 = vmatpush.msra.mxu1 %v7870_v23  ;;  %7933 = vmatpush.msrb.mxu2 %v14318_v57  ;;  %v585_v23 = vadd.f32 %v15891_v32, %v527_v39  ;;  %v14435_v39 = vsub.f32 %v7126_v2, %v14407_v25  ;;  %v7120_v32 = vld [vmem:[%s15140_s10 + $0x88] sm:$0xff] }
 0xa38   :  { %7565 = vmatmul.f32.vlgmr.msrb.gmra.mxu0 %v14037_v50  ;;  %7613 = vmatmul.f32.gmra.mxu1 %v14068_v22  ;;  %v7122_v50 = vld [vmem:[%s15140_s10 + $0x98] sm:$0xff]  ;;  %v8214_v22 = vand.u32 4294901760, %v8213_v47  ;;  %v14460_v47 = vand.u32 4294901760, %v7120_v32 }
 0xa39   :  { %7985 = vmatpush.msrb.mxu3 %v14295_v13  ;;  %7736 = vmatpush.msra.mxu0 %v14278_v48  ;;  %15893 = vst [vmem:[#allocation32_spill] sm:$0xff] %v14435_v39  ;;  %v636_v51 = vadd.f32 %v15895_v11, %v585_v23  ;;  %v14447_v2 = vand.u32 4294901760, %v7122_v50  ;;  %v15897_v11 = vld [vmem:[#allocation6_spill] sm:$0xff]  ;;  %v15231_v35 = vand.u32 4294901760, %v14435_v39 }
 0xa3a   :  { %7662 = vmatmul.f32.gmra.mxu2 %v14053_v27  ;;  %8097 = vmatpush.msrb.mxu1 %v14109_v43  ;;  %v15894_v43 = vld [vmem:[#allocation4_spill] sm:$0xff] }
 0xa3b   :  { %7936 = vmatpush.msrb.mxu2 %v14330_v20  ;;  %7987 = vmatpush.msrb.mxu3 %v14303_v55  ;;  %v755_v29 = vadd.f32 %v15894_v43, %v710_v1  ;;  %v14455_v43 = vsub.f32 %v7124_v46, %v14424_v34  ;;  %v675_v23 = vadd.f32 %v15897_v11, %v636_v51  ;;  %v7118_v20 = vld [vmem:[%s15140_s10 + $0x78] sm:$0xff] }
 0xa3c   :  { %7699 = vmatmul.f32.gmra.mxu3 %v14053_v27  ;;  %7738 = vmatpush.msra.mxu0 %v14295_v13  ;;  %v15896_v27 = vand.u32 4294901760, %v14400_v38  ;;  %v15899_v46 = vld [vmem:[#allocation17_spill] sm:$0xff]  ;;  %v14490_v11 = vsub.f32 %v7120_v32, %v14460_v47 }
 0xa3d   :  { %7989 = vmatpush.msrb.mxu3 %v14320_v33  ;;  %8099 = vmatpush.msrb.mxu1 %v14121_v37  ;;  %v8220_v37 = vand.u32 4294901760, %v8219_v31  ;;  %v790_v57 = vadd.f32 %v15898_v36, %v755_v29  ;;  %v716_v51 = vadd.f32 %v15899_v46, %v675_v23  ;;  %v14475_v31 = vsub.f32 %v7122_v50, %v14447_v2  ;;  %v7116_v29 = vld [vmem:[%s15140_s10 + $0x68] sm:$0xff] }
 0xa3e   :  { %8146 = vmatpush.msra.mxu2 %v14347_v49  ;;  %7740 = vmatpush.msra.mxu0 %v14303_v55  ;;  %v8225_v1 = vsub.f32 %v14400_v38, %v15896_v27  ;;  %v14480_v36 = vand.u32 4294901760, %v7118_v20  ;;  %v532_v27 = vpop.permute.xlu0 %531  ;;  %v8237_v50 = vsub.f32 %v14435_v39, %v15231_v35  ;;  %v15902_v46 = vand.u32 4294901760, %v14119_v0 }
 0xa3f   :  { %8101 = vmatpush.msrb.mxu1 %v14133_v5  ;;  %8215 = vmatpush.msra.mxu3 %v8214_v22  ;;  %v15900_v5 = vand.u32 4294901760, %v14419_v42  ;;  %v14493_v23 = vand.u32 4294901760, %v790_v57  ;;  %v15905_v0 = vand.u32 4294901760, %v14131_v24  ;;  %v7112_v24 = vld [vmem:[%s15140_s10 + $0x48] sm:$0xff] }
 0xa40   :  { %7570 = vmatmul.f32.gmra.mxu0 %v14061_v26  ;;  %7619 = vmatmul.f32.gmra.mxu1 %v14091_v14  ;;  %v8226_v26 = vand.u32 4294901760, %v8225_v1  ;;  %v15903_v14 = vld [vmem:[#allocation3_spill] sm:$0xff] }
 0xa41   :  { %8148 = vmatpush.msra.mxu2 %v14365_v12  ;;  %7742 = vmatpush.msra.mxu0 %v14320_v33  ;;  %v8231_v22 = vsub.f32 %v14419_v42, %v15900_v5  ;;  %v537_v5 = vpop.permute.xlu1 %536  ;;  %v759_v42 = vadd.f32 %v15903_v14, %v716_v51  ;;  %v14514_v51 = vsub.f32 %v7118_v20, %v14480_v36  ;;  %v15908_v20 = vld [vmem:[#allocation5_spill] sm:$0xff] }
 0xa42   :  { %7666 = vmatmul.f32.gmra.mxu2 %v14078_v63  ;;  %8103 = vmatpush.msrb.mxu1 %v14147_v54  ;;  %v15901_v54 = vld [vmem:[#allocation9_spill] sm:$0xff] }
 0xa43   :  { %8150 = vmatpush.msra.mxu2 %v14376_v44  ;;  %8221 = vmatpush.msra.mxu3 %v8220_v37  ;;  %v593_v1 = vadd.f32 %v15901_v54, %v532_v27  ;;  %v7114_v37 = vld [vmem:[%s15140_s10 + $0x58] sm:$0xff]  ;;  %v8232_v32 = vand.u32 4294901760, %v8231_v22  ;;  %v15235_v27 = vand.u32 4294901760, %v14475_v31  ;;  %v14505_v54 = vand.u32 4294901760, %v7116_v29 }
 0xa44   :  { %7703 = vmatmul.f32.gmra.mxu3 %v14078_v63  ;;  %8018 = vmatpush.msrb.mxu0 %v15902_v46  ;;  %v15904_v63 = vld [vmem:[#allocation12_spill] sm:$0xff]  ;;  %v15906_v46 = vand.u32 4294901760, %v14455_v43  ;;  %v14519_v14 = vand.u32 4294901760, %v7114_v37 }
 0xa45   :  { %8105 = vmatpush.msrb.mxu1 %v14158_v41  ;;  %8152 = vmatpush.msra.mxu2 %v14394_v30  ;;  %v640_v35 = vadd.f32 %v15904_v63, %v593_v1  ;;  %v8238_v41 = vand.u32 4294901760, %v8237_v50  ;;  %v14526_v63 = vsub.f32 %v790_v57, %v14493_v23  ;;  %v8249_v22 = vsub.f32 %v14475_v31, %v15235_v27  ;;  %v15911_v57 = vld [vmem:[#allocation21_spill] sm:$0xff]  ;;  %v15920_v27 = vld [vmem:[#allocation24_spill] sm:$0xff] }
 0xa46   :  { %8227 = vmatpush.msra.mxu3 %v8226_v26  ;;  %8022 = vmatpush.msrb.mxu0 %v15905_v0  ;;  %v8243_v39 = vsub.f32 %v14455_v43, %v15906_v46  ;;  %v15907_v26 = vld [vmem:[#allocation11_spill] sm:$0xff]  ;;  %v15910_v46 = vand.u32 4294901760, %v14145_v19  ;;  %v7110_v19 = vld [vmem:[%s15140_s10 + $0x38] sm:$0xff] }
 0xa47   :  { %8107 = vmatpush.msrb.mxu1 %v14173_v56  ;;  %8154 = vmatpush.msra.mxu2 %v14407_v25  ;;  %v601_v1 = vadd.f32 %v15907_v26, %v537_v5  ;;  %v680_v0 = vadd.f32 %v15908_v20, %v640_v35  ;;  %v15909_v56 = vld [vmem:[#allocation18_spill] sm:$0xff]  ;;  %v14538_v5 = vsub.f32 %v7116_v29, %v14505_v54  ;;  %v15912_v35 = vand.u32 4294901760, %v14490_v11 }
 0xa48   :  { %7575 = vmatmul.f32.gmra.mxu0 %v14084_v45  ;;  %7625 = vmatmul.f32.gmra.mxu1 %v14116_v17  ;;  %v794_v50 = vadd.f32 %v15909_v56, %v759_v42  ;;  %v8244_v45 = vand.u32 4294901760, %v8243_v39  ;;  %v15234_v17 = vand.u32 4294901760, %v14514_v51  ;;  %v14544_v42 = vand.u32 4294901760, %v7112_v24 }
 0xa49   :  { %8233 = vmatpush.msra.mxu3 %v8232_v32  ;;  %8026 = vmatpush.msrb.mxu0 %v15910_v46  ;;  %v722_v26 = vadd.f32 %v15911_v57, %v680_v0  ;;  %v8255_v29 = vsub.f32 %v14490_v11, %v15912_v35  ;;  %v14554_v32 = vsub.f32 %v7114_v37, %v14519_v14  ;;  %v14559_v20 = vand.u32 4294901760, %v14526_v63  ;;  %v15915_v46 = vld [vmem:[#allocation19_spill] sm:$0xff] }
 0xa4a   :  { %7670 = vmatmul.f32.gmra.mxu2 %v14097_v28  ;;  %8109 = vmatpush.msrb.mxu1 %v14185_v6  ;;  %v15913_v6 = vld [vmem:[#allocation13_spill] sm:$0xff]  ;;  %v15914_v0 = vand.u32 4294901760, %v14161_v7  ;;  %v14566_v56 = vand.u32 4294901760, %v794_v50  ;;  %v8250_v37 = vand.u32 4294901760, %v8249_v22  ;;  %v15916_v7 = vand.u32 4294901760, %v14171_v58 }
 0xa4b   :  { %8156 = vmatpush.msra.mxu2 %v14424_v34  ;;  %8239 = vmatpush.msra.mxu3 %v8238_v41  ;;  %v644_v39 = vadd.f32 %v15913_v6, %v601_v1  ;;  %v7108_v41 = vld [vmem:[%s15140_s10 + $0x28] sm:$0xff]  ;;  %v15236_v1 = vand.u32 4294901760, %v14538_v5  ;;  %v763_v57 = vadd.f32 %v15915_v46, %v722_v26  ;;  %v8261_v35 = vsub.f32 %v14514_v51, %v15234_v17 }
 0xa4c   :  { %7707 = vmatmul.f32.gmra.mxu3 %v14097_v28  ;;  %8030 = vmatpush.msrb.mxu0 %v15914_v0  ;;  %v14571_v28 = vand.u32 4294901760, %v7110_v19  ;;  %v14580_v6 = vsub.f32 %v7112_v24, %v14544_v42  ;;  %v8256_v22 = vand.u32 4294901760, %v8255_v29  ;;  %v14588_v58 = vand.u32 4294901760, %v7108_v41 }
 0xa4d   :  { %8111 = vmatpush.msrb.mxu1 %v14202_v4  ;;  %8158 = vmatpush.msra.mxu2 %v14447_v2  ;;  %v7106_v4 = vld [vmem:[%s15140_s10 + $0x18] sm:$0xff]  ;;  %v7746_v24 = vsub.f32 %v14526_v63, %v14559_v20  ;;  %v14599_v46 = vsub.f32 %v794_v50, %v14566_v56  ;;  %v15918_v29 = vand.u32 4294901760, %v14183_v15  ;;  %v8262_v50 = vand.u32 4294901760, %v8261_v35 }
 0xa4e   :  { %8245 = vmatpush.msra.mxu3 %v8244_v45  ;;  %8034 = vmatpush.msrb.mxu0 %v15916_v7  ;;  %v15917_v45 = vld [vmem:[#allocation20_spill] sm:$0xff]  ;;  %v14609_v7 = vand.u32 4294901760, %v7106_v4  ;;  %v8278_v15 = vand.u32 4294901760, %v14580_v6 }
 0xa4f   :  { %8113 = vmatpush.msrb.mxu1 %v14219_v60  ;;  %8160 = vmatpush.msra.mxu2 %v14460_v47  ;;  %v685_v0 = vadd.f32 %v15917_v45, %v644_v39  ;;  %v7104_v60 = vld [vmem:[%s15140_s10 + $0x8] sm:$0xff]  ;;  %v14607_v39 = vsub.f32 %v7110_v19, %v14571_v28  ;;  %v15919_v45 = vld [vmem:[#allocation22_spill] sm:$0xff] }
 0xa50   :  { %7580 = vmatmul.f32.gmra.mxu0 %v14105_v3  ;;  %7873 = vmatmul.f32.vlgmr.msra.gmra.mxu1 %v14493_v23  ;;  %v8267_v3 = vsub.f32 %v14538_v5, %v15236_v1  ;;  %v798_v17 = vadd.f32 %v15919_v45, %v763_v57  ;;  %v14623_v57 = vand.u32 4294901760, %v7104_v60  ;;  %v15923_v45 = vld [vmem:[#allocation23_spill] sm:$0xff]  ;;  %v14640_v1 = vand.u32 4294901760, %v14599_v46 }
 0xa51   :  { %8251 = vmatpush.msra.mxu3 %v8250_v37  ;;  %8038 = vmatpush.msrb.mxu0 %v15918_v29  ;;  %v728_v26 = vadd.f32 %v15920_v27, %v685_v0  ;;  %v15921_v37 = vand.u32 4294901760, %v14554_v32  ;;  %v14621_v29 = vsub.f32 %v7108_v41, %v14588_v58  ;;  %v15922_v27 = vand.u32 4294901760, %v14200_v52 }
 0xa52   :  { %7939 = vmatmul.f32.vlgmr.msrb.gmra.mxu2 %v14526_v63  ;;  %8115 = vmatpush.msrb.mxu1 %v14230_v59  ;;  %v14628_v59 = vand.u32 4294901760, %v7746_v24  ;;  %v8268_v35 = vand.u32 4294901760, %v8267_v3  ;;  %v14634_v0 = vsub.f32 %v7106_v4, %v14609_v7  ;;  %v14636_v41 = vand.u32 4294901760, %v798_v17 }
 0xa53   :  { %8162 = vmatpush.msra.mxu2 %v14480_v36  ;;  %8257 = vmatpush.msra.mxu3 %v8256_v22  ;;  %v8273_v19 = vsub.f32 %v14554_v32, %v15921_v37  ;;  %v8284_v22 = vand.u32 4294901760, %v14607_v39  ;;  %v767_v37 = vadd.f32 %v15923_v45, %v728_v26  ;;  %v15924_v52 = vand.u32 4294901760, %v14216_v18 }
 0xa54   :  { %7993 = vmatmul.f32.vlgmr.msrb.gmra.mxu3 %v14559_v20  ;;  %8042 = vmatpush.msrb.mxu0 %v15922_v27  ;;  %v8290_v24 = vand.u32 4294901760, %v14621_v29  ;;  %v14651_v26 = vsub.f32 %v7104_v60, %v14623_v57  ;;  %v15925_v18 = vand.u32 4294901760, %v14234_v9  ;;  %v8296_v3 = vand.u32 4294901760, %v14634_v0 }
 0xa55   :  { %8117 = vmatpush.msrb.mxu1 %v14247_v61  ;;  %8164 = vmatpush.msra.mxu2 %v14505_v54  ;;  %v8279_v61 = vsub.f32 %v14580_v6, %v8278_v15  ;;  %v8274_v4 = vand.u32 4294901760, %v8273_v19  ;;  %v7754_v60 = vsub.f32 %v14599_v46, %v14640_v1  ;;  %v14666_v27 = vsub.f32 %v798_v17, %v14636_v41 }
 0xa56   :  { %8263 = vmatpush.msra.mxu3 %v8262_v50  ;;  %8046 = vmatpush.msrb.mxu0 %v15924_v52  ;;  %v15926_v50 = vld [vmem:[#allocation25_spill] sm:$0xff]  ;;  %v8302_v45 = vand.u32 4294901760, %v14651_v26  ;;  %v8297_v17 = vsub.f32 %v14634_v0, %v8296_v3 }
 0xa57   :  { %8119 = vmatpush.msrb.mxu1 %v14260_v21  ;;  %8166 = vmatpush.msra.mxu2 %v14519_v14  ;;  %v8285_v21 = vsub.f32 %v14607_v39, %v8284_v22  ;;  %v802_v19 = vadd.f32 %v15926_v50, %v767_v37  ;;  %v8280_v9 = vand.u32 4294901760, %v8279_v61  ;;  %v15927_v37 = vand.u32 4294901760, %v14245_v62 }
 0xa58   :  { %7748 = vmatmul.f32.vlgmr.msra.gmra.mxu0 %v14628_v59  ;;  %7877 = vmatmul.f32.gmra.mxu1 %v14566_v56  ;;  %v14684_v61 = vand.u32 4294901760, %v7754_v60  ;;  %v15928_v62 = vand.u32 4294901760, %v14258_v8  ;;  %v8298_v50 = vand.u32 4294901760, %v8297_v17 }
 0xa59   :  { %8269 = vmatpush.msra.mxu3 %v8268_v35  ;;  %8050 = vmatpush.msrb.mxu0 %v15925_v18  ;;  %v8291_v35 = vsub.f32 %v14621_v29, %v8290_v24  ;;  %v14682_v52 = vand.u32 4294901760, %v802_v19  ;;  %v8303_v18 = vsub.f32 %v14651_v26, %v8302_v45 }
 0xa5a   :  { %7944 = vmatmul.f32.gmra.mxu2 %v14599_v46  ;;  %8121 = vmatpush.msrb.mxu1 %v14278_v48  ;;  %v8286_v48 = vand.u32 4294901760, %v8285_v21  ;;  %v15929_v21 = vand.u32 4294901760, %v14276_v16  ;;  %v15930_v16 = vand.u32 4294901760, %v14291_v10  ;;  %v15933_v10 = vld [vmem:[#allocation37_spill] sm:$0xff] }
 0xa5b   :  { %8168 = vmatpush.msra.mxu2 %v14544_v42  ;;  %8275 = vmatpush.msra.mxu3 %v8274_v4  ;;  %v14687_v4 = vand.u32 4294901760, %v14666_v27  ;;  %v8304_v60 = vand.u32 4294901760, %v8303_v18 }
 0xa5c   :  { %7999 = vmatmul.f32.gmra.mxu3 %v14640_v1  ;;  %8054 = vmatpush.msrb.mxu0 %v15927_v37  ;;  %v15934_v37 = vand.u32 4294901760, %v15933_v10 }
 0xa5d   :  { %8123 = vmatpush.msrb.mxu1 %v14295_v13  ;;  %8170 = vmatpush.msra.mxu2 %v14571_v28  ;;  %v8292_v13 = vand.u32 4294901760, %v8291_v35  ;;  %v7762_v8 = vsub.f32 %v14666_v27, %v14687_v4 }
 0xa5e   :  { %8281 = vmatpush.msra.mxu3 %v8280_v9  ;;  %8058 = vmatpush.msrb.mxu0 %v15928_v62  ;;  %v15937_v62 = vld [vmem:[#allocation27_spill] sm:$0xff] }
 0xa5f   :  { %8125 = vmatpush.msrb.mxu1 %v14303_v55  ;;  %8172 = vmatpush.msra.mxu2 %v14588_v58  ;;  %v14704_v55 = vsub.f32 %v802_v19, %v14682_v52  ;;  %v14712_v9 = vand.u32 4294901760, %v7762_v8  ;;  %v15932_v19 = vand.u32 4294901760, %v14363_v40 }
 0xa60   :  { %7756 = vmatmul.f32.gmra.mxu0 %v14684_v61  ;;  %7881 = vmatmul.f32.gmra.mxu1 %v14636_v41 }
 0xa61   :  { %8287 = vmatpush.msra.mxu3 %v8286_v48  ;;  %8062 = vmatpush.msrb.mxu0 %v15929_v21  ;;  %v14715_v35 = vand.u32 4294901760, %v14704_v55  ;;  %v15939_v21 = vand.u32 4294901760, %v14400_v38 }
 0xa62   :  { %7949 = vmatmul.f32.gmra.mxu2 %v14666_v27  ;;  %8127 = vmatpush.msrb.mxu1 %v14320_v33  ;;  %v15931_v33 = vand.u32 4294901760, %v14310_v53  ;;  %v15935_v53 = vld [vmem:[#allocation29_spill] sm:$0xff] }
 0xa63   :  { %8174 = vmatpush.msra.mxu2 %v14609_v7  ;;  %8293 = vmatpush.msra.mxu3 %v8292_v13  ;;  %v7770_v48 = vsub.f32 %v14704_v55, %v14715_v35  ;;  %v15936_v17 = vand.u32 4294901760, %v15935_v53  ;;  %v15938_v13 = vand.u32 4294901760, %v15937_v62 }
 0xa64   :  { %8005 = vmatmul.f32.gmra.mxu3 %v14687_v4  ;;  %8066 = vmatpush.msrb.mxu0 %v15930_v16 }
 0xa65   :  { %8176 = vmatpush.msra.mxu2 %v14623_v57  ;;  %8299 = vmatpush.msra.mxu3 %v8298_v50  ;;  %v14742_v50 = vand.u32 4294901760, %v7770_v48 }
 0xa66   :  { %8393 = vmatpush.msra.mxu1 %v14347_v49  ;;  %8070 = vmatpush.msrb.mxu0 %v15931_v33 }
 0xa67   :  { %8305 = vmatpush.msra.mxu3 %v8304_v60  ;;  %8452 = vmatpush.msrb.mxu2 %v15932_v19 }
 0xa68   :  { %7764 = vmatmul.f32.gmra.mxu0 %v14712_v9  ;;  %7885 = vmatmul.f32.gmra.mxu1 %v14682_v52 }
 0xa69   :  { %8395 = vmatpush.msra.mxu1 %v14365_v12  ;;  %8074 = vmatpush.msrb.mxu0 %v15934_v37 }
 0xa6a   :  { %7954 = vmatmul.f32.gmra.mxu2 %v14704_v55  ;;  %8531 = vmatpush.msrb.mxu3 %v14347_v49  ;;  %v15940_v49 = vld [vmem:[#allocation30_spill] sm:$0xff] }
 0xa6b   :  { %8397 = vmatpush.msra.mxu1 %v14376_v44  ;;  %8456 = vmatpush.msrb.mxu2 %v15936_v17  ;;  %v15941_v8 = vand.u32 4294901760, %v15940_v49 }
 0xa6c   :  { %8011 = vmatmul.f32.gmra.mxu3 %v14715_v35  ;;  %8078 = vmatpush.msrb.mxu0 %v15938_v13 }
 0xa6d   :  { %v14737_v18 = vpop.f32.mrf.mxu1  ;;  %8399 = vmatpush.msra.mxu1 %v14394_v30  ;;  %8460 = vmatpush.msrb.mxu2 %v15939_v21 }
 0xa6e   :  { %8533 = vmatpush.msrb.mxu3 %v14365_v12  ;;  %8325 = vmatpush.msra.mxu0 %v14363_v40  ;;  %v15942_v12 = vld [vmem:[#allocation32_spill] sm:$0xff] }
 0xa6f   :  { %8401 = vmatpush.msra.mxu1 %v14407_v25  ;;  %8464 = vmatpush.msrb.mxu2 %v15941_v8  ;;  %v15943_v60 = vand.u32 4294901760, %v15942_v12 }
 0xa70   :  { %7772 = vmatmul.f32.gmra.mxu0 %v14742_v50  ;;  %8129 = vmatmul.f32.vlgmr.msrb.gmra.mxu1 %v14493_v23 }
 0xa71   :  { %8535 = vmatpush.msrb.mxu3 %v14376_v44  ;;  %8328 = vmatpush.msra.mxu0 %v15935_v53  ;;  %v15944_v44 = vand.u32 4294901760, %v14455_v43 }
 0xa72   :  { %8182 = vmatmul.f32.vlgmr.msra.gmra.mxu2 %v14628_v59  ;;  %8403 = vmatpush.msra.mxu1 %v14424_v34 }
 0xa73   :  { %8468 = vmatpush.msrb.mxu2 %v15943_v60  ;;  %8537 = vmatpush.msrb.mxu3 %v14394_v30 }
 0xa74   :  { %8307 = vmatmul.f32.vlgmr.msra.gmra.mxu3 %v14493_v23  ;;  %8331 = vmatpush.msra.mxu0 %v14400_v38  ;;  %v15945_v38 = vand.u32 4294901760, %v14475_v31 }
 0xa75   :  { %v14760_v40 = vpop.f32.mrf.mxu0  ;;  %v14762_v16 = vpop.f32.mrf.mxu1  ;;  %8405 = vmatpush.msra.mxu1 %v14447_v2  ;;  %8472 = vmatpush.msrb.mxu2 %v15944_v44 }
 0xa76   :  { %v14767_v59 = vpop.f32.mrf.mxu2  ;;  %8539 = vmatpush.msrb.mxu3 %v14407_v25  ;;  %8334 = vmatpush.msra.mxu0 %v15940_v49  ;;  %v15946_v25 = vand.u32 4294901760, %v14490_v11 }
 0xa77   :  { %v14771_v30 = vpop.f32.mrf.mxu3  ;;  %8407 = vmatpush.msra.mxu1 %v14460_v47  ;;  %8476 = vmatpush.msrb.mxu2 %v15945_v38 }
 0xa78   :  { %8080 = vmatmul.f32.vlgmr.msrb.gmra.mxu0 %v14493_v23  ;;  %8133 = vmatmul.f32.gmra.mxu1 %v14566_v56 }
 0xa79   :  { %8541 = vmatpush.msrb.mxu3 %v14424_v34  ;;  %8337 = vmatpush.msra.mxu0 %v15942_v12  ;;  %v15947_v34 = vand.u32 4294901760, %v14514_v51 }
 0xa7a   :  { %8190 = vmatmul.f32.gmra.mxu2 %v14684_v61  ;;  %8409 = vmatpush.msra.mxu1 %v14480_v36 }
 0xa7b   :  { %8480 = vmatpush.msrb.mxu2 %v15946_v25  ;;  %8543 = vmatpush.msrb.mxu3 %v14447_v2 }
 0xa7c   :  { %8311 = vmatmul.f32.gmra.mxu3 %v14566_v56  ;;  %8340 = vmatpush.msra.mxu0 %v14455_v43  ;;  %v15948_v43 = vand.u32 4294901760, %v14538_v5 }
 0xa7d   :  { %v14787_v33 = vpop.f32.mrf.mxu0  ;;  %v14789_v19 = vpop.f32.mrf.mxu1  ;;  %8411 = vmatpush.msra.mxu1 %v14505_v54  ;;  %8484 = vmatpush.msrb.mxu2 %v15947_v34 }
 0xa7e   :  { %v14794_v61 = vpop.f32.mrf.mxu2  ;;  %8545 = vmatpush.msrb.mxu3 %v14460_v47  ;;  %8343 = vmatpush.msra.mxu0 %v14475_v31  ;;  %v15949_v47 = vand.u32 4294901760, %v14554_v32 }
 0xa7f   :  { %v14798_v2 = vpop.f32.mrf.mxu3  ;;  %8413 = vmatpush.msra.mxu1 %v14519_v14  ;;  %8488 = vmatpush.msrb.mxu2 %v15948_v43 }
 0xa80   :  { %8084 = vmatmul.f32.gmra.mxu0 %v14566_v56  ;;  %8137 = vmatmul.f32.gmra.mxu1 %v14636_v41 }
 0xa81   :  { %8547 = vmatpush.msrb.mxu3 %v14480_v36  ;;  %8346 = vmatpush.msra.mxu0 %v14490_v11 }
 0xa82   :  { %8198 = vmatmul.f32.gmra.mxu2 %v14712_v9  ;;  %8415 = vmatpush.msra.mxu1 %v14544_v42 }
 0xa83   :  { %8492 = vmatpush.msrb.mxu2 %v15949_v47  ;;  %8549 = vmatpush.msrb.mxu3 %v14505_v54 }
 0xa84   :  { %8315 = vmatmul.f32.gmra.mxu3 %v14636_v41  ;;  %8349 = vmatpush.msra.mxu0 %v14514_v51 }
 0xa85   :  { %v14814_v31 = vpop.f32.mrf.mxu0  ;;  %v14816_v10 = vpop.f32.mrf.mxu1  ;;  %8417 = vmatpush.msra.mxu1 %v14571_v28  ;;  %8496 = vmatpush.msrb.mxu2 %v8278_v15 }
 0xa86   :  { %v14821_v36 = vpop.f32.mrf.mxu2  ;;  %8551 = vmatpush.msrb.mxu3 %v14519_v14  ;;  %8352 = vmatpush.msra.mxu0 %v14538_v5 }
 0xa87   :  { %v14825_v11 = vpop.f32.mrf.mxu3  ;;  %8419 = vmatpush.msra.mxu1 %v14588_v58  ;;  %8500 = vmatpush.msrb.mxu2 %v8284_v22 }
 0xa88   :  { %8088 = vmatmul.f32.gmra.mxu0 %v14636_v41  ;;  %8141 = vmatmul.f32.gmra.mxu1 %v14682_v52 }
 0xa89   :  { %8553 = vmatpush.msrb.mxu3 %v14544_v42  ;;  %8355 = vmatpush.msra.mxu0 %v14554_v32 }
 0xa8a   :  { %8206 = vmatmul.f32.gmra.mxu2 %v14742_v50  ;;  %8421 = vmatpush.msra.mxu1 %v14609_v7 }
 0xa8b   :  { %8504 = vmatpush.msrb.mxu2 %v8290_v24  ;;  %8555 = vmatpush.msrb.mxu3 %v14571_v28 }
 0xa8c   :  { %8319 = vmatmul.f32.gmra.mxu3 %v14682_v52  ;;  %8358 = vmatpush.msra.mxu0 %v14580_v6 }
 0xa8d   :  { %v14841_v54 = vpop.f32.mrf.mxu0  ;;  %v14843_v51 = vpop.f32.mrf.mxu1  ;;  %8423 = vmatpush.msra.mxu1 %v14623_v57  ;;  %8508 = vmatpush.msrb.mxu2 %v8296_v3 }
 0xa8e   :  { %v14848_v14 = vpop.f32.mrf.mxu2  ;;  %8557 = vmatpush.msrb.mxu3 %v14588_v58  ;;  %8361 = vmatpush.msra.mxu0 %v14607_v39 }
 0xa8f   :  { %v14852_v5 = vpop.f32.mrf.mxu3  ;;  %8512 = vmatpush.msrb.mxu2 %v8302_v45 }
 0xa90   :  { %8092 = vmatmul.f32.gmra.mxu0 %v14682_v52  ;;  %8427 = vmatmul.f32.vlgmr.msra.gmra.mxu1 %v14559_v20 }
 0xa91   :  { %8559 = vmatpush.msrb.mxu3 %v14609_v7  ;;  %8364 = vmatpush.msra.mxu0 %v14621_v29 }
 0xa92   :  { %8514 = vmatmul.f32.vlgmr.msrb.gmra.mxu2 %v14493_v23 }
 0xa93   :  { %8561 = vmatpush.msrb.mxu3 %v14623_v57  ;;  %8367 = vmatpush.msra.mxu0 %v14634_v0 }
 0xa94   :  { %8563 = vmatmul.f32.vlgmr.msrb.gmra.mxu3 %v14493_v23 }
 0xa95   :  { %v14864_v42 = vpop.f32.mrf.mxu0  ;;  %v14866_v32 = vpop.f32.mrf.mxu1  ;;  %8370 = vmatpush.msra.mxu0 %v14651_v26 }
 0xa96   :  { %v14869_v28 = vpop.f32.mrf.mxu2 }
 0xa97   :  { %v14871_v20 = vpop.f32.mrf.mxu3 }
 0xa98   :  { %8373 = vmatmul.f32.vlgmr.msra.gmra.mxu0 %v14526_v63  ;;  %8433 = vmatmul.f32.gmra.mxu1 %v14640_v1 }
 0xa9a   :  { %8518 = vmatmul.f32.gmra.mxu2 %v14566_v56 }
 0xa9c   :  { %8567 = vmatmul.f32.gmra.mxu3 %v14566_v56 }
 0xa9d   :  { %v14877_v6 = vpop.f32.mrf.mxu0  ;;  %v14879_v23 = vpop.f32.mrf.mxu1 }
 0xa9e   :  { %v7467_v58 = vpop.f32.mrf.mxu2 }
 0xa9f   :  { %v7528_v39 = vpop.f32.mrf.mxu3 }
 0xaa0   :  { %8378 = vmatmul.f32.gmra.mxu0 %v14599_v46  ;;  %8439 = vmatmul.f32.gmra.mxu1 %v14687_v4  ;;  %v7529_v26 = vadd.f32 %v7528_v39, %v7467_v58 }
 0xaa2   :  { %8522 = vmatmul.f32.gmra.mxu2 %v14636_v41 }
 0xaa4   :  { %8571 = vmatmul.f32.gmra.mxu3 %v14636_v41 }
 0xaa5   :  { %v14885_v63 = vpop.f32.mrf.mxu0  ;;  %v14887_v1 = vpop.f32.mrf.mxu1 }
 0xaa6   :  { %v7475_v7 = vpop.f32.mrf.mxu2 }
 0xaa7   :  { %v7532_v56 = vpop.f32.mrf.mxu3 }
 0xaa8   :  { %8383 = vmatmul.f32.gmra.mxu0 %v14666_v27  ;;  %8445 = vmatmul.f32.gmra.mxu1 %v14715_v35  ;;  %v7533_v37 = vadd.f32 %v7532_v56, %v7475_v7 }
 0xaaa   :  { %8526 = vmatmul.f32.gmra.mxu2 %v14682_v52 }
 0xaac   :  { %8575 = vmatmul.f32.gmra.mxu3 %v14682_v52 }
 0xaad   :  { %v14893_v46 = vpop.f32.mrf.mxu0  ;;  %v14895_v15 = vpop.f32.mrf.mxu1 }
 0xaae   :  { %v7483_v29 = vpop.f32.mrf.mxu2 }
 0xaaf   :  { %v7536_v57 = vpop.f32.mrf.mxu3 }
 0xab0   :  { %8388 = vmatmul.f32.gmra.mxu0 %v14704_v55  ;;  %v7537_v49 = vadd.f32 %v7536_v57, %v7483_v29 }
 0xab5   :  { %v14898_v22 = vpop.f32.mrf.mxu0  ;;  %v7614_v0 = vpop.f32.mrf.mxu1 }
 0xab6   :  { %v14900_v41 = vpop.f32.mrf.mxu2 }
 0xab7   :  { %v14902_v24 = vpop.f32.mrf.mxu3 }
 0xabd   :  { %v7571_v3 = vpop.f32.mrf.mxu0  ;;  %v7620_v27 = vpop.f32.mrf.mxu1 }
 0xabe   :  { %v7572_v45 = vadd.f32 %v7571_v3, %v7529_v26  ;;  %v7663_v52 = vpop.f32.mrf.mxu2 }
 0xabf   :  { %v7700_v4 = vpop.f32.mrf.mxu3 }
 0xac0   :  { %v7615_v9 = vadd.f32 %v7614_v0, %v7572_v45 }
 0xac2   :  { %v7664_v35 = vadd.f32 %v7663_v52, %v7615_v9  ;;  %v7255_v9 = vadd.f32 %v14789_v19, %v14814_v31 }
 0xac4   :  { %v14904_v48 = vadd.f32 %v7700_v4, %v7664_v35  ;;  %v7251_v4 = vadd.f32 %v14762_v16, %v14787_v33  ;;  %v7247_v35 = vadd.f32 %v14737_v18, %v14760_v40  ;;  %v7259_v33 = vadd.f32 %v14816_v10, %v14841_v54 }
 0xac5   :  { %v7576_v53 = vpop.f32.mrf.mxu0  ;;  %v7626_v55 = vpop.f32.mrf.mxu1 }
 0xac6   :  { %v7577_v17 = vadd.f32 %v7576_v53, %v7533_v37  ;;  %v7667_v62 = vpop.f32.mrf.mxu2  ;;  %v7294_v37 = vadd.f32 %v14794_v61, %v7251_v4  ;;  %v7299_v53 = vadd.f32 %v14821_v36, %v7255_v9  ;;  %v7304_v61 = vadd.f32 %v14848_v14, %v7259_v33 }
 0xac7   :  { %v7704_v13 = vpop.f32.mrf.mxu3 }
 0xac8   :  { %v7621_v21 = vadd.f32 %v7620_v27, %v7577_v17  ;;  %v7343_v16 = vadd.f32 %v14825_v11, %v7299_v53 }
 0xaca   :  { %v7668_v50 = vadd.f32 %v7667_v62, %v7621_v21  ;;  %v7289_v62 = vadd.f32 %v14767_v59, %v7247_v35  ;;  %v7390_v40 = vadd.f32 %v14885_v63, %v7343_v16 }
 0xacc   :  { %v14906_v8 = vadd.f32 %v7704_v13, %v7668_v50  ;;  %v7337_v50 = vadd.f32 %v14798_v2, %v7294_v37  ;;  %v7331_v19 = vadd.f32 %v14771_v30, %v7289_v62  ;;  %v7427_v2 = vadd.f32 %v14879_v23, %v7390_v40 }
 0xacd   :  { %v7581_v12 = vpop.f32.mrf.mxu0  ;;  %v7874_v60 = vpop.f32.mrf.mxu1  ;;  %v7349_v30 = vadd.f32 %v14852_v5, %v7304_v61 }
 0xace   :  { %v7582_v44 = vadd.f32 %v7581_v12, %v7537_v49  ;;  %v7671_v38 = vpop.f32.mrf.mxu2  ;;  %v7386_v18 = vadd.f32 %v14877_v6, %v7337_v50  ;;  %v7382_v31 = vadd.f32 %v14864_v42, %v7331_v19  ;;  %v7525_v19 = vadd.f32 %v14871_v20, %v14869_v28 }
 0xacf   :  { %v7708_v25 = vpop.f32.mrf.mxu3  ;;  %v7394_v14 = vadd.f32 %v14893_v46, %v7349_v30 }
 0xad0   :  { %v7627_v34 = vadd.f32 %v7626_v55, %v7582_v44  ;;  %v7423_v49 = vadd.f32 %v14866_v32, %v7386_v18  ;;  %v7419_v10 = vadd.f32 %v14843_v51, %v7382_v31  ;;  %v8579_v51 = vld [vmem:[%s15141_s12] sm:$0xff]  ;;  %v7567_v31 = vadd.f32 %v14898_v22, %v7525_v19 }
 0xad1   :  { %v7431_v23 = vadd.f32 %v14887_v1, %v7394_v14 }
 0xad2   :  { %v7672_v43 = vadd.f32 %v7671_v38, %v7627_v34 }
 0xad4   :  { %v14908_v47 = vadd.f32 %v7708_v25, %v7672_v43 }
 0xad5   :  { %v7749_v58 = vpop.f32.mrf.mxu0  ;;  %v7878_v39 = vpop.f32.mrf.mxu1 }
 0xad6   :  { %v7940_v7 = vpop.f32.mrf.mxu2  ;;  %v7750_v63 = vadd.f32 %v7749_v58, %v7419_v10  ;;  %v7609_v10 = vadd.f32 %v14895_v15, %v7567_v31 }
 0xad7   :  { %v7994_v56 = vpop.f32.mrf.mxu3 }
 0xad8   :  { %v7875_v32 = vadd.f32 %v7874_v60, %v7750_v63 }
 0xada   :  { %v7941_v46 = vadd.f32 %v7940_v7, %v7875_v32  ;;  %v8580_v7 = vld [vmem:[%s15141_s12 + $0x8] sm:$0xff] }
 0xadb   :  { %v8604_v33 = vsel %vm6812_vm2, %v8580_v7, 0 }
 0xadd   :  { %v7757_v0 = vpop.f32.mrf.mxu0  ;;  %v7882_v26 = vpop.f32.mrf.mxu1 }
 0xade   :  { %v7945_v3 = vpop.f32.mrf.mxu2  ;;  %v7758_v54 = vadd.f32 %v7757_v0, %v7423_v49 }
 0xadf   :  { %v8000_v27 = vpop.f32.mrf.mxu3 }
 0xae0   :  { %v7879_v42 = vadd.f32 %v7878_v39, %v7758_v54 }
 0xae2   :  { %v7946_v4 = vadd.f32 %v7945_v3, %v7879_v42 }
 0xae4   :  { %v8001_v58 = vadd.f32 %v8000_v27, %v7946_v4 }
 0xae5   :  { %v7765_v29 = vpop.f32.mrf.mxu0  ;;  %v7886_v57 = vpop.f32.mrf.mxu1 }
 0xae6   :  { %v7950_v45 = vpop.f32.mrf.mxu2  ;;  %v7766_v6 = vadd.f32 %v7765_v29, %v7427_v2  ;;  %v7995_v29 = vadd.f32 %v7994_v56, %v7941_v46  ;;  %v8581_v2 = vld [vmem:[%s15141_s12 + $0x10] sm:$0xff] }
 0xae7   :  { %v8006_v52 = vpop.f32.mrf.mxu3 }
 0xae8   :  { %v7883_v44 = vadd.f32 %v7882_v26, %v7766_v6  ;;  %v8601_v26 = vsel %vm6812_vm2, %v8579_v51, 0  ;;  %v7660_v51 = vadd.f32 %v14900_v41, %v7609_v10 }
 0xaea   :  { %v7951_v5 = vadd.f32 %v7950_v45, %v7883_v44  ;;  %v14950_v45 = vand.u32 4294901760, %v8601_v26  ;;  %v8607_v44 = vsel %vm6812_vm2, %v8581_v2, 0 }
 0xaec   :  { %v8007_v39 = vadd.f32 %v8006_v52, %v7951_v5 }
 0xaed   :  { %v7773_v55 = vpop.f32.mrf.mxu0  ;;  %v8130_v17 = vpop.f32.mrf.mxu1 }
 0xaee   :  { %v7955_v13 = vpop.f32.mrf.mxu2  ;;  %v7774_v9 = vadd.f32 %v7773_v55, %v7431_v23 }
 0xaef   :  { %v8012_v21 = vpop.f32.mrf.mxu3 }
 0xaf0   :  { %v7887_v0 = vadd.f32 %v7886_v57, %v7774_v9  ;;  %v14956_v57 = vsub.f32 %v8601_v26, %v14950_v45  ;;  %v15008_v9 = vand.u32 4294901760, %v8607_v44 }
 0xaf2   :  { %v7956_v55 = vadd.f32 %v7955_v13, %v7887_v0 }
 0xaf4   :  { %v8013_v56 = vadd.f32 %v8012_v21, %v7956_v55  ;;  %v14971_v21 = vand.u32 4294901760, %v14956_v57 }
 0xaf5   :  { %v8081_v59 = vpop.f32.mrf.mxu0  ;;  %v8134_v36 = vpop.f32.mrf.mxu1 }
 0xaf6   :  { %v14930_v11 = vpop.f32.mrf.mxu2  ;;  %v8082_v62 = vadd.f32 %v8081_v59, %v7995_v29  ;;  %v8632_v54 = vsub.f32 %v14956_v57, %v14971_v21  ;;  %v15019_v29 = vsub.f32 %v8607_v44, %v15008_v9 }
 0xaf7   :  { %v14932_v12 = vpop.f32.mrf.mxu3 }
 0xaf8   :  { %v8131_v52 = vadd.f32 %v8130_v17, %v8082_v62  ;;  %v14973_v17 = vand.u32 4294901760, %v8604_v33  ;;  %v15003_v4 = vand.u32 4294901760, %v8632_v54 }
 0xafa   :  { %v14990_v6 = vsub.f32 %v8604_v33, %v14973_v17 }
 0xafc   :  { %v15006_v5 = vand.u32 4294901760, %v14990_v6 }
 0xafd   :  { %v8085_v38 = vpop.f32.mrf.mxu0  ;;  %v8138_v25 = vpop.f32.mrf.mxu1 }
 0xafe   :  { %v14938_v34 = vpop.f32.mrf.mxu2  ;;  %v8086_v1 = vadd.f32 %v8085_v38, %v8001_v58  ;;  %v8640_v41 = vsub.f32 %v14990_v6, %v15006_v5 }
 0xaff   :  { %v14940_v43 = vpop.f32.mrf.mxu3 }
 0xb00   :  { %v8135_v27 = vadd.f32 %v8134_v36, %v8086_v1  ;;  %v14975_v36 = vand.u32 4294901760, %v8131_v52  ;;  %v7697_v1 = vadd.f32 %v14902_v24, %v7660_v51  ;;  %v15027_v24 = vand.u32 4294901760, %v8640_v41 }
 0xb02   :  { %v14963_v18 = vand.u32 4294901760, %v8135_v27  ;;  %v8685_v63 = vsub.f32 %v8131_v52, %v14975_v36 }
 0xb04   :  { %v8679_v22 = vsub.f32 %v8135_v27, %v14963_v18 }
 0xb05   :  { %v8089_v60 = vpop.f32.mrf.mxu0  ;;  %v8142_v53 = vpop.f32.mrf.mxu1 }
 0xb06   :  { %v8090_v35 = vadd.f32 %v8089_v60, %v8007_v39  ;;  %v14946_v37 = vpop.f32.mrf.mxu2  ;;  %v8680_v32 = vand.u32 4294901760, %v8679_v22  ;;  %v8686_v39 = vand.u32 4294901760, %v8685_v63 }
 0xb07   :  { %v14948_v3 = vpop.f32.mrf.mxu3  ;;  %v8200_v52 = vadd.f32 %v14946_v37, %v14906_v8 }
 0xb08   :  { %v8139_v50 = vadd.f32 %v8138_v25, %v8090_v35  ;;  %v8681_v26 = vsub.f32 %v8679_v22, %v8680_v32  ;;  %v8192_v35 = vadd.f32 %v14938_v34, %v14904_v48  ;;  %v8687_v55 = vsub.f32 %v8685_v63, %v8686_v39 }
 0xb09   :  { %v15030_v48 = vand.u32 4294901760, %v15019_v29 }
 0xb0a   :  { %v14958_v16 = vand.u32 4294901760, %v8139_v50  ;;  %v8682_v27 = vand.u32 4294901760, %v8681_v26  ;;  %v8313_v34 = vadd.f32 %v14940_v43, %v8192_v35  ;;  %v8317_v43 = vadd.f32 %v14948_v3, %v8200_v52 }
 0xb0c   :  { %v8673_v28 = vsub.f32 %v8139_v50, %v14958_v16  ;;  %v8184_v50 = vadd.f32 %v14930_v11, %v7697_v1  ;;  %v8688_v11 = vand.u32 4294901760, %v8687_v55 }
 0xb0d   :  { %v8093_v13 = vpop.f32.mrf.mxu0  ;;  %v14978_v20 = vpop.f32.mrf.mxu1 }
 0xb0e   :  { %v8094_v40 = vadd.f32 %v8093_v13, %v8013_v56  ;;  %v14965_v61 = vpop.f32.mrf.mxu2  ;;  %v8674_v42 = vand.u32 4294901760, %v8673_v28  ;;  %v8309_v33 = vadd.f32 %v14932_v12, %v8184_v50  ;;  %v8648_v13 = vsub.f32 %v15019_v29, %v15030_v48 }
 0xb0f   :  { %v14968_v59 = vpop.f32.mrf.mxu3  ;;  %v8208_v2 = vadd.f32 %v14965_v61, %v14908_v47 }
 0xb10   :  { %v8143_v49 = vadd.f32 %v8142_v53, %v8094_v40  ;;  %v8675_v58 = vsub.f32 %v8673_v28, %v8674_v42 }
 0xb12   :  { %v14983_v30 = vand.u32 4294901760, %v8143_v49  ;;  %v8676_v53 = vand.u32 4294901760, %v8675_v58 }
 0xb14   :  { %v8667_v14 = vsub.f32 %v8143_v49, %v14983_v30  ;;  %8622 = vmatpush.msrb.mxu0 %v14983_v30  ;;  %8756 = vmatpush.msra.mxu3 %v14983_v30 }
 0xb15   :  { %v8374_v38 = vpop.f32.mrf.mxu0  ;;  %v8434_v60 = vpop.f32.mrf.mxu1 }
 0xb16   :  { %v14997_v25 = vpop.f32.mrf.mxu2  ;;  %8624 = vmatpush.msrb.mxu0 %v14958_v16  ;;  %8717 = vmatpush.msra.mxu2 %v8667_v14  ;;  %v8668_v15 = vand.u32 4294901760, %v8667_v14  ;;  %v8375_v40 = vadd.f32 %v8374_v38, %v8309_v33 }
 0xb17   :  { %8758 = vmatpush.msra.mxu3 %v14958_v16  ;;  %v15001_v23 = vpop.f32.mrf.mxu3 }
 0xb18   :  { %8626 = vmatpush.msrb.mxu0 %v14963_v18  ;;  %8720 = vmatpush.msra.mxu2 %v8673_v28  ;;  %v8669_v46 = vsub.f32 %v8667_v14, %v8668_v15  ;;  %v15045_v28 = vand.u32 4294901760, %v8648_v13  ;;  %v8429_v3 = vadd.f32 %v14978_v20, %v8375_v40  ;;  %v15087_v40 = vpop.permute.xlu0 %8597 }
 0xb19   :  { %8760 = vmatpush.msra.mxu3 %v14963_v18 }
 0xb1a   :  { %8628 = vmatpush.msrb.mxu0 %v14975_v36  ;;  %8723 = vmatpush.msra.mxu2 %v8679_v22  ;;  %v8670_v0 = vand.u32 4294901760, %v8669_v46  ;;  %v8516_v14 = vadd.f32 %v14997_v25, %v8429_v3  ;;  %v15090_v3 = vpop.permute.xlu1 %8592 }
 0xb1b   :  { %8762 = vmatpush.msra.mxu3 %v14975_v36  ;;  %8634 = vmatmul.f32.vlgmr.msrb.gmra.mxu0 %v15003_v4 }
 0xb1c   :  { %8797 = vmatpush.msra.mxu0 %v8668_v15  ;;  %8671 = vmatpush.msrb.mxu1 %v8670_v0 }
 0xb1d   :  { %8726 = vmatpush.msra.mxu2 %v8685_v63  ;;  %v8379_v62 = vpop.f32.mrf.mxu0  ;;  %8766 = vmatmul.f32.vlgmr.msra.gmra.mxu3 %v14971_v21  ;;  %v8440_v8 = vpop.f32.mrf.mxu1 }
 0xb1e   :  { %v8519_v7 = vpop.f32.mrf.mxu2  ;;  %8801 = vmatpush.msra.mxu0 %v8674_v42  ;;  %8677 = vmatpush.msrb.mxu1 %v8676_v53  ;;  %v8380_v19 = vadd.f32 %v8379_v62, %v8313_v34  ;;  %v8565_v42 = vadd.f32 %v15001_v23, %v8516_v14  ;;  %v15084_v34 = vpop.permute.xlu2 %8587 }
 0xb1f   :  { %v8568_v56 = vpop.f32.mrf.mxu3  ;;  %8729 = vmatmul.f32.vlgmr.msra.gmra.mxu2 %v14956_v57 }
 0xb20   :  { %8805 = vmatpush.msra.mxu0 %v8680_v32  ;;  %8683 = vmatpush.msrb.mxu1 %v8682_v27  ;;  %v8435_v12 = vadd.f32 %v8434_v60, %v8380_v19 }
 0xb22   :  { %8809 = vmatpush.msra.mxu0 %v8686_v39  ;;  %8689 = vmatpush.msrb.mxu1 %v8688_v11  ;;  %v8520_v10 = vadd.f32 %v8519_v7, %v8435_v12 }
 0xb23   :  { %8642 = vmatmul.f32.gmra.mxu0 %v15027_v24  ;;  %8691 = vmatmul.f32.vlgmr.msrb.gmra.mxu1 %v14950_v45 }
 0xb24   :  { %8836 = vmatpush.msra.mxu1 %v14983_v30  ;;  %v8569_v61 = vadd.f32 %v8568_v56, %v8520_v10 }
 0xb25   :  { %v8384_v37 = vpop.f32.mrf.mxu0  ;;  %8772 = vmatmul.f32.gmra.mxu3 %v15006_v5 }
 0xb26   :  { %v8385_v31 = vadd.f32 %v8384_v37, %v8317_v43  ;;  %8838 = vmatpush.msra.mxu1 %v14958_v16  ;;  %v8523_v49 = vpop.f32.mrf.mxu2  ;;  %v8321_v16 = vadd.f32 %v14968_v59, %v8208_v2  ;;  %v8872_v15 = vand.u32 4294901760, %v8569_v61  ;;  %v8874_v59 = vand.u32 4294901760, %v8565_v42 }
 0xb27   :  { %8734 = vmatmul.f32.gmra.mxu2 %v14990_v6  ;;  %v8572_v30 = vpop.f32.mrf.mxu3 }
 0xb28   :  { %v8441_v22 = vadd.f32 %v8440_v8, %v8385_v31  ;;  %8840 = vmatpush.msra.mxu1 %v14963_v18  ;;  %v8446_v18 = vpop.f32.mrf.mxu1  ;;  %v8926_v58 = vsub.f32 %v8569_v61, %v8872_v15  ;;  %v8932_v0 = vsub.f32 %v8565_v42, %v8874_v59 }
 0xb2a   :  { %v8524_v54 = vadd.f32 %v8523_v49, %v8441_v22  ;;  %8842 = vmatpush.msra.mxu1 %v14975_v36  ;;  %v8927_v41 = vand.u32 4294901760, %v8926_v58  ;;  %v8933_v53 = vand.u32 4294901760, %v8932_v0 }
 0xb2b   :  { %8650 = vmatmul.f32.gmra.mxu0 %v15045_v28  ;;  %8695 = vmatmul.f32.gmra.mxu1 %v14973_v17 }
 0xb2c   :  { %v8573_v63 = vadd.f32 %v8572_v30, %v8524_v54  ;;  %v8928_v62 = vsub.f32 %v8926_v58, %v8927_v41  ;;  %v8934_v7 = vsub.f32 %v8932_v0, %v8933_v53 }
 0xb2d   :  { %v8389_v47 = vpop.f32.mrf.mxu0  ;;  %8778 = vmatmul.f32.gmra.mxu3 %v15030_v48 }
 0xb2e   :  { %v8390_v20 = vadd.f32 %v8389_v47, %v8321_v16  ;;  %v8870_v36 = vand.u32 4294901760, %v8573_v63  ;;  %v8527_v38 = vpop.f32.mrf.mxu2  ;;  %v8929_v27 = vand.u32 4294901760, %v8928_v62  ;;  %v8935_v56 = vand.u32 4294901760, %v8934_v7  ;;  %v9149_v62 = vld [vmem:[%s15142_s14 + $0x20] sm:$0xff] }
 0xb2f   :  { %8739 = vmatmul.f32.gmra.mxu2 %v15019_v29  ;;  %v8576_v51 = vpop.f32.mrf.mxu3 }
 0xb30   :  { %v8447_v44 = vadd.f32 %v8446_v18, %v8390_v20  ;;  %v8920_v25 = vsub.f32 %v8573_v63, %v8870_v36 }
 0xb32   :  { %v8528_v32 = vadd.f32 %v8527_v38, %v8447_v44  ;;  %v8921_v23 = vand.u32 4294901760, %v8920_v25 }
 0xb33   :  { %8699 = vmatmul.f32.gmra.mxu1 %v15008_v9  ;;  %8811 = vmatmul.f32.vlgmr.msra.gmra.mxu0 %v14950_v45 }
 0xb34   :  { %v8577_v46 = vadd.f32 %v8576_v51, %v8528_v32  ;;  %v8922_v35 = vsub.f32 %v8920_v25, %v8921_v23 }
 0xb36   :  { %v8868_v39 = vand.u32 4294901760, %v8577_v46  ;;  %v8923_v50 = vand.u32 4294901760, %v8922_v35 }
 0xb38   :  { %v8914_v26 = vsub.f32 %v8577_v46, %v8868_v39  ;;  %8869 = vmatpush.msrb.mxu2 %v8868_v39  ;;  %9003 = vmatpush.msrb.mxu1 %v8868_v39 }
 0xb3a   :  { %v8915_v60 = vand.u32 4294901760, %v8914_v26  ;;  %8871 = vmatpush.msrb.mxu2 %v8870_v36  ;;  %8964 = vmatpush.msrb.mxu0 %v8914_v26 }
 0xb3b   :  { %9005 = vmatpush.msrb.mxu1 %v8870_v36  ;;  %8815 = vmatmul.f32.gmra.mxu0 %v14973_v17 }
 0xb3c   :  { %v8916_v1 = vsub.f32 %v8914_v26, %v8915_v60  ;;  %8844 = vmatmul.f32.vlgmr.msra.gmra.mxu1 %v14950_v45  ;;  %8873 = vmatpush.msrb.mxu2 %v8872_v15 }
 0xb3d   :  { %8967 = vmatpush.msrb.mxu0 %v8920_v25  ;;  %9007 = vmatpush.msrb.mxu1 %v8872_v15 }
 0xb3e   :  { %8875 = vmatpush.msrb.mxu2 %v8874_v59  ;;  %v8917_v55 = vand.u32 4294901760, %v8916_v1 }
 0xb3f   :  { %8970 = vmatpush.msrb.mxu0 %v8926_v58  ;;  %9009 = vmatpush.msrb.mxu1 %v8874_v59 }
 0xb40   :  { %8881 = vmatmul.f32.vlgmr.msrb.gmra.mxu2 %v15003_v4  ;;  %8918 = vmatpush.msrb.mxu3 %v8917_v55  ;;  %v9147_v55 = vld [vmem:[%s15142_s14 + $0x10] sm:$0xff] }
 0xb41   :  { %9044 = vmatpush.msra.mxu2 %v8915_v60  ;;  %8973 = vmatpush.msrb.mxu0 %v8932_v0  ;;  %v9145_v0 = vld [vmem:[%s15142_s14] sm:$0xff] }
 0xb42   :  { %8924 = vmatpush.msrb.mxu3 %v8923_v50 }
 0xb43   :  { %9048 = vmatpush.msra.mxu2 %v8921_v23  ;;  %8819 = vmatmul.f32.gmra.mxu0 %v15008_v9 }
 0xb44   :  { %8848 = vmatmul.f32.gmra.mxu1 %v14973_v17  ;;  %8930 = vmatpush.msrb.mxu3 %v8929_v27 }
 0xb45   :  { %9052 = vmatpush.msra.mxu2 %v8927_v41 }
 0xb46   :  { %8936 = vmatpush.msrb.mxu3 %v8935_v56 }
 0xb47   :  { %9056 = vmatpush.msra.mxu2 %v8933_v53  ;;  %8938 = vmatmul.f32.vlgmr.msrb.gmra.mxu3 %v14950_v45 }
 0xb48   :  { %8889 = vmatmul.f32.gmra.mxu2 %v15027_v24  ;;  %9083 = vmatpush.msra.mxu3 %v8868_v39 }
 0xb4a   :  { %9085 = vmatpush.msra.mxu3 %v8870_v36 }
 0xb4b   :  { %8976 = vmatmul.f32.vlgmr.msrb.gmra.mxu0 %v14956_v57 }
 0xb4c   :  { %8852 = vmatmul.f32.gmra.mxu1 %v15008_v9  ;;  %9087 = vmatpush.msra.mxu3 %v8872_v15 }
 0xb4e   :  { %9089 = vmatpush.msra.mxu3 %v8874_v59 }
 0xb4f   :  { %8942 = vmatmul.f32.gmra.mxu3 %v14973_v17 }
 0xb50   :  { %8897 = vmatmul.f32.gmra.mxu2 %v15045_v28 }
 0xb53   :  { %8981 = vmatmul.f32.gmra.mxu0 %v14990_v6 }
 0xb54   :  { %9013 = vmatmul.f32.vlgmr.msrb.gmra.mxu1 %v14971_v21 }
 0xb57   :  { %8946 = vmatmul.f32.gmra.mxu3 %v15008_v9 }
 0xb58   :  { %9058 = vmatmul.f32.vlgmr.msra.gmra.mxu2 %v14950_v45 }
 0xb5b   :  { %8986 = vmatmul.f32.gmra.mxu0 %v15019_v29 }
 0xb5c   :  { %9019 = vmatmul.f32.gmra.mxu1 %v15006_v5 }
 0xb5f   :  { %9091 = vmatmul.f32.vlgmr.msra.gmra.mxu3 %v14950_v45 }
 0xb60   :  { %9062 = vmatmul.f32.gmra.mxu2 %v14973_v17 }
 0xb64   :  { %9025 = vmatmul.f32.gmra.mxu1 %v15030_v48 }
 0xb67   :  { %9095 = vmatmul.f32.gmra.mxu3 %v14973_v17 }
 0xb68   :  { %9066 = vmatmul.f32.gmra.mxu2 %v15008_v9 }
 0xb6f   :  { %9099 = vmatmul.f32.gmra.mxu3 %v15008_v9 }
 0xb98   :  { %v8635_v57 = vpop.f32.mrf.mxu0 }
 0xb99   :  { %v8636_v45 = vadd.f32 %v8635_v57, %v15084_v34 }
 0xba0   :  { %v8643_v21 = vpop.f32.mrf.mxu0  ;;  %v8692_v6 = vpop.f32.mrf.mxu1 }
 0xba1   :  { %v8693_v5 = vadd.f32 %v8692_v6, %v8636_v45  ;;  %v8767_v52 = vpop.f32.mrf.mxu3  ;;  %v8644_v22 = vadd.f32 %v8643_v21, %v15090_v3 }
 0xba2   :  { %v8730_v4 = vpop.f32.mrf.mxu2 }
 0xba3   :  { %v8731_v17 = vadd.f32 %v8730_v4, %v8693_v5 }
 0xba5   :  { %v8768_v19 = vadd.f32 %v8767_v52, %v8731_v17 }
 0xba8   :  { %v8651_v24 = vpop.f32.mrf.mxu0  ;;  %v8696_v29 = vpop.f32.mrf.mxu1 }
 0xba9   :  { %v8773_v13 = vpop.f32.mrf.mxu3  ;;  %v8652_v31 = vadd.f32 %v8651_v24, %v15087_v40  ;;  %v8697_v16 = vadd.f32 %v8696_v29, %v8644_v22 }
 0xbaa   :  { %v8735_v48 = vpop.f32.mrf.mxu2 }
 0xbab   :  { %v8736_v20 = vadd.f32 %v8735_v48, %v8697_v16 }
 0xbad   :  { %v8774_v15 = vadd.f32 %v8773_v13, %v8736_v20 }
 0xbb0   :  { %v8700_v11 = vpop.f32.mrf.mxu1  ;;  %v8812_v33 = vpop.f32.mrf.mxu0 }
 0xbb1   :  { %v8813_v43 = vadd.f32 %v8812_v33, %v8768_v19  ;;  %v8701_v28 = vadd.f32 %v8700_v11, %v8652_v31  ;;  %v8779_v54 = vpop.f32.mrf.mxu3 }
 0xbb2   :  { %v8740_v37 = vpop.f32.mrf.mxu2 }
 0xbb3   :  { %v8741_v10 = vadd.f32 %v8740_v37, %v8701_v28 }
 0xbb5   :  { %v8780_v61 = vadd.f32 %v8779_v54, %v8741_v10 }
 0xbb8   :  { %v8816_v12 = vpop.f32.mrf.mxu0 }
 0xbb9   :  { %v8845_v9 = vpop.f32.mrf.mxu1  ;;  %v8817_v59 = vadd.f32 %v8816_v12, %v8774_v15 }
 0xbba   :  { %v8846_v8 = vadd.f32 %v8845_v9, %v8813_v43 }
 0xbbc   :  { %v9103_v49 = vsub.f32 0.0, %v8846_v8 }
 0xbbe   :  { %v9105_v2 = vmul.f32 1.442695, %v9103_v49 }
 0xbc0   :  { %9341 = vpow2.f32 %v9105_v2  ;;  %v8820_v63 = vpop.f32.mrf.mxu0 }
 0xbc1   :  { %v8849_v30 = vpop.f32.mrf.mxu1  ;;  %v8821_v42 = vadd.f32 %v8820_v63, %v8780_v61 }
 0xbc2   :  { %v8850_v58 = vadd.f32 %v8849_v30, %v8817_v59 }
 0xbc3   :  { %v8882_v14 = vpop.f32.mrf.mxu2 }
 0xbc4   :  { %v9151_v41 = vmul.f32 %v9145_v0, %v8850_v58  ;;  %v8883_v21 = vadd.f32 %v8882_v14, %v15084_v34 }
 0xbc6   :  { %v9342_v47 = vpop.eup %9341  ;;  %v9153_v57 = vadd.f32 %v9151_v41, %v9147_v55 }
 0xbc7   :  { %v9109_v18 = vadd.f32 1.0, %v9342_v47 }
 0xbc8   :  { %v8977_v27 = vpop.f32.mrf.mxu0 }
 0xbc9   :  { %9343 = vrcp.f32 %v9109_v18  ;;  %v8853_v36 = vpop.f32.mrf.mxu1  ;;  %v9122_v60 = vand.u32 2147483648, %v9109_v18  ;;  %v9120_v53 = vand.u32 2147483647, %v9109_v18  ;;  %vm9116_vm4 = vweird.f32 %v9109_v18 }
 0xbca   :  { %v8854_v44 = vadd.f32 %v8853_v36, %v8821_v42  ;;  %v8939_v38 = vpop.f32.mrf.mxu3 }
 0xbcb   :  { %v8890_v32 = vpop.f32.mrf.mxu2  ;;  %v9123_v56 = vor.u32 1.1754944e-38, %v9122_v60  ;;  %vm9121_vm6 = vcmp.eq.f32.partialorder %v9120_v53, 8.507059e+37  ;;  %v8940_v5 = vadd.f32 %v8939_v38, %v8883_v21 }
 0xbcc   :  { %v9143_v51 = vmin.f32 %v8854_v44, 4.0  ;;  %v8891_v30 = vadd.f32 %v8890_v32, %v15090_v3  ;;  %v9146_v3 = vld [vmem:[%s15142_s14 + $0x8] sm:$0xff] }
 0xbcd   :  { %v8978_v17 = vadd.f32 %v8977_v27, %v8940_v5 }
 0xbce   :  { %v9155_v25 = vmul.f32 1.442695, %v9143_v51 }
 0xbcf   :  { %v9344_v46 = vpop.eup %9343 }
 0xbd0   :  { %v9112_v39 = vmul.f32 %v9344_v46, %v9109_v18  ;;  %9345 = vpow2.f32 %v9155_v25  ;;  %vm9117_vm3 = vweird.f32 %v9344_v46  ;;  %v8982_v19 = vpop.f32.mrf.mxu0 }
 0xbd1   :  { %vm9118_vm5 = vmor %vm9116_vm4, %vm9117_vm3  ;;  %v9014_v24 = vpop.f32.mrf.mxu1 }
 0xbd2   :  { %v9113_v26 = vsub.f32 1.0, %v9112_v39  ;;  %v8943_v23 = vpop.f32.mrf.mxu3  ;;  %v9015_v34 = vadd.f32 %v9014_v24, %v8978_v17 }
 0xbd3   :  { %v8898_v1 = vpop.f32.mrf.mxu2  ;;  %v8944_v16 = vadd.f32 %v8943_v23, %v8891_v30  ;;  %v9150_v23 = vld [vmem:[%s15142_s14 + $0x28] sm:$0xff] }
 0xbd4   :  { %v9114_v35 = vmul.f32 %v9344_v46, %v9113_v26  ;;  %v8899_v31 = vadd.f32 %v8898_v1, %v15087_v40  ;;  %v9148_v26 = vld [vmem:[%s15142_s14 + $0x18] sm:$0xff] }
 0xbd5   :  { %v8983_v18 = vadd.f32 %v8982_v19, %v8944_v16 }
 0xbd6   :  { %v9346_v50 = vpop.eup %9345  ;;  %v9115_v7 = vadd.f32 %v9344_v46, %v9114_v35 }
 0xbd7   :  { %v9159_v6 = vmul.f32 %v9346_v50, %v9149_v62 }
 0xbd8   :  { %v9119_v4 = vsel %vm9118_vm5, %v9344_v46, %v9115_v7  ;;  %v8987_v2 = vpop.f32.mrf.mxu0 }
 0xbd9   :  { %v9124_v29 = vsel %vm9121_vm6, %v9123_v56, %v9119_v4  ;;  %v9161_v45 = vadd.f32 %v9159_v6, %v9153_v57  ;;  %v9020_v43 = vpop.f32.mrf.mxu1 }
 0xbda   :  { %9141 = vst [vmem:[%s15143_s15] sm:$0xff] %v9124_v29  ;;  %v8947_v52 = vpop.f32.mrf.mxu3  ;;  %v9021_v40 = vadd.f32 %v9020_v43, %v8983_v18 }
 0xbdb   :  { %v9163_v11 = vmax.f32 %v9161_v45, 0.0  ;;  %v9059_v48 = vpop.f32.mrf.mxu2  ;;  %v8948_v28 = vadd.f32 %v8947_v52, %v8899_v31 }
 0xbdc   :  { %v9060_v13 = vadd.f32 %v9059_v48, %v9015_v34 }
 0xbdd   :  { %v9165_v33 = vmin.f32 %v9163_v11, 1.0  ;;  %v8988_v54 = vadd.f32 %v8987_v2, %v8948_v28 }
 0xbdf   :  { %9167 = vst [vmem:[%s15144_s16] sm:$0xff] %v9165_v33 }
 0xbe1   :  { %v9026_v10 = vpop.f32.mrf.mxu1 }
 0xbe2   :  { %v9092_v9 = vpop.f32.mrf.mxu3  ;;  %v9027_v47 = vadd.f32 %v9026_v10, %v8988_v54 }
 0xbe3   :  { %v9093_v8 = vadd.f32 %v9092_v9, %v9060_v13  ;;  %v9063_v37 = vpop.f32.mrf.mxu2 }
 0xbe4   :  { %v9064_v38 = vadd.f32 %v9063_v37, %v9021_v40 }
 0xbe5   :  { %v9104_v12 = vsub.f32 0.0, %v9093_v8 }
 0xbe7   :  { %v9107_v49 = vmul.f32 1.442695, %v9104_v12 }
 0xbe9   :  { %9347 = vpow2.f32 %v9107_v49 }
 0xbea   :  { %v9096_v22 = vpop.f32.mrf.mxu3 }
 0xbeb   :  { %v9067_v14 = vpop.f32.mrf.mxu2  ;;  %v9097_v59 = vadd.f32 %v9096_v22, %v9064_v38 }
 0xbec   :  { %v9068_v20 = vadd.f32 %v9067_v14, %v9027_v47 }
 0xbed   :  { %v9152_v58 = vmul.f32 %v9146_v3, %v9097_v59 }
 0xbef   :  { %v9348_v63 = vpop.eup %9347  ;;  %v9154_v35 = vadd.f32 %v9152_v58, %v9148_v26 }
 0xbf0   :  { %v9110_v61 = vadd.f32 1.0, %v9348_v63 }
 0xbf2   :  { %9349 = vrcp.f32 %v9110_v61  ;;  %v9100_v42 = vpop.f32.mrf.mxu3  ;;  %v9137_v46 = vand.u32 2147483648, %v9110_v61  ;;  %v9135_v0 = vand.u32 2147483647, %v9110_v61  ;;  %vm9131_vm8 = vweird.f32 %v9110_v61 }
 0xbf3   :  { %v9101_v36 = vadd.f32 %v9100_v42, %v9068_v20 }
 0xbf4   :  { %v9138_v1 = vor.u32 1.1754944e-38, %v9137_v46  ;;  %vm9136_vm10 = vcmp.eq.f32.partialorder %v9135_v0, 8.507059e+37 }
 0xbf5   :  { %v9144_v44 = vmin.f32 %v9101_v36, 4.0 }
 0xbf7   :  { %v9157_v15 = vmul.f32 1.442695, %v9144_v44 }
 0xbf8   :  { %v9350_v51 = vpop.eup %9349 }
 0xbf9   :  { %v9127_v25 = vmul.f32 %v9350_v51, %v9110_v61  ;;  %9351 = vpow2.f32 %v9157_v15  ;;  %vm9132_vm7 = vweird.f32 %v9350_v51 }
 0xbfa   :  { %vm9133_vm9 = vmor %vm9131_vm8, %vm9132_vm7 }
 0xbfb   :  { %v9128_v32 = vsub.f32 1.0, %v9127_v25 }
 0xbfd   :  { %v9129_v39 = vmul.f32 %v9350_v51, %v9128_v32 }
 0xbff   :  { %v9352_v60 = vpop.eup %9351  ;;  %v9130_v41 = vadd.f32 %v9350_v51, %v9129_v39 }
 0xc00   :  { %v9160_v53 = vmul.f32 %v9352_v60, %v9150_v23 }
 0xc01   :  { %v9134_v55 = vsel %vm9133_vm9, %v9350_v51, %v9130_v41 }
 0xc02   :  { %v9139_v62 = vsel %vm9136_vm10, %v9138_v1, %v9134_v55  ;;  %v9162_v50 = vadd.f32 %v9160_v53, %v9154_v35 }
 0xc03   :  { %9142 = vst.msk [vmem:[%s15143_s15 + $0x8] sm:$0xff] %vm6812_vm2, %v9139_v62 }
 0xc04   :  { %v9164_v7 = vmax.f32 %v9162_v50, 0.0 }
 0xc06   :  { %v9166_v27 = vmin.f32 %v9164_v7, 1.0 }
 0xc08   :  { %9168 = vst.msk [vmem:[%s15144_s16 + $0x8] sm:$0xff] %vm6812_vm2, %v9166_v27 }

</bundles_post_ra>
